<compile_context>
chip_gen: v7x
topology: tpu7x:2x2x1
jax: 0.10.0
libtpu: 0.0.40
codegen_flags: <defaults>
</compile_context>

<pallas_src>
import jax
import jax.numpy as jnp
from jax.experimental import pallas as pl
from jax.experimental.pallas import tpu as pltpu

EPS = 1e-5  # PyTorch BatchNorm2d default eps

# Matmul operand dtype. float32 keeps exact numerical parity with the PyTorch
# reference; set to jnp.bfloat16 on v5e/v6e for ~2x MXU throughput and half the
# DMA volume (all accumulation below stays float32 via preferred_element_type).
COMPUTE_DTYPE = jnp.float32


def _compiler_params(num_grid_axes):
    return pltpu.CompilerParams(
        dimension_semantics=("parallel",) * num_grid_axes,
        vmem_limit_bytes=32 * 1024 * 1024,
    )


# ---------------------------------------------------------------------------
# Kernel 1: ConvTranspose2d(k=2, s=2) as a row-tiled matmul.
#   rows = flattened (n, i, j) input pixels, cols = (co, ki, kj) sub-pixel taps.
# ---------------------------------------------------------------------------
def _matmul_bias_kernel(x_ref, w_ref, b_ref, o_ref):
    o_ref[...] = (
        jnp.dot(x_ref[...], w_ref[...], preferred_element_type=jnp.float32)
        + b_ref[...]
    )


def _convT_matmul(x_rows, w, b, rows_per_step):
    M, Cin = x_rows.shape
    Ncols = w.shape[1]
    assert M % rows_per_step == 0 and rows_per_step % 8 == 0
    return pl.pallas_call(
        _matmul_bias_kernel,
        out_shape=jax.ShapeDtypeStruct((M, Ncols), jnp.float32),
        grid_spec=pltpu.PrefetchScalarGridSpec(
            num_scalar_prefetch=0,
            grid=(M // rows_per_step,),
            in_specs=[
                pl.BlockSpec((rows_per_step, Cin), lambda i: (i, 0)),
                pl.BlockSpec((Cin, Ncols), lambda i: (0, 0)),   # weight: grid-invariant
                pl.BlockSpec((1, Ncols), lambda i: (0, 0)),
            ],
            out_specs=pl.BlockSpec((rows_per_step, Ncols), lambda i: (i, 0)),
        ),
        compiler_params=_compiler_params(1),
    )(x_rows, w, b)


# ---------------------------------------------------------------------------
# Kernel 2: 3x3 conv over concat([up, Z]) (concat fused via split weights)
#           + per-image partial BatchNorm statistics of the pre-BN output.
# Inputs are already zero-padded by 1 in H and W (NHWC).
# ---------------------------------------------------------------------------
def _conv3x3_cat_stats_kernel(xa_ref, xb_ref, wa_ref, wb_ref, b_ref, y_ref, st_ref):
    _, Hs, Ws, Co = y_ref.shape
    Ca = xa_ref.shape[3]
    Cb = xb_ref.shape[3]
    M = Hs * Ws
    acc = jnp.zeros((M, Co), jnp.float32) + b_ref[...]
    for kh in range(3):
        for kw in range(3):
            t = kh * 3 + kw
            a = xa_ref[0, kh:kh + Hs, kw:kw + Ws, :].reshape(M, Ca)
            z = xb_ref[0, kh:kh + Hs, kw:kw + Ws, :].reshape(M, Cb)
            acc = acc + jnp.dot(a, wa_ref[t], preferred_element_type=jnp.float32)
            acc = acc + jnp.dot(z, wb_ref[t], preferred_element_type=jnp.float32)
    y_ref[...] = acc.reshape(y_ref.shape)
    # Per-image partial sums for the (global, two-pass) BatchNorm.
    st_ref[0, 0:1, :] = jnp.sum(acc, axis=0, keepdims=True)
    st_ref[0, 1:2, :] = jnp.sum(acc * acc, axis=0, keepdims=True)


def _conv1_cat_stats(xa_pad, xb_pad, wa, wb, b):
    N, Hp, Wp, Ca = xa_pad.shape
    Cb = xb_pad.shape[3]
    Co = wa.shape[2]
    Hs, Ws = Hp - 2, Wp - 2
    return pl.pallas_call(
        _conv3x3_cat_stats_kernel,
        out_shape=(
            jax.ShapeDtypeStruct((N, Hs, Ws, Co), jnp.float32),
            jax.ShapeDtypeStruct((N, 2, Co), jnp.float32),
        ),
        grid_spec=pltpu.PrefetchScalarGridSpec(
            num_scalar_prefetch=0,
            grid=(N,),
            in_specs=[
                pl.BlockSpec((1, Hp, Wp, Ca), lambda i: (i, 0, 0, 0)),
                pl.BlockSpec((1, Hp, Wp, Cb), lambda i: (i, 0, 0, 0)),
                pl.BlockSpec((9, Ca, Co), lambda i: (0, 0, 0)),
                pl.BlockSpec((9, Cb, Co), lambda i: (0, 0, 0)),
                pl.BlockSpec((1, Co), lambda i: (0, 0)),
            ],
            out_specs=[
                pl.BlockSpec((1, Hs, Ws, Co), lambda i: (i, 0, 0, 0)),
                pl.BlockSpec((1, 2, Co), lambda i: (i, 0, 0)),
            ],
        ),
        compiler_params=_compiler_params(1),
    )(xa_pad, xb_pad, wa, wb, b)


# ---------------------------------------------------------------------------
# Kernel 3: BN1(scale/shift) + ReLU fused with the second 3x3 conv
#           + per-image partial BN2 statistics.  The normalized activation x1
#           is zero-padded in a VMEM scratch and never written to HBM.
# ---------------------------------------------------------------------------
def _bn_relu_conv3x3_stats_kernel(y1_ref, sc_ref, sh_ref, w_ref, b_ref,
                                  y2_ref, st_ref, xpad_ref):
    _, Hs, Ws, Co = y2_ref.shape
    M = Hs * Ws
    sc = sc_ref[...].reshape(1, 1, Co)
    sh = sh_ref[...].reshape(1, 1, Co)
    x1 = jnp.maximum(y1_ref[0] * sc + sh, 0.0)           # (Hs, Ws, Co)

    xpad_ref[...] = jnp.zeros(xpad_ref.shape, xpad_ref.dtype)
    xpad_ref[1:Hs + 1, 1:Ws + 1, :] = x1.astype(xpad_ref.dtype)

    acc = jnp.zeros((M, Co), jnp.float32) + b_ref[...]
    for kh in range(3):
        for kw in range(3):
            t = kh * 3 + kw
            a = xpad_ref[kh:kh + Hs, kw:kw + Ws, :].reshape(M, Co)
            acc = acc + jnp.dot(a, w_ref[t], preferred_element_type=jnp.float32)
    y2_ref[...] = acc.reshape(y2_ref.shape)
    st_ref[0, 0:1, :] = jnp.sum(acc, axis=0, keepdims=True)
    st_ref[0, 1:2, :] = jnp.sum(acc * acc, axis=0, keepdims=True)


def _bn1_relu_conv2_stats(y1, scale1, shift1, w2, b2):
    N, Hs, Ws, Co = y1.shape
    return pl.pallas_call(
        _bn_relu_conv3x3_stats_kernel,
        out_shape=(
            jax.ShapeDtypeStruct((N, Hs, Ws, Co), jnp.float32),
            jax.ShapeDtypeStruct((N, 2, Co), jnp.float32),
        ),
        grid_spec=pltpu.PrefetchScalarGridSpec(
            num_scalar_prefetch=0,
            grid=(N,),
            in_specs=[
                pl.BlockSpec((1, Hs, Ws, Co), lambda i: (i, 0, 0, 0)),
                pl.BlockSpec((1, Co), lambda i: (0, 0)),
                pl.BlockSpec((1, Co), lambda i: (0, 0)),
                pl.BlockSpec((9, Co, Co), lambda i: (0, 0, 0)),
                pl.BlockSpec((1, Co), lambda i: (0, 0)),
            ],
            out_specs=[
                pl.BlockSpec((1, Hs, Ws, Co), lambda i: (i, 0, 0, 0)),
                pl.BlockSpec((1, 2, Co), lambda i: (i, 0, 0)),
            ],
            scratch_shapes=[pltpu.VMEM((Hs + 2, Ws + 2, Co), COMPUTE_DTYPE)],
        ),
        compiler_params=_compiler_params(1),
    )(y1, scale1, shift1, w2, b2)


# ---------------------------------------------------------------------------
# Kernel 4: BN2(scale/shift) + ReLU, elementwise.
# ---------------------------------------------------------------------------
def _bn_relu_kernel(y_ref, sc_ref, sh_ref, o_ref):
    Co = o_ref.shape[3]
    sc = sc_ref[...].reshape(1, 1, 1, Co)
    sh = sh_ref[...].reshape(1, 1, 1, Co)
    o_ref[...] = jnp.maximum(y_ref[...] * sc + sh, 0.0)


def _bn_relu_apply(y, scale, shift):
    N, Hs, Ws, Co = y.shape
    return pl.pallas_call(
        _bn_relu_kernel,
        out_shape=jax.ShapeDtypeStruct((N, Hs, Ws, Co), jnp.float32),
        grid_spec=pltpu.PrefetchScalarGridSpec(
            num_scalar_prefetch=0,
            grid=(N,),
            in_specs=[
                pl.BlockSpec((1, Hs, Ws, Co), lambda i: (i, 0, 0, 0)),
                pl.BlockSpec((1, Co), lambda i: (0, 0)),
                pl.BlockSpec((1, Co), lambda i: (0, 0)),
            ],
            out_specs=pl.BlockSpec((1, Hs, Ws, Co), lambda i: (i, 0, 0, 0)),
        ),
        compiler_params=_compiler_params(1),
    )(y, scale, shift)


# ---------------------------------------------------------------------------
# JAX glue: weight reshapes, pixel shuffle / zero pad, BN stat finalization.
# ---------------------------------------------------------------------------
def _bn_scale_shift(stats, gamma, beta, count):
    # stats: (num_steps, 2, C) partial [sum, sum-of-squares]; tiny reduction.
    s = jnp.sum(stats[:, 0, :], axis=0)
    ss = jnp.sum(stats[:, 1, :], axis=0)
    mean = s / count
    var = jnp.maximum(ss / count - mean * mean, 0.0)  # biased var (PyTorch BN fwd)
    scale = gamma * jax.lax.rsqrt(var + EPS)
    shift = beta - mean * scale
    return scale, shift


def up_forward(params, X, Z):
    N, Cin, H, W = X.shape
    Co = params["up_b"].shape[0]
    Hs, Ws = 2 * H, 2 * W
    cdt = COMPUTE_DTYPE

    # Single NCHW -> NHWC conversion at the block boundary.
    x_nhwc = jnp.transpose(X, (0, 2, 3, 1))
    z_nhwc = jnp.transpose(Z, (0, 2, 3, 1))

    # --- ConvTranspose2d(k=2, s=2) as a row-tiled matmul -----------------------
    x_rows = x_nhwc.reshape(N * H * W, Cin).astype(cdt)
    w_up = params["up_w"].reshape(Cin, Co * 4).astype(cdt)          # cols = (co, ki, kj)
    b_up = jnp.repeat(params["up_b"], 4).reshape(1, Co * 4).astype(jnp.float32)
    up_rows = _convT_matmul(x_rows, w_up, b_up, rows_per_step=H * W)

    # Sub-pixel shuffle (pure layout, still NHWC) + halo padding for the 3x3 conv.
    up_img = (up_rows.reshape(N, H, W, Co, 2, 2)
                     .transpose(0, 1, 4, 2, 5, 3)
                     .reshape(N, Hs, Ws, Co))
    up_pad = jnp.pad(up_img, ((0, 0), (1, 1), (1, 1), (0, 0))).astype(cdt)
    z_pad = jnp.pad(z_nhwc, ((0, 0), (1, 1), (1, 1), (0, 0))).astype(cdt)

    # --- conv1 (concat fused via split weights) + partial BN1 stats ------------
    w1 = params["c1_w"].transpose(2, 3, 1, 0).reshape(9, 2 * Co, Co)  # (tap, ci, co)
    w1a = w1[:, :Co, :].astype(cdt)        # channels coming from the upsampled X
    w1b = w1[:, Co:, :].astype(cdt)        # channels coming from the skip Z
    b1 = params["c1_b"].reshape(1, Co).astype(jnp.float32)
    y1, st1 = _conv1_cat_stats(up_pad, z_pad, w1a, w1b, b1)

    cnt = N * Hs * Ws
    sc1, sh1 = _bn_scale_shift(st1, params["bn1_g"], params["bn1_b"], cnt)

    # --- BN1 + ReLU fused with conv2 (+ partial BN2 stats) ----------------------
    w2 = params["c2_w"].transpose(2, 3, 1, 0).reshape(9, Co, Co).astype(cdt)
    b2 = params["c2_b"].reshape(1, Co).astype(jnp.float32)
    y2, st2 = _bn1_relu_conv2_stats(y1, sc1.reshape(1, Co), sh1.reshape(1, Co), w2, b2)

    sc2, sh2 = _bn_scale_shift(st2, params["bn2_g"], params["bn2_b"], cnt)

    # --- BN2 + ReLU -------------------------------------------------------------
    out_nhwc = _bn_relu_apply(y2, sc2.reshape(1, Co), sh2.reshape(1, Co))

    # Back to the PyTorch NCHW convention.
    return jnp.transpose(out_nhwc, (0, 3, 1, 2))


def init_params(key, size):
    size2 = 1 << size
    size2p1 = 1 << (size + 1)
    ks = jax.random.split(key, 6)
    return {
        # ConvTranspose2d weight: (Cin, Cout, 2, 2)
        "up_w": 0.1 * jax.random.normal(ks[0], (size2p1, size2, 2, 2), jnp.float32),
        "up_b": 0.1 * jax.random.normal(ks[1], (size2,), jnp.float32),
        # Conv2d weights: (Cout, Cin, 3, 3)
        "c1_w": 0.1 * jax.random.normal(ks[2], (size2, size2p1, 3, 3), jnp.float32),
        "c1_b": 0.1 * jax.random.normal(ks[3], (size2,), jnp.float32),
        "c2_w": 0.1 * jax.random.normal(ks[4], (size2, size2, 3, 3), jnp.float32),
        "c2_b": 0.1 * jax.random.normal(ks[5], (size2,), jnp.float32),
        # BatchNorm affine params (PyTorch default init: gamma=1, beta=0)
        "bn1_g": jnp.ones((size2,), jnp.float32),
        "bn1_b": jnp.zeros((size2,), jnp.float32),
        "bn2_g": jnp.ones((size2,), jnp.float32),
        "bn2_b": jnp.zeros((size2,), jnp.float32),
    }


# ---------------------------------------------------------------------------
# Pure-JAX reference (independent path) used to validate the Pallas pipeline.
# ---------------------------------------------------------------------------
def up_reference(params, X, Z):
    N, _, H, W = X.shape
    Co = params["up_b"].shape[0]
    up = jnp.zeros((N, Co, 2 * H, 2 * W), jnp.float32)
    for ki in range(2):
        for kj in range(2):
            contrib = jnp.einsum("nchw,cd->ndhw", X, params["up_w"][:, :, ki, kj])
            up = up.at[:, :, ki::2, kj::2].set(contrib)
    up = up + params["up_b"][None, :, None, None]
    x = jnp.concatenate([up, Z], axis=1)

    def conv_bn_relu(x, w, b, g, beta):
        y = jax.lax.conv_general_dilated(
            x, w, window_strides=(1, 1), padding=((1, 1), (1, 1)),
            dimension_numbers=("NCHW", "OIHW", "NCHW"),
        ) + b[None, :, None, None]
        mean = y.mean(axis=(0, 2, 3), keepdims=True)
        var = y.var(axis=(0, 2, 3), keepdims=True)
        yh = (y - mean) * jax.lax.rsqrt(var + EPS)
        return jnp.maximum(yh * g[None, :, None, None] + beta[None, :, None, None], 0.0)

    x = conv_bn_relu(x, params["c1_w"], params["c1_b"], params["bn1_g"], params["bn1_b"])
    x = conv_bn_relu(x, params["c2_w"], params["c2_b"], params["bn2_g"], params["bn2_b"])
    return x


if __name__ == "__main__":
    size = 3                      # Cout = 8, Cin = 16 (module asserts size > 2)
    N, H, W = 2, 8, 8             # X spatial; Z must be (N, Cout, 2H, 2W)
    key = jax.random.PRNGKey(0)
    kx, kz, kp = jax.random.split(key, 3)

    Cin, Cout = 1 << (size + 1), 1 << size
    X = jax.random.normal(kx, (N, Cin, H, W), jnp.float32)
    Z = jax.random.normal(kz, (N, Cout, 2 * H, 2 * W), jnp.float32)
    params = init_params(kp, size)

    out = jax.jit(up_forward)(params, X, Z)
    out = jax.block_until_ready(out)
    assert out.shape == (N, Cout, 2 * H, 2 * W), out.shape
    assert bool(jnp.all(jnp.isfinite(out)))

    if COMPUTE_DTYPE == jnp.float32:
        ref = jax.block_until_ready(jax.jit(up_reference)(params, X, Z))
        max_err = float(jnp.max(jnp.abs(out - ref)))
        assert max_err < 5e-3, f"mismatch vs reference: max |err| = {max_err}"

    print("KERNEL_OK")
</pallas_src>

<mosaic_0001>
module attributes {stable_mosaic.version = 11 : i64} {
  func.func @_matmul_bias_kernel(%arg0: i32, %arg1: memref<64x16xf32, #tpu.memory_space<vmem>>, %arg2: memref<16x32xf32, #tpu.memory_space<vmem>>, %arg3: memref<1x32xf32, #tpu.memory_space<vmem>>, %arg4: memref<64x32xf32, #tpu.memory_space<vmem>>) attributes {dimension_semantics = [#tpu.dimension_semantics<parallel>], iteration_bounds = array<i64: 2>, scalar_prefetch = 0 : i64, scratch_operands = 0 : i64, tpu.core_type = #tpu.core_type<tc>, window_params = [{transform_indices = @transform_0, window_bounds = array<i64: 64, 16>}, {pipeline_mode = #tpu.pipeline_mode<synchronous>, transform_indices = @transform_1, window_bounds = array<i64: 16, 32>}, {pipeline_mode = #tpu.pipeline_mode<synchronous>, transform_indices = @transform_2, window_bounds = array<i64: 1, 32>}, {transform_indices = @transform_3, window_bounds = array<i64: 64, 32>}]} {
    %c0 = arith.constant 0 : index
    %c0_0 = arith.constant 0 : index
    %0 = vector.load %arg1[%c0, %c0_0] : memref<64x16xf32, #tpu.memory_space<vmem>>, vector<64x16xf32>
    %c0_1 = arith.constant 0 : index
    %c0_2 = arith.constant 0 : index
    %1 = vector.load %arg2[%c0_1, %c0_2] : memref<16x32xf32, #tpu.memory_space<vmem>>, vector<16x32xf32>
    %cst = arith.constant dense<0.000000e+00> : vector<64x32xf32>
    %2 = tpu.matmul %0, %1, %cst {dimension_numbers = #tpu.dot_dimension_numbers<[1], [0], [0], [1], [0, 0, 1, 1], [], []>} : vector<64x16xf32>, vector<16x32xf32>, vector<64x32xf32> -> vector<64x32xf32>
    %c0_3 = arith.constant 0 : index
    %c0_4 = arith.constant 0 : index
    %3 = vector.load %arg3[%c0_3, %c0_4] : memref<1x32xf32, #tpu.memory_space<vmem>>, vector<1x32xf32>
    %4 = vector.broadcast %3 : vector<1x32xf32> to vector<64x32xf32>
    %5 = arith.addf %2, %4 : vector<64x32xf32>
    %c0_5 = arith.constant 0 : index
    %c0_6 = arith.constant 0 : index
    %6 = vector.load %arg4[%c0_5, %c0_6] : memref<64x32xf32, #tpu.memory_space<vmem>>, vector<64x32xf32>
    tpu.vector_store %arg4[%c0_5, %c0_6], %5 {strides = array<i32>} : memref<64x32xf32, #tpu.memory_space<vmem>>, vector<64x32xf32>,
    return
  }
  func.func @transform_0(%arg0: i32) -> (i32, i32) {
    %c0_i32 = arith.constant 0 : i32
    %c0_i32_0 = arith.constant 0 : i32
    return %arg0, %c0_i32 : i32, i32
  }
  func.func @transform_1(%arg0: i32) -> (i32, i32) {
    %c0_i32 = arith.constant 0 : i32
    %c0_i32_0 = arith.constant 0 : i32
    %c0_i32_1 = arith.constant 0 : i32
    return %c0_i32, %c0_i32_0 : i32, i32
  }
  func.func @transform_2(%arg0: i32) -> (i32, i32) {
    %c0_i32 = arith.constant 0 : i32
    %c0_i32_0 = arith.constant 0 : i32
    %c0_i32_1 = arith.constant 0 : i32
    return %c0_i32, %c0_i32_0 : i32, i32
  }
  func.func @transform_3(%arg0: i32) -> (i32, i32) {
    %c0_i32 = arith.constant 0 : i32
    %c0_i32_0 = arith.constant 0 : i32
    return %arg0, %c0_i32 : i32, i32
  }
}

module attributes {stable_mosaic.version = 11 : i64} {
  func.func @_conv3x3_cat_stats_kernel(%arg0: i32, %arg1: memref<1x18x18x8xf32, #tpu.memory_space<vmem>>, %arg2: memref<1x18x18x8xf32, #tpu.memory_space<vmem>>, %arg3: memref<9x8x8xf32, #tpu.memory_space<vmem>>, %arg4: memref<9x8x8xf32, #tpu.memory_space<vmem>>, %arg5: memref<1x8xf32, #tpu.memory_space<vmem>>, %arg6: memref<1x16x16x8xf32, #tpu.memory_space<vmem>>, %arg7: memref<1x2x8xf32, #tpu.memory_space<vmem>>) attributes {dimension_semantics = [#tpu.dimension_semantics<parallel>], iteration_bounds = array<i64: 2>, scalar_prefetch = 0 : i64, scratch_operands = 0 : i64, tpu.core_type = #tpu.core_type<tc>, window_params = [{transform_indices = @transform_0, window_bounds = array<i64: 1, 18, 18, 8>}, {transform_indices = @transform_1, window_bounds = array<i64: 1, 18, 18, 8>}, {pipeline_mode = #tpu.pipeline_mode<synchronous>, transform_indices = @transform_2, window_bounds = array<i64: 9, 8, 8>}, {pipeline_mode = #tpu.pipeline_mode<synchronous>, transform_indices = @transform_3, window_bounds = array<i64: 9, 8, 8>}, {pipeline_mode = #tpu.pipeline_mode<synchronous>, transform_indices = @transform_4, window_bounds = array<i64: 1, 8>}, {transform_indices = @transform_5, window_bounds = array<i64: 1, 16, 16, 8>}, {transform_indices = @transform_6, window_bounds = array<i64: 1, 2, 8>}]} {
    %cst = arith.constant 0.000000e+00 : f32
    %0 = vector.broadcast %cst : f32 to vector<256x8xf32>
    %c0 = arith.constant 0 : index
    %c0_0 = arith.constant 0 : index
    %1 = vector.load %arg5[%c0, %c0_0] : memref<1x8xf32, #tpu.memory_space<vmem>>, vector<1x8xf32>
    %2 = vector.broadcast %1 : vector<1x8xf32> to vector<256x8xf32>
    %3 = arith.addf %0, %2 : vector<256x8xf32>
    %c0_1 = arith.constant 0 : index
    %c0_2 = arith.constant 0 : index
    %c0_3 = arith.constant 0 : index
    %c0_4 = arith.constant 0 : index
    %4 = vector.load %arg1[%c0_1, %c0_2, %c0_3, %c0_4] : memref<1x18x18x8xf32, #tpu.memory_space<vmem>>, vector<1x16x16x8xf32>
    %5 = vector.shape_cast %4 : vector<1x16x16x8xf32> to vector<16x16x8xf32>
    %6 = vector.shape_cast %5 : vector<16x16x8xf32> to vector<256x8xf32>
    %c0_5 = arith.constant 0 : index
    %c0_6 = arith.constant 0 : index
    %c0_7 = arith.constant 0 : index
    %c0_8 = arith.constant 0 : index
    %7 = vector.load %arg2[%c0_5, %c0_6, %c0_7, %c0_8] : memref<1x18x18x8xf32, #tpu.memory_space<vmem>>, vector<1x16x16x8xf32>
    %8 = vector.shape_cast %7 : vector<1x16x16x8xf32> to vector<16x16x8xf32>
    %9 = vector.shape_cast %8 : vector<16x16x8xf32> to vector<256x8xf32>
    %c0_9 = arith.constant 0 : index
    %c0_10 = arith.constant 0 : index
    %c0_11 = arith.constant 0 : index
    %10 = vector.load %arg3[%c0_9, %c0_10, %c0_11] : memref<9x8x8xf32, #tpu.memory_space<vmem>>, vector<1x8x8xf32>
    %11 = vector.shape_cast %10 : vector<1x8x8xf32> to vector<8x8xf32>
    %cst_12 = arith.constant dense<0.000000e+00> : vector<256x8xf32>
    %12 = tpu.matmul %6, %11, %cst_12 {dimension_numbers = #tpu.dot_dimension_numbers<[1], [0], [0], [1], [0, 0, 1, 1], [], []>} : vector<256x8xf32>, vector<8x8xf32>, vector<256x8xf32> -> vector<256x8xf32>
    %13 = arith.addf %3, %12 : vector<256x8xf32>
    %c0_13 = arith.constant 0 : index
    %c0_14 = arith.constant 0 : index
    %c0_15 = arith.constant 0 : index
    %14 = vector.load %arg4[%c0_13, %c0_14, %c0_15] : memref<9x8x8xf32, #tpu.memory_space<vmem>>, vector<1x8x8xf32>
    %15 = vector.shape_cast %14 : vector<1x8x8xf32> to vector<8x8xf32>
    %cst_16 = arith.constant dense<0.000000e+00> : vector<256x8xf32>
    %16 = tpu.matmul %9, %15, %cst_16 {dimension_numbers = #tpu.dot_dimension_numbers<[1], [0], [0], [1], [0, 0, 1, 1], [], []>} : vector<256x8xf32>, vector<8x8xf32>, vector<256x8xf32> -> vector<256x8xf32>
    %17 = arith.addf %13, %16 : vector<256x8xf32>
    %c0_17 = arith.constant 0 : index
    %c0_18 = arith.constant 0 : index
    %c1 = arith.constant 1 : index
    %c0_19 = arith.constant 0 : index
    %18 = vector.load %arg1[%c0_17, %c0_18, %c1, %c0_19] : memref<1x18x18x8xf32, #tpu.memory_space<vmem>>, vector<1x16x16x8xf32>
    %19 = vector.shape_cast %18 : vector<1x16x16x8xf32> to vector<16x16x8xf32>
    %20 = vector.shape_cast %19 : vector<16x16x8xf32> to vector<256x8xf32>
    %c0_20 = arith.constant 0 : index
    %c0_21 = arith.constant 0 : index
    %c1_22 = arith.constant 1 : index
    %c0_23 = arith.constant 0 : index
    %21 = vector.load %arg2[%c0_20, %c0_21, %c1_22, %c0_23] : memref<1x18x18x8xf32, #tpu.memory_space<vmem>>, vector<1x16x16x8xf32>
    %22 = vector.shape_cast %21 : vector<1x16x16x8xf32> to vector<16x16x8xf32>
    %23 = vector.shape_cast %22 : vector<16x16x8xf32> to vector<256x8xf32>
    %c1_24 = arith.constant 1 : index
    %c0_25 = arith.constant 0 : index
    %c0_26 = arith.constant 0 : index
    %24 = vector.load %arg3[%c1_24, %c0_25, %c0_26] : memref<9x8x8xf32, #tpu.memory_space<vmem>>, vector<1x8x8xf32>
    %25 = vector.shape_cast %24 : vector<1x8x8xf32> to vector<8x8xf32>
    %cst_27 = arith.constant dense<0.000000e+00> : vector<256x8xf32>
    %26 = tpu.matmul %20, %25, %cst_27 {dimension_numbers = #tpu.dot_dimension_numbers<[1], [0], [0], [1], [0, 0, 1, 1], [], []>} : vector<256x8xf32>, vector<8x8xf32>, vector<256x8xf32> -> vector<256x8xf32>
    %27 = arith.addf %17, %26 : vector<256x8xf32>
    %c1_28 = arith.constant 1 : index
    %c0_29 = arith.constant 0 : index
    %c0_30 = arith.constant 0 : index
    %28 = vector.load %arg4[%c1_28, %c0_29, %c0_30] : memref<9x8x8xf32, #tpu.memory_space<vmem>>, vector<1x8x8xf32>
    %29 = vector.shape_cast %28 : vector<1x8x8xf32> to vector<8x8xf32>
    %cst_31 = arith.constant dense<0.000000e+00> : vector<256x8xf32>
    %30 = tpu.matmul %23, %29, %cst_31 {dimension_numbers = #tpu.dot_dimension_numbers<[1], [0], [0], [1], [0, 0, 1, 1], [], []>} : vector<256x8xf32>, vector<8x8xf32>, vector<256x8xf32> -> vector<256x8xf32>
    %31 = arith.addf %27, %30 : vector<256x8xf32>
    %c0_32 = arith.constant 0 : index
    %c0_33 = arith.constant 0 : index
    %c2 = arith.constant 2 : index
    %c0_34 = arith.constant 0 : index
    %32 = vector.load %arg1[%c0_32, %c0_33, %c2, %c0_34] : memref<1x18x18x8xf32, #tpu.memory_space<vmem>>, vector<1x16x16x8xf32>
    %33 = vector.shape_cast %32 : vector<1x16x16x8xf32> to vector<16x16x8xf32>
    %34 = vector.shape_cast %33 : vector<16x16x8xf32> to vector<256x8xf32>
    %c0_35 = arith.constant 0 : index
    %c0_36 = arith.constant 0 : index
    %c2_37 = arith.constant 2 : index
    %c0_38 = arith.constant 0 : index
    %35 = vector.load %arg2[%c0_35, %c0_36, %c2_37, %c0_38] : memref<1x18x18x8xf32, #tpu.memory_space<vmem>>, vector<1x16x16x8xf32>
    %36 = vector.shape_cast %35 : vector<1x16x16x8xf32> to vector<16x16x8xf32>
    %37 = vector.shape_cast %36 : vector<16x16x8xf32> to vector<256x8xf32>
    %c2_39 = arith.constant 2 : index
    %c0_40 = arith.constant 0 : index
    %c0_41 = arith.constant 0 : index
    %38 = vector.load %arg3[%c2_39, %c0_40, %c0_41] : memref<9x8x8xf32, #tpu.memory_space<vmem>>, vector<1x8x8xf32>
    %39 = vector.shape_cast %38 : vector<1x8x8xf32> to vector<8x8xf32>
    %cst_42 = arith.constant dense<0.000000e+00> : vector<256x8xf32>
    %40 = tpu.matmul %34, %39, %cst_42 {dimension_numbers = #tpu.dot_dimension_numbers<[1], [0], [0], [1], [0, 0, 1, 1], [], []>} : vector<256x8xf32>, vector<8x8xf32>, vector<256x8xf32> -> vector<256x8xf32>
    %41 = arith.addf %31, %40 : vector<256x8xf32>
    %c2_43 = arith.constant 2 : index
    %c0_44 = arith.constant 0 : index
    %c0_45 = arith.constant 0 : index
    %42 = vector.load %arg4[%c2_43, %c0_44, %c0_45] : memref<9x8x8xf32, #tpu.memory_space<vmem>>, vector<1x8x8xf32>
    %43 = vector.shape_cast %42 : vector<1x8x8xf32> to vector<8x8xf32>
    %cst_46 = arith.constant dense<0.000000e+00> : vector<256x8xf32>
    %44 = tpu.matmul %37, %43, %cst_46 {dimension_numbers = #tpu.dot_dimension_numbers<[1], [0], [0], [1], [0, 0, 1, 1], [], []>} : vector<256x8xf32>, vector<8x8xf32>, vector<256x8xf32> -> vector<256x8xf32>
    %45 = arith.addf %41, %44 : vector<256x8xf32>
    %c0_47 = arith.constant 0 : index
    %c1_48 = arith.constant 1 : index
    %c0_49 = arith.constant 0 : index
    %c0_50 = arith.constant 0 : index
    %46 = vector.load %arg1[%c0_47, %c1_48, %c0_49, %c0_50] : memref<1x18x18x8xf32, #tpu.memory_space<vmem>>, vector<1x16x16x8xf32>
    %47 = vector.shape_cast %46 : vector<1x16x16x8xf32> to vector<16x16x8xf32>
    %48 = vector.shape_cast %47 : vector<16x16x8xf32> to vector<256x8xf32>
    %c0_51 = arith.constant 0 : index
    %c1_52 = arith.constant 1 : index
    %c0_53 = arith.constant 0 : index
    %c0_54 = arith.constant 0 : index
    %49 = vector.load %arg2[%c0_51, %c1_52, %c0_53, %c0_54] : memref<1x18x18x8xf32, #tpu.memory_space<vmem>>, vector<1x16x16x8xf32>
    %50 = vector.shape_cast %49 : vector<1x16x16x8xf32> to vector<16x16x8xf32>
    %51 = vector.shape_cast %50 : vector<16x16x8xf32> to vector<256x8xf32>
    %c3 = arith.constant 3 : index
    %c0_55 = arith.constant 0 : index
    %c0_56 = arith.constant 0 : index
    %52 = vector.load %arg3[%c3, %c0_55, %c0_56] : memref<9x8x8xf32, #tpu.memory_space<vmem>>, vector<1x8x8xf32>
    %53 = vector.shape_cast %52 : vector<1x8x8xf32> to vector<8x8xf32>
    %cst_57 = arith.constant dense<0.000000e+00> : vector<256x8xf32>
    %54 = tpu.matmul %48, %53, %cst_57 {dimension_numbers = #tpu.dot_dimension_numbers<[1], [0], [0], [1], [0, 0, 1, 1], [], []>} : vector<256x8xf32>, vector<8x8xf32>, vector<256x8xf32> -> vector<256x8xf32>
    %55 = arith.addf %45, %54 : vector<256x8xf32>
    %c3_58 = arith.constant 3 : index
    %c0_59 = arith.constant 0 : index
    %c0_60 = arith.constant 0 : index
    %56 = vector.load %arg4[%c3_58, %c0_59, %c0_60] : memref<9x8x8xf32, #tpu.memory_space<vmem>>, vector<1x8x8xf32>
    %57 = vector.shape_cast %56 : vector<1x8x8xf32> to vector<8x8xf32>
    %cst_61 = arith.constant dense<0.000000e+00> : vector<256x8xf32>
    %58 = tpu.matmul %51, %57, %cst_61 {dimension_numbers = #tpu.dot_dimension_numbers<[1], [0], [0], [1], [0, 0, 1, 1], [], []>} : vector<256x8xf32>, vector<8x8xf32>, vector<256x8xf32> -> vector<256x8xf32>
    %59 = arith.addf %55, %58 : vector<256x8xf32>
    %c0_62 = arith.constant 0 : index
    %c1_63 = arith.constant 1 : index
    %c1_64 = arith.constant 1 : index
    %c0_65 = arith.constant 0 : index
    %60 = vector.load %arg1[%c0_62, %c1_63, %c1_64, %c0_65] : memref<1x18x18x8xf32, #tpu.memory_space<vmem>>, vector<1x16x16x8xf32>
    %61 = vector.shape_cast %60 : vector<1x16x16x8xf32> to vector<16x16x8xf32>
    %62 = vector.shape_cast %61 : vector<16x16x8xf32> to vector<256x8xf32>
    %c0_66 = arith.constant 0 : index
    %c1_67 = arith.constant 1 : index
    %c1_68 = arith.constant 1 : index
    %c0_69 = arith.constant 0 : index
    %63 = vector.load %arg2[%c0_66, %c1_67, %c1_68, %c0_69] : memref<1x18x18x8xf32, #tpu.memory_space<vmem>>, vector<1x16x16x8xf32>
    %64 = vector.shape_cast %63 : vector<1x16x16x8xf32> to vector<16x16x8xf32>
    %65 = vector.shape_cast %64 : vector<16x16x8xf32> to vector<256x8xf32>
    %c4 = arith.constant 4 : index
    %c0_70 = arith.constant 0 : index
    %c0_71 = arith.constant 0 : index
    %66 = vector.load %arg3[%c4, %c0_70, %c0_71] : memref<9x8x8xf32, #tpu.memory_space<vmem>>, vector<1x8x8xf32>
    %67 = vector.shape_cast %66 : vector<1x8x8xf32> to vector<8x8xf32>
    %cst_72 = arith.constant dense<0.000000e+00> : vector<256x8xf32>
    %68 = tpu.matmul %62, %67, %cst_72 {dimension_numbers = #tpu.dot_dimension_numbers<[1], [0], [0], [1], [0, 0, 1, 1], [], []>} : vector<256x8xf32>, vector<8x8xf32>, vector<256x8xf32> -> vector<256x8xf32>
    %69 = arith.addf %59, %68 : vector<256x8xf32>
    %c4_73 = arith.constant 4 : index
    %c0_74 = arith.constant 0 : index
    %c0_75 = arith.constant 0 : index
    %70 = vector.load %arg4[%c4_73, %c0_74, %c0_75] : memref<9x8x8xf32, #tpu.memory_space<vmem>>, vector<1x8x8xf32>
    %71 = vector.shape_cast %70 : vector<1x8x8xf32> to vector<8x8xf32>
    %cst_76 = arith.constant dense<0.000000e+00> : vector<256x8xf32>
    %72 = tpu.matmul %65, %71, %cst_76 {dimension_numbers = #tpu.dot_dimension_numbers<[1], [0], [0], [1], [0, 0, 1, 1], [], []>} : vector<256x8xf32>, vector<8x8xf32>, vector<256x8xf32> -> vector<256x8xf32>
    %73 = arith.addf %69, %72 : vector<256x8xf32>
    %c0_77 = arith.constant 0 : index
    %c1_78 = arith.constant 1 : index
    %c2_79 = arith.constant 2 : index
    %c0_80 = arith.constant 0 : index
    %74 = vector.load %arg1[%c0_77, %c1_78, %c2_79, %c0_80] : memref<1x18x18x8xf32, #tpu.memory_space<vmem>>, vector<1x16x16x8xf32>
    %75 = vector.shape_cast %74 : vector<1x16x16x8xf32> to vector<16x16x8xf32>
    %76 = vector.shape_cast %75 : vector<16x16x8xf32> to vector<256x8xf32>
    %c0_81 = arith.constant 0 : index
    %c1_82 = arith.constant 1 : index
    %c2_83 = arith.constant 2 : index
    %c0_84 = arith.constant 0 : index
    %77 = vector.load %arg2[%c0_81, %c1_82, %c2_83, %c0_84] : memref<1x18x18x8xf32, #tpu.memory_space<vmem>>, vector<1x16x16x8xf32>
    %78 = vector.shape_cast %77 : vector<1x16x16x8xf32> to vector<16x16x8xf32>
    %79 = vector.shape_cast %78 : vector<16x16x8xf32> to vector<256x8xf32>
    %c5 = arith.constant 5 : index
    %c0_85 = arith.constant 0 : index
    %c0_86 = arith.constant 0 : index
    %80 = vector.load %arg3[%c5, %c0_85, %c0_86] : memref<9x8x8xf32, #tpu.memory_space<vmem>>, vector<1x8x8xf32>
    %81 = vector.shape_cast %80 : vector<1x8x8xf32> to vector<8x8xf32>
    %cst_87 = arith.constant dense<0.000000e+00> : vector<256x8xf32>
    %82 = tpu.matmul %76, %81, %cst_87 {dimension_numbers = #tpu.dot_dimension_numbers<[1], [0], [0], [1], [0, 0, 1, 1], [], []>} : vector<256x8xf32>, vector<8x8xf32>, vector<256x8xf32> -> vector<256x8xf32>
    %83 = arith.addf %73, %82 : vector<256x8xf32>
    %c5_88 = arith.constant 5 : index
    %c0_89 = arith.constant 0 : index
    %c0_90 = arith.constant 0 : index
    %84 = vector.load %arg4[%c5_88, %c0_89, %c0_90] : memref<9x8x8xf32, #tpu.memory_space<vmem>>, vector<1x8x8xf32>
    %85 = vector.shape_cast %84 : vector<1x8x8xf32> to vector<8x8xf32>
    %cst_91 = arith.constant dense<0.000000e+00> : vector<256x8xf32>
    %86 = tpu.matmul %79, %85, %cst_91 {dimension_numbers = #tpu.dot_dimension_numbers<[1], [0], [0], [1], [0, 0, 1, 1], [], []>} : vector<256x8xf32>, vector<8x8xf32>, vector<256x8xf32> -> vector<256x8xf32>
    %87 = arith.addf %83, %86 : vector<256x8xf32>
    %c0_92 = arith.constant 0 : index
    %c2_93 = arith.constant 2 : index
    %c0_94 = arith.constant 0 : index
    %c0_95 = arith.constant 0 : index
    %88 = vector.load %arg1[%c0_92, %c2_93, %c0_94, %c0_95] : memref<1x18x18x8xf32, #tpu.memory_space<vmem>>, vector<1x16x16x8xf32>
    %89 = vector.shape_cast %88 : vector<1x16x16x8xf32> to vector<16x16x8xf32>
    %90 = vector.shape_cast %89 : vector<16x16x8xf32> to vector<256x8xf32>
    %c0_96 = arith.constant 0 : index
    %c2_97 = arith.constant 2 : index
    %c0_98 = arith.constant 0 : index
    %c0_99 = arith.constant 0 : index
    %91 = vector.load %arg2[%c0_96, %c2_97, %c0_98, %c0_99] : memref<1x18x18x8xf32, #tpu.memory_space<vmem>>, vector<1x16x16x8xf32>
    %92 = vector.shape_cast %91 : vector<1x16x16x8xf32> to vector<16x16x8xf32>
    %93 = vector.shape_cast %92 : vector<16x16x8xf32> to vector<256x8xf32>
    %c6 = arith.constant 6 : index
    %c0_100 = arith.constant 0 : index
    %c0_101 = arith.constant 0 : index
    %94 = vector.load %arg3[%c6, %c0_100, %c0_101] : memref<9x8x8xf32, #tpu.memory_space<vmem>>, vector<1x8x8xf32>
    %95 = vector.shape_cast %94 : vector<1x8x8xf32> to vector<8x8xf32>
    %cst_102 = arith.constant dense<0.000000e+00> : vector<256x8xf32>
    %96 = tpu.matmul %90, %95, %cst_102 {dimension_numbers = #tpu.dot_dimension_numbers<[1], [0], [0], [1], [0, 0, 1, 1], [], []>} : vector<256x8xf32>, vector<8x8xf32>, vector<256x8xf32> -> vector<256x8xf32>
    %97 = arith.addf %87, %96 : vector<256x8xf32>
    %c6_103 = arith.constant 6 : index
    %c0_104 = arith.constant 0 : index
    %c0_105 = arith.constant 0 : index
    %98 = vector.load %arg4[%c6_103, %c0_104, %c0_105] : memref<9x8x8xf32, #tpu.memory_space<vmem>>, vector<1x8x8xf32>
    %99 = vector.shape_cast %98 : vector<1x8x8xf32> to vector<8x8xf32>
    %cst_106 = arith.constant dense<0.000000e+00> : vector<256x8xf32>
    %100 = tpu.matmul %93, %99, %cst_106 {dimension_numbers = #tpu.dot_dimension_numbers<[1], [0], [0], [1], [0, 0, 1, 1], [], []>} : vector<256x8xf32>, vector<8x8xf32>, vector<256x8xf32> -> vector<256x8xf32>
    %101 = arith.addf %97, %100 : vector<256x8xf32>
    %c0_107 = arith.constant 0 : index
    %c2_108 = arith.constant 2 : index
    %c1_109 = arith.constant 1 : index
    %c0_110 = arith.constant 0 : index
    %102 = vector.load %arg1[%c0_107, %c2_108, %c1_109, %c0_110] : memref<1x18x18x8xf32, #tpu.memory_space<vmem>>, vector<1x16x16x8xf32>
    %103 = vector.shape_cast %102 : vector<1x16x16x8xf32> to vector<16x16x8xf32>
    %104 = vector.shape_cast %103 : vector<16x16x8xf32> to vector<256x8xf32>
    %c0_111 = arith.constant 0 : index
    %c2_112 = arith.constant 2 : index
    %c1_113 = arith.constant 1 : index
    %c0_114 = arith.constant 0 : index
    %105 = vector.load %arg2[%c0_111, %c2_112, %c1_113, %c0_114] : memref<1x18x18x8xf32, #tpu.memory_space<vmem>>, vector<1x16x16x8xf32>
    %106 = vector.shape_cast %105 : vector<1x16x16x8xf32> to vector<16x16x8xf32>
    %107 = vector.shape_cast %106 : vector<16x16x8xf32> to vector<256x8xf32>
    %c7 = arith.constant 7 : index
    %c0_115 = arith.constant 0 : index
    %c0_116 = arith.constant 0 : index
    %108 = vector.load %arg3[%c7, %c0_115, %c0_116] : memref<9x8x8xf32, #tpu.memory_space<vmem>>, vector<1x8x8xf32>
    %109 = vector.shape_cast %108 : vector<1x8x8xf32> to vector<8x8xf32>
    %cst_117 = arith.constant dense<0.000000e+00> : vector<256x8xf32>
    %110 = tpu.matmul %104, %109, %cst_117 {dimension_numbers = #tpu.dot_dimension_numbers<[1], [0], [0], [1], [0, 0, 1, 1], [], []>} : vector<256x8xf32>, vector<8x8xf32>, vector<256x8xf32> -> vector<256x8xf32>
    %111 = arith.addf %101, %110 : vector<256x8xf32>
    %c7_118 = arith.constant 7 : index
    %c0_119 = arith.constant 0 : index
    %c0_120 = arith.constant 0 : index
    %112 = vector.load %arg4[%c7_118, %c0_119, %c0_120] : memref<9x8x8xf32, #tpu.memory_space<vmem>>, vector<1x8x8xf32>
    %113 = vector.shape_cast %112 : vector<1x8x8xf32> to vector<8x8xf32>
    %cst_121 = arith.constant dense<0.000000e+00> : vector<256x8xf32>
    %114 = tpu.matmul %107, %113, %cst_121 {dimension_numbers = #tpu.dot_dimension_numbers<[1], [0], [0], [1], [0, 0, 1, 1], [], []>} : vector<256x8xf32>, vector<8x8xf32>, vector<256x8xf32> -> vector<256x8xf32>
    %115 = arith.addf %111, %114 : vector<256x8xf32>
    %c0_122 = arith.constant 0 : index
    %c2_123 = arith.constant 2 : index
    %c2_124 = arith.constant 2 : index
    %c0_125 = arith.constant 0 : index
    %116 = vector.load %arg1[%c0_122, %c2_123, %c2_124, %c0_125] : memref<1x18x18x8xf32, #tpu.memory_space<vmem>>, vector<1x16x16x8xf32>
    %117 = vector.shape_cast %116 : vector<1x16x16x8xf32> to vector<16x16x8xf32>
    %118 = vector.shape_cast %117 : vector<16x16x8xf32> to vector<256x8xf32>
    %c0_126 = arith.constant 0 : index
    %c2_127 = arith.constant 2 : index
    %c2_128 = arith.constant 2 : index
    %c0_129 = arith.constant 0 : index
    %119 = vector.load %arg2[%c0_126, %c2_127, %c2_128, %c0_129] : memref<1x18x18x8xf32, #tpu.memory_space<vmem>>, vector<1x16x16x8xf32>
    %120 = vector.shape_cast %119 : vector<1x16x16x8xf32> to vector<16x16x8xf32>
    %121 = vector.shape_cast %120 : vector<16x16x8xf32> to vector<256x8xf32>
    %c8 = arith.constant 8 : index
    %c0_130 = arith.constant 0 : index
    %c0_131 = arith.constant 0 : index
    %122 = vector.load %arg3[%c8, %c0_130, %c0_131] : memref<9x8x8xf32, #tpu.memory_space<vmem>>, vector<1x8x8xf32>
    %123 = vector.shape_cast %122 : vector<1x8x8xf32> to vector<8x8xf32>
    %cst_132 = arith.constant dense<0.000000e+00> : vector<256x8xf32>
    %124 = tpu.matmul %118, %123, %cst_132 {dimension_numbers = #tpu.dot_dimension_numbers<[1], [0], [0], [1], [0, 0, 1, 1], [], []>} : vector<256x8xf32>, vector<8x8xf32>, vector<256x8xf32> -> vector<256x8xf32>
    %125 = arith.addf %115, %124 : vector<256x8xf32>
    %c8_133 = arith.constant 8 : index
    %c0_134 = arith.constant 0 : index
    %c0_135 = arith.constant 0 : index
    %126 = vector.load %arg4[%c8_133, %c0_134, %c0_135] : memref<9x8x8xf32, #tpu.memory_space<vmem>>, vector<1x8x8xf32>
    %127 = vector.shape_cast %126 : vector<1x8x8xf32> to vector<8x8xf32>
    %cst_136 = arith.constant dense<0.000000e+00> : vector<256x8xf32>
    %128 = tpu.matmul %121, %127, %cst_136 {dimension_numbers = #tpu.dot_dimension_numbers<[1], [0], [0], [1], [0, 0, 1, 1], [], []>} : vector<256x8xf32>, vector<8x8xf32>, vector<256x8xf32> -> vector<256x8xf32>
    %129 = arith.addf %125, %128 : vector<256x8xf32>
    %130 = vector.shape_cast %129 : vector<256x8xf32> to vector<1x16x16x8xf32>
    %c0_137 = arith.constant 0 : index
    %c0_138 = arith.constant 0 : index
    %c0_139 = arith.constant 0 : index
    %c0_140 = arith.constant 0 : index
    %131 = vector.load %arg6[%c0_137, %c0_138, %c0_139, %c0_140] : memref<1x16x16x8xf32, #tpu.memory_space<vmem>>, vector<1x16x16x8xf32>
    tpu.vector_store %arg6[%c0_137, %c0_138, %c0_139, %c0_140], %130 {strides = array<i32>} : memref<1x16x16x8xf32, #tpu.memory_space<vmem>>, vector<1x16x16x8xf32>,
    %cst_141 = arith.constant dense<0.000000e+00> : vector<8xf32>
    %132 = vector.multi_reduction <add>, %129, %cst_141 [0] : vector<256x8xf32> to vector<8xf32>
    %133 = vector.shape_cast %132 : vector<8xf32> to vector<1x8xf32>
    %c0_142 = arith.constant 0 : index
    %c0_143 = arith.constant 0 : index
    %c0_144 = arith.constant 0 : index
    %134 = vector.load %arg7[%c0_142, %c0_143, %c0_144] : memref<1x2x8xf32, #tpu.memory_space<vmem>>, vector<1x1x8xf32>
    %135 = vector.shape_cast %134 : vector<1x1x8xf32> to vector<1x8xf32>
    %136 = vector.shape_cast %133 : vector<1x8xf32> to vector<1x1x8xf32>
    tpu.vector_store %arg7[%c0_142, %c0_143, %c0_144], %136 {strides = array<i32>} : memref<1x2x8xf32, #tpu.memory_space<vmem>>, vector<1x1x8xf32>,
    %137 = arith.mulf %129, %129 : vector<256x8xf32>
    %cst_145 = arith.constant dense<0.000000e+00> : vector<8xf32>
    %138 = vector.multi_reduction <add>, %137, %cst_145 [0] : vector<256x8xf32> to vector<8xf32>
    %139 = vector.shape_cast %138 : vector<8xf32> to vector<1x8xf32>
    %c0_146 = arith.constant 0 : index
    %c1_147 = arith.constant 1 : index
    %c0_148 = arith.constant 0 : index
    %140 = vector.load %arg7[%c0_146, %c1_147, %c0_148] : memref<1x2x8xf32, #tpu.memory_space<vmem>>, vector<1x1x8xf32>
    %141 = vector.shape_cast %140 : vector<1x1x8xf32> to vector<1x8xf32>
    %142 = vector.shape_cast %139 : vector<1x8xf32> to vector<1x1x8xf32>
    tpu.vector_store %arg7[%c0_146, %c1_147, %c0_148], %142 {strides = array<i32>} : memref<1x2x8xf32, #tpu.memory_space<vmem>>, vector<1x1x8xf32>,
    return
  }
  func.func @transform_0(%arg0: i32) -> (i32, i32, i32, i32) {
    %c0_i32 = arith.constant 0 : i32
    %c0_i32_0 = arith.constant 0 : i32
    %c0_i32_1 = arith.constant 0 : i32
    %c0_i32_2 = arith.constant 0 : i32
    return %arg0, %c0_i32, %c0_i32_0, %c0_i32_1 : i32, i32, i32, i32
  }
  func.func @transform_1(%arg0: i32) -> (i32, i32, i32, i32) {
    %c0_i32 = arith.constant 0 : i32
    %c0_i32_0 = arith.constant 0 : i32
    %c0_i32_1 = arith.constant 0 : i32
    %c0_i32_2 = arith.constant 0 : i32
    return %arg0, %c0_i32, %c0_i32_0, %c0_i32_1 : i32, i32, i32, i32
  }
  func.func @transform_2(%arg0: i32) -> (i32, i32, i32) {
    %c0_i32 = arith.constant 0 : i32
    %c0_i32_0 = arith.constant 0 : i32
    %c0_i32_1 = arith.constant 0 : i32
    %c0_i32_2 = arith.constant 0 : i32
    return %c0_i32, %c0_i32_0, %c0_i32_1 : i32, i32, i32
  }
  func.func @transform_3(%arg0: i32) -> (i32, i32, i32) {
    %c0_i32 = arith.constant 0 : i32
    %c0_i32_0 = arith.constant 0 : i32
    %c0_i32_1 = arith.constant 0 : i32
    %c0_i32_2 = arith.constant 0 : i32
    return %c0_i32, %c0_i32_0, %c0_i32_1 : i32, i32, i32
  }
  func.func @transform_4(%arg0: i32) -> (i32, i32) {
    %c0_i32 = arith.constant 0 : i32
    %c0_i32_0 = arith.constant 0 : i32
    %c0_i32_1 = arith.constant 0 : i32
    return %c0_i32, %c0_i32_0 : i32, i32
  }
  func.func @transform_5(%arg0: i32) -> (i32, i32, i32, i32) {
    %c0_i32 = arith.constant 0 : i32
    %c0_i32_0 = arith.constant 0 : i32
    %c0_i32_1 = arith.constant 0 : i32
    %c0_i32_2 = arith.constant 0 : i32
    return %arg0, %c0_i32, %c0_i32_0, %c0_i32_1 : i32, i32, i32, i32
  }
  func.func @transform_6(%arg0: i32) -> (i32, i32, i32) {
    %c0_i32 = arith.constant 0 : i32
    %c0_i32_0 = arith.constant 0 : i32
    %c0_i32_1 = arith.constant 0 : i32
    return %arg0, %c0_i32, %c0_i32_0 : i32, i32, i32
  }
}

module attributes {stable_mosaic.version = 11 : i64} {
  func.func @_bn_relu_conv3x3_stats_kernel(%arg0: i32, %arg1: memref<1x16x16x8xf32, #tpu.memory_space<vmem>>, %arg2: memref<1x8xf32, #tpu.memory_space<vmem>>, %arg3: memref<1x8xf32, #tpu.memory_space<vmem>>, %arg4: memref<9x8x8xf32, #tpu.memory_space<vmem>>, %arg5: memref<1x8xf32, #tpu.memory_space<vmem>>, %arg6: memref<1x16x16x8xf32, #tpu.memory_space<vmem>>, %arg7: memref<1x2x8xf32, #tpu.memory_space<vmem>>, %arg8: memref<18x18x8xf32, #tpu.memory_space<vmem>>) attributes {dimension_semantics = [#tpu.dimension_semantics<parallel>], iteration_bounds = array<i64: 2>, scalar_prefetch = 0 : i64, scratch_operands = 1 : i64, tpu.core_type = #tpu.core_type<tc>, window_params = [{transform_indices = @transform_0, window_bounds = array<i64: 1, 16, 16, 8>}, {pipeline_mode = #tpu.pipeline_mode<synchronous>, transform_indices = @transform_1, window_bounds = array<i64: 1, 8>}, {pipeline_mode = #tpu.pipeline_mode<synchronous>, transform_indices = @transform_2, window_bounds = array<i64: 1, 8>}, {pipeline_mode = #tpu.pipeline_mode<synchronous>, transform_indices = @transform_3, window_bounds = array<i64: 9, 8, 8>}, {pipeline_mode = #tpu.pipeline_mode<synchronous>, transform_indices = @transform_4, window_bounds = array<i64: 1, 8>}, {transform_indices = @transform_5, window_bounds = array<i64: 1, 16, 16, 8>}, {transform_indices = @transform_6, window_bounds = array<i64: 1, 2, 8>}]} {
    %c0 = arith.constant 0 : index
    %c0_0 = arith.constant 0 : index
    %0 = vector.load %arg2[%c0, %c0_0] : memref<1x8xf32, #tpu.memory_space<vmem>>, vector<1x8xf32>
    %1 = vector.shape_cast %0 : vector<1x8xf32> to vector<1x1x8xf32>
    %c0_1 = arith.constant 0 : index
    %c0_2 = arith.constant 0 : index
    %2 = vector.load %arg3[%c0_1, %c0_2] : memref<1x8xf32, #tpu.memory_space<vmem>>, vector<1x8xf32>
    %3 = vector.shape_cast %2 : vector<1x8xf32> to vector<1x1x8xf32>
    %c0_3 = arith.constant 0 : index
    %c0_4 = arith.constant 0 : index
    %c0_5 = arith.constant 0 : index
    %c0_6 = arith.constant 0 : index
    %4 = vector.load %arg1[%c0_3, %c0_4, %c0_5, %c0_6] : memref<1x16x16x8xf32, #tpu.memory_space<vmem>>, vector<1x16x16x8xf32>
    %5 = vector.shape_cast %4 : vector<1x16x16x8xf32> to vector<16x16x8xf32>
    %6 = vector.broadcast %1 : vector<1x1x8xf32> to vector<16x16x8xf32>
    %7 = arith.mulf %5, %6 : vector<16x16x8xf32>
    %8 = vector.broadcast %3 : vector<1x1x8xf32> to vector<16x16x8xf32>
    %9 = arith.addf %7, %8 : vector<16x16x8xf32>
    %cst = arith.constant 0.000000e+00 : f32
    %10 = vector.broadcast %cst : f32 to vector<16x16x8xf32>
    %11 = arith.maximumf %9, %10 : vector<16x16x8xf32>
    %cst_7 = arith.constant 0.000000e+00 : f32
    %12 = vector.broadcast %cst_7 : f32 to vector<18x18x8xf32>
    %c0_8 = arith.constant 0 : index
    %c0_9 = arith.constant 0 : index
    %c0_10 = arith.constant 0 : index
    %13 = vector.load %arg8[%c0_8, %c0_9, %c0_10] : memref<18x18x8xf32, #tpu.memory_space<vmem>>, vector<18x18x8xf32>
    tpu.vector_store %arg8[%c0_8, %c0_9, %c0_10], %12 {strides = array<i32>} : memref<18x18x8xf32, #tpu.memory_space<vmem>>, vector<18x18x8xf32>,
    %c1 = arith.constant 1 : index
    %c1_11 = arith.constant 1 : index
    %c0_12 = arith.constant 0 : index
    %14 = vector.load %arg8[%c1, %c1_11, %c0_12] : memref<18x18x8xf32, #tpu.memory_space<vmem>>, vector<16x16x8xf32>
    tpu.vector_store %arg8[%c1, %c1_11, %c0_12], %11 {strides = array<i32>} : memref<18x18x8xf32, #tpu.memory_space<vmem>>, vector<16x16x8xf32>,
    %cst_13 = arith.constant 0.000000e+00 : f32
    %15 = vector.broadcast %cst_13 : f32 to vector<256x8xf32>
    %c0_14 = arith.constant 0 : index
    %c0_15 = arith.constant 0 : index
    %16 = vector.load %arg5[%c0_14, %c0_15] : memref<1x8xf32, #tpu.memory_space<vmem>>, vector<1x8xf32>
    %17 = vector.broadcast %16 : vector<1x8xf32> to vector<256x8xf32>
    %18 = arith.addf %15, %17 : vector<256x8xf32>
    %c0_16 = arith.constant 0 : index
    %c0_17 = arith.constant 0 : index
    %c0_18 = arith.constant 0 : index
    %19 = vector.load %arg8[%c0_16, %c0_17, %c0_18] : memref<18x18x8xf32, #tpu.memory_space<vmem>>, vector<16x16x8xf32>
    %20 = vector.shape_cast %19 : vector<16x16x8xf32> to vector<256x8xf32>
    %c0_19 = arith.constant 0 : index
    %c0_20 = arith.constant 0 : index
    %c0_21 = arith.constant 0 : index
    %21 = vector.load %arg4[%c0_19, %c0_20, %c0_21] : memref<9x8x8xf32, #tpu.memory_space<vmem>>, vector<1x8x8xf32>
    %22 = vector.shape_cast %21 : vector<1x8x8xf32> to vector<8x8xf32>
    %cst_22 = arith.constant dense<0.000000e+00> : vector<256x8xf32>
    %23 = tpu.matmul %20, %22, %cst_22 {dimension_numbers = #tpu.dot_dimension_numbers<[1], [0], [0], [1], [0, 0, 1, 1], [], []>} : vector<256x8xf32>, vector<8x8xf32>, vector<256x8xf32> -> vector<256x8xf32>
    %24 = arith.addf %18, %23 : vector<256x8xf32>
    %c0_23 = arith.constant 0 : index
    %c1_24 = arith.constant 1 : index
    %c0_25 = arith.constant 0 : index
    %25 = vector.load %arg8[%c0_23, %c1_24, %c0_25] : memref<18x18x8xf32, #tpu.memory_space<vmem>>, vector<16x16x8xf32>
    %26 = vector.shape_cast %25 : vector<16x16x8xf32> to vector<256x8xf32>
    %c1_26 = arith.constant 1 : index
    %c0_27 = arith.constant 0 : index
    %c0_28 = arith.constant 0 : index
    %27 = vector.load %arg4[%c1_26, %c0_27, %c0_28] : memref<9x8x8xf32, #tpu.memory_space<vmem>>, vector<1x8x8xf32>
    %28 = vector.shape_cast %27 : vector<1x8x8xf32> to vector<8x8xf32>
    %cst_29 = arith.constant dense<0.000000e+00> : vector<256x8xf32>
    %29 = tpu.matmul %26, %28, %cst_29 {dimension_numbers = #tpu.dot_dimension_numbers<[1], [0], [0], [1], [0, 0, 1, 1], [], []>} : vector<256x8xf32>, vector<8x8xf32>, vector<256x8xf32> -> vector<256x8xf32>
    %30 = arith.addf %24, %29 : vector<256x8xf32>
    %c0_30 = arith.constant 0 : index
    %c2 = arith.constant 2 : index
    %c0_31 = arith.constant 0 : index
    %31 = vector.load %arg8[%c0_30, %c2, %c0_31] : memref<18x18x8xf32, #tpu.memory_space<vmem>>, vector<16x16x8xf32>
    %32 = vector.shape_cast %31 : vector<16x16x8xf32> to vector<256x8xf32>
    %c2_32 = arith.constant 2 : index
    %c0_33 = arith.constant 0 : index
    %c0_34 = arith.constant 0 : index
    %33 = vector.load %arg4[%c2_32, %c0_33, %c0_34] : memref<9x8x8xf32, #tpu.memory_space<vmem>>, vector<1x8x8xf32>
    %34 = vector.shape_cast %33 : vector<1x8x8xf32> to vector<8x8xf32>
    %cst_35 = arith.constant dense<0.000000e+00> : vector<256x8xf32>
    %35 = tpu.matmul %32, %34, %cst_35 {dimension_numbers = #tpu.dot_dimension_numbers<[1], [0], [0], [1], [0, 0, 1, 1], [], []>} : vector<256x8xf32>, vector<8x8xf32>, vector<256x8xf32> -> vector<256x8xf32>
    %36 = arith.addf %30, %35 : vector<256x8xf32>
    %c1_36 = arith.constant 1 : index
    %c0_37 = arith.constant 0 : index
    %c0_38 = arith.constant 0 : index
    %37 = vector.load %arg8[%c1_36, %c0_37, %c0_38] : memref<18x18x8xf32, #tpu.memory_space<vmem>>, vector<16x16x8xf32>
    %38 = vector.shape_cast %37 : vector<16x16x8xf32> to vector<256x8xf32>
    %c3 = arith.constant 3 : index
    %c0_39 = arith.constant 0 : index
    %c0_40 = arith.constant 0 : index
    %39 = vector.load %arg4[%c3, %c0_39, %c0_40] : memref<9x8x8xf32, #tpu.memory_space<vmem>>, vector<1x8x8xf32>
    %40 = vector.shape_cast %39 : vector<1x8x8xf32> to vector<8x8xf32>
    %cst_41 = arith.constant dense<0.000000e+00> : vector<256x8xf32>
    %41 = tpu.matmul %38, %40, %cst_41 {dimension_numbers = #tpu.dot_dimension_numbers<[1], [0], [0], [1], [0, 0, 1, 1], [], []>} : vector<256x8xf32>, vector<8x8xf32>, vector<256x8xf32> -> vector<256x8xf32>
    %42 = arith.addf %36, %41 : vector<256x8xf32>
    %c1_42 = arith.constant 1 : index
    %c1_43 = arith.constant 1 : index
    %c0_44 = arith.constant 0 : index
    %43 = vector.load %arg8[%c1_42, %c1_43, %c0_44] : memref<18x18x8xf32, #tpu.memory_space<vmem>>, vector<16x16x8xf32>
    %44 = vector.shape_cast %43 : vector<16x16x8xf32> to vector<256x8xf32>
    %c4 = arith.constant 4 : index
    %c0_45 = arith.constant 0 : index
    %c0_46 = arith.constant 0 : index
    %45 = vector.load %arg4[%c4, %c0_45, %c0_46] : memref<9x8x8xf32, #tpu.memory_space<vmem>>, vector<1x8x8xf32>
    %46 = vector.shape_cast %45 : vector<1x8x8xf32> to vector<8x8xf32>
    %cst_47 = arith.constant dense<0.000000e+00> : vector<256x8xf32>
    %47 = tpu.matmul %44, %46, %cst_47 {dimension_numbers = #tpu.dot_dimension_numbers<[1], [0], [0], [1], [0, 0, 1, 1], [], []>} : vector<256x8xf32>, vector<8x8xf32>, vector<256x8xf32> -> vector<256x8xf32>
    %48 = arith.addf %42, %47 : vector<256x8xf32>
    %c1_48 = arith.constant 1 : index
    %c2_49 = arith.constant 2 : index
    %c0_50 = arith.constant 0 : index
    %49 = vector.load %arg8[%c1_48, %c2_49, %c0_50] : memref<18x18x8xf32, #tpu.memory_space<vmem>>, vector<16x16x8xf32>
    %50 = vector.shape_cast %49 : vector<16x16x8xf32> to vector<256x8xf32>
    %c5 = arith.constant 5 : index
    %c0_51 = arith.constant 0 : index
    %c0_52 = arith.constant 0 : index
    %51 = vector.load %arg4[%c5, %c0_51, %c0_52] : memref<9x8x8xf32, #tpu.memory_space<vmem>>, vector<1x8x8xf32>
    %52 = vector.shape_cast %51 : vector<1x8x8xf32> to vector<8x8xf32>
    %cst_53 = arith.constant dense<0.000000e+00> : vector<256x8xf32>
    %53 = tpu.matmul %50, %52, %cst_53 {dimension_numbers = #tpu.dot_dimension_numbers<[1], [0], [0], [1], [0, 0, 1, 1], [], []>} : vector<256x8xf32>, vector<8x8xf32>, vector<256x8xf32> -> vector<256x8xf32>
    %54 = arith.addf %48, %53 : vector<256x8xf32>
    %c2_54 = arith.constant 2 : index
    %c0_55 = arith.constant 0 : index
    %c0_56 = arith.constant 0 : index
    %55 = vector.load %arg8[%c2_54, %c0_55, %c0_56] : memref<18x18x8xf32, #tpu.memory_space<vmem>>, vector<16x16x8xf32>
    %56 = vector.shape_cast %55 : vector<16x16x8xf32> to vector<256x8xf32>
    %c6 = arith.constant 6 : index
    %c0_57 = arith.constant 0 : index
    %c0_58 = arith.constant 0 : index
    %57 = vector.load %arg4[%c6, %c0_57, %c0_58] : memref<9x8x8xf32, #tpu.memory_space<vmem>>, vector<1x8x8xf32>
    %58 = vector.shape_cast %57 : vector<1x8x8xf32> to vector<8x8xf32>
    %cst_59 = arith.constant dense<0.000000e+00> : vector<256x8xf32>
    %59 = tpu.matmul %56, %58, %cst_59 {dimension_numbers = #tpu.dot_dimension_numbers<[1], [0], [0], [1], [0, 0, 1, 1], [], []>} : vector<256x8xf32>, vector<8x8xf32>, vector<256x8xf32> -> vector<256x8xf32>
    %60 = arith.addf %54, %59 : vector<256x8xf32>
    %c2_60 = arith.constant 2 : index
    %c1_61 = arith.constant 1 : index
    %c0_62 = arith.constant 0 : index
    %61 = vector.load %arg8[%c2_60, %c1_61, %c0_62] : memref<18x18x8xf32, #tpu.memory_space<vmem>>, vector<16x16x8xf32>
    %62 = vector.shape_cast %61 : vector<16x16x8xf32> to vector<256x8xf32>
    %c7 = arith.constant 7 : index
    %c0_63 = arith.constant 0 : index
    %c0_64 = arith.constant 0 : index
    %63 = vector.load %arg4[%c7, %c0_63, %c0_64] : memref<9x8x8xf32, #tpu.memory_space<vmem>>, vector<1x8x8xf32>
    %64 = vector.shape_cast %63 : vector<1x8x8xf32> to vector<8x8xf32>
    %cst_65 = arith.constant dense<0.000000e+00> : vector<256x8xf32>
    %65 = tpu.matmul %62, %64, %cst_65 {dimension_numbers = #tpu.dot_dimension_numbers<[1], [0], [0], [1], [0, 0, 1, 1], [], []>} : vector<256x8xf32>, vector<8x8xf32>, vector<256x8xf32> -> vector<256x8xf32>
    %66 = arith.addf %60, %65 : vector<256x8xf32>
    %c2_66 = arith.constant 2 : index
    %c2_67 = arith.constant 2 : index
    %c0_68 = arith.constant 0 : index
    %67 = vector.load %arg8[%c2_66, %c2_67, %c0_68] : memref<18x18x8xf32, #tpu.memory_space<vmem>>, vector<16x16x8xf32>
    %68 = vector.shape_cast %67 : vector<16x16x8xf32> to vector<256x8xf32>
    %c8 = arith.constant 8 : index
    %c0_69 = arith.constant 0 : index
    %c0_70 = arith.constant 0 : index
    %69 = vector.load %arg4[%c8, %c0_69, %c0_70] : memref<9x8x8xf32, #tpu.memory_space<vmem>>, vector<1x8x8xf32>
    %70 = vector.shape_cast %69 : vector<1x8x8xf32> to vector<8x8xf32>
    %cst_71 = arith.constant dense<0.000000e+00> : vector<256x8xf32>
    %71 = tpu.matmul %68, %70, %cst_71 {dimension_numbers = #tpu.dot_dimension_numbers<[1], [0], [0], [1], [0, 0, 1, 1], [], []>} : vector<256x8xf32>, vector<8x8xf32>, vector<256x8xf32> -> vector<256x8xf32>
    %72 = arith.addf %66, %71 : vector<256x8xf32>
    %73 = vector.shape_cast %72 : vector<256x8xf32> to vector<1x16x16x8xf32>
    %c0_72 = arith.constant 0 : index
    %c0_73 = arith.constant 0 : index
    %c0_74 = arith.constant 0 : index
    %c0_75 = arith.constant 0 : index
    %74 = vector.load %arg6[%c0_72, %c0_73, %c0_74, %c0_75] : memref<1x16x16x8xf32, #tpu.memory_space<vmem>>, vector<1x16x16x8xf32>
    tpu.vector_store %arg6[%c0_72, %c0_73, %c0_74, %c0_75], %73 {strides = array<i32>} : memref<1x16x16x8xf32, #tpu.memory_space<vmem>>, vector<1x16x16x8xf32>,
    %cst_76 = arith.constant dense<0.000000e+00> : vector<8xf32>
    %75 = vector.multi_reduction <add>, %72, %cst_76 [0] : vector<256x8xf32> to vector<8xf32>
    %76 = vector.shape_cast %75 : vector<8xf32> to vector<1x8xf32>
    %c0_77 = arith.constant 0 : index
    %c0_78 = arith.constant 0 : index
    %c0_79 = arith.constant 0 : index
    %77 = vector.load %arg7[%c0_77, %c0_78, %c0_79] : memref<1x2x8xf32, #tpu.memory_space<vmem>>, vector<1x1x8xf32>
    %78 = vector.shape_cast %77 : vector<1x1x8xf32> to vector<1x8xf32>
    %79 = vector.shape_cast %76 : vector<1x8xf32> to vector<1x1x8xf32>
    tpu.vector_store %arg7[%c0_77, %c0_78, %c0_79], %79 {strides = array<i32>} : memref<1x2x8xf32, #tpu.memory_space<vmem>>, vector<1x1x8xf32>,
    %80 = arith.mulf %72, %72 : vector<256x8xf32>
    %cst_80 = arith.constant dense<0.000000e+00> : vector<8xf32>
    %81 = vector.multi_reduction <add>, %80, %cst_80 [0] : vector<256x8xf32> to vector<8xf32>
    %82 = vector.shape_cast %81 : vector<8xf32> to vector<1x8xf32>
    %c0_81 = arith.constant 0 : index
    %c1_82 = arith.constant 1 : index
    %c0_83 = arith.constant 0 : index
    %83 = vector.load %arg7[%c0_81, %c1_82, %c0_83] : memref<1x2x8xf32, #tpu.memory_space<vmem>>, vector<1x1x8xf32>
    %84 = vector.shape_cast %83 : vector<1x1x8xf32> to vector<1x8xf32>
    %85 = vector.shape_cast %82 : vector<1x8xf32> to vector<1x1x8xf32>
    tpu.vector_store %arg7[%c0_81, %c1_82, %c0_83], %85 {strides = array<i32>} : memref<1x2x8xf32, #tpu.memory_space<vmem>>, vector<1x1x8xf32>,
    return
  }
  func.func @transform_0(%arg0: i32) -> (i32, i32, i32, i32) {
    %c0_i32 = arith.constant 0 : i32
    %c0_i32_0 = arith.constant 0 : i32
    %c0_i32_1 = arith.constant 0 : i32
    %c0_i32_2 = arith.constant 0 : i32
    return %arg0, %c0_i32, %c0_i32_0, %c0_i32_1 : i32, i32, i32, i32
  }
  func.func @transform_1(%arg0: i32) -> (i32, i32) {
    %c0_i32 = arith.constant 0 : i32
    %c0_i32_0 = arith.constant 0 : i32
    %c0_i32_1 = arith.constant 0 : i32
    return %c0_i32, %c0_i32_0 : i32, i32
  }
  func.func @transform_2(%arg0: i32) -> (i32, i32) {
    %c0_i32 = arith.constant 0 : i32
    %c0_i32_0 = arith.constant 0 : i32
    %c0_i32_1 = arith.constant 0 : i32
    return %c0_i32, %c0_i32_0 : i32, i32
  }
  func.func @transform_3(%arg0: i32) -> (i32, i32, i32) {
    %c0_i32 = arith.constant 0 : i32
    %c0_i32_0 = arith.constant 0 : i32
    %c0_i32_1 = arith.constant 0 : i32
    %c0_i32_2 = arith.constant 0 : i32
    return %c0_i32, %c0_i32_0, %c0_i32_1 : i32, i32, i32
  }
  func.func @transform_4(%arg0: i32) -> (i32, i32) {
    %c0_i32 = arith.constant 0 : i32
    %c0_i32_0 = arith.constant 0 : i32
    %c0_i32_1 = arith.constant 0 : i32
    return %c0_i32, %c0_i32_0 : i32, i32
  }
  func.func @transform_5(%arg0: i32) -> (i32, i32, i32, i32) {
    %c0_i32 = arith.constant 0 : i32
    %c0_i32_0 = arith.constant 0 : i32
    %c0_i32_1 = arith.constant 0 : i32
    %c0_i32_2 = arith.constant 0 : i32
    return %arg0, %c0_i32, %c0_i32_0, %c0_i32_1 : i32, i32, i32, i32
  }
  func.func @transform_6(%arg0: i32) -> (i32, i32, i32) {
    %c0_i32 = arith.constant 0 : i32
    %c0_i32_0 = arith.constant 0 : i32
    %c0_i32_1 = arith.constant 0 : i32
    return %arg0, %c0_i32, %c0_i32_0 : i32, i32, i32
  }
}

module attributes {stable_mosaic.version = 11 : i64} {
  func.func @_bn_relu_kernel(%arg0: i32, %arg1: memref<1x16x16x8xf32, #tpu.memory_space<vmem>>, %arg2: memref<1x8xf32, #tpu.memory_space<vmem>>, %arg3: memref<1x8xf32, #tpu.memory_space<vmem>>, %arg4: memref<1x16x16x8xf32, #tpu.memory_space<vmem>>) attributes {dimension_semantics = [#tpu.dimension_semantics<parallel>], iteration_bounds = array<i64: 2>, scalar_prefetch = 0 : i64, scratch_operands = 0 : i64, tpu.core_type = #tpu.core_type<tc>, window_params = [{transform_indices = @transform_0, window_bounds = array<i64: 1, 16, 16, 8>}, {pipeline_mode = #tpu.pipeline_mode<synchronous>, transform_indices = @transform_1, window_bounds = array<i64: 1, 8>}, {pipeline_mode = #tpu.pipeline_mode<synchronous>, transform_indices = @transform_2, window_bounds = array<i64: 1, 8>}, {transform_indices = @transform_3, window_bounds = array<i64: 1, 16, 16, 8>}]} {
    %c0 = arith.constant 0 : index
    %c0_0 = arith.constant 0 : index
    %0 = vector.load %arg2[%c0, %c0_0] : memref<1x8xf32, #tpu.memory_space<vmem>>, vector<1x8xf32>
    %1 = vector.shape_cast %0 : vector<1x8xf32> to vector<1x1x1x8xf32>
    %c0_1 = arith.constant 0 : index
    %c0_2 = arith.constant 0 : index
    %2 = vector.load %arg3[%c0_1, %c0_2] : memref<1x8xf32, #tpu.memory_space<vmem>>, vector<1x8xf32>
    %3 = vector.shape_cast %2 : vector<1x8xf32> to vector<1x1x1x8xf32>
    %c0_3 = arith.constant 0 : index
    %c0_4 = arith.constant 0 : index
    %c0_5 = arith.constant 0 : index
    %c0_6 = arith.constant 0 : index
    %4 = vector.load %arg1[%c0_3, %c0_4, %c0_5, %c0_6] : memref<1x16x16x8xf32, #tpu.memory_space<vmem>>, vector<1x16x16x8xf32>
    %5 = vector.broadcast %1 : vector<1x1x1x8xf32> to vector<1x16x16x8xf32>
    %6 = arith.mulf %4, %5 : vector<1x16x16x8xf32>
    %7 = vector.broadcast %3 : vector<1x1x1x8xf32> to vector<1x16x16x8xf32>
    %8 = arith.addf %6, %7 : vector<1x16x16x8xf32>
    %cst = arith.constant 0.000000e+00 : f32
    %9 = vector.broadcast %cst : f32 to vector<1x16x16x8xf32>
    %10 = arith.maximumf %8, %9 : vector<1x16x16x8xf32>
    %c0_7 = arith.constant 0 : index
    %c0_8 = arith.constant 0 : index
    %c0_9 = arith.constant 0 : index
    %c0_10 = arith.constant 0 : index
    %11 = vector.load %arg4[%c0_7, %c0_8, %c0_9, %c0_10] : memref<1x16x16x8xf32, #tpu.memory_space<vmem>>, vector<1x16x16x8xf32>
    tpu.vector_store %arg4[%c0_7, %c0_8, %c0_9, %c0_10], %10 {strides = array<i32>} : memref<1x16x16x8xf32, #tpu.memory_space<vmem>>, vector<1x16x16x8xf32>,
    return
  }
  func.func @transform_0(%arg0: i32) -> (i32, i32, i32, i32) {
    %c0_i32 = arith.constant 0 : i32
    %c0_i32_0 = arith.constant 0 : i32
    %c0_i32_1 = arith.constant 0 : i32
    %c0_i32_2 = arith.constant 0 : i32
    return %arg0, %c0_i32, %c0_i32_0, %c0_i32_1 : i32, i32, i32, i32
  }
  func.func @transform_1(%arg0: i32) -> (i32, i32) {
    %c0_i32 = arith.constant 0 : i32
    %c0_i32_0 = arith.constant 0 : i32
    %c0_i32_1 = arith.constant 0 : i32
    return %c0_i32, %c0_i32_0 : i32, i32
  }
  func.func @transform_2(%arg0: i32) -> (i32, i32) {
    %c0_i32 = arith.constant 0 : i32
    %c0_i32_0 = arith.constant 0 : i32
    %c0_i32_1 = arith.constant 0 : i32
    return %c0_i32, %c0_i32_0 : i32, i32
  }
  func.func @transform_3(%arg0: i32) -> (i32, i32, i32, i32) {
    %c0_i32 = arith.constant 0 : i32
    %c0_i32_0 = arith.constant 0 : i32
    %c0_i32_1 = arith.constant 0 : i32
    %c0_i32_2 = arith.constant 0 : i32
    return %arg0, %c0_i32, %c0_i32_0, %c0_i32_1 : i32, i32, i32, i32
  }
}

</mosaic_0001>

<bundles_post_ra>
// kernel: up_forward.4
= control target key start
LH: loop header
LB: loop body
LE: loop exit
PB: predicated region body
PF: predicated region fallthrough
CT: control target
= control target key end

     0   :  { %s474_s12 = smov 0   ;;  %s516_s0 = inlined_call_operand.vmem [shape: f32[128,16], index: 0, kind: input, shape index: {}]   ;;  %s517_s1 = inlined_call_operand.vmem [shape: f32[16,32], index: 1, kind: input, shape index: {}]   ;;  %s518_s2 = inlined_call_operand.vmem [shape: f32[1,32], index: 2, kind: input, shape index: {}]   ;;  %s519_s3 = inlined_call_operand.vmem [shape: f32[128,32], index: 3, kind: output, shape index: {}]  }
   0x1 LB: > { %s386_s13 = sadd.s32 4294967295, %s452_s12   ;;  %p390_p0 = scmp.ge.s32.totalorder %s452_s12, 1  ;;  %s452_s12 = sphi %s474_s12, %s13_s12  }
   0x2   : > { %p138_p1 = scmp.lt.s32.totalorder %s452_s12, 3 }
   0x4   : > { %p139_p2 = pnand %p390_p0, %p138_p1 }
   0x5   : > { %v182_v0 = vld [vmem:[%s517_s1] sm:$0xff] (!%p139_p2)  ;;  %v183_v1 = vld [vmem:[%s517_s1 + $0x8] sm:$0xff] (!%p139_p2)  ;;  %s391_s18 = sshll.u32 (!%p139_p2), %s386_s13, 3  ;;  %vm191_vm0 = vcmask (!%p139_p2), 130048   ;;  %vm321_vm1 = vcmask (!%p139_p2), 261120  }
   0x6   : > { %142 = sbr.rel (%p139_p2) target bundleno = 239 (0xef), region = 32  ;;  %v432_v2 = vpack.c.bf16 (!%p139_p2), %v183_v1, %v182_v0  ;;  %p163_p3 = scmp.lt.s32.totalorder (!%p139_p2), %s391_s18, 15  ;;  %v395_v11 = vld [vmem:[%s518_s2] ss:$0 sm:$0xff] (!%p139_p2) }
   0x8   : > { %433 = vmatprep.subr.bf16.mxu0 (!%p139_p2), %v432_v2  ;;  %436 = vmatprep.subr.bf16.mxu1 (!%p139_p2), %v432_v2 }
   0x9   : > { %435 = vmatpush3.bf16.msra.mxu0 (!%p139_p2), %v432_v2  ;;  %437 = vmatpush3.bf16.msra.mxu1 (!%p139_p2), %v432_v2 }
   0xd   : > { %s521_s18 = smov (!%p163_p3, %s391_s18), 15 }
   0xe   : > { %s392_s19 = sshll.u32 %s521_s18, 3 }
   0xf   : > { %s166_s22 = scalar_lea.vmem %s516_s0, %s392_s19  ;;  %s172_s27 = scalar_lea.vmem %s519_s3, %s392_s19 }
  0x10   : > { %v174_v3 = vld [vmem:[%s166_s22] sm:$0xff]  ;;  %v175_v5 = vld [vmem:[%s166_s22 + $0x8] sm:$0xff]  ;;  %v176_v7 = vld [vmem:[%s166_s22 + $0x10] sm:$0xff] }
  0x11   : > { %v178_v4 = vld [vmem:[%s166_s22 + $0x20] sm:$0xff]  ;;  %420 = vmatprep.mubr.msk.f32.mxu0 %vm191_vm0, %v174_v3  ;;  %v179_v6 = vld [vmem:[%s166_s22 + $0x28] sm:$0xff]  ;;  %v180_v8 = vld [vmem:[%s166_s22 + $0x30] sm:$0xff] }
  0x12   : > { %426 = vmatprep.mubr.msk.f32.mxu1 %vm191_vm0, %v178_v4  ;;  %421 = vmatmul.mubr.msk.f32.vlgmr.msra.gmra.mrb[0].mxu0 %vm191_vm0, %v175_v5  ;;  %v177_v9 = vld [vmem:[%s166_s22 + $0x18] sm:$0xff] }
  0x13   : > { %427 = vmatmul.mubr.msk.f32.vlgmr.msra.gmra.mrb[0].mxu1 %vm191_vm0, %v179_v6  ;;  %423 = vmatprep.mubr.msk.f32.mxu0 %vm191_vm0, %v176_v7  ;;  %v181_v10 = vld [vmem:[%s166_s22 + $0x38] sm:$0xff] }
  0x14   : > { %429 = vmatprep.mubr.msk.f32.mxu1 %vm191_vm0, %v180_v8 }
  0x16   : > { %424 = vmatmul.mubr.msk.f32.gmra.mrb[2].mxu0 %vm191_vm0, %v177_v9 }
  0x17   : > { %430 = vmatmul.mubr.msk.f32.gmra.mrb[2].mxu1 %vm191_vm0, %v181_v10 }
  0xe5   : > { %v422_v12 = vpop.f32.mrb[0].mxu0 }
  0xe6   : > { %v428_v13 = vpop.f32.mrb[0].mxu1  ;;  %v288_v14 = vadd.f32 %v422_v12, %v395_v11  ;;  %v282_v16 = vpop.f32.mrb[1].mxu0 }
  0xe7   : > { %v308_v15 = vadd.f32 %v428_v13, %v395_v11  ;;  %v302_v17 = vpop.f32.mrb[1].mxu1  ;;  %v283_v18 = vadd.f32 %v395_v11, %v282_v16 }
  0xe8   : > { %v303_v19 = vadd.f32 %v395_v11, %v302_v17  ;;  %323 = vst.msk [vmem:[%s172_s27 + $0x8] sm:$0xff] %vm321_vm1, %v288_v14 }
  0xe9   : > { %327 = vst.msk [vmem:[%s172_s27 + $0x28] sm:$0xff] %vm321_vm1, %v308_v15  ;;  %322 = vst.msk [vmem:[%s172_s27] sm:$0xff] %vm321_vm1, %v283_v18  ;;  %v425_v20 = vpop.f32.mrb[2].mxu0 }
  0xea   : > { %326 = vst.msk [vmem:[%s172_s27 + $0x20] sm:$0xff] %vm321_vm1, %v303_v19  ;;  %v431_v21 = vpop.f32.mrb[2].mxu1  ;;  %v298_v22 = vadd.f32 %v425_v20, %v395_v11  ;;  %v292_v24 = vpop.f32.mrb[3].mxu0 }
  0xeb   : > { %v318_v23 = vadd.f32 %v431_v21, %v395_v11  ;;  %v312_v25 = vpop.f32.mrb[3].mxu1  ;;  %v293_v26 = vadd.f32 %v395_v11, %v292_v24 }
  0xec   : > { %v313_v27 = vadd.f32 %v395_v11, %v312_v25  ;;  %325 = vst.msk [vmem:[%s172_s27 + $0x18] sm:$0xff] %vm321_vm1, %v298_v22 }
  0xed   : > { %329 = vst.msk [vmem:[%s172_s27 + $0x38] sm:$0xff] %vm321_vm1, %v318_v23  ;;  %324 = vst.msk [vmem:[%s172_s27 + $0x10] sm:$0xff] %vm321_vm1, %v293_v26 }
  0xee   : > { %328 = vst.msk [vmem:[%s172_s27 + $0x30] sm:$0xff] %vm321_vm1, %v313_v27 }
  0xef PF: > { %s13_s12 = sadd.s32 1, %s452_s12  }
  0xf0   : > { %p10_p4 = scmp.ge.s32.totalorder %s13_s12, 4  }
  0xf2   :  { %12 = sbr.rel (!%p10_p4) target bundleno = 1 (0x1), region = 62 }

// kernel: up_forward.7
= control target key start
LH: loop header
LB: loop body
LE: loop exit
PB: predicated region body
PF: predicated region fallthrough
CT: control target
= control target key end

     0   :  { %s452_s12 = smov 0   ;;  %s643_s0 = inlined_call_operand.vmem [shape: f32[2,16,16,8], index: 0, kind: input, shape index: {}]   ;;  %s644_s1 = inlined_call_operand.vmem [shape: f32[1,8], index: 1, kind: input, shape index: {}]   ;;  %s645_s2 = inlined_call_operand.vmem [shape: f32[1,8], index: 2, kind: input, shape index: {}]   ;;  %s646_s3 = inlined_call_operand.vmem [shape: f32[2,16,16,8], index: 3, kind: output, shape index: {}]  }
   0x1 LB: > { %s401_s13 = sadd.s32 4294967295, %s430_s12   ;;  %p405_p0 = scmp.ge.s32.totalorder %s430_s12, 1  ;;  %s430_s12 = sphi %s452_s12, %s13_s12  }
   0x2   : > { %p137_p1 = scmp.lt.s32.totalorder %s430_s12, 3 }
   0x4   : > { %p138_p2 = pnand %p405_p0, %p137_p1 }
   0x5   : > { %p161_p3 = scmp.lt.s32.totalorder (!%p138_p2), %s401_s13, 1  ;;  %v463_v0 = vld [vmem:[%s644_s1] ss:$0 sm:$0xff] (!%p138_p2)  ;;  %vm313_vm0 = vcmask (!%p138_p2), 64512  }
   0x6   : > { %141 = sbr.rel (%p138_p2) target bundleno = 46 (0x2e), region = 32  ;;  %v473_v1 = vld [vmem:[%s645_s2] ss:$0 sm:$0xff] (!%p138_p2) }
   0xd   : > { %s648_s13 = smov (!%p161_p3, %s401_s13), 1 }
   0xe   : > { %s414_s14 = sshll.u32 %s648_s13, 8 }
   0xf   : > { %s468_s19 = scalar_lea.vmem %s643_s0, %s414_s14  ;;  %s496_s24 = scalar_lea.vmem %s646_s3, %s414_s14 }
  0x10   : > { %v173_v2 = vld [vmem:[%s468_s19] sm:$0xff]  ;;  %v174_v3 = vld [vmem:[%s468_s19 + $0x8] sm:$0xff]  ;;  %v175_v4 = vld [vmem:[%s468_s19 + $0x10] sm:$0xff] }
  0x11   : > { %v211_v5 = vmul.f32 %v463_v0, %v173_v2  ;;  %v212_v6 = vmul.f32 %v463_v0, %v174_v3  ;;  %v213_v7 = vmul.f32 %v463_v0, %v175_v4  ;;  %v176_v8 = vld [vmem:[%s468_s19 + $0x18] sm:$0xff]  ;;  %v177_v9 = vld [vmem:[%s468_s19 + $0x20] sm:$0xff]  ;;  %v178_v10 = vld [vmem:[%s468_s19 + $0x28] sm:$0xff] }
  0x12   : > { %v214_v11 = vmul.f32 %v463_v0, %v176_v8  ;;  %v215_v12 = vmul.f32 %v463_v0, %v177_v9  ;;  %v216_v13 = vmul.f32 %v463_v0, %v178_v10  ;;  %v179_v14 = vld [vmem:[%s468_s19 + $0x30] sm:$0xff]  ;;  %v180_v15 = vld [vmem:[%s468_s19 + $0x38] sm:$0xff]  ;;  %v181_v24 = vld [vmem:[%s468_s19 + $0x40] sm:$0xff] }
  0x13   : > { %v249_v16 = vadd.f32 %v473_v1, %v211_v5  ;;  %v250_v17 = vadd.f32 %v473_v1, %v212_v6  ;;  %v251_v18 = vadd.f32 %v473_v1, %v213_v7  ;;  %v217_v19 = vmul.f32 %v463_v0, %v179_v14  ;;  %v182_v25 = vld [vmem:[%s468_s19 + $0x48] sm:$0xff]  ;;  %v183_v26 = vld [vmem:[%s468_s19 + $0x50] sm:$0xff]  ;;  %v184_v31 = vld [vmem:[%s468_s19 + $0x58] sm:$0xff] }
  0x14   : > { %v252_v20 = vadd.f32 %v473_v1, %v214_v11  ;;  %v253_v21 = vadd.f32 %v473_v1, %v215_v12  ;;  %v254_v22 = vadd.f32 %v473_v1, %v216_v13  ;;  %v218_v23 = vmul.f32 %v463_v0, %v180_v15  ;;  %v185_v32 = vld [vmem:[%s468_s19 + $0x60] sm:$0xff]  ;;  %v186_v33 = vld [vmem:[%s468_s19 + $0x68] sm:$0xff]  ;;  %v187_v38 = vld [vmem:[%s468_s19 + $0x70] sm:$0xff] }
  0x15   : > { %v281_v27 = vmax.f32 %v249_v16, 0.0  ;;  %v282_v28 = vmax.f32 %v250_v17, 0.0  ;;  %v283_v29 = vmax.f32 %v251_v18, 0.0  ;;  %v255_v30 = vadd.f32 %v473_v1, %v217_v19  ;;  %v188_v43 = vld [vmem:[%s468_s19 + $0x78] sm:$0xff]  ;;  %v189_v56 = vld [vmem:[%s468_s19 + $0x80] sm:$0xff]  ;;  %v190_v57 = vld [vmem:[%s468_s19 + $0x88] sm:$0xff] }
  0x16   : > { %v284_v34 = vmax.f32 %v252_v20, 0.0  ;;  %v285_v35 = vmax.f32 %v253_v21, 0.0  ;;  %v286_v36 = vmax.f32 %v254_v22, 0.0  ;;  %v256_v37 = vadd.f32 %v473_v1, %v218_v23  ;;  %v191_v58 = vld [vmem:[%s468_s19 + $0x90] sm:$0xff]  ;;  %v192_v63 = vld [vmem:[%s468_s19 + $0x98] sm:$0xff]  ;;  %v193_v2 = vld [vmem:[%s468_s19 + $0xa0] sm:$0xff] }
  0x17   : > { %314 = vst.msk [vmem:[%s496_s24] sm:$0xff] %vm313_vm0, %v281_v27  ;;  %315 = vst.msk [vmem:[%s496_s24 + $0x8] sm:$0xff] %vm313_vm0, %v282_v28  ;;  %v287_v39 = vmax.f32 %v255_v30, 0.0  ;;  %v219_v40 = vmul.f32 %v463_v0, %v181_v24  ;;  %v220_v41 = vmul.f32 %v463_v0, %v182_v25  ;;  %v221_v42 = vmul.f32 %v463_v0, %v183_v26  ;;  %v194_v3 = vld [vmem:[%s468_s19 + $0xa8] sm:$0xff]  ;;  %v195_v8 = vld [vmem:[%s468_s19 + $0xb0] sm:$0xff] }
  0x18   : > { %316 = vst.msk [vmem:[%s496_s24 + $0x10] sm:$0xff] %vm313_vm0, %v283_v29  ;;  %317 = vst.msk [vmem:[%s496_s24 + $0x18] sm:$0xff] %vm313_vm0, %v284_v34  ;;  %v288_v44 = vmax.f32 %v256_v37, 0.0  ;;  %v222_v45 = vmul.f32 %v463_v0, %v184_v31  ;;  %v223_v46 = vmul.f32 %v463_v0, %v185_v32  ;;  %v224_v47 = vmul.f32 %v463_v0, %v186_v33  ;;  %v196_v13 = vld [vmem:[%s468_s19 + $0xb8] sm:$0xff]  ;;  %v197_v26 = vld [vmem:[%s468_s19 + $0xc0] sm:$0xff] }
  0x19   : > { %318 = vst.msk [vmem:[%s496_s24 + $0x20] sm:$0xff] %vm313_vm0, %v285_v35  ;;  %319 = vst.msk [vmem:[%s496_s24 + $0x28] sm:$0xff] %vm313_vm0, %v286_v36  ;;  %v257_v48 = vadd.f32 %v473_v1, %v219_v40  ;;  %v258_v49 = vadd.f32 %v473_v1, %v220_v41  ;;  %v259_v50 = vadd.f32 %v473_v1, %v221_v42  ;;  %v198_v27 = vld [vmem:[%s468_s19 + $0xc8] sm:$0xff]  ;;  %v199_v28 = vld [vmem:[%s468_s19 + $0xd0] sm:$0xff] }
  0x1a   : > { %320 = vst.msk [vmem:[%s496_s24 + $0x30] sm:$0xff] %vm313_vm0, %v287_v39  ;;  %v225_v51 = vmul.f32 %v463_v0, %v187_v38  ;;  %321 = vst.msk [vmem:[%s496_s24 + $0x38] sm:$0xff] %vm313_vm0, %v288_v44  ;;  %v260_v52 = vadd.f32 %v473_v1, %v222_v45  ;;  %v261_v53 = vadd.f32 %v473_v1, %v223_v46  ;;  %v200_v33 = vld [vmem:[%s468_s19 + $0xd8] sm:$0xff]  ;;  %v201_v34 = vld [vmem:[%s468_s19 + $0xe0] sm:$0xff] }
  0x1b   : > { %v262_v54 = vadd.f32 %v473_v1, %v224_v47  ;;  %v226_v55 = vmul.f32 %v463_v0, %v188_v43  ;;  %v289_v59 = vmax.f32 %v257_v48, 0.0  ;;  %v290_v60 = vmax.f32 %v258_v49, 0.0  ;;  %v202_v35 = vld [vmem:[%s468_s19 + $0xe8] sm:$0xff]  ;;  %v203_v40 = vld [vmem:[%s468_s19 + $0xf0] sm:$0xff]  ;;  %v204_v45 = vld [vmem:[%s468_s19 + $0xf8] sm:$0xff] }
  0x1c   : > { %v291_v61 = vmax.f32 %v259_v50, 0.0  ;;  %v263_v62 = vadd.f32 %v473_v1, %v225_v51  ;;  %v292_v4 = vmax.f32 %v260_v52, 0.0  ;;  %v293_v5 = vmax.f32 %v261_v53, 0.0 }
  0x1d   : > { %v294_v6 = vmax.f32 %v262_v54, 0.0  ;;  %v264_v7 = vadd.f32 %v473_v1, %v226_v55  ;;  %322 = vst.msk [vmem:[%s496_s24 + $0x40] sm:$0xff] %vm313_vm0, %v289_v59  ;;  %323 = vst.msk [vmem:[%s496_s24 + $0x48] sm:$0xff] %vm313_vm0, %v290_v60  ;;  %v227_v10 = vmul.f32 %v463_v0, %v189_v56  ;;  %v228_v11 = vmul.f32 %v463_v0, %v190_v57 }
  0x1e   : > { %324 = vst.msk [vmem:[%s496_s24 + $0x50] sm:$0xff] %vm313_vm0, %v291_v61  ;;  %v295_v9 = vmax.f32 %v263_v62, 0.0  ;;  %v229_v12 = vmul.f32 %v463_v0, %v191_v58  ;;  %325 = vst.msk [vmem:[%s496_s24 + $0x58] sm:$0xff] %vm313_vm0, %v292_v4  ;;  %v230_v15 = vmul.f32 %v463_v0, %v192_v63  ;;  %v231_v16 = vmul.f32 %v463_v0, %v193_v2 }
  0x1f   : > { %326 = vst.msk [vmem:[%s496_s24 + $0x60] sm:$0xff] %vm313_vm0, %v293_v5  ;;  %327 = vst.msk [vmem:[%s496_s24 + $0x68] sm:$0xff] %vm313_vm0, %v294_v6  ;;  %v296_v14 = vmax.f32 %v264_v7, 0.0  ;;  %v232_v17 = vmul.f32 %v463_v0, %v194_v3  ;;  %v265_v18 = vadd.f32 %v473_v1, %v227_v10  ;;  %v266_v19 = vadd.f32 %v473_v1, %v228_v11 }
  0x20   : > { %328 = vst.msk [vmem:[%s496_s24 + $0x70] sm:$0xff] %vm313_vm0, %v295_v9  ;;  %v267_v20 = vadd.f32 %v473_v1, %v229_v12  ;;  %v233_v21 = vmul.f32 %v463_v0, %v195_v8  ;;  %v268_v22 = vadd.f32 %v473_v1, %v230_v15  ;;  %v269_v23 = vadd.f32 %v473_v1, %v231_v16 }
  0x21   : > { %329 = vst.msk [vmem:[%s496_s24 + $0x78] sm:$0xff] %vm313_vm0, %v296_v14  ;;  %v270_v24 = vadd.f32 %v473_v1, %v232_v17  ;;  %v234_v25 = vmul.f32 %v463_v0, %v196_v13  ;;  %v297_v29 = vmax.f32 %v265_v18, 0.0  ;;  %v298_v30 = vmax.f32 %v266_v19, 0.0 }
  0x22   : > { %v299_v31 = vmax.f32 %v267_v20, 0.0  ;;  %v271_v32 = vadd.f32 %v473_v1, %v233_v21  ;;  %v300_v36 = vmax.f32 %v268_v22, 0.0  ;;  %v301_v37 = vmax.f32 %v269_v23, 0.0 }
  0x23   : > { %v302_v38 = vmax.f32 %v270_v24, 0.0  ;;  %v272_v39 = vadd.f32 %v473_v1, %v234_v25  ;;  %330 = vst.msk [vmem:[%s496_s24 + $0x80] sm:$0xff] %vm313_vm0, %v297_v29  ;;  %331 = vst.msk [vmem:[%s496_s24 + $0x88] sm:$0xff] %vm313_vm0, %v298_v30  ;;  %v235_v42 = vmul.f32 %v463_v0, %v197_v26  ;;  %v236_v43 = vmul.f32 %v463_v0, %v198_v27 }
  0x24   : > { %332 = vst.msk [vmem:[%s496_s24 + $0x90] sm:$0xff] %vm313_vm0, %v299_v31  ;;  %v303_v41 = vmax.f32 %v271_v32, 0.0  ;;  %v237_v44 = vmul.f32 %v463_v0, %v199_v28  ;;  %333 = vst.msk [vmem:[%s496_s24 + $0x98] sm:$0xff] %vm313_vm0, %v300_v36  ;;  %v238_v47 = vmul.f32 %v463_v0, %v200_v33  ;;  %v239_v48 = vmul.f32 %v463_v0, %v201_v34 }
  0x25   : > { %334 = vst.msk [vmem:[%s496_s24 + $0xa0] sm:$0xff] %vm313_vm0, %v301_v37  ;;  %335 = vst.msk [vmem:[%s496_s24 + $0xa8] sm:$0xff] %vm313_vm0, %v302_v38  ;;  %v304_v46 = vmax.f32 %v272_v39, 0.0  ;;  %v240_v49 = vmul.f32 %v463_v0, %v202_v35  ;;  %v273_v50 = vadd.f32 %v473_v1, %v235_v42  ;;  %v274_v51 = vadd.f32 %v473_v1, %v236_v43 }
  0x26   : > { %336 = vst.msk [vmem:[%s496_s24 + $0xb0] sm:$0xff] %vm313_vm0, %v303_v41  ;;  %v275_v52 = vadd.f32 %v473_v1, %v237_v44  ;;  %v241_v53 = vmul.f32 %v463_v0, %v203_v40  ;;  %v276_v54 = vadd.f32 %v473_v1, %v238_v47  ;;  %v277_v55 = vadd.f32 %v473_v1, %v239_v48 }
  0x27   : > { %337 = vst.msk [vmem:[%s496_s24 + $0xb8] sm:$0xff] %vm313_vm0, %v304_v46  ;;  %v278_v56 = vadd.f32 %v473_v1, %v240_v49  ;;  %v242_v57 = vmul.f32 %v463_v0, %v204_v45  ;;  %v305_v58 = vmax.f32 %v273_v50, 0.0  ;;  %v306_v59 = vmax.f32 %v274_v51, 0.0 }
  0x28   : > { %v307_v60 = vmax.f32 %v275_v52, 0.0  ;;  %v279_v61 = vadd.f32 %v473_v1, %v241_v53  ;;  %v308_v62 = vmax.f32 %v276_v54, 0.0  ;;  %v309_v63 = vmax.f32 %v277_v55, 0.0 }
  0x29   : > { %v310_v2 = vmax.f32 %v278_v56, 0.0  ;;  %v280_v3 = vadd.f32 %v473_v1, %v242_v57  ;;  %338 = vst.msk [vmem:[%s496_s24 + $0xc0] sm:$0xff] %vm313_vm0, %v305_v58  ;;  %339 = vst.msk [vmem:[%s496_s24 + $0xc8] sm:$0xff] %vm313_vm0, %v306_v59 }
  0x2a   : > { %340 = vst.msk [vmem:[%s496_s24 + $0xd0] sm:$0xff] %vm313_vm0, %v307_v60  ;;  %v311_v4 = vmax.f32 %v279_v61, 0.0  ;;  %341 = vst.msk [vmem:[%s496_s24 + $0xd8] sm:$0xff] %vm313_vm0, %v308_v62 }
  0x2b   : > { %342 = vst.msk [vmem:[%s496_s24 + $0xe0] sm:$0xff] %vm313_vm0, %v309_v63  ;;  %343 = vst.msk [vmem:[%s496_s24 + $0xe8] sm:$0xff] %vm313_vm0, %v310_v2  ;;  %v312_v0 = vmax.f32 %v280_v3, 0.0 }
  0x2c   : > { %344 = vst.msk [vmem:[%s496_s24 + $0xf0] sm:$0xff] %vm313_vm0, %v311_v4 }
  0x2d   : > { %345 = vst.msk [vmem:[%s496_s24 + $0xf8] sm:$0xff] %vm313_vm0, %v312_v0 }
  0x2e PF: > { %s13_s12 = sadd.s32 1, %s430_s12  }
  0x2f   : > { %p10_p4 = scmp.ge.s32.totalorder %s13_s12, 4  }
  0x31   :  { %12 = sbr.rel (!%p10_p4) target bundleno = 1 (0x1), region = 62 }

// kernel: up_forward.6
= control target key start
LH: loop header
LB: loop body
LE: loop exit
PB: predicated region body
PF: predicated region fallthrough
CT: control target
= control target key end

     0   :  { %s5680_s21 = smov 0   ;;  %s6908_s0 = inlined_call_operand.vmem [shape: f32[2,16,16,8], index: 0, kind: input, shape index: {}]   ;;  %s6909_s1 = inlined_call_operand.vmem [shape: f32[1,8], index: 1, kind: input, shape index: {}]   ;;  %s6910_s2 = inlined_call_operand.vmem [shape: f32[1,8], index: 2, kind: input, shape index: {}]   ;;  %s6911_s3 = inlined_call_operand.vmem [shape: f32[9,8,8], index: 3, kind: input, shape index: {}]   ;;  %s6912_s4 = inlined_call_operand.vmem [shape: f32[1,8], index: 4, kind: input, shape index: {}]   ;;  %s6913_s5 = inlined_call_operand.vmem [shape: f32[2,16,16,8], index: 5, kind: output, shape index: {0}]   ;;  %s6914_s6 = inlined_call_operand.vmem [shape: f32[2,2,8], index: 6, kind: output, shape index: {1}]  }
   0x1 LB: > { %s4276_s22 = sadd.s32 4294967295, %s5642_s21   ;;  %p4280_p0 = scmp.ge.s32.totalorder %s5642_s21, 1  ;;  %s5642_s21 = sphi %s5680_s21, %s17_s21  }
   0x2   : > { %p215_p1 = scmp.lt.s32.totalorder %s5642_s21, 3 }
   0x4   : > { %p216_p2 = pnand %p4280_p0, %p215_p1 }
   0x6   : > { %219 = sbr.rel (%p216_p2) target bundleno = 570 (0x23a), region = 40 }
   0xd   : > { %v534_v0 = vld [vmem:[%s6911_s3] sm:$0xff]  ;;  %vm405_vm0 = vcmask 64512   ;;  %v5694_v1 = vld [vmem:[%s6911_s3 + $0x8] sm:$0xff]  ;;  %p5703_p3 = scmp.lt.s32.totalorder %s4276_s22, 1  ;;  %v5644_v3 = vmov 0.0   ;;  %vm408_vm1 = vcmask 58368  }
   0xe   : > { %v5699_v2 = vld [vmem:[%s6911_s3 + $0x20] sm:$0xff]  ;;  %4886 = vmatprep.subr.mxu1 %v534_v0  ;;  %406 = vst.msk [vmem:[#allocation2] sm:$0xff] %vm405_vm0, %v5644_v3  ;;  %407 = vst.msk [vmem:[#allocation2 + $0x8] sm:$0xff] %vm405_vm0, %v5644_v3  ;;  %v5747_v4 = vld [vmem:[%s6911_s3 + $0x28] sm:$0xff]  ;;  %vm4086_vm2 = vcmask 57344  }
   0xf   : > { %410 = vst.msk [vmem:[#allocation2 + $0x18] sm:$0xff] %vm405_vm0, %v5644_v3  ;;  %411 = vst.msk [vmem:[#allocation2 + $0x20] sm:$0xff] %vm405_vm0, %v5644_v3  ;;  %5086 = vmatprep.subr.mxu0 %v5699_v2  ;;  %4887 = vmatpush3.msra.mxu1 %v534_v0  ;;  %s7003_s22 = smov (!%p5703_p3, %s4276_s22), 1  ;;  %v5780_v5 = vld [vmem:[%s6909_s1] ss:$0 sm:$0xff]  ;;  %v5816_v27 = vld [vmem:[%s6911_s3 + $0x10] sm:$0xff] }
  0x10   : > { %413 = vst.msk [vmem:[#allocation2 + $0x30] sm:$0xff] %vm405_vm0, %v5644_v3  ;;  %414 = vst.msk [vmem:[#allocation2 + $0x38] sm:$0xff] %vm405_vm0, %v5644_v3  ;;  %5087 = vmatpush3.msra.mxu0 %v5699_v2  ;;  %4936 = vmatprep.subr.mxu1 %v5694_v1  ;;  %s4587_s8 = sshll.u32 %s7003_s22, 8  ;;  %v5792_v6 = vld [vmem:[%s6910_s2] ss:$0 sm:$0xff] }
  0x11   : > { %416 = vst.msk [vmem:[#allocation2 + $0x48] sm:$0xff] %vm405_vm0, %v5644_v3  ;;  %417 = vst.msk [vmem:[#allocation2 + $0x50] sm:$0xff] %vm405_vm0, %v5644_v3  ;;  %5136 = vmatprep.subr.mxu0 %v5747_v4  ;;  %s5787_s13 = scalar_lea.vmem %s6908_s0, %s4587_s8  ;;  %s6733_s11 = scalar_lea.vmem %s6913_s5, %s4587_s8 }
  0x12   : > { %419 = vst.msk [vmem:[#allocation2 + $0x60] sm:$0xff] %vm405_vm0, %v5644_v3  ;;  %420 = vst.msk [vmem:[#allocation2 + $0x68] sm:$0xff] %vm405_vm0, %v5644_v3  ;;  %v265_v7 = vld [vmem:[%s5787_s13] sm:$0xff]  ;;  %v266_v8 = vld [vmem:[%s5787_s13 + $0x8] sm:$0xff]  ;;  %s4285_s8 = sshll.u32 %s7003_s22, 1 }
  0x13   : > { %422 = vst.msk [vmem:[#allocation2 + $0x78] sm:$0xff] %vm405_vm0, %v5644_v3  ;;  %423 = vst.msk [vmem:[#allocation2 + $0x80] sm:$0xff] %vm405_vm0, %v5644_v3  ;;  %v267_v9 = vld [vmem:[%s5787_s13 + $0x10] sm:$0xff]  ;;  %v303_v10 = vmul.f32 %v5780_v5, %v265_v7  ;;  %v304_v11 = vmul.f32 %v5780_v5, %v266_v8  ;;  %v268_v13 = vld [vmem:[%s5787_s13 + $0x18] sm:$0xff]  ;;  %s262_s14 = scalar_lea.vmem %s6914_s6, %s4285_s8 }
  0x14   : > { %425 = vst.msk [vmem:[#allocation2 + $0x90] sm:$0xff] %vm405_vm0, %v5644_v3  ;;  %426 = vst.msk [vmem:[#allocation2 + $0x98] sm:$0xff] %vm405_vm0, %v5644_v3  ;;  %v305_v12 = vmul.f32 %v5780_v5, %v267_v9  ;;  %v269_v14 = vld [vmem:[%s5787_s13 + $0x20] sm:$0xff]  ;;  %v270_v15 = vld [vmem:[%s5787_s13 + $0x28] sm:$0xff]  ;;  %v306_v18 = vmul.f32 %v5780_v5, %v268_v13 }
  0x15   : > { %428 = vst.msk [vmem:[#allocation2 + $0xa8] sm:$0xff] %vm405_vm0, %v5644_v3  ;;  %429 = vst.msk [vmem:[#allocation2 + $0xb0] sm:$0xff] %vm405_vm0, %v5644_v3  ;;  %v502_v16 = vld [vmem:[#allocation2] sm:$0xff]  ;;  %v503_v17 = vld [vmem:[#allocation2 + $0x8] sm:$0xff]  ;;  %v307_v19 = vmul.f32 %v5780_v5, %v269_v14  ;;  %v308_v20 = vmul.f32 %v5780_v5, %v270_v15  ;;  %v341_v22 = vadd.f32 %v5792_v6, %v303_v10 }
  0x16   : > { %431 = vst.msk [vmem:[#allocation2 + $0xc0] sm:$0xff] %vm405_vm0, %v5644_v3  ;;  %432 = vst.msk [vmem:[#allocation2 + $0xc8] sm:$0xff] %vm405_vm0, %v5644_v3  ;;  %v271_v21 = vld [vmem:[%s5787_s13 + $0x30] sm:$0xff]  ;;  %4888 = vmatprep.mubr.msk.f32.mxu1 %vm405_vm0, %v502_v16  ;;  %v342_v23 = vadd.f32 %v5792_v6, %v304_v11  ;;  %v343_v24 = vadd.f32 %v5792_v6, %v305_v12  ;;  %v272_v26 = vld [vmem:[%s5787_s13 + $0x38] sm:$0xff]  ;;  %v344_v28 = vadd.f32 %v5792_v6, %v306_v18 }
  0x17   : > { %434 = vst.msk [vmem:[#allocation2 + $0xd8] sm:$0xff] %vm405_vm0, %v5644_v3  ;;  %435 = vst.msk [vmem:[#allocation2 + $0xe0] sm:$0xff] %vm405_vm0, %v5644_v3  ;;  %v309_v25 = vmul.f32 %v5780_v5, %v271_v21  ;;  %4889 = vmatmul.mubr.msk.f32.vlgmr.msra.gmra.mrb[0].mxu1 %vm405_vm0, %v503_v17  ;;  %v345_v29 = vadd.f32 %v5792_v6, %v307_v19  ;;  %v346_v30 = vadd.f32 %v5792_v6, %v308_v20  ;;  %v273_v32 = vld [vmem:[%s5787_s13 + $0x40] sm:$0xff]  ;;  %v274_v33 = vld [vmem:[%s5787_s13 + $0x48] sm:$0xff] }
  0x18   : > { %437 = vst.msk [vmem:[#allocation2 + $0xf0] sm:$0xff] %vm405_vm0, %v5644_v3  ;;  %438 = vst.msk [vmem:[#allocation2 + $0xf8] sm:$0xff] %vm405_vm0, %v5644_v3  ;;  %v310_v31 = vmul.f32 %v5780_v5, %v272_v26  ;;  %v275_v34 = vld [vmem:[%s5787_s13 + $0x50] sm:$0xff]  ;;  %4937 = vmatpush3.msra.mxu1 %v5694_v1  ;;  %v373_v35 = vmax.f32 %v341_v22, 0.0  ;;  %v374_v36 = vmax.f32 %v342_v23, 0.0  ;;  %v375_v37 = vmax.f32 %v343_v24, 0.0 }
  0x19   : > { %440 = vst.msk [vmem:[#allocation2 + $0x108] sm:$0xff] %vm405_vm0, %v5644_v3  ;;  %441 = vst.msk [vmem:[#allocation2 + $0x110] sm:$0xff] %vm405_vm0, %v5644_v3  ;;  %v347_v38 = vadd.f32 %v5792_v6, %v309_v25  ;;  %v276_v39 = vld [vmem:[%s5787_s13 + $0x58] sm:$0xff]  ;;  %v277_v40 = vld [vmem:[%s5787_s13 + $0x60] sm:$0xff]  ;;  %v376_v42 = vmax.f32 %v344_v28, 0.0  ;;  %v377_v43 = vmax.f32 %v345_v29, 0.0  ;;  %4986 = vmatprep.subr.mxu1 %v5816_v27  ;;  %v311_v48 = vmul.f32 %v5780_v5, %v273_v32 }
  0x1a   : > { %443 = vst.msk [vmem:[#allocation2 + $0x120] sm:$0xff] %vm405_vm0, %v5644_v3  ;;  %444 = vst.msk [vmem:[#allocation2 + $0x128] sm:$0xff] %vm405_vm0, %v5644_v3  ;;  %v278_v41 = vld [vmem:[%s5787_s13 + $0x68] sm:$0xff]  ;;  %v378_v44 = vmax.f32 %v346_v30, 0.0  ;;  %v348_v45 = vadd.f32 %v5792_v6, %v310_v31  ;;  %v279_v46 = vld [vmem:[%s5787_s13 + $0x70] sm:$0xff]  ;;  %v312_v49 = vmul.f32 %v5780_v5, %v274_v33  ;;  %v313_v50 = vmul.f32 %v5780_v5, %v275_v34 }
  0x1b   : > { %446 = vst.msk [vmem:[#allocation2 + $0x138] sm:$0xff] %vm405_vm0, %v5644_v3  ;;  %447 = vst.msk [vmem:[#allocation2 + $0x140] sm:$0xff] %vm405_vm0, %v5644_v3  ;;  %v379_v47 = vmax.f32 %v347_v38, 0.0  ;;  %v280_v51 = vld [vmem:[%s5787_s13 + $0x78] sm:$0xff]  ;;  %v314_v53 = vmul.f32 %v5780_v5, %v276_v39  ;;  %v315_v54 = vmul.f32 %v5780_v5, %v277_v40  ;;  %v316_v55 = vmul.f32 %v5780_v5, %v278_v41  ;;  %v281_v0 = vld [vmem:[%s5787_s13 + $0x80] sm:$0xff] }
  0x1c   : > { %449 = vst.msk [vmem:[#allocation2 + $0x150] sm:$0xff] %vm405_vm0, %v5644_v3  ;;  %450 = vst.msk [vmem:[#allocation2 + $0x158] sm:$0xff] %vm405_vm0, %v5644_v3  ;;  %v380_v52 = vmax.f32 %v348_v45, 0.0  ;;  %v349_v56 = vadd.f32 %v5792_v6, %v311_v48  ;;  %v350_v57 = vadd.f32 %v5792_v6, %v312_v49  ;;  %v351_v58 = vadd.f32 %v5792_v6, %v313_v50  ;;  %v282_v1 = vld [vmem:[%s5787_s13 + $0x88] sm:$0xff]  ;;  %v284_v11 = vld [vmem:[%s5787_s13 + $0x98] sm:$0xff] }
  0x1d   : > { %452 = vst.msk [vmem:[#allocation2 + $0x168] sm:$0xff] %vm405_vm0, %v5644_v3  ;;  %453 = vst.msk [vmem:[#allocation2 + $0x170] sm:$0xff] %vm405_vm0, %v5644_v3  ;;  %v317_v59 = vmul.f32 %v5780_v5, %v279_v46  ;;  %v352_v60 = vadd.f32 %v5792_v6, %v314_v53  ;;  %v353_v61 = vadd.f32 %v5792_v6, %v315_v54  ;;  %v285_v12 = vld [vmem:[%s5787_s13 + $0xa0] sm:$0xff]  ;;  %v286_v13 = vld [vmem:[%s5787_s13 + $0xa8] sm:$0xff] }
  0x1e   : > { %455 = vst.msk [vmem:[#allocation2 + $0x180] sm:$0xff] %vm405_vm0, %v5644_v3  ;;  %456 = vst.msk [vmem:[#allocation2 + $0x188] sm:$0xff] %vm405_vm0, %v5644_v3  ;;  %v354_v62 = vadd.f32 %v5792_v6, %v316_v55  ;;  %v318_v63 = vmul.f32 %v5780_v5, %v280_v51  ;;  %v381_v7 = vmax.f32 %v349_v56, 0.0  ;;  %v382_v8 = vmax.f32 %v350_v57, 0.0  ;;  %v5872_v20 = vld [vmem:[%s6911_s3 + $0x30] sm:$0xff]  ;;  %v288_v24 = vld [vmem:[%s5787_s13 + $0xb8] sm:$0xff] }
  0x1f   : > { %458 = vst.msk [vmem:[#allocation2 + $0x198] sm:$0xff] %vm405_vm0, %v5644_v3  ;;  %459 = vst.msk [vmem:[#allocation2 + $0x1a0] sm:$0xff] %vm405_vm0, %v5644_v3  ;;  %v383_v9 = vmax.f32 %v351_v58, 0.0  ;;  %v355_v10 = vadd.f32 %v5792_v6, %v317_v59  ;;  %v384_v14 = vmax.f32 %v352_v60, 0.0  ;;  %v385_v15 = vmax.f32 %v353_v61, 0.0  ;;  %v287_v23 = vld [vmem:[%s5787_s13 + $0xb0] sm:$0xff] }
  0x20   : > { %412 = vst.msk [vmem:[#allocation2 + $0x28] sm:$0x3] %vm408_vm1, %v5644_v3  ;;  %409 = vst.msk [vmem:[#allocation2 + $0x10] sm:$0x3] %vm408_vm1, %v5644_v3  ;;  %v386_v16 = vmax.f32 %v354_v62, 0.0  ;;  %v356_v17 = vadd.f32 %v5792_v6, %v318_v63  ;;  %v319_v19 = vmul.f32 %v5780_v5, %v281_v0  ;;  %v320_v21 = vmul.f32 %v5780_v5, %v282_v1  ;;  %v289_v33 = vld [vmem:[%s5787_s13 + $0xc0] sm:$0xff] }
  0x21   : > { %415 = vst.msk [vmem:[#allocation2 + $0x40] sm:$0x3] %vm408_vm1, %v5644_v3  ;;  %418 = vst.msk [vmem:[#allocation2 + $0x58] sm:$0x3] %vm408_vm1, %v5644_v3  ;;  %v387_v18 = vmax.f32 %v355_v10, 0.0  ;;  %v322_v30 = vmul.f32 %v5780_v5, %v284_v11  ;;  %v323_v31 = vmul.f32 %v5780_v5, %v285_v12  ;;  %v324_v32 = vmul.f32 %v5780_v5, %v286_v13  ;;  %v292_v45 = vld [vmem:[%s5787_s13 + $0xd8] sm:$0xff] }
  0x22   : > { %421 = vst.msk [vmem:[#allocation2 + $0x70] sm:$0x3] %vm408_vm1, %v5644_v3  ;;  %424 = vst.msk [vmem:[#allocation2 + $0x88] sm:$0x3] %vm408_vm1, %v5644_v3  ;;  %v388_v29 = vmax.f32 %v356_v17, 0.0  ;;  %v358_v38 = vadd.f32 %v5792_v6, %v320_v21  ;;  %v325_v51 = vmul.f32 %v5780_v5, %v287_v23  ;;  %v326_v57 = vmul.f32 %v5780_v5, %v288_v24  ;;  %v294_v62 = vld [vmem:[%s5787_s13 + $0xe8] sm:$0xff] }
  0x23   : > { %427 = vst.msk [vmem:[#allocation2 + $0xa0] sm:$0x3] %vm408_vm1, %v5644_v3  ;;  %430 = vst.msk [vmem:[#allocation2 + $0xb8] sm:$0x3] %vm408_vm1, %v5644_v3  ;;  %v360_v40 = vadd.f32 %v5792_v6, %v322_v30  ;;  %v361_v41 = vadd.f32 %v5792_v6, %v323_v31  ;;  %v327_v59 = vmul.f32 %v5780_v5, %v289_v33  ;;  %v296_v13 = vld [vmem:[%s5787_s13 + $0xf8] sm:$0xff] }
  0x24   : > { %433 = vst.msk [vmem:[#allocation2 + $0xd0] sm:$0x3] %vm408_vm1, %v5644_v3  ;;  %436 = vst.msk [vmem:[#allocation2 + $0xe8] sm:$0x3] %vm408_vm1, %v5644_v3  ;;  %v390_v49 = vmax.f32 %v358_v38, 0.0  ;;  %v363_v58 = vadd.f32 %v5792_v6, %v325_v51  ;;  %v364_v63 = vadd.f32 %v5792_v6, %v326_v57  ;;  %v330_v0 = vmul.f32 %v5780_v5, %v292_v45 }
  0x25   : > { %439 = vst.msk [vmem:[#allocation2 + $0x100] sm:$0x3] %vm408_vm1, %v5644_v3  ;;  %442 = vst.msk [vmem:[#allocation2 + $0x118] sm:$0x3] %vm408_vm1, %v5644_v3  ;;  %v392_v54 = vmax.f32 %v360_v40, 0.0  ;;  %v393_v55 = vmax.f32 %v361_v41, 0.0  ;;  %v365_v10 = vadd.f32 %v5792_v6, %v327_v59  ;;  %v334_v30 = vmul.f32 %v5780_v5, %v296_v13 }
  0x26   : > { %445 = vst.msk [vmem:[#allocation2 + $0x130] sm:$0x3] %vm408_vm1, %v5644_v3  ;;  %448 = vst.msk [vmem:[#allocation2 + $0x148] sm:$0x3] %vm408_vm1, %v5644_v3  ;;  %v368_v17 = vadd.f32 %v5792_v6, %v330_v0  ;;  %v6079_v0 = vld [vmem:[%s6911_s3 + $0x38] sm:$0xff] }
  0x27   : > { %451 = vst.msk [vmem:[#allocation2 + $0x160] sm:$0x3] %vm408_vm1, %v5644_v3  ;;  %454 = vst.msk [vmem:[#allocation2 + $0x178] sm:$0x3] %vm408_vm1, %v5644_v3  ;;  %v397_v21 = vmax.f32 %v365_v10, 0.0 }
  0x28   : > { %457 = vst.msk [vmem:[#allocation2 + $0x190] sm:$0x3] %vm408_vm1, %v5644_v3  ;;  %460 = vst.msk [vmem:[#allocation2 + $0x1a8] sm:$0x3] %vm408_vm1, %v5644_v3  ;;  %v283_v3 = vld [vmem:[%s5787_s13 + $0x90] sm:$0xff] }
  0x29   : > { %462 = vst.msk [vmem:[#allocation2 + $0x19] sm:$0xff] %vm405_vm0, %v373_v35  ;;  %463 = vst.msk [vmem:[#allocation2 + $0x21] sm:$0xff] %vm405_vm0, %v374_v36  ;;  %v321_v22 = vmul.f32 %v5780_v5, %v283_v3  ;;  %v295_v3 = vld [vmem:[%s5787_s13 + $0xf0] sm:$0xff] }
  0x2a   : > { %464 = vst.msk [vmem:[#allocation2 + $0x31] sm:$0xff] %vm405_vm0, %v375_v37  ;;  %465 = vst.msk [vmem:[#allocation2 + $0x39] sm:$0xff] %vm405_vm0, %v376_v42  ;;  %v357_v37 = vadd.f32 %v5792_v6, %v319_v19  ;;  %v362_v42 = vadd.f32 %v5792_v6, %v324_v32  ;;  %v332_v19 = vmul.f32 %v5780_v5, %v294_v62 }
  0x2b   : > { %466 = vst.msk [vmem:[#allocation2 + $0x49] sm:$0xff] %vm405_vm0, %v377_v43  ;;  %467 = vst.msk [vmem:[#allocation2 + $0x51] sm:$0xff] %vm405_vm0, %v378_v44  ;;  %v359_v39 = vadd.f32 %v5792_v6, %v321_v22  ;;  %v290_v43 = vld [vmem:[%s5787_s13 + $0xc8] sm:$0xff]  ;;  %v291_v44 = vld [vmem:[%s5787_s13 + $0xd0] sm:$0xff]  ;;  %v333_v24 = vmul.f32 %v5780_v5, %v295_v3 }
  0x2c   : > { %468 = vst.msk [vmem:[#allocation2 + $0x61] sm:$0xff] %vm405_vm0, %v379_v47  ;;  %469 = vst.msk [vmem:[#allocation2 + $0x69] sm:$0xff] %vm405_vm0, %v380_v52  ;;  %v389_v48 = vmax.f32 %v357_v37, 0.0  ;;  %v293_v52 = vld [vmem:[%s5787_s13 + $0xe0] sm:$0xff]  ;;  %v394_v56 = vmax.f32 %v362_v42, 0.0  ;;  %v328_v60 = vmul.f32 %v5780_v5, %v290_v43  ;;  %v329_v61 = vmul.f32 %v5780_v5, %v291_v44 }
  0x2d   : > { %470 = vst.msk [vmem:[#allocation2 + $0x79] sm:$0xff] %vm405_vm0, %v381_v7  ;;  %471 = vst.msk [vmem:[#allocation2 + $0x81] sm:$0xff] %vm405_vm0, %v382_v8  ;;  %v391_v50 = vmax.f32 %v359_v39, 0.0  ;;  %v331_v1 = vmul.f32 %v5780_v5, %v293_v52  ;;  %v371_v33 = vadd.f32 %v5792_v6, %v333_v24  ;;  %v372_v39 = vadd.f32 %v5792_v6, %v334_v30 }
  0x2e   : > { %472 = vst.msk [vmem:[#allocation2 + $0x91] sm:$0xff] %vm405_vm0, %v383_v9  ;;  %473 = vst.msk [vmem:[#allocation2 + $0x99] sm:$0xff] %vm405_vm0, %v384_v14  ;;  %v395_v9 = vmax.f32 %v363_v58, 0.0  ;;  %v366_v11 = vadd.f32 %v5792_v6, %v328_v60  ;;  %v367_v12 = vadd.f32 %v5792_v6, %v329_v61 }
  0x2f   : > { %474 = vst.msk [vmem:[#allocation2 + $0xa9] sm:$0xff] %vm405_vm0, %v385_v15  ;;  %475 = vst.msk [vmem:[#allocation2 + $0xb1] sm:$0xff] %vm405_vm0, %v386_v16  ;;  %v396_v16 = vmax.f32 %v364_v63, 0.0  ;;  %v403_v40 = vmax.f32 %v371_v33, 0.0  ;;  %v404_v41 = vmax.f32 %v372_v39, 0.0  ;;  %v888_v39 = vld [vmem:[#allocation2 + $0x1] sm:$0xff] }
  0x30   : > { %v504_v25 = vld [vmem:[#allocation2 + $0x18] sm:$0xff]  ;;  %v505_v28 = vld [vmem:[#allocation2 + $0x20] sm:$0xff]  ;;  %476 = vst.msk [vmem:[#allocation2 + $0xc1] sm:$0xff] %vm405_vm0, %v387_v18  ;;  %477 = vst.msk [vmem:[#allocation2 + $0xc9] sm:$0xff] %vm405_vm0, %v388_v29  ;;  %v369_v18 = vadd.f32 %v5792_v6, %v331_v1  ;;  %v398_v22 = vmax.f32 %v366_v11, 0.0  ;;  %v399_v23 = vmax.f32 %v367_v12, 0.0  ;;  %v370_v29 = vadd.f32 %v5792_v6, %v332_v19 }
  0x31   : > { %v5878_v26 = vld [vmem:[#allocation2 + $0x19] sm:$0xff]  ;;  %4891 = vmatprep.mubr.msk.f32.mxu1 %vm405_vm0, %v504_v25  ;;  %v5890_v34 = vld [vmem:[#allocation2 + $0x21] sm:$0xff]  ;;  %v5892_v35 = vld [vmem:[#allocation2 + $0x30] sm:$0xff]  ;;  %478 = vst.msk [vmem:[#allocation2 + $0xd9] sm:$0xff] %vm405_vm0, %v389_v48  ;;  %v400_v25 = vmax.f32 %v368_v17, 0.0 }
  0x32   : > { %5088 = vmatprep.mubr.msk.f32.mxu0 %vm405_vm0, %v5878_v26  ;;  %v5894_v36 = vld [vmem:[#allocation2 + $0x31] sm:$0xff]  ;;  %4892 = vmatmul.mubr.msk.f32.gmra.mrb[2].mxu1 %vm405_vm0, %v505_v28  ;;  %v5915_v47 = vld [vmem:[#allocation2 + $0x39] sm:$0xff]  ;;  %v5921_v53 = vld [vmem:[#allocation2 + $0x48] sm:$0xff]  ;;  %479 = vst.msk [vmem:[#allocation2 + $0xe1] sm:$0xff] %vm405_vm0, %v390_v49  ;;  %v401_v28 = vmax.f32 %v369_v18, 0.0  ;;  %v402_v38 = vmax.f32 %v370_v29, 0.0 }
  0x33   : > { %5089 = vmatmul.mubr.msk.f32.vlgmr.msra.gmra.mrb[0].mxu0 %vm405_vm0, %v5890_v34  ;;  %4894 = vmatprep.mubr.msk.f32.mxu1 %vm405_vm0, %v5892_v35  ;;  %v5913_v46 = vld [vmem:[#allocation2 + $0x38] sm:$0xff]  ;;  %480 = vst.msk [vmem:[#allocation2 + $0xf1] sm:$0xff] %vm405_vm0, %v391_v50  ;;  %481 = vst.msk [vmem:[#allocation2 + $0xf9] sm:$0xff] %vm405_vm0, %v392_v54  ;;  %v5950_v7 = vld [vmem:[#allocation2 + $0x50] sm:$0xff] }
  0x34   : > { %5137 = vmatpush3.msra.mxu0 %v5747_v4  ;;  %5091 = vmatprep.mubr.msk.f32.mxu0 %vm405_vm0, %v5894_v36  ;;  %v5923_v4 = vld [vmem:[#allocation2 + $0x49] sm:$0xff]  ;;  %482 = vst.msk [vmem:[#allocation2 + $0x109] sm:$0xff] %vm405_vm0, %v393_v55  ;;  %483 = vst.msk [vmem:[#allocation2 + $0x111] sm:$0xff] %vm405_vm0, %v394_v56  ;;  %v5952_v8 = vld [vmem:[#allocation2 + $0x51] sm:$0xff] }
  0x35   : > { %6952 = vst [vmem:[#allocation3_spill] sm:$0xff] %v5923_v4  ;;  %5186 = vmatprep.subr.mxu0 %v5872_v20  ;;  %v5958_v14 = vld [vmem:[#allocation2 + $0x60] sm:$0xff]  ;;  %484 = vst.msk [vmem:[#allocation2 + $0x121] sm:$0xff] %vm405_vm0, %v395_v9  ;;  %v5978_v31 = vld [vmem:[#allocation2 + $0x68] sm:$0xff] }
  0x36   : > { %4895 = vmatmul.mubr.msk.f32.gmra.mrb[4].mxu1 %vm405_vm0, %v5913_v46  ;;  %v5960_v15 = vld [vmem:[#allocation2 + $0x61] sm:$0xff]  ;;  %485 = vst.msk [vmem:[#allocation2 + $0x129] sm:$0xff] %vm405_vm0, %v396_v16  ;;  %v5980_v32 = vld [vmem:[#allocation2 + $0x69] sm:$0xff]  ;;  %486 = vst.msk [vmem:[#allocation2 + $0x139] sm:$0xff] %vm405_vm0, %v397_v21 }
  0x37   : > { %5092 = vmatmul.mubr.msk.f32.gmra.mrb[2].mxu0 %vm405_vm0, %v5915_v47  ;;  %4897 = vmatprep.mubr.msk.f32.mxu1 %vm405_vm0, %v5921_v53  ;;  %6953 = vst [vmem:[#allocation4_spill] sm:$0xff] %v5960_v15  ;;  %487 = vst.msk [vmem:[#allocation2 + $0x141] sm:$0xff] %vm405_vm0, %v398_v22  ;;  %v5986_v37 = vld [vmem:[#allocation2 + $0x78] sm:$0xff]  ;;  %v6002_v42 = vld [vmem:[#allocation2 + $0x80] sm:$0xff] }
  0x38   : > { %5094 = vmatprep.mubr.msk.f32.mxu0 %vm405_vm0, %v5923_v4  ;;  %488 = vst.msk [vmem:[#allocation2 + $0x151] sm:$0xff] %vm405_vm0, %v399_v23  ;;  %v5988_v5 = vld [vmem:[#allocation2 + $0x79] sm:$0xff]  ;;  %489 = vst.msk [vmem:[#allocation2 + $0x159] sm:$0xff] %vm405_vm0, %v400_v25  ;;  %v6004_v43 = vld [vmem:[#allocation2 + $0x81] sm:$0xff] }
  0x39   : > { %6954 = vst [vmem:[#allocation5_spill] sm:$0xff] %v5988_v5  ;;  %490 = vst.msk [vmem:[#allocation2 + $0x169] sm:$0xff] %vm405_vm0, %v401_v28  ;;  %v6007_v6 = vld [vmem:[#allocation2 + $0x90] sm:$0xff]  ;;  %v6020_v45 = vld [vmem:[#allocation2 + $0x98] sm:$0xff] }
  0x3a   : > { %4898 = vmatmul.mubr.msk.f32.gmra.mrb[6].mxu1 %vm405_vm0, %v5950_v7  ;;  %491 = vst.msk [vmem:[#allocation2 + $0x171] sm:$0xff] %vm405_vm0, %v402_v38  ;;  %6955 = vst [vmem:[#allocation6_spill] sm:$0xff] %v6002_v42  ;;  %v6009_v44 = vld [vmem:[#allocation2 + $0x91] sm:$0xff]  ;;  %v6022_v48 = vld [vmem:[#allocation2 + $0x99] sm:$0xff] }
  0x3b   : > { %5095 = vmatmul.mubr.msk.f32.gmra.mrb[4].mxu0 %vm405_vm0, %v5952_v8  ;;  %4900 = vmatprep.mubr.msk.f32.mxu1 %vm405_vm0, %v5958_v14  ;;  %492 = vst.msk [vmem:[#allocation2 + $0x181] sm:$0xff] %vm405_vm0, %v403_v40  ;;  %6956 = vst [vmem:[#allocation7_spill] sm:$0xff] %v6009_v44  ;;  %v6024_v49 = vld [vmem:[#allocation2 + $0xa8] sm:$0xff]  ;;  %v6036_v51 = vld [vmem:[#allocation2 + $0xb0] sm:$0xff] }
  0x3c   : > { %5097 = vmatprep.mubr.msk.f32.mxu0 %vm405_vm0, %v5960_v15  ;;  %493 = vst.msk [vmem:[#allocation2 + $0x189] sm:$0xff] %vm405_vm0, %v404_v41  ;;  %6957 = vst [vmem:[#allocation8_spill] sm:$0xff] %v6020_v45  ;;  %v6026_v50 = vld [vmem:[#allocation2 + $0xa9] sm:$0xff]  ;;  %v6038_v52 = vld [vmem:[#allocation2 + $0xb1] sm:$0xff] }
  0x3d   : > { %6958 = vst [vmem:[#allocation9_spill] sm:$0xff] %v6026_v50  ;;  %6959 = vst [vmem:[#allocation10_spill] sm:$0xff] %v6036_v51  ;;  %v6040_v54 = vld [vmem:[#allocation2 + $0xc0] sm:$0xff]  ;;  %v6052_v56 = vld [vmem:[#allocation2 + $0xc8] sm:$0xff] }
  0x3e   : > { %4901 = vmatmul.mubr.msk.f32.gmra.mrb[8].mxu1 %vm405_vm0, %v5978_v31  ;;  %v6042_v55 = vld [vmem:[#allocation2 + $0xc1] sm:$0xff]  ;;  %v6054_v57 = vld [vmem:[#allocation2 + $0xc9] sm:$0xff]  ;;  %v6056_v58 = vld [vmem:[#allocation2 + $0xd8] sm:$0xff] }
  0x3f   : > { %5098 = vmatmul.mubr.msk.f32.gmra.mrb[6].mxu0 %vm405_vm0, %v5980_v32  ;;  %4903 = vmatprep.mubr.msk.f32.mxu1 %vm405_vm0, %v5986_v37  ;;  %6960 = vst [vmem:[#allocation11_spill] sm:$0xff] %v6042_v55  ;;  %v6058_v59 = vld [vmem:[#allocation2 + $0x1a] sm:$0xff]  ;;  %v6070_v61 = vld [vmem:[#allocation2 + $0x22] sm:$0xff]  ;;  %v6072_v62 = vld [vmem:[#allocation2 + $0xf0] sm:$0xff] }
  0x40   : > { %5100 = vmatprep.mubr.msk.f32.mxu0 %vm405_vm0, %v5988_v5  ;;  %v6068_v60 = vld [vmem:[#allocation2 + $0xe0] sm:$0xff]  ;;  %v6074_v63 = vld [vmem:[#allocation2 + $0x32] sm:$0xff]  ;;  %v6094_v9 = vld [vmem:[#allocation2 + $0x108] sm:$0xff] }
  0x41   : > { %v6088_v1 = vld [vmem:[#allocation2 + $0xf8] sm:$0xff]  ;;  %v6096_v10 = vld [vmem:[#allocation2 + $0x4a] sm:$0xff]  ;;  %v6111_v12 = vld [vmem:[#allocation2 + $0x120] sm:$0xff] }
  0x42   : > { %4904 = vmatmul.mubr.msk.f32.gmra.mrb[10].mxu1 %vm405_vm0, %v6002_v42  ;;  %v6090_v3 = vld [vmem:[#allocation2 + $0x3a] sm:$0xff]  ;;  %v6109_v11 = vld [vmem:[#allocation2 + $0x52] sm:$0xff]  ;;  %v6113_v13 = vld [vmem:[#allocation2 + $0x62] sm:$0xff] }
  0x43   : > { %5101 = vmatmul.mubr.msk.f32.gmra.mrb[8].mxu0 %vm405_vm0, %v6004_v43  ;;  %4906 = vmatprep.mubr.msk.f32.mxu1 %vm405_vm0, %v6007_v6  ;;  %v6123_v16 = vld [vmem:[#allocation2 + $0x128] sm:$0xff]  ;;  %v6127_v18 = vld [vmem:[#allocation2 + $0x138] sm:$0xff]  ;;  %v6139_v21 = vld [vmem:[#allocation2 + $0x140] sm:$0xff] }
  0x44   : > { %5103 = vmatprep.mubr.msk.f32.mxu0 %vm405_vm0, %v6009_v44  ;;  %v6125_v17 = vld [vmem:[#allocation2 + $0x6a] sm:$0xff]  ;;  %v6129_v19 = vld [vmem:[#allocation2 + $0x7a] sm:$0xff]  ;;  %v6141_v22 = vld [vmem:[#allocation2 + $0x82] sm:$0xff] }
  0x45   : > { %v6143_v23 = vld [vmem:[#allocation2 + $0x150] sm:$0xff]  ;;  %v6155_v25 = vld [vmem:[#allocation2 + $0x158] sm:$0xff]  ;;  %v6159_v29 = vld [vmem:[#allocation2 + $0x168] sm:$0xff] }
  0x46   : > { %4907 = vmatmul.mubr.msk.f32.gmra.mrb[12].mxu1 %vm405_vm0, %v6020_v45  ;;  %v6145_v24 = vld [vmem:[#allocation2 + $0x92] sm:$0xff]  ;;  %v6157_v28 = vld [vmem:[#allocation2 + $0x9a] sm:$0xff]  ;;  %6962 = vst [vmem:[#allocation13_spill] sm:$0xff] %v6159_v29  ;;  %v6161_v30 = vld [vmem:[#allocation2 + $0xaa] sm:$0xff] }
  0x47   : > { %5104 = vmatmul.mubr.msk.f32.gmra.mrb[10].mxu0 %vm405_vm0, %v6022_v48  ;;  %4909 = vmatprep.mubr.msk.f32.mxu1 %vm405_vm0, %v6024_v49  ;;  %6961 = vst [vmem:[#allocation12_spill] sm:$0xff] %v6157_v28  ;;  %6963 = vst [vmem:[#allocation14_spill] sm:$0xff] %v6161_v30  ;;  %v6171_v33 = vld [vmem:[#allocation2 + $0x170] sm:$0xff]  ;;  %v6175_v40 = vld [vmem:[#allocation2 + $0xc2] sm:$0xff] }
  0x48   : > { %5106 = vmatprep.mubr.msk.f32.mxu0 %vm405_vm0, %v6026_v50  ;;  %6964 = vst [vmem:[#allocation15_spill] sm:$0xff] %v6171_v33  ;;  %v6173_v38 = vld [vmem:[#allocation2 + $0xb2] sm:$0xff]  ;;  %6965 = vst [vmem:[#allocation16_spill] sm:$0xff] %v6175_v40  ;;  %v889_v41 = vld [vmem:[#allocation2 + $0x9] sm:$0xff] }
  0x4a   : > { %4910 = vmatmul.mubr.msk.f32.gmra.mrb[14].mxu1 %vm405_vm0, %v6036_v51 }
  0x4b   : > { %5107 = vmatmul.mubr.msk.f32.gmra.mrb[12].mxu0 %vm405_vm0, %v6038_v52  ;;  %4912 = vmatprep.mubr.msk.f32.mxu1 %vm405_vm0, %v6040_v54 }
  0x4c   : > { %5109 = vmatprep.mubr.msk.f32.mxu0 %vm405_vm0, %v6042_v55 }
  0x4e   : > { %4913 = vmatmul.mubr.msk.f32.gmra.mrb[16].mxu1 %vm405_vm0, %v6052_v56 }
  0x4f   : > { %5110 = vmatmul.mubr.msk.f32.gmra.mrb[14].mxu0 %vm405_vm0, %v6054_v57  ;;  %4915 = vmatprep.mubr.msk.f32.mxu1 %vm405_vm0, %v6056_v58 }
  0x50   : > { %5138 = vmatprep.mubr.msk.f32.mxu0 %vm405_vm0, %v6058_v59 }
  0x52   : > { %4916 = vmatmul.mubr.msk.f32.gmra.mrb[18].mxu1 %vm405_vm0, %v6068_v60 }
  0x53   : > { %5139 = vmatmul.mubr.msk.f32.vlgmr.msra.gmra.mrb[0].mxu0 %vm405_vm0, %v6070_v61  ;;  %4918 = vmatprep.mubr.msk.f32.mxu1 %vm405_vm0, %v6072_v62 }
  0x54   : > { %5187 = vmatpush3.msra.mxu0 %v5872_v20  ;;  %5141 = vmatprep.mubr.msk.f32.mxu0 %vm405_vm0, %v6074_v63  ;;  %v6107_v20 = vld [vmem:[#allocation2 + $0x110] sm:$0xff] }
  0x55   : > { %5236 = vmatprep.subr.mxu0 %v6079_v0 }
  0x56   : > { %4919 = vmatmul.mubr.msk.f32.gmra.mrb[20].mxu1 %vm405_vm0, %v6088_v1 }
  0x57   : > { %5142 = vmatmul.mubr.msk.f32.gmra.mrb[2].mxu0 %vm405_vm0, %v6090_v3  ;;  %4921 = vmatprep.mubr.msk.f32.mxu1 %vm405_vm0, %v6094_v9 }
  0x58   : > { %5144 = vmatprep.mubr.msk.f32.mxu0 %vm405_vm0, %v6096_v10 }
  0x5a   : > { %4922 = vmatmul.mubr.msk.f32.gmra.mrb[22].mxu1 %vm405_vm0, %v6107_v20 }
  0x5b   : > { %5145 = vmatmul.mubr.msk.f32.gmra.mrb[4].mxu0 %vm405_vm0, %v6109_v11  ;;  %4924 = vmatprep.mubr.msk.f32.mxu1 %vm405_vm0, %v6111_v12 }
  0x5c   : > { %5147 = vmatprep.mubr.msk.f32.mxu0 %vm405_vm0, %v6113_v13 }
  0x5e   : > { %4925 = vmatmul.mubr.msk.f32.gmra.mrb[24].mxu1 %vm405_vm0, %v6123_v16 }
  0x5f   : > { %5148 = vmatmul.mubr.msk.f32.gmra.mrb[6].mxu0 %vm405_vm0, %v6125_v17  ;;  %4927 = vmatprep.mubr.msk.f32.mxu1 %vm405_vm0, %v6127_v18 }
  0x60   : > { %5150 = vmatprep.mubr.msk.f32.mxu0 %vm405_vm0, %v6129_v19 }
  0x62   : > { %4928 = vmatmul.mubr.msk.f32.gmra.mrb[26].mxu1 %vm405_vm0, %v6139_v21 }
  0x63   : > { %5151 = vmatmul.mubr.msk.f32.gmra.mrb[8].mxu0 %vm405_vm0, %v6141_v22  ;;  %4930 = vmatprep.mubr.msk.f32.mxu1 %vm405_vm0, %v6143_v23 }
  0x64   : > { %5153 = vmatprep.mubr.msk.f32.mxu0 %vm405_vm0, %v6145_v24 }
  0x66   : > { %4931 = vmatmul.mubr.msk.f32.gmra.mrb[28].mxu1 %vm405_vm0, %v6155_v25 }
  0x67   : > { %5154 = vmatmul.mubr.msk.f32.gmra.mrb[10].mxu0 %vm405_vm0, %v6157_v28  ;;  %4933 = vmatprep.mubr.msk.f32.mxu1 %vm405_vm0, %v6159_v29  ;;  %v6186_v28 = vld [vmem:[#allocation2 + $0xda] sm:$0xff] }
  0x68   : > { %5156 = vmatprep.mubr.msk.f32.mxu0 %vm405_vm0, %v6161_v30  ;;  %v6184_v30 = vld [vmem:[#allocation2 + $0xca] sm:$0xff]  ;;  %v6191_v29 = vld [vmem:[%s6911_s3 + $0x18] sm:$0xff] }
  0x6a   : > { %4934 = vmatmul.mubr.msk.f32.gmra.mrb[30].mxu1 %vm405_vm0, %v6171_v33 }
  0x6b   : > { %5157 = vmatmul.mubr.msk.f32.gmra.mrb[12].mxu0 %vm405_vm0, %v6173_v38  ;;  %4938 = vmatprep.mubr.msk.f32.mxu1 %vm405_vm0, %v888_v39  ;;  %v6199_v39 = vld [vmem:[#allocation2 + $0xe2] sm:$0xff] }
  0x6c   : > { %5159 = vmatprep.mubr.msk.f32.mxu0 %vm405_vm0, %v6175_v40  ;;  %v6203_v40 = vld [vmem:[#allocation2 + $0xf2] sm:$0xff] }
  0x6e   : > { %4939 = vmatmul.mubr.msk.f32.vlgmr.msra.gmra.mrb[0].mxu1 %vm405_vm0, %v889_v41  ;;  %v6228_v41 = vld [vmem:[#allocation2 + $0x122] sm:$0xff] }
  0x6f   : > { %5160 = vmatmul.mubr.msk.f32.gmra.mrb[14].mxu0 %vm405_vm0, %v6184_v30  ;;  %4987 = vmatpush3.msra.mxu1 %v5816_v27  ;;  %v6214_v27 = vld [vmem:[#allocation2 + $0xfa] sm:$0xff] }
  0x70   : > { %4941 = vmatprep.mubr.msk.f32.mxu1 %vm405_vm0, %v5878_v26  ;;  %5162 = vmatprep.mubr.msk.f32.mxu0 %vm405_vm0, %v6186_v28  ;;  %6966 = vst [vmem:[#allocation17_spill] sm:$0xff] %v6214_v27  ;;  %v6216_v26 = vld [vmem:[#allocation2 + $0x10a] sm:$0xff] }
  0x71   : > { %5036 = vmatprep.subr.mxu1 %v6191_v29 }
  0x72   : > { %4942 = vmatmul.mubr.msk.f32.gmra.mrb[2].mxu1 %vm405_vm0, %v5890_v34  ;;  %v6226_v34 = vld [vmem:[#allocation2 + $0x112] sm:$0xff] }
  0x73   : > { %5163 = vmatmul.mubr.msk.f32.gmra.mrb[16].mxu0 %vm405_vm0, %v6199_v39  ;;  %4944 = vmatprep.mubr.msk.f32.mxu1 %vm405_vm0, %v5894_v36  ;;  %6967 = vst [vmem:[#allocation18_spill] sm:$0xff] %v6226_v34 }
  0x74   : > { %5165 = vmatprep.mubr.msk.f32.mxu0 %vm405_vm0, %v6203_v40 }
  0x76   : > { %4945 = vmatmul.mubr.msk.f32.gmra.mrb[4].mxu1 %vm405_vm0, %v5915_v47 }
  0x77   : > { %5166 = vmatmul.mubr.msk.f32.gmra.mrb[18].mxu0 %vm405_vm0, %v6214_v27  ;;  %4947 = vmatprep.mubr.msk.f32.mxu1 %vm405_vm0, %v5923_v4  ;;  %v6238_v27 = vld [vmem:[#allocation2 + $0x12a] sm:$0xff]  ;;  %v6240_v4 = vld [vmem:[#allocation2 + $0x13a] sm:$0xff] }
  0x78   : > { %5168 = vmatprep.mubr.msk.f32.mxu0 %vm405_vm0, %v6216_v26  ;;  %6968 = vst [vmem:[#allocation19_spill] sm:$0xff] %v6238_v27 }
  0x7a   : > { %4948 = vmatmul.mubr.msk.f32.gmra.mrb[6].mxu1 %vm405_vm0, %v5952_v8 }
  0x7b   : > { %5169 = vmatmul.mubr.msk.f32.gmra.mrb[20].mxu0 %vm405_vm0, %v6226_v34  ;;  %4950 = vmatprep.mubr.msk.f32.mxu1 %vm405_vm0, %v5960_v15  ;;  %v6250_v34 = vld [vmem:[#allocation2 + $0x142] sm:$0xff]  ;;  %v6252_v15 = vld [vmem:[#allocation2 + $0x152] sm:$0xff] }
  0x7c   : > { %5171 = vmatprep.mubr.msk.f32.mxu0 %vm405_vm0, %v6228_v41  ;;  %6969 = vst [vmem:[#allocation20_spill] sm:$0xff] %v6250_v34 }
  0x7e   : > { %4951 = vmatmul.mubr.msk.f32.gmra.mrb[8].mxu1 %vm405_vm0, %v5980_v32 }
  0x7f   : > { %5172 = vmatmul.mubr.msk.f32.gmra.mrb[22].mxu0 %vm405_vm0, %v6238_v27  ;;  %4953 = vmatprep.mubr.msk.f32.mxu1 %vm405_vm0, %v5988_v5  ;;  %v6262_v27 = vld [vmem:[#allocation2 + $0x15a] sm:$0xff]  ;;  %v6264_v5 = vld [vmem:[#allocation2 + $0x16a] sm:$0xff] }
  0x80   : > { %5174 = vmatprep.mubr.msk.f32.mxu0 %vm405_vm0, %v6240_v4  ;;  %6970 = vst [vmem:[#allocation21_spill] sm:$0xff] %v6262_v27 }
  0x82   : > { %4954 = vmatmul.mubr.msk.f32.gmra.mrb[10].mxu1 %vm405_vm0, %v6004_v43 }
  0x83   : > { %5175 = vmatmul.mubr.msk.f32.gmra.mrb[24].mxu0 %vm405_vm0, %v6250_v34  ;;  %4956 = vmatprep.mubr.msk.f32.mxu1 %vm405_vm0, %v6009_v44  ;;  %v6274_v34 = vld [vmem:[#allocation2 + $0x172] sm:$0xff]  ;;  %v6276_v44 = vld [vmem:[#allocation2 + $0x182] sm:$0xff] }
  0x84   : > { %5177 = vmatprep.mubr.msk.f32.mxu0 %vm405_vm0, %v6252_v15  ;;  %6971 = vst [vmem:[#allocation22_spill] sm:$0xff] %v6274_v34  ;;  %6972 = vst [vmem:[#allocation23_spill] sm:$0xff] %v6276_v44 }
  0x86   : > { %4957 = vmatmul.mubr.msk.f32.gmra.mrb[12].mxu1 %vm405_vm0, %v6022_v48 }
  0x87   : > { %5178 = vmatmul.mubr.msk.f32.gmra.mrb[26].mxu0 %vm405_vm0, %v6262_v27  ;;  %4959 = vmatprep.mubr.msk.f32.mxu1 %vm405_vm0, %v6026_v50  ;;  %v6286_v27 = vld [vmem:[#allocation2 + $0x18a] sm:$0xff]  ;;  %v6288_v50 = vld [vmem:[#allocation2 + $0xd9] sm:$0xff] }
  0x88   : > { %5180 = vmatprep.mubr.msk.f32.mxu0 %vm405_vm0, %v6264_v5  ;;  %6973 = vst [vmem:[#allocation24_spill] sm:$0xff] %v6286_v27 }
  0x8a   : > { %4960 = vmatmul.mubr.msk.f32.gmra.mrb[14].mxu1 %vm405_vm0, %v6038_v52 }
  0x8b   : > { %5181 = vmatmul.mubr.msk.f32.gmra.mrb[28].mxu0 %vm405_vm0, %v6274_v34  ;;  %4962 = vmatprep.mubr.msk.f32.mxu1 %vm405_vm0, %v6042_v55  ;;  %v6298_v34 = vld [vmem:[#allocation2 + $0xe1] sm:$0xff]  ;;  %v6300_v55 = vld [vmem:[#allocation2 + $0xf1] sm:$0xff] }
  0x8c   : > { %5183 = vmatprep.mubr.msk.f32.mxu0 %vm405_vm0, %v6276_v44  ;;  %v6305_v44 = vld [vmem:[%s6911_s3 + $0x40] sm:$0xff] }
  0x8e   : > { %4963 = vmatmul.mubr.msk.f32.gmra.mrb[16].mxu1 %vm405_vm0, %v6054_v57 }
  0x8f   : > { %5184 = vmatmul.mubr.msk.f32.gmra.mrb[30].mxu0 %vm405_vm0, %v6286_v27  ;;  %4965 = vmatprep.mubr.msk.f32.mxu1 %vm405_vm0, %v6288_v50  ;;  %v6318_v27 = vld [vmem:[#allocation2 + $0x109] sm:$0xff] }
  0x90   : > { %5188 = vmatprep.mubr.msk.f32.mxu0 %vm405_vm0, %v5892_v35  ;;  %v6314_v35 = vld [vmem:[#allocation2 + $0xf9] sm:$0xff] }
  0x92   : > { %4966 = vmatmul.mubr.msk.f32.gmra.mrb[18].mxu1 %vm405_vm0, %v6298_v34 }
  0x93   : > { %5189 = vmatmul.mubr.msk.f32.vlgmr.msra.gmra.mrb[0].mxu0 %vm405_vm0, %v5913_v46  ;;  %4968 = vmatprep.mubr.msk.f32.mxu1 %vm405_vm0, %v6300_v55  ;;  %v6329_v46 = vld [vmem:[#allocation2 + $0x111] sm:$0xff] }
  0x94   : > { %5237 = vmatpush3.msra.mxu0 %v6079_v0  ;;  %5191 = vmatprep.mubr.msk.f32.mxu0 %vm405_vm0, %v5921_v53  ;;  %v6331_v0 = vld [vmem:[#allocation2 + $0x121] sm:$0xff]  ;;  %v6341_v53 = vld [vmem:[#allocation2 + $0x129] sm:$0xff] }
  0x95   : > { %5286 = vmatprep.subr.mxu0 %v6305_v44 }
  0x96   : > { %4969 = vmatmul.mubr.msk.f32.gmra.mrb[20].mxu1 %vm405_vm0, %v6314_v35 }
  0x97   : > { %5192 = vmatmul.mubr.msk.f32.gmra.mrb[2].mxu0 %vm405_vm0, %v5950_v7  ;;  %4971 = vmatprep.mubr.msk.f32.mxu1 %vm405_vm0, %v6318_v27  ;;  %v6343_v7 = vld [vmem:[#allocation2 + $0x139] sm:$0xff] }
  0x98   : > { %5194 = vmatprep.mubr.msk.f32.mxu0 %vm405_vm0, %v5958_v14  ;;  %6974 = vst [vmem:[#allocation25_spill] sm:$0xff] %v6343_v7  ;;  %v6353_v14 = vld [vmem:[#allocation2 + $0x141] sm:$0xff] }
  0x9a   : > { %4972 = vmatmul.mubr.msk.f32.gmra.mrb[22].mxu1 %vm405_vm0, %v6329_v46 }
  0x9b   : > { %5195 = vmatmul.mubr.msk.f32.gmra.mrb[4].mxu0 %vm405_vm0, %v5978_v31  ;;  %4974 = vmatprep.mubr.msk.f32.mxu1 %vm405_vm0, %v6331_v0  ;;  %v6355_v31 = vld [vmem:[#allocation2 + $0x151] sm:$0xff] }
  0x9c   : > { %5197 = vmatprep.mubr.msk.f32.mxu0 %vm405_vm0, %v5986_v37  ;;  %6975 = vst [vmem:[#allocation26_spill] sm:$0xff] %v6355_v31 }
  0x9e   : > { %4975 = vmatmul.mubr.msk.f32.gmra.mrb[24].mxu1 %vm405_vm0, %v6341_v53 }
  0x9f   : > { %5198 = vmatmul.mubr.msk.f32.gmra.mrb[6].mxu0 %vm405_vm0, %v6002_v42  ;;  %4977 = vmatprep.mubr.msk.f32.mxu1 %vm405_vm0, %v6343_v7  ;;  %v6365_v42 = vld [vmem:[#allocation2 + $0x159] sm:$0xff]  ;;  %v6367_v7 = vld [vmem:[#allocation2 + $0x169] sm:$0xff] }
  0xa0   : > { %5200 = vmatprep.mubr.msk.f32.mxu0 %vm405_vm0, %v6007_v6 }
  0xa2   : > { %4978 = vmatmul.mubr.msk.f32.gmra.mrb[26].mxu1 %vm405_vm0, %v6353_v14 }
  0xa3   : > { %5201 = vmatmul.mubr.msk.f32.gmra.mrb[8].mxu0 %vm405_vm0, %v6020_v45  ;;  %4980 = vmatprep.mubr.msk.f32.mxu1 %vm405_vm0, %v6355_v31  ;;  %v6377_v45 = vld [vmem:[#allocation2 + $0x171] sm:$0xff]  ;;  %v1275_v31 = vld [vmem:[#allocation2 + $0x2] sm:$0xff] }
  0xa4   : > { %5203 = vmatprep.mubr.msk.f32.mxu0 %vm405_vm0, %v6024_v49 }
  0xa6   : > { %4981 = vmatmul.mubr.msk.f32.gmra.mrb[28].mxu1 %vm405_vm0, %v6365_v42 }
  0xa7   : > { %5204 = vmatmul.mubr.msk.f32.gmra.mrb[10].mxu0 %vm405_vm0, %v6036_v51  ;;  %4983 = vmatprep.mubr.msk.f32.mxu1 %vm405_vm0, %v6367_v7  ;;  %v1276_v51 = vld [vmem:[#allocation2 + $0xa] sm:$0xff] }
  0xa8   : > { %5206 = vmatprep.mubr.msk.f32.mxu0 %vm405_vm0, %v6040_v54 }
  0xaa   : > { %4984 = vmatmul.mubr.msk.f32.gmra.mrb[30].mxu1 %vm405_vm0, %v6377_v45 }
  0xab   : > { %5207 = vmatmul.mubr.msk.f32.gmra.mrb[12].mxu0 %vm405_vm0, %v6052_v56  ;;  %4988 = vmatprep.mubr.msk.f32.mxu1 %vm405_vm0, %v1275_v31  ;;  %v2854_v31 = vld [vmem:[#allocation2 + $0x198] sm:$0xff] }
  0xac   : > { %5209 = vmatprep.mubr.msk.f32.mxu0 %vm405_vm0, %v6056_v58 }
  0xae   : > { %4989 = vmatmul.mubr.msk.f32.vlgmr.msra.gmra.mrb[0].mxu1 %vm405_vm0, %v1276_v51  ;;  %v6435_v51 = vld [vmem:[#allocation2 + $0x180] sm:$0xff] }
  0xaf   : > { %5210 = vmatmul.mubr.msk.f32.gmra.mrb[14].mxu0 %vm405_vm0, %v6068_v60  ;;  %5037 = vmatpush3.msra.mxu1 %v6191_v29  ;;  %v6445_v29 = vld [vmem:[#allocation2 + $0x188] sm:$0xff] }
  0xb0   : > { %4991 = vmatprep.mubr.msk.f32.mxu1 %vm405_vm0, %v6058_v59  ;;  %5212 = vmatprep.mubr.msk.f32.mxu0 %vm405_vm0, %v6072_v62  ;;  %v6977_v59 = vld [vmem:[#allocation12_spill] sm:$0xff] }
  0xb1   : > { %5336 = vmatprep.subr.mxu1 %v5699_v2  ;;  %v6976_v2 = vld [vmem:[#allocation13_spill] sm:$0xff] }
  0xb2   : > { %4992 = vmatmul.mubr.msk.f32.gmra.mrb[2].mxu1 %vm405_vm0, %v6070_v61  ;;  %v6978_v61 = vld [vmem:[#allocation14_spill] sm:$0xff] }
  0xb3   : > { %5213 = vmatmul.mubr.msk.f32.gmra.mrb[16].mxu0 %vm405_vm0, %v6088_v1  ;;  %4994 = vmatprep.mubr.msk.f32.mxu1 %vm405_vm0, %v6074_v63 }
  0xb4   : > { %5215 = vmatprep.mubr.msk.f32.mxu0 %vm405_vm0, %v6094_v9 }
  0xb6   : > { %4995 = vmatmul.mubr.msk.f32.gmra.mrb[4].mxu1 %vm405_vm0, %v6090_v3 }
  0xb7   : > { %5216 = vmatmul.mubr.msk.f32.gmra.mrb[18].mxu0 %vm405_vm0, %v6107_v20  ;;  %4997 = vmatprep.mubr.msk.f32.mxu1 %vm405_vm0, %v6096_v10 }
  0xb8   : > { %5218 = vmatprep.mubr.msk.f32.mxu0 %vm405_vm0, %v6111_v12 }
  0xba   : > { %4998 = vmatmul.mubr.msk.f32.gmra.mrb[6].mxu1 %vm405_vm0, %v6109_v11 }
  0xbb   : > { %5219 = vmatmul.mubr.msk.f32.gmra.mrb[20].mxu0 %vm405_vm0, %v6123_v16  ;;  %5000 = vmatprep.mubr.msk.f32.mxu1 %vm405_vm0, %v6113_v13 }
  0xbc   : > { %5221 = vmatprep.mubr.msk.f32.mxu0 %vm405_vm0, %v6127_v18 }
  0xbe   : > { %5001 = vmatmul.mubr.msk.f32.gmra.mrb[8].mxu1 %vm405_vm0, %v6125_v17 }
  0xbf   : > { %5222 = vmatmul.mubr.msk.f32.gmra.mrb[22].mxu0 %vm405_vm0, %v6139_v21  ;;  %5003 = vmatprep.mubr.msk.f32.mxu1 %vm405_vm0, %v6129_v19 }
  0xc0   : > { %5224 = vmatprep.mubr.msk.f32.mxu0 %vm405_vm0, %v6143_v23 }
  0xc2   : > { %5004 = vmatmul.mubr.msk.f32.gmra.mrb[10].mxu1 %vm405_vm0, %v6141_v22 }
  0xc3   : > { %5225 = vmatmul.mubr.msk.f32.gmra.mrb[24].mxu0 %vm405_vm0, %v6155_v25  ;;  %5006 = vmatprep.mubr.msk.f32.mxu1 %vm405_vm0, %v6145_v24 }
  0xc4   : > { %5227 = vmatprep.mubr.msk.f32.mxu0 %vm405_vm0, %v6976_v2  ;;  %v6979_v2 = vld [vmem:[#allocation16_spill] sm:$0xff] }
  0xc6   : > { %5007 = vmatmul.mubr.msk.f32.gmra.mrb[12].mxu1 %vm405_vm0, %v6977_v59 }
  0xc7   : > { %5228 = vmatmul.mubr.msk.f32.gmra.mrb[26].mxu0 %vm405_vm0, %v6171_v33  ;;  %5009 = vmatprep.mubr.msk.f32.mxu1 %vm405_vm0, %v6978_v61  ;;  %v2855_v33 = vld [vmem:[#allocation2 + $0x1a0] sm:$0xff] }
  0xc8   : > { %5230 = vmatprep.mubr.msk.f32.mxu0 %vm405_vm0, %v6435_v51 }
  0xca   : > { %5010 = vmatmul.mubr.msk.f32.gmra.mrb[14].mxu1 %vm405_vm0, %v6173_v38 }
  0xcb   : > { %5231 = vmatmul.mubr.msk.f32.gmra.mrb[28].mxu0 %vm405_vm0, %v6445_v29  ;;  %5012 = vmatprep.mubr.msk.f32.mxu1 %vm405_vm0, %v6979_v2 }
  0xcc   : > { %5233 = vmatprep.mubr.msk.f32.mxu0 %vm405_vm0, %v2854_v31  ;;  %v6980_v31 = vld [vmem:[#allocation3_spill] sm:$0xff] }
  0xce   : > { %5013 = vmatmul.mubr.msk.f32.gmra.mrb[16].mxu1 %vm405_vm0, %v6184_v30 }
  0xcf   : > { %5234 = vmatmul.mubr.msk.f32.gmra.mrb[30].mxu0 %vm405_vm0, %v2855_v33  ;;  %5015 = vmatprep.mubr.msk.f32.mxu1 %vm405_vm0, %v6186_v28  ;;  %v6981_v33 = vld [vmem:[#allocation17_spill] sm:$0xff] }
  0xd0   : > { %5238 = vmatprep.mubr.msk.f32.mxu0 %vm405_vm0, %v5894_v36  ;;  %v6982_v36 = vld [vmem:[#allocation4_spill] sm:$0xff] }
  0xd2   : > { %5016 = vmatmul.mubr.msk.f32.gmra.mrb[18].mxu1 %vm405_vm0, %v6199_v39 }
  0xd3   : > { %5239 = vmatmul.mubr.msk.f32.vlgmr.msra.gmra.mrb[0].mxu0 %vm405_vm0, %v5915_v47  ;;  %5018 = vmatprep.mubr.msk.f32.mxu1 %vm405_vm0, %v6203_v40  ;;  %v6983_v47 = vld [vmem:[#allocation18_spill] sm:$0xff] }
  0xd4   : > { %5287 = vmatpush3.msra.mxu0 %v6305_v44  ;;  %5241 = vmatprep.mubr.msk.f32.mxu0 %vm405_vm0, %v6980_v31  ;;  %v6984_v44 = vld [vmem:[#allocation5_spill] sm:$0xff]  ;;  %v6985_v31 = vld [vmem:[#allocation19_spill] sm:$0xff] }
  0xd6   : > { %5019 = vmatmul.mubr.msk.f32.gmra.mrb[20].mxu1 %vm405_vm0, %v6981_v33 }
  0xd7   : > { %5242 = vmatmul.mubr.msk.f32.gmra.mrb[2].mxu0 %vm405_vm0, %v5952_v8  ;;  %5021 = vmatprep.mubr.msk.f32.mxu1 %vm405_vm0, %v6216_v26  ;;  %v6986_v8 = vld [vmem:[#allocation7_spill] sm:$0xff] }
  0xd8   : > { %5244 = vmatprep.mubr.msk.f32.mxu0 %vm405_vm0, %v6982_v36  ;;  %v6987_v36 = vld [vmem:[#allocation20_spill] sm:$0xff] }
  0xda   : > { %5022 = vmatmul.mubr.msk.f32.gmra.mrb[22].mxu1 %vm405_vm0, %v6983_v47 }
  0xdb   : > { %5245 = vmatmul.mubr.msk.f32.gmra.mrb[4].mxu0 %vm405_vm0, %v5980_v32  ;;  %5024 = vmatprep.mubr.msk.f32.mxu1 %vm405_vm0, %v6228_v41  ;;  %v6988_v32 = vld [vmem:[#allocation9_spill] sm:$0xff] }
  0xdc   : > { %5247 = vmatprep.mubr.msk.f32.mxu0 %vm405_vm0, %v6984_v44  ;;  %v6989_v44 = vld [vmem:[#allocation21_spill] sm:$0xff] }
  0xde   : > { %5025 = vmatmul.mubr.msk.f32.gmra.mrb[24].mxu1 %vm405_vm0, %v6985_v31 }
  0xdf   : > { %5248 = vmatmul.mubr.msk.f32.gmra.mrb[6].mxu0 %vm405_vm0, %v6004_v43  ;;  %5027 = vmatprep.mubr.msk.f32.mxu1 %vm405_vm0, %v6240_v4  ;;  %v6990_v43 = vld [vmem:[#allocation11_spill] sm:$0xff] }
  0xe0   : > { %5250 = vmatprep.mubr.msk.f32.mxu0 %vm405_vm0, %v6986_v8  ;;  %v1662_v8 = vld [vmem:[#allocation2 + $0x18] sm:$0xff] }
  0xe2   : > { %5028 = vmatmul.mubr.msk.f32.gmra.mrb[26].mxu1 %vm405_vm0, %v6987_v36 }
  0xe3   : > { %5251 = vmatmul.mubr.msk.f32.gmra.mrb[8].mxu0 %vm405_vm0, %v6022_v48  ;;  %5030 = vmatprep.mubr.msk.f32.mxu1 %vm405_vm0, %v6252_v15  ;;  %v6991_v48 = vld [vmem:[#allocation22_spill] sm:$0xff] }
  0xe4   : > { %5253 = vmatprep.mubr.msk.f32.mxu0 %vm405_vm0, %v6988_v32  ;;  %v1663_v32 = vld [vmem:[#allocation2 + $0x20] sm:$0xff] }
  0xe6   : > { %5031 = vmatmul.mubr.msk.f32.gmra.mrb[28].mxu1 %vm405_vm0, %v6989_v44 }
  0xe7   : > { %5254 = vmatmul.mubr.msk.f32.gmra.mrb[10].mxu0 %vm405_vm0, %v6038_v52  ;;  %5033 = vmatprep.mubr.msk.f32.mxu1 %vm405_vm0, %v6264_v5  ;;  %v1664_v52 = vld [vmem:[#allocation2 + $0x30] sm:$0xff] }
  0xe8   : > { %5256 = vmatprep.mubr.msk.f32.mxu0 %vm405_vm0, %v6990_v43  ;;  %v5635_v43 = vld [vmem:[%s6911_s3 + $0x20] sm:$0xff] }
  0xea   : > { %5034 = vmatmul.mubr.msk.f32.gmra.mrb[30].mxu1 %vm405_vm0, %v6991_v48  ;;  %v1668_v48 = vld [vmem:[#allocation2 + $0x60] sm:$0xff] }
  0xeb   : > { %5257 = vmatmul.mubr.msk.f32.gmra.mrb[12].mxu0 %vm405_vm0, %v6054_v57  ;;  %5038 = vmatprep.mubr.msk.f32.mxu1 %vm405_vm0, %v1662_v8  ;;  %v1665_v57 = vld [vmem:[#allocation2 + $0x38] sm:$0xff]  ;;  %v1666_v8 = vld [vmem:[#allocation2 + $0x48] sm:$0xff] }
  0xec   : > { %5259 = vmatprep.mubr.msk.f32.mxu0 %vm405_vm0, %v6288_v50 }
  0xee   : > { %5039 = vmatmul.mubr.msk.f32.vlgmr.msra.gmra.mrb[0].mxu1 %vm405_vm0, %v1663_v32  ;;  %v1667_v32 = vld [vmem:[#allocation2 + $0x50] sm:$0xff] }
  0xef   : > { %5260 = vmatmul.mubr.msk.f32.gmra.mrb[14].mxu0 %vm405_vm0, %v6298_v34  ;;  %5337 = vmatpush3.msra.mxu1 %v5635_v43  ;;  %v6992_v43 = vld [vmem:[#allocation25_spill] sm:$0xff] }
  0xf0   : > { %5041 = vmatprep.mubr.msk.f32.mxu1 %vm405_vm0, %v1664_v52  ;;  %5262 = vmatprep.mubr.msk.f32.mxu0 %vm405_vm0, %v6300_v55  ;;  %v1669_v52 = vld [vmem:[#allocation2 + $0x68] sm:$0xff] }
  0xf2   : > { %5042 = vmatmul.mubr.msk.f32.gmra.mrb[2].mxu1 %vm405_vm0, %v1665_v57  ;;  %v6993_v57 = vld [vmem:[#allocation6_spill] sm:$0xff] }
  0xf3   : > { %5263 = vmatmul.mubr.msk.f32.gmra.mrb[16].mxu0 %vm405_vm0, %v6314_v35  ;;  %5044 = vmatprep.mubr.msk.f32.mxu1 %vm405_vm0, %v1666_v8  ;;  %v6995_v8 = vld [vmem:[#allocation8_spill] sm:$0xff] }
  0xf4   : > { %5265 = vmatprep.mubr.msk.f32.mxu0 %vm405_vm0, %v6318_v27 }
  0xf6   : > { %5045 = vmatmul.mubr.msk.f32.gmra.mrb[4].mxu1 %vm405_vm0, %v1667_v32  ;;  %v6996_v32 = vld [vmem:[#allocation10_spill] sm:$0xff] }
  0xf7   : > { %5266 = vmatmul.mubr.msk.f32.gmra.mrb[18].mxu0 %vm405_vm0, %v6329_v46  ;;  %5047 = vmatprep.mubr.msk.f32.mxu1 %vm405_vm0, %v1668_v48  ;;  %v6994_v48 = vld [vmem:[#allocation26_spill] sm:$0xff] }
  0xf8   : > { %5268 = vmatprep.mubr.msk.f32.mxu0 %vm405_vm0, %v6331_v0 }
  0xfa   : > { %5048 = vmatmul.mubr.msk.f32.gmra.mrb[6].mxu1 %vm405_vm0, %v1669_v52  ;;  %v3242_v52 = vld [vmem:[#allocation2 + $0x1a1] sm:$0xff] }
  0xfb   : > { %5269 = vmatmul.mubr.msk.f32.gmra.mrb[20].mxu0 %vm405_vm0, %v6341_v53  ;;  %5050 = vmatprep.mubr.msk.f32.mxu1 %vm405_vm0, %v5986_v37  ;;  %v6561_v37 = vld [vmem:[#allocation2 + $0x181] sm:$0xff] }
  0xfc   : > { %5271 = vmatprep.mubr.msk.f32.mxu0 %vm405_vm0, %v6992_v43 }
  0xfe   : > { %5051 = vmatmul.mubr.msk.f32.gmra.mrb[8].mxu1 %vm405_vm0, %v6993_v57 }
  0xff   : > { %5272 = vmatmul.mubr.msk.f32.gmra.mrb[22].mxu0 %vm405_vm0, %v6353_v14  ;;  %5053 = vmatprep.mubr.msk.f32.mxu1 %vm405_vm0, %v6007_v6  ;;  %v6571_v6 = vld [vmem:[#allocation2 + $0x189] sm:$0xff] }
 0x100   : > { %5274 = vmatprep.mubr.msk.f32.mxu0 %vm405_vm0, %v6994_v48 }
 0x102   : > { %5054 = vmatmul.mubr.msk.f32.gmra.mrb[10].mxu1 %vm405_vm0, %v6995_v8 }
 0x103   : > { %5275 = vmatmul.mubr.msk.f32.gmra.mrb[24].mxu0 %vm405_vm0, %v6365_v42  ;;  %5056 = vmatprep.mubr.msk.f32.mxu1 %vm405_vm0, %v6024_v49  ;;  %v3241_v49 = vld [vmem:[#allocation2 + $0x199] sm:$0xff] }
 0x104   : > { %5277 = vmatprep.mubr.msk.f32.mxu0 %vm405_vm0, %v6367_v7 }
 0x106   : > { %5057 = vmatmul.mubr.msk.f32.gmra.mrb[12].mxu1 %vm405_vm0, %v6996_v32 }
 0x107   : > { %5278 = vmatmul.mubr.msk.f32.gmra.mrb[26].mxu0 %vm405_vm0, %v6377_v45  ;;  %5059 = vmatprep.mubr.msk.f32.mxu1 %vm405_vm0, %v6040_v54  ;;  %v6997_v54 = vld [vmem:[#allocation13_spill] sm:$0xff] }
 0x108   : > { %5280 = vmatprep.mubr.msk.f32.mxu0 %vm405_vm0, %v6561_v37 }
 0x10a   : > { %5060 = vmatmul.mubr.msk.f32.gmra.mrb[14].mxu1 %vm405_vm0, %v6052_v56  ;;  %v6998_v56 = vld [vmem:[#allocation15_spill] sm:$0xff] }
 0x10b   : > { %5281 = vmatmul.mubr.msk.f32.gmra.mrb[28].mxu0 %vm405_vm0, %v6571_v6  ;;  %5062 = vmatprep.mubr.msk.f32.mxu1 %vm405_vm0, %v6056_v58 }
 0x10c   : > { %5283 = vmatprep.mubr.msk.f32.mxu0 %vm405_vm0, %v3241_v49 }
 0x10e   : > { %5063 = vmatmul.mubr.msk.f32.gmra.mrb[16].mxu1 %vm405_vm0, %v6068_v60 }
 0x10f   : > { %5284 = vmatmul.mubr.msk.f32.gmra.mrb[30].mxu0 %vm405_vm0, %v3242_v52  ;;  %5065 = vmatprep.mubr.msk.f32.mxu1 %vm405_vm0, %v6072_v62 }
 0x110   : > { %5288 = vmatprep.mubr.msk.f32.mxu0 %vm405_vm0, %v6074_v63 }
 0x112   : > { %5066 = vmatmul.mubr.msk.f32.gmra.mrb[18].mxu1 %vm405_vm0, %v6088_v1 }
 0x113   : > { %5289 = vmatmul.mubr.msk.f32.vlgmr.msra.gmra.mrb[0].mxu0 %vm405_vm0, %v6090_v3  ;;  %5068 = vmatprep.mubr.msk.f32.mxu1 %vm405_vm0, %v6094_v9 }
 0x114   : > { %5291 = vmatprep.mubr.msk.f32.mxu0 %vm405_vm0, %v6096_v10 }
 0x116   : > { %5069 = vmatmul.mubr.msk.f32.gmra.mrb[20].mxu1 %vm405_vm0, %v6107_v20 }
 0x117   : > { %5292 = vmatmul.mubr.msk.f32.gmra.mrb[2].mxu0 %vm405_vm0, %v6109_v11  ;;  %5071 = vmatprep.mubr.msk.f32.mxu1 %vm405_vm0, %v6111_v12 }
 0x118   : > { %5294 = vmatprep.mubr.msk.f32.mxu0 %vm405_vm0, %v6113_v13 }
 0x11a   : > { %5072 = vmatmul.mubr.msk.f32.gmra.mrb[22].mxu1 %vm405_vm0, %v6123_v16 }
 0x11b   : > { %5295 = vmatmul.mubr.msk.f32.gmra.mrb[4].mxu0 %vm405_vm0, %v6125_v17  ;;  %5074 = vmatprep.mubr.msk.f32.mxu1 %vm405_vm0, %v6127_v18  ;;  %v6724_v18 = vld [vmem:[%s6912_s4] ss:$0 sm:$0xff] }
 0x11c   : > { %5297 = vmatprep.mubr.msk.f32.mxu0 %vm405_vm0, %v6129_v19 }
 0x11e   : > { %5075 = vmatmul.mubr.msk.f32.gmra.mrb[24].mxu1 %vm405_vm0, %v6139_v21 }
 0x11f   : > { %5298 = vmatmul.mubr.msk.f32.gmra.mrb[6].mxu0 %vm405_vm0, %v6141_v22  ;;  %5077 = vmatprep.mubr.msk.f32.mxu1 %vm405_vm0, %v6143_v23 }
 0x120   : > { %5300 = vmatprep.mubr.msk.f32.mxu0 %vm405_vm0, %v6145_v24 }
 0x122   : > { %5078 = vmatmul.mubr.msk.f32.gmra.mrb[26].mxu1 %vm405_vm0, %v6155_v25 }
 0x123   : > { %5301 = vmatmul.mubr.msk.f32.gmra.mrb[8].mxu0 %vm405_vm0, %v6977_v59  ;;  %5080 = vmatprep.mubr.msk.f32.mxu1 %vm405_vm0, %v6997_v54 }
 0x124   : > { %5303 = vmatprep.mubr.msk.f32.mxu0 %vm405_vm0, %v6978_v61 }
 0x126   : > { %5081 = vmatmul.mubr.msk.f32.gmra.mrb[28].mxu1 %vm405_vm0, %v6998_v56 }
 0x127   : > { %5304 = vmatmul.mubr.msk.f32.gmra.mrb[10].mxu0 %vm405_vm0, %v6173_v38  ;;  %5083 = vmatprep.mubr.msk.f32.mxu1 %vm405_vm0, %v6435_v51 }
 0x128   : > { %5306 = vmatprep.mubr.msk.f32.mxu0 %vm405_vm0, %v6979_v2 }
 0x12a   : > { %5084 = vmatmul.mubr.msk.f32.gmra.mrb[30].mxu1 %vm405_vm0, %v6445_v29 }
 0x12b   : > { %5307 = vmatmul.mubr.msk.f32.gmra.mrb[12].mxu0 %vm405_vm0, %v6184_v30  ;;  %5112 = vmatprep.mubr.msk.f32.mxu1 %vm405_vm0, %v6288_v50  ;;  %v7001_v50 = vld [vmem:[#allocation24_spill] sm:$0xff] }
 0x12c   : > { %5309 = vmatprep.mubr.msk.f32.mxu0 %vm405_vm0, %v6186_v28 }
 0x12e   : > { %5113 = vmatmul.mubr.msk.f32.vlgmr.msra.gmra.mrb[16].mxu1 %vm405_vm0, %v6298_v34 }
 0x12f   : > { %5310 = vmatmul.mubr.msk.f32.gmra.mrb[14].mxu0 %vm405_vm0, %v6199_v39  ;;  %5115 = vmatprep.mubr.msk.f32.mxu1 %vm405_vm0, %v6300_v55 }
 0x130   : > { %5312 = vmatprep.mubr.msk.f32.mxu0 %vm405_vm0, %v6203_v40 }
 0x132   : > { %5116 = vmatmul.mubr.msk.f32.gmra.mrb[18].mxu1 %vm405_vm0, %v6314_v35 }
 0x133   : > { %5313 = vmatmul.mubr.msk.f32.gmra.mrb[16].mxu0 %vm405_vm0, %v6981_v33  ;;  %5118 = vmatprep.mubr.msk.f32.mxu1 %vm405_vm0, %v6318_v27 }
 0x134   : > { %5315 = vmatprep.mubr.msk.f32.mxu0 %vm405_vm0, %v6216_v26 }
 0x136   : > { %5119 = vmatmul.mubr.msk.f32.gmra.mrb[20].mxu1 %vm405_vm0, %v6329_v46 }
 0x137   : > { %5316 = vmatmul.mubr.msk.f32.gmra.mrb[18].mxu0 %vm405_vm0, %v6983_v47  ;;  %5121 = vmatprep.mubr.msk.f32.mxu1 %vm405_vm0, %v6331_v0 }
 0x138   : > { %5318 = vmatprep.mubr.msk.f32.mxu0 %vm405_vm0, %v6228_v41 }
 0x13a   : > { %5122 = vmatmul.mubr.msk.f32.gmra.mrb[22].mxu1 %vm405_vm0, %v6341_v53 }
 0x13b   : > { %5319 = vmatmul.mubr.msk.f32.gmra.mrb[20].mxu0 %vm405_vm0, %v6985_v31  ;;  %5124 = vmatprep.mubr.msk.f32.mxu1 %vm405_vm0, %v6992_v43 }
 0x13c   : > { %5321 = vmatprep.mubr.msk.f32.mxu0 %vm405_vm0, %v6240_v4  ;;  %v6999_v4 = vld [vmem:[#allocation22_spill] sm:$0xff] }
 0x13e   : > { %5125 = vmatmul.mubr.msk.f32.gmra.mrb[24].mxu1 %vm405_vm0, %v6353_v14 }
 0x13f   : > { %5322 = vmatmul.mubr.msk.f32.gmra.mrb[22].mxu0 %vm405_vm0, %v6987_v36  ;;  %5127 = vmatprep.mubr.msk.f32.mxu1 %vm405_vm0, %v6994_v48 }
 0x140   : > { %5324 = vmatprep.mubr.msk.f32.mxu0 %vm405_vm0, %v6252_v15  ;;  %v7000_v15 = vld [vmem:[#allocation23_spill] sm:$0xff] }
 0x142   : > { %5128 = vmatmul.mubr.msk.f32.gmra.mrb[26].mxu1 %vm405_vm0, %v6365_v42  ;;  %v3628_v42 = vld [vmem:[#allocation2 + $0x19a] sm:$0xff] }
 0x143   : > { %5325 = vmatmul.mubr.msk.f32.gmra.mrb[24].mxu0 %vm405_vm0, %v6989_v44  ;;  %5130 = vmatprep.mubr.msk.f32.mxu1 %vm405_vm0, %v6367_v7 }
 0x144   : > { %5327 = vmatprep.mubr.msk.f32.mxu0 %vm405_vm0, %v6264_v5  ;;  %v3629_v5 = vld [vmem:[#allocation2 + $0x1a2] sm:$0xff] }
 0x146   : > { %5131 = vmatmul.mubr.msk.f32.gmra.mrb[28].mxu1 %vm405_vm0, %v6377_v45 }
 0x147   : > { %5328 = vmatmul.mubr.msk.f32.gmra.mrb[26].mxu0 %vm405_vm0, %v6999_v4  ;;  %5133 = vmatprep.mubr.msk.f32.mxu1 %vm405_vm0, %v6561_v37 }
 0x148   : > { %5330 = vmatprep.mubr.msk.f32.mxu0 %vm405_vm0, %v7000_v15 }
 0x14a   : > { %5134 = vmatmul.mubr.msk.f32.gmra.mrb[30].mxu1 %vm405_vm0, %v6571_v6 }
 0x14b   : > { %5331 = vmatmul.mubr.msk.f32.gmra.mrb[28].mxu0 %vm405_vm0, %v7001_v50 }
 0x14c   : > { %5333 = vmatprep.mubr.msk.f32.mxu0 %vm405_vm0, %v3628_v42 }
 0x14f   : > { %5334 = vmatmul.mubr.msk.f32.gmra.mrb[30].mxu0 %vm405_vm0, %v3629_v5 }
 0x1c1   : > { %v5040_v45 = vpop.f32.mrb[0].mxu1 }
 0x1c2   : > { %v1858_v55 = vpop.f32.mrb[1].mxu1  ;;  %v5338_v19 = vadd.f32 %v5040_v45, %v6724_v18 }
 0x1c3   : > { %v5340_v21 = vadd.f32 %v6724_v18, %v1858_v55 }
 0x1c5   : > { %v5043_v58 = vpop.f32.mrb[2].mxu1 }
 0x1c6   : > { %v1868_v60 = vpop.f32.mrb[3].mxu1  ;;  %v5342_v28 = vadd.f32 %v5043_v58, %v6724_v18 }
 0x1c7   : > { %v5344_v40 = vadd.f32 %v6724_v18, %v1868_v60 }
 0x1c9   : > { %v5046_v62 = vpop.f32.mrb[4].mxu1 }
 0x1ca   : > { %v1878_v63 = vpop.f32.mrb[5].mxu1  ;;  %v5346_v7 = vadd.f32 %v5046_v62, %v6724_v18 }
 0x1cb   : > { %v5348_v2 = vadd.f32 %v6724_v18, %v1878_v63 }
 0x1cd   : > { %v5049_v1 = vpop.f32.mrb[6].mxu1 }
 0x1ce   : > { %v1888_v3 = vpop.f32.mrb[7].mxu1  ;;  %v5350_v57 = vadd.f32 %v5049_v1, %v6724_v18 }
 0x1cf   : > { %v5352_v48 = vadd.f32 %v6724_v18, %v1888_v3 }
 0x1d1   : > { %v6705_v9 = vpop.f32.mrb[8].mxu1 }
 0x1d2   : > { %v6707_v10 = vpop.f32.mrb[9].mxu1  ;;  %v5354_v55 = vadd.f32 %v6705_v9, %v6724_v18 }
 0x1d3   : > { %v5356_v58 = vadd.f32 %v6724_v18, %v6707_v10 }
 0x1d5   : > { %v6709_v20 = vpop.f32.mrb[10].mxu1 }
 0x1d6   : > { %v6711_v11 = vpop.f32.mrb[11].mxu1 }
 0x1d9   : > { %v6713_v12 = vpop.f32.mrb[12].mxu1 }
 0x1da   : > { %v6715_v13 = vpop.f32.mrb[13].mxu1 }
 0x1dd   : > { %v6717_v16 = vpop.f32.mrb[14].mxu1 }
 0x1de   : > { %v6719_v17 = vpop.f32.mrb[15].mxu1 }
 0x1e6   : > { %v5290_v22 = vpop.f32.mrb[0].mxu0 }
 0x1e7   : > { %v5339_v23 = vadd.f32 %v5338_v19, %v5290_v22  ;;  %v3794_v24 = vpop.f32.mrb[1].mxu0 }
 0x1e8   : > { %v5341_v25 = vadd.f32 %v5340_v21, %v3794_v24 }
 0x1e9   : > { %3986 = vst.msk [vmem:[%s6733_s11 + $0x8] sm:$0xff] %vm405_vm0, %v5339_v23  ;;  %v4018_v30 = vsel %vm405_vm0, %v5339_v23, 0.0  ;;  %v4089_v38 = vmul.f32 %v5339_v23, %v5339_v23 }
 0x1ea   : > { %3985 = vst.msk [vmem:[%s6733_s11] sm:$0xff] %vm405_vm0, %v5341_v25  ;;  %v4017_v39 = vsel %vm405_vm0, %v5341_v25, 0.0  ;;  %v4088_v27 = vmul.f32 %v5341_v25, %v5341_v25  ;;  %v5293_v26 = vpop.f32.mrb[2].mxu0 }
 0x1eb   : > { %v4121_v34 = vsel %vm405_vm0, %v4089_v38, 0.0  ;;  %v4019_v41 = vadd.f32 %v4018_v30, %v4017_v39  ;;  %v5343_v35 = vadd.f32 %v5342_v28, %v5293_v26  ;;  %v3804_v46 = vpop.f32.mrb[3].mxu0  ;;  %v5358_v30 = vadd.f32 %v6709_v20, %v6724_v18 }
 0x1ec   : > { %v4120_v0 = vsel %vm405_vm0, %v4088_v27, 0.0  ;;  %v5345_v53 = vadd.f32 %v5344_v40, %v3804_v46  ;;  %v5360_v38 = vadd.f32 %v6724_v18, %v6711_v11 }
 0x1ed   : > { %v4122_v14 = vadd.f32 %v4121_v34, %v4120_v0  ;;  %3988 = vst.msk [vmem:[%s6733_s11 + $0x18] sm:$0xff] %vm405_vm0, %v5343_v35  ;;  %v4091_v51 = vmul.f32 %v5343_v35, %v5343_v35  ;;  %v4022_v36 = vsel %vm405_vm0, %v5343_v35, 0.0 }
 0x1ee   : > { %3987 = vst.msk [vmem:[%s6733_s11 + $0x10] sm:$0xff] %vm405_vm0, %v5345_v53  ;;  %v4020_v59 = vsel %vm405_vm0, %v5345_v53, 0.0  ;;  %v4090_v61 = vmul.f32 %v5345_v53, %v5345_v53  ;;  %v5296_v29 = vpop.f32.mrb[4].mxu0 }
 0x1ef   : > { %v4021_v33 = vadd.f32 %v4020_v59, %v4019_v41  ;;  %v5347_v47 = vadd.f32 %v5346_v7, %v5296_v29  ;;  %v3814_v31 = vpop.f32.mrb[5].mxu0  ;;  %v4125_v32 = vsel %vm405_vm0, %v4091_v51, 0.0  ;;  %v5364_v51 = vadd.f32 %v6724_v18, %v6715_v13 }
 0x1f0   : > { %v4123_v44 = vsel %vm405_vm0, %v4090_v61, 0.0  ;;  %v5349_v43 = vadd.f32 %v5348_v2, %v3814_v31  ;;  %v5362_v2 = vadd.f32 %v6713_v12, %v6724_v18 }
 0x1f1   : > { %v4124_v8 = vadd.f32 %v4123_v44, %v4122_v14  ;;  %3990 = vst.msk [vmem:[%s6733_s11 + $0x28] sm:$0xff] %vm405_vm0, %v5347_v47  ;;  %v4023_v37 = vadd.f32 %v4022_v36, %v4021_v33  ;;  %v4093_v6 = vmul.f32 %v5347_v47, %v5347_v47  ;;  %v4026_v50 = vsel %vm405_vm0, %v5347_v47, 0.0 }
 0x1f2   : > { %3989 = vst.msk [vmem:[%s6733_s11 + $0x20] sm:$0xff] %vm405_vm0, %v5349_v43  ;;  %v4024_v49 = vsel %vm405_vm0, %v5349_v43, 0.0  ;;  %v4092_v52 = vmul.f32 %v5349_v43, %v5349_v43  ;;  %v5299_v54 = vpop.f32.mrb[6].mxu0 }
 0x1f3   : > { %v4025_v56 = vadd.f32 %v4024_v49, %v4023_v37  ;;  %v4126_v4 = vadd.f32 %v4125_v32, %v4124_v8  ;;  %v5351_v15 = vadd.f32 %v5350_v57, %v5299_v54  ;;  %v3824_v42 = vpop.f32.mrb[7].mxu0  ;;  %v4129_v63 = vsel %vm405_vm0, %v4093_v6, 0.0 }
 0x1f4   : > { %v4127_v5 = vsel %vm405_vm0, %v4092_v52, 0.0  ;;  %v5353_v45 = vadd.f32 %v5352_v48, %v3824_v42  ;;  %v5366_v37 = vadd.f32 %v6717_v16, %v6724_v18  ;;  %v5368_v52 = vadd.f32 %v6724_v18, %v6719_v17 }
 0x1f5   : > { %v4128_v60 = vadd.f32 %v4127_v5, %v4126_v4  ;;  %3992 = vst.msk [vmem:[%s6733_s11 + $0x38] sm:$0xff] %vm405_vm0, %v5351_v15  ;;  %v4027_v62 = vadd.f32 %v4026_v50, %v4025_v56  ;;  %v4095_v1 = vmul.f32 %v5351_v15, %v5351_v15  ;;  %v4030_v10 = vsel %vm405_vm0, %v5351_v15, 0.0 }
 0x1f6   : > { %3991 = vst.msk [vmem:[%s6733_s11 + $0x30] sm:$0xff] %vm405_vm0, %v5353_v45  ;;  %v4028_v3 = vsel %vm405_vm0, %v5353_v45, 0.0  ;;  %v4094_v19 = vmul.f32 %v5353_v45, %v5353_v45  ;;  %v5302_v21 = vpop.f32.mrb[8].mxu0 }
 0x1f7   : > { %v4029_v22 = vadd.f32 %v4028_v3, %v4027_v62  ;;  %v4130_v9 = vadd.f32 %v4129_v63, %v4128_v60  ;;  %v5355_v23 = vadd.f32 %v5354_v55, %v5302_v21  ;;  %v3834_v24 = vpop.f32.mrb[9].mxu0  ;;  %v4133_v27 = vsel %vm405_vm0, %v4095_v1, 0.0 }
 0x1f8   : > { %v4131_v25 = vsel %vm405_vm0, %v4094_v19, 0.0  ;;  %v5357_v28 = vadd.f32 %v5356_v58, %v3834_v24 }
 0x1f9   : > { %v4132_v40 = vadd.f32 %v4131_v25, %v4130_v9  ;;  %3994 = vst.msk [vmem:[%s6733_s11 + $0x48] sm:$0xff] %vm405_vm0, %v5355_v23  ;;  %v4031_v39 = vadd.f32 %v4030_v10, %v4029_v22  ;;  %v4097_v26 = vmul.f32 %v5355_v23, %v5355_v23  ;;  %v4034_v11 = vsel %vm405_vm0, %v5355_v23, 0.0 }
 0x1fa   : > { %3993 = vst.msk [vmem:[%s6733_s11 + $0x40] sm:$0xff] %vm405_vm0, %v5357_v28  ;;  %v4032_v34 = vsel %vm405_vm0, %v5357_v28, 0.0  ;;  %v4096_v41 = vmul.f32 %v5357_v28, %v5357_v28  ;;  %v5305_v35 = vpop.f32.mrb[10].mxu0 }
 0x1fb   : > { %v4033_v46 = vadd.f32 %v4032_v34, %v4031_v39  ;;  %v4134_v20 = vadd.f32 %v4133_v27, %v4132_v40  ;;  %v5359_v0 = vadd.f32 %v5358_v30, %v5305_v35  ;;  %v3844_v53 = vpop.f32.mrb[11].mxu0  ;;  %v4137_v29 = vsel %vm405_vm0, %v4097_v26, 0.0 }
 0x1fc   : > { %v4135_v7 = vsel %vm405_vm0, %v4096_v41, 0.0  ;;  %v5361_v14 = vadd.f32 %v5360_v38, %v3844_v53 }
 0x1fd   : > { %v4136_v59 = vadd.f32 %v4135_v7, %v4134_v20  ;;  %3996 = vst.msk [vmem:[%s6733_s11 + $0x58] sm:$0xff] %vm405_vm0, %v5359_v0  ;;  %v4035_v61 = vadd.f32 %v4034_v11, %v4033_v46  ;;  %v4099_v33 = vmul.f32 %v5359_v0, %v5359_v0  ;;  %v4038_v13 = vsel %vm405_vm0, %v5359_v0, 0.0 }
 0x1fe   : > { %3995 = vst.msk [vmem:[%s6733_s11 + $0x50] sm:$0xff] %vm405_vm0, %v5361_v14  ;;  %v4036_v47 = vsel %vm405_vm0, %v5361_v14, 0.0  ;;  %v4098_v31 = vmul.f32 %v5361_v14, %v5361_v14  ;;  %v5308_v36 = vpop.f32.mrb[12].mxu0 }
 0x1ff   : > { %v4037_v44 = vadd.f32 %v4036_v47, %v4035_v61  ;;  %v4138_v12 = vadd.f32 %v4137_v29, %v4136_v59  ;;  %v5363_v43 = vadd.f32 %v5362_v2, %v5308_v36  ;;  %v3854_v57 = vpop.f32.mrb[13].mxu0  ;;  %v4141_v54 = vsel %vm405_vm0, %v4099_v33, 0.0 }
 0x200   : > { %v4139_v48 = vsel %vm405_vm0, %v4098_v31, 0.0  ;;  %v5365_v8 = vadd.f32 %v5364_v51, %v3854_v57 }
 0x201   : > { %v4140_v32 = vadd.f32 %v4139_v48, %v4138_v12  ;;  %3998 = vst.msk [vmem:[%s6733_s11 + $0x68] sm:$0xff] %vm405_vm0, %v5363_v43  ;;  %v4101_v6 = vmul.f32 %v5363_v43, %v5363_v43  ;;  %v4039_v49 = vadd.f32 %v4038_v13, %v4037_v44  ;;  %v5114_v15 = vpop.f32.mrb[16].mxu1  ;;  %v4042_v55 = vsel %vm405_vm0, %v5363_v43, 0.0 }
 0x202   : > { %3997 = vst.msk [vmem:[%s6733_s11 + $0x60] sm:$0xff] %vm405_vm0, %v5365_v8  ;;  %v4040_v56 = vsel %vm405_vm0, %v5365_v8, 0.0  ;;  %v4100_v4 = vmul.f32 %v5365_v8, %v5365_v8  ;;  %v5311_v42 = vpop.f32.mrb[14].mxu0  ;;  %v2325_v5 = vpop.f32.mrb[17].mxu1  ;;  %v5370_v1 = vadd.f32 %v5114_v15, %v6724_v18 }
 0x203   : > { %v4041_v16 = vadd.f32 %v4040_v56, %v4039_v49  ;;  %v4142_v50 = vadd.f32 %v4141_v54, %v4140_v32  ;;  %v3864_v45 = vpop.f32.mrb[15].mxu0  ;;  %v5367_v17 = vadd.f32 %v5366_v37, %v5311_v42  ;;  %v4145_v62 = vsel %vm405_vm0, %v4101_v6, 0.0 }
 0x204   : > { %v4143_v58 = vsel %vm405_vm0, %v4100_v4, 0.0  ;;  %v5369_v60 = vadd.f32 %v5368_v52, %v3864_v45  ;;  %v5372_v21 = vadd.f32 %v6724_v18, %v2325_v5 }
 0x205   : > { %v4144_v63 = vadd.f32 %v4143_v58, %v4142_v50  ;;  %v4043_v3 = vadd.f32 %v4042_v55, %v4041_v16  ;;  %4000 = vst.msk [vmem:[%s6733_s11 + $0x78] sm:$0xff] %vm405_vm0, %v5367_v17  ;;  %v4103_v19 = vmul.f32 %v5367_v17, %v5367_v17  ;;  %v5117_v23 = vpop.f32.mrb[18].mxu1  ;;  %v4046_v40 = vsel %vm405_vm0, %v5367_v17, 0.0 }
 0x206   : > { %3999 = vst.msk [vmem:[%s6733_s11 + $0x70] sm:$0xff] %vm405_vm0, %v5369_v60  ;;  %v4044_v22 = vsel %vm405_vm0, %v5369_v60, 0.0  ;;  %v4102_v9 = vmul.f32 %v5369_v60, %v5369_v60  ;;  %v5314_v24 = vpop.f32.mrb[16].mxu0  ;;  %v2335_v30 = vpop.f32.mrb[19].mxu1  ;;  %v5374_v34 = vadd.f32 %v5117_v23, %v6724_v18 }
 0x207   : > { %v4045_v10 = vadd.f32 %v4044_v22, %v4043_v3  ;;  %v4146_v25 = vadd.f32 %v4145_v62, %v4144_v63  ;;  %v5371_v28 = vadd.f32 %v5370_v1, %v5314_v24  ;;  %v3874_v38 = vpop.f32.mrb[17].mxu0  ;;  %v4149_v46 = vsel %vm405_vm0, %v4103_v19, 0.0 }
 0x208   : > { %v4147_v39 = vsel %vm405_vm0, %v4102_v9, 0.0  ;;  %v5373_v27 = vadd.f32 %v5372_v21, %v3874_v38  ;;  %v5376_v20 = vadd.f32 %v6724_v18, %v2335_v30 }
 0x209   : > { %v4148_v26 = vadd.f32 %v4147_v39, %v4146_v25  ;;  %4002 = vst.msk [vmem:[%s6733_s11 + $0x88] sm:$0xff] %vm405_vm0, %v5371_v28  ;;  %v4105_v41 = vmul.f32 %v5371_v28, %v5371_v28  ;;  %v4047_v35 = vadd.f32 %v4046_v40, %v4045_v10  ;;  %v5120_v11 = vpop.f32.mrb[20].mxu1  ;;  %v4050_v61 = vsel %vm405_vm0, %v5371_v28, 0.0 }
 0x20a   : > { %4001 = vst.msk [vmem:[%s6733_s11 + $0x80] sm:$0xff] %vm405_vm0, %v5373_v27  ;;  %v4048_v0 = vsel %vm405_vm0, %v5373_v27, 0.0  ;;  %v4104_v53 = vmul.f32 %v5373_v27, %v5373_v27  ;;  %v5317_v7 = vpop.f32.mrb[18].mxu0  ;;  %v2345_v51 = vpop.f32.mrb[21].mxu1  ;;  %v5378_v44 = vadd.f32 %v5120_v11, %v6724_v18 }
 0x20b   : > { %v4049_v14 = vadd.f32 %v4048_v0, %v4047_v35  ;;  %v4150_v2 = vadd.f32 %v4149_v46, %v4148_v26  ;;  %v3884_v59 = vpop.f32.mrb[19].mxu0  ;;  %v5375_v33 = vadd.f32 %v5374_v34, %v5317_v7  ;;  %v4153_v31 = vsel %vm405_vm0, %v4105_v41, 0.0 }
 0x20c   : > { %v4151_v29 = vsel %vm405_vm0, %v4104_v53, 0.0  ;;  %v5377_v47 = vadd.f32 %v5376_v20, %v3884_v59  ;;  %v5380_v57 = vadd.f32 %v6724_v18, %v2345_v51 }
 0x20d   : > { %v4152_v36 = vadd.f32 %v4151_v29, %v4150_v2  ;;  %v4051_v12 = vadd.f32 %v4050_v61, %v4049_v14  ;;  %4004 = vst.msk [vmem:[%s6733_s11 + $0x98] sm:$0xff] %vm405_vm0, %v5375_v33  ;;  %v4107_v43 = vmul.f32 %v5375_v33, %v5375_v33  ;;  %v5123_v8 = vpop.f32.mrb[22].mxu1  ;;  %v4054_v56 = vsel %vm405_vm0, %v5375_v33, 0.0 }
 0x20e   : > { %4003 = vst.msk [vmem:[%s6733_s11 + $0x90] sm:$0xff] %vm405_vm0, %v5377_v47  ;;  %v4052_v13 = vsel %vm405_vm0, %v5377_v47, 0.0  ;;  %v4106_v48 = vmul.f32 %v5377_v47, %v5377_v47  ;;  %v5320_v37 = vpop.f32.mrb[20].mxu0  ;;  %v2355_v52 = vpop.f32.mrb[23].mxu1  ;;  %v5382_v16 = vadd.f32 %v5123_v8, %v6724_v18 }
 0x20f   : > { %v4053_v32 = vadd.f32 %v4052_v13, %v4051_v12  ;;  %v4154_v6 = vadd.f32 %v4153_v31, %v4152_v36  ;;  %v5379_v49 = vadd.f32 %v5378_v44, %v5320_v37  ;;  %v3894_v54 = vpop.f32.mrb[21].mxu0  ;;  %v4157_v45 = vsel %vm405_vm0, %v4107_v43, 0.0 }
 0x210   : > { %v4155_v4 = vsel %vm405_vm0, %v4106_v48, 0.0  ;;  %v5381_v15 = vadd.f32 %v5380_v57, %v3894_v54  ;;  %v5384_v55 = vadd.f32 %v6724_v18, %v2355_v52 }
 0x211   : > { %v4156_v42 = vadd.f32 %v4155_v4, %v4154_v6  ;;  %4006 = vst.msk [vmem:[%s6733_s11 + $0xa8] sm:$0xff] %vm405_vm0, %v5379_v49  ;;  %v4109_v50 = vmul.f32 %v5379_v49, %v5379_v49  ;;  %v4055_v5 = vadd.f32 %v4054_v56, %v4053_v32  ;;  %v5126_v60 = vpop.f32.mrb[24].mxu1  ;;  %v4058_v21 = vsel %vm405_vm0, %v5379_v49, 0.0 }
 0x212   : > { %4005 = vst.msk [vmem:[%s6733_s11 + $0xa0] sm:$0xff] %vm405_vm0, %v5381_v15  ;;  %v4056_v58 = vsel %vm405_vm0, %v5381_v15, 0.0  ;;  %v4108_v17 = vmul.f32 %v5381_v15, %v5381_v15  ;;  %v5323_v62 = vpop.f32.mrb[22].mxu0  ;;  %v2365_v3 = vpop.f32.mrb[25].mxu1  ;;  %v5386_v25 = vadd.f32 %v5126_v60, %v6724_v18 }
 0x213   : > { %v4057_v63 = vadd.f32 %v4056_v58, %v4055_v5  ;;  %v4158_v1 = vadd.f32 %v4157_v45, %v4156_v42  ;;  %v3904_v19 = vpop.f32.mrb[23].mxu0  ;;  %v5383_v9 = vadd.f32 %v5382_v16, %v5323_v62  ;;  %v4161_v24 = vsel %vm405_vm0, %v4109_v50, 0.0 }
 0x214   : > { %v4159_v22 = vsel %vm405_vm0, %v4108_v17, 0.0  ;;  %v5385_v23 = vadd.f32 %v5384_v55, %v3904_v19  ;;  %v5388_v38 = vadd.f32 %v6724_v18, %v2365_v3 }
 0x215   : > { %v4160_v10 = vadd.f32 %v4159_v22, %v4158_v1  ;;  %v4059_v28 = vadd.f32 %v4058_v21, %v4057_v63  ;;  %4008 = vst.msk [vmem:[%s6733_s11 + $0xb8] sm:$0xff] %vm405_vm0, %v5383_v9  ;;  %v4111_v30 = vmul.f32 %v5383_v9, %v5383_v9  ;;  %v5129_v27 = vpop.f32.mrb[26].mxu1  ;;  %v4062_v0 = vsel %vm405_vm0, %v5383_v9, 0.0 }
 0x216   : > { %4007 = vst.msk [vmem:[%s6733_s11 + $0xb0] sm:$0xff] %vm405_vm0, %v5385_v23  ;;  %v4060_v40 = vsel %vm405_vm0, %v5385_v23, 0.0  ;;  %v4110_v39 = vmul.f32 %v5385_v23, %v5385_v23  ;;  %v5326_v26 = vpop.f32.mrb[24].mxu0  ;;  %v2375_v46 = vpop.f32.mrb[27].mxu1  ;;  %v5390_v14 = vadd.f32 %v5129_v27, %v6724_v18 }
 0x217   : > { %v4061_v34 = vadd.f32 %v4060_v40, %v4059_v28  ;;  %v4162_v41 = vadd.f32 %v4161_v24, %v4160_v10  ;;  %v5387_v35 = vadd.f32 %v5386_v25, %v5326_v26  ;;  %v3914_v20 = vpop.f32.mrb[25].mxu0  ;;  %v4165_v59 = vsel %vm405_vm0, %v4111_v30, 0.0 }
 0x218   : > { %v4163_v53 = vsel %vm405_vm0, %v4110_v39, 0.0  ;;  %v5389_v11 = vadd.f32 %v5388_v38, %v3914_v20  ;;  %v5392_v61 = vadd.f32 %v6724_v18, %v2375_v46 }
 0x219   : > { %v4164_v7 = vadd.f32 %v4163_v53, %v4162_v41  ;;  %4010 = vst.msk [vmem:[%s6733_s11 + $0xc8] sm:$0xff] %vm405_vm0, %v5387_v35  ;;  %v4113_v2 = vmul.f32 %v5387_v35, %v5387_v35  ;;  %v4063_v51 = vadd.f32 %v4062_v0, %v4061_v34  ;;  %v5132_v47 = vpop.f32.mrb[28].mxu1  ;;  %v4066_v57 = vsel %vm405_vm0, %v5387_v35, 0.0 }
 0x21a   : > { %4009 = vst.msk [vmem:[%s6733_s11 + $0xc0] sm:$0xff] %vm405_vm0, %v5389_v11  ;;  %v4064_v29 = vsel %vm405_vm0, %v5389_v11, 0.0  ;;  %v4112_v33 = vmul.f32 %v5389_v11, %v5389_v11  ;;  %v5329_v31 = vpop.f32.mrb[26].mxu0  ;;  %v2385_v12 = vpop.f32.mrb[29].mxu1  ;;  %v5394_v6 = vadd.f32 %v5132_v47, %v6724_v18 }
 0x21b   : > { %v4065_v36 = vadd.f32 %v4064_v29, %v4063_v51  ;;  %v4166_v44 = vadd.f32 %v4165_v59, %v4164_v7  ;;  %v3924_v43 = vpop.f32.mrb[27].mxu0  ;;  %v5391_v48 = vadd.f32 %v5390_v14, %v5329_v31  ;;  %v4169_v37 = vsel %vm405_vm0, %v4113_v2, 0.0 }
 0x21c   : > { %v4167_v13 = vsel %vm405_vm0, %v4112_v33, 0.0  ;;  %v5393_v8 = vadd.f32 %v5392_v61, %v3924_v43  ;;  %v5396_v54 = vadd.f32 %v6724_v18, %v2385_v12 }
 0x21d   : > { %v4168_v32 = vadd.f32 %v4167_v13, %v4166_v44  ;;  %v4067_v49 = vadd.f32 %v4066_v57, %v4065_v36  ;;  %4012 = vst.msk [vmem:[%s6733_s11 + $0xd8] sm:$0xff] %vm405_vm0, %v5391_v48  ;;  %v4115_v52 = vmul.f32 %v5391_v48, %v5391_v48  ;;  %v5135_v15 = vpop.f32.mrb[30].mxu1  ;;  %v4070_v58 = vsel %vm405_vm0, %v5391_v48, 0.0 }
 0x21e   : > { %4011 = vst.msk [vmem:[%s6733_s11 + $0xd0] sm:$0xff] %vm405_vm0, %v5393_v8  ;;  %v4068_v56 = vsel %vm405_vm0, %v5393_v8, 0.0  ;;  %v4114_v4 = vmul.f32 %v5393_v8, %v5393_v8  ;;  %v5332_v42 = vpop.f32.mrb[28].mxu0  ;;  %v2395_v45 = vpop.f32.mrb[31].mxu1  ;;  %v5398_v1 = vadd.f32 %v5135_v15, %v6724_v18 }
 0x21f   : > { %v4069_v16 = vadd.f32 %v4068_v56, %v4067_v49  ;;  %v4170_v50 = vadd.f32 %v4169_v37, %v4168_v32  ;;  %v5395_v5 = vadd.f32 %v5394_v6, %v5332_v42  ;;  %v3934_v55 = vpop.f32.mrb[29].mxu0  ;;  %v4173_v62 = vsel %vm405_vm0, %v4115_v52, 0.0 }
 0x220   : > { %v4171_v17 = vsel %vm405_vm0, %v4114_v4, 0.0  ;;  %v5397_v60 = vadd.f32 %v5396_v54, %v3934_v55  ;;  %v5400_v21 = vadd.f32 %v6724_v18, %v2395_v45 }
 0x221   : > { %v4172_v63 = vadd.f32 %v4171_v17, %v4170_v50  ;;  %4014 = vst.msk [vmem:[%s6733_s11 + $0xe8] sm:$0xff] %vm405_vm0, %v5395_v5  ;;  %v4071_v3 = vadd.f32 %v4070_v58, %v4069_v16  ;;  %v4117_v19 = vmul.f32 %v5395_v5, %v5395_v5  ;;  %v4074_v30 = vsel %vm405_vm0, %v5395_v5, 0.0 }
 0x222   : > { %4013 = vst.msk [vmem:[%s6733_s11 + $0xe0] sm:$0xff] %vm405_vm0, %v5397_v60  ;;  %v4072_v22 = vsel %vm405_vm0, %v5397_v60, 0.0  ;;  %v4116_v9 = vmul.f32 %v5397_v60, %v5397_v60  ;;  %v5335_v23 = vpop.f32.mrb[30].mxu0 }
 0x223   : > { %v4073_v24 = vadd.f32 %v4072_v22, %v4071_v3  ;;  %v4174_v10 = vadd.f32 %v4173_v62, %v4172_v63  ;;  %v5399_v25 = vadd.f32 %v5398_v1, %v5335_v23  ;;  %v3944_v28 = vpop.f32.mrb[31].mxu0  ;;  %v4177_v27 = vsel %vm405_vm0, %v4117_v19, 0.0 }
 0x224   : > { %v4175_v38 = vsel %vm405_vm0, %v4116_v9, 0.0  ;;  %v5401_v40 = vadd.f32 %v5400_v21, %v3944_v28 }
 0x225   : > { %v4176_v39 = vadd.f32 %v4175_v38, %v4174_v10  ;;  %4016 = vst.msk [vmem:[%s6733_s11 + $0xf8] sm:$0xff] %vm405_vm0, %v5399_v25  ;;  %v4075_v18 = vadd.f32 %v4074_v30, %v4073_v24  ;;  %v4119_v26 = vmul.f32 %v5399_v25, %v5399_v25  ;;  %v4078_v20 = vsel %vm405_vm0, %v5399_v25, 0.0 }
 0x226   : > { %4015 = vst.msk [vmem:[%s6733_s11 + $0xf0] sm:$0xff] %vm405_vm0, %v5401_v40  ;;  %v4076_v34 = vsel %vm405_vm0, %v5401_v40, 0.0  ;;  %v4118_v41 = vmul.f32 %v5401_v40, %v5401_v40 }
 0x227   : > { %v4077_v35 = vadd.f32 %v4076_v34, %v4075_v18  ;;  %v4178_v46 = vadd.f32 %v4177_v27, %v4176_v39  ;;  %v4181_v7 = vsel %vm405_vm0, %v4119_v26, 0.0 }
 0x228   : > { %v4179_v0 = vsel %vm405_vm0, %v4118_v41, 0.0 }
 0x229   : > { %v4079_v53 = vadd.f32 %v4078_v20, %v4077_v35  ;;  %v4180_v11 = vadd.f32 %v4179_v0, %v4178_v46 }
 0x22b   : > { %v4080_v14 = vrot.slane %v4079_v53, 4  ;;  %v4182_v2 = vadd.f32 %v4181_v7, %v4180_v11 }
 0x22d   : > { %v4081_v51 = vadd.f32 %v4080_v14, %v4079_v53  ;;  %v4183_v59 = vrot.slane %v4182_v2, 4 }
 0x22f   : > { %v4082_v61 = vrot.slane %v4081_v51, 2  ;;  %v4184_v29 = vadd.f32 %v4183_v59, %v4182_v2 }
 0x231   : > { %v4083_v33 = vadd.f32 %v4082_v61, %v4081_v51  ;;  %v4185_v47 = vrot.slane %v4184_v29, 2 }
 0x233   : > { %v4084_v31 = vrot.slane %v4083_v33, 1  ;;  %v4186_v36 = vadd.f32 %v4185_v47, %v4184_v29 }
 0x235   : > { %v4085_v44 = vadd.f32 %v4084_v31, %v4083_v33  ;;  %v4187_v12 = vrot.slane %v4186_v36, 1 }
 0x237   : > { %4087 = vst.msk [vmem:[%s262_s14] sm:$0x1] %vm4086_vm2, %v4085_v44  ;;  %v4188_v43 = vadd.f32 %v4187_v12, %v4186_v36 }
 0x239   : > { %4189 = vst.msk [vmem:[%s262_s14 + $0x1] sm:$0x1] %vm4086_vm2, %v4188_v43 }
 0x23a PF: > { %s17_s21 = sadd.s32 1, %s5642_s21  }
 0x23b   : > { %p14_p4 = scmp.ge.s32.totalorder %s17_s21, 4  }
 0x23d   :  { %16 = sbr.rel (!%p14_p4) target bundleno = 1 (0x1), region = 92 }

// kernel: up_forward.5
= control target key start
LH: loop header
LB: loop body
LE: loop exit
PB: predicated region body
PF: predicated region fallthrough
CT: control target
= control target key end

     0   :  { %s10675_s21 = smov 0   ;;  %s12676_s0 = inlined_call_operand.vmem [shape: f32[2,18,18,8], index: 0, kind: input, shape index: {}]   ;;  %s12677_s1 = inlined_call_operand.vmem [shape: f32[2,18,18,8], index: 1, kind: input, shape index: {}]   ;;  %s12678_s2 = inlined_call_operand.vmem [shape: f32[9,8,8], index: 2, kind: input, shape index: {}]   ;;  %s12679_s3 = inlined_call_operand.vmem [shape: f32[9,8,8], index: 3, kind: input, shape index: {}]   ;;  %s12680_s4 = inlined_call_operand.vmem [shape: f32[1,8], index: 4, kind: input, shape index: {}]   ;;  %s12681_s5 = inlined_call_operand.vmem [shape: f32[2,16,16,8], index: 5, kind: output, shape index: {0}]   ;;  %s12682_s6 = inlined_call_operand.vmem [shape: f32[2,2,8], index: 6, kind: output, shape index: {1}]  }
   0x1 LB: > { %s7563_s22 = sadd.s32 4294967295, %s10638_s21   ;;  %p7567_p0 = scmp.ge.s32.totalorder %s10638_s21, 1  ;;  %s10638_s21 = sphi %s10675_s21, %s17_s21  }
   0x2   : > { %p225_p1 = scmp.lt.s32.totalorder %s10638_s21, 3 }
   0x4   : > { %p226_p2 = pnand %p7567_p0, %p225_p1 }
   0x6   : > { %229 = sbr.rel (%p226_p2) target bundleno = 830 (0x33e), region = 40 }
   0xd   : > { %v355_v0 = vld [vmem:[%s12678_s2] sm:$0xff]  ;;  %p264_p3 = scmp.lt.s32.totalorder %s7563_s22, 1  ;;  %v8094_v3 = vld [vmem:[%s12678_s2 + $0x28] sm:$0xff]  ;;  %vm356_vm0 = vcmask 64512   ;;  %vm7361_vm1 = vcmask 57344  }
   0xe   : > { %v7997_v1 = vld [vmem:[%s12679_s3 + $0x20] sm:$0xff]  ;;  %9147 = vmatprep.subr.mxu1 %v355_v0  ;;  %v10729_v10 = vld [vmem:[%s12678_s2 + $0x8] sm:$0xff] }
   0xf   : > { %v710_v2 = vld [vmem:[%s12679_s3] sm:$0xff]  ;;  %9597 = vmatprep.subr.mxu0 %v7997_v1  ;;  %9148 = vmatpush3.msra.mxu1 %v355_v0  ;;  %s13032_s22 = smov (!%p264_p3, %s7563_s22), 1  ;;  %v10734_v11 = vld [vmem:[%s12679_s3 + $0x28] sm:$0xff] }
  0x10   : > { %9598 = vmatpush3.msra.mxu0 %v7997_v1  ;;  %9197 = vmatprep.subr.mxu1 %v710_v2  ;;  %s10623_s7 = smul.u32 432, %s13032_s22  ;;  %s7572_s28 = sshll.u32 %s13032_s22, 1 }
  0x11   : > { %9647 = vmatprep.subr.mxu0 %v8094_v3 }
  0x12   : > { %s10701_s10 = scalar_lea.vmem %s12676_s0, %s10623_s7  ;;  %s10706_s13 = scalar_lea.vmem %s12677_s1, %s10623_s7 }
  0x13   : > { %v291_v4 = vld [vmem:[%s10701_s10] sm:$0xff]  ;;  %v292_v6 = vld [vmem:[%s10701_s10 + $0x8] sm:$0xff]  ;;  %v293_v8 = vld [vmem:[%s10701_s10 + $0x18] sm:$0xff]  ;;  %s282_s7 = scalar_lea.vmem %s12682_s6, %s7572_s28 }
  0x14   : > { %v10710_v5 = vld [vmem:[%s10706_s13 + $0x19] sm:$0xff]  ;;  %9149 = vmatprep.mubr.msk.f32.mxu1 %vm356_vm0, %v291_v4  ;;  %v10717_v7 = vld [vmem:[%s10706_s13 + $0x21] sm:$0xff]  ;;  %v10721_v9 = vld [vmem:[%s10706_s13 + $0x31] sm:$0xff] }
  0x15   : > { %9599 = vmatprep.mubr.msk.f32.mxu0 %vm356_vm0, %v10710_v5  ;;  %9150 = vmatmul.mubr.msk.f32.vlgmr.msra.gmra.mrb[0].mxu1 %vm356_vm0, %v292_v6  ;;  %v294_v12 = vld [vmem:[%s10701_s10 + $0x20] sm:$0xff]  ;;  %v10744_v14 = vld [vmem:[%s10701_s10 + $0x30] sm:$0xff]  ;;  %v10759_v16 = vld [vmem:[%s10701_s10 + $0x38] sm:$0xff] }
  0x16   : > { %9600 = vmatmul.mubr.msk.f32.vlgmr.msra.gmra.mrb[0].mxu0 %vm356_vm0, %v10717_v7  ;;  %9198 = vmatpush3.msra.mxu1 %v710_v2  ;;  %v10738_v13 = vld [vmem:[%s10706_s13 + $0x39] sm:$0xff]  ;;  %v10747_v15 = vld [vmem:[%s10706_s13 + $0x49] sm:$0xff]  ;;  %v10762_v17 = vld [vmem:[%s10706_s13 + $0x51] sm:$0xff] }
  0x17   : > { %9648 = vmatpush3.msra.mxu0 %v8094_v3  ;;  %9152 = vmatprep.mubr.msk.f32.mxu1 %vm356_vm0, %v293_v8  ;;  %v10765_v18 = vld [vmem:[%s10701_s10 + $0x48] sm:$0xff]  ;;  %v10779_v20 = vld [vmem:[%s10701_s10 + $0x50] sm:$0xff]  ;;  %v10785_v22 = vld [vmem:[%s10701_s10 + $0x60] sm:$0xff] }
  0x18   : > { %9602 = vmatprep.mubr.msk.f32.mxu0 %vm356_vm0, %v10721_v9  ;;  %9247 = vmatprep.subr.mxu1 %v10729_v10  ;;  %v10768_v19 = vld [vmem:[%s10706_s13 + $0x61] sm:$0xff]  ;;  %v10782_v21 = vld [vmem:[%s10706_s13 + $0x69] sm:$0xff]  ;;  %v10788_v23 = vld [vmem:[%s10706_s13 + $0x79] sm:$0xff] }
  0x19   : > { %9697 = vmatprep.subr.mxu0 %v10734_v11  ;;  %9153 = vmatmul.mubr.msk.f32.gmra.mrb[2].mxu1 %vm356_vm0, %v294_v12  ;;  %v10799_v24 = vld [vmem:[%s10701_s10 + $0x68] sm:$0xff]  ;;  %v10805_v26 = vld [vmem:[%s10701_s10 + $0x78] sm:$0xff]  ;;  %v10819_v28 = vld [vmem:[%s10701_s10 + $0x80] sm:$0xff] }
  0x1a   : > { %9603 = vmatmul.mubr.msk.f32.gmra.mrb[2].mxu0 %vm356_vm0, %v10738_v13  ;;  %9155 = vmatprep.mubr.msk.f32.mxu1 %vm356_vm0, %v10744_v14  ;;  %v10802_v25 = vld [vmem:[%s10706_s13 + $0x81] sm:$0xff]  ;;  %v10808_v27 = vld [vmem:[%s10706_s13 + $0x91] sm:$0xff]  ;;  %v10822_v29 = vld [vmem:[%s10706_s13 + $0x99] sm:$0xff] }
  0x1b   : > { %9605 = vmatprep.mubr.msk.f32.mxu0 %vm356_vm0, %v10747_v15  ;;  %v10825_v30 = vld [vmem:[%s10701_s10 + $0x90] sm:$0xff]  ;;  %v10839_v32 = vld [vmem:[%s10701_s10 + $0x98] sm:$0xff]  ;;  %v10845_v34 = vld [vmem:[%s10701_s10 + $0xa8] sm:$0xff] }
  0x1c   : > { %v10828_v31 = vld [vmem:[%s10706_s13 + $0xa9] sm:$0xff]  ;;  %v10842_v33 = vld [vmem:[%s10706_s13 + $0xb1] sm:$0xff]  ;;  %v10848_v35 = vld [vmem:[%s10706_s13 + $0xc1] sm:$0xff] }
  0x1d   : > { %9156 = vmatmul.mubr.msk.f32.gmra.mrb[4].mxu1 %vm356_vm0, %v10759_v16  ;;  %v10859_v36 = vld [vmem:[%s10701_s10 + $0xb0] sm:$0xff]  ;;  %v10865_v38 = vld [vmem:[%s10701_s10 + $0xc0] sm:$0xff]  ;;  %v10879_v40 = vld [vmem:[%s10701_s10 + $0xc8] sm:$0xff] }
  0x1e   : > { %9606 = vmatmul.mubr.msk.f32.gmra.mrb[4].mxu0 %vm356_vm0, %v10762_v17  ;;  %9158 = vmatprep.mubr.msk.f32.mxu1 %vm356_vm0, %v10765_v18  ;;  %v10862_v37 = vld [vmem:[%s10706_s13 + $0xc9] sm:$0xff]  ;;  %v10868_v39 = vld [vmem:[%s10706_s13 + $0xd9] sm:$0xff]  ;;  %v10882_v41 = vld [vmem:[%s10706_s13 + $0xe1] sm:$0xff] }
  0x1f   : > { %9608 = vmatprep.mubr.msk.f32.mxu0 %vm356_vm0, %v10768_v19  ;;  %v10885_v42 = vld [vmem:[%s10701_s10 + $0xd8] sm:$0xff]  ;;  %v10899_v44 = vld [vmem:[%s10701_s10 + $0xe0] sm:$0xff]  ;;  %v10905_v46 = vld [vmem:[%s10701_s10 + $0xf0] sm:$0xff] }
  0x20   : > { %v10888_v43 = vld [vmem:[%s10706_s13 + $0xf1] sm:$0xff]  ;;  %v10902_v45 = vld [vmem:[%s10706_s13 + $0xf9] sm:$0xff]  ;;  %v10908_v47 = vld [vmem:[%s10706_s13 + $0x109] sm:$0xff] }
  0x21   : > { %9159 = vmatmul.mubr.msk.f32.gmra.mrb[6].mxu1 %vm356_vm0, %v10779_v20  ;;  %v10919_v48 = vld [vmem:[%s10701_s10 + $0xf8] sm:$0xff]  ;;  %v10925_v50 = vld [vmem:[%s10701_s10 + $0x108] sm:$0xff]  ;;  %v10939_v52 = vld [vmem:[%s10701_s10 + $0x110] sm:$0xff] }
  0x22   : > { %9609 = vmatmul.mubr.msk.f32.gmra.mrb[6].mxu0 %vm356_vm0, %v10782_v21  ;;  %9161 = vmatprep.mubr.msk.f32.mxu1 %vm356_vm0, %v10785_v22  ;;  %v10922_v49 = vld [vmem:[%s10706_s13 + $0x111] sm:$0xff]  ;;  %v10928_v51 = vld [vmem:[%s10706_s13 + $0x121] sm:$0xff]  ;;  %v10942_v53 = vld [vmem:[%s10706_s13 + $0x129] sm:$0xff] }
  0x23   : > { %9611 = vmatprep.mubr.msk.f32.mxu0 %vm356_vm0, %v10788_v23  ;;  %v10945_v54 = vld [vmem:[%s10701_s10 + $0x120] sm:$0xff]  ;;  %v10959_v56 = vld [vmem:[%s10701_s10 + $0x128] sm:$0xff]  ;;  %v10965_v58 = vld [vmem:[%s10701_s10 + $0x138] sm:$0xff] }
  0x24   : > { %v10948_v55 = vld [vmem:[%s10706_s13 + $0x139] sm:$0xff]  ;;  %v10962_v57 = vld [vmem:[%s10706_s13 + $0x141] sm:$0xff]  ;;  %v10968_v59 = vld [vmem:[%s10706_s13 + $0x151] sm:$0xff] }
  0x25   : > { %9162 = vmatmul.mubr.msk.f32.gmra.mrb[8].mxu1 %vm356_vm0, %v10799_v24  ;;  %12799 = vst [vmem:[#allocation2_spill] sm:$0xff] %v10968_v59  ;;  %v10979_v60 = vld [vmem:[%s10701_s10 + $0x140] sm:$0xff]  ;;  %v10985_v62 = vld [vmem:[%s10701_s10 + $0x150] sm:$0xff]  ;;  %v10999_v0 = vld [vmem:[%s10701_s10 + $0x158] sm:$0xff] }
  0x26   : > { %9612 = vmatmul.mubr.msk.f32.gmra.mrb[8].mxu0 %vm356_vm0, %v10802_v25  ;;  %9164 = vmatprep.mubr.msk.f32.mxu1 %vm356_vm0, %v10805_v26  ;;  %v10982_v61 = vld [vmem:[%s10706_s13 + $0x159] sm:$0xff]  ;;  %v10988_v63 = vld [vmem:[%s10706_s13 + $0x169] sm:$0xff]  ;;  %v11002_v1 = vld [vmem:[%s10706_s13 + $0x171] sm:$0xff] }
  0x27   : > { %9614 = vmatprep.mubr.msk.f32.mxu0 %vm356_vm0, %v10808_v27  ;;  %12800 = vst [vmem:[#allocation3_spill] sm:$0xff] %v10982_v61  ;;  %12801 = vst [vmem:[#allocation4_spill] sm:$0xff] %v10988_v63  ;;  %v11005_v2 = vld [vmem:[%s10701_s10 + $0x168] sm:$0xff]  ;;  %v11016_v4 = vld [vmem:[%s10701_s10 + $0x170] sm:$0xff] }
  0x28   : > { %12802 = vst [vmem:[#allocation5_spill] sm:$0xff] %v11002_v1  ;;  %v7962_v3 = vld [vmem:[%s10706_s13 + $0x181] sm:$0xff]  ;;  %v7963_v6 = vld [vmem:[%s10706_s13 + $0x189] sm:$0xff] }
  0x29   : > { %9165 = vmatmul.mubr.msk.f32.gmra.mrb[10].mxu1 %vm356_vm0, %v10819_v28  ;;  %v323_v8 = vld [vmem:[%s10706_s13] sm:$0xff] }
  0x2a   : > { %9615 = vmatmul.mubr.msk.f32.gmra.mrb[10].mxu0 %vm356_vm0, %v10822_v29  ;;  %9167 = vmatprep.mubr.msk.f32.mxu1 %vm356_vm0, %v10825_v30  ;;  %v11021_v12 = vld [vmem:[%s10701_s10 + $0x1a] sm:$0xff] }
  0x2b   : > { %9617 = vmatprep.mubr.msk.f32.mxu0 %vm356_vm0, %v10828_v31  ;;  %12803 = vst [vmem:[#allocation6_spill] sm:$0xff] %v11021_v12 }
  0x2d   : > { %9168 = vmatmul.mubr.msk.f32.gmra.mrb[12].mxu1 %vm356_vm0, %v10839_v32 }
  0x2e   : > { %9618 = vmatmul.mubr.msk.f32.gmra.mrb[12].mxu0 %vm356_vm0, %v10842_v33  ;;  %9170 = vmatprep.mubr.msk.f32.mxu1 %vm356_vm0, %v10845_v34 }
  0x2f   : > { %9620 = vmatprep.mubr.msk.f32.mxu0 %vm356_vm0, %v10848_v35 }
  0x31   : > { %9171 = vmatmul.mubr.msk.f32.gmra.mrb[14].mxu1 %vm356_vm0, %v10859_v36 }
  0x32   : > { %9621 = vmatmul.mubr.msk.f32.gmra.mrb[14].mxu0 %vm356_vm0, %v10862_v37  ;;  %9173 = vmatprep.mubr.msk.f32.mxu1 %vm356_vm0, %v10865_v38 }
  0x33   : > { %9623 = vmatprep.mubr.msk.f32.mxu0 %vm356_vm0, %v10868_v39 }
  0x35   : > { %9174 = vmatmul.mubr.msk.f32.gmra.mrb[16].mxu1 %vm356_vm0, %v10879_v40 }
  0x36   : > { %9624 = vmatmul.mubr.msk.f32.gmra.mrb[16].mxu0 %vm356_vm0, %v10882_v41  ;;  %9176 = vmatprep.mubr.msk.f32.mxu1 %vm356_vm0, %v10885_v42 }
  0x37   : > { %9626 = vmatprep.mubr.msk.f32.mxu0 %vm356_vm0, %v10888_v43 }
  0x39   : > { %9177 = vmatmul.mubr.msk.f32.gmra.mrb[18].mxu1 %vm356_vm0, %v10899_v44 }
  0x3a   : > { %9627 = vmatmul.mubr.msk.f32.gmra.mrb[18].mxu0 %vm356_vm0, %v10902_v45  ;;  %9179 = vmatprep.mubr.msk.f32.mxu1 %vm356_vm0, %v10905_v46 }
  0x3b   : > { %9629 = vmatprep.mubr.msk.f32.mxu0 %vm356_vm0, %v10908_v47 }
  0x3d   : > { %9180 = vmatmul.mubr.msk.f32.gmra.mrb[20].mxu1 %vm356_vm0, %v10919_v48 }
  0x3e   : > { %9630 = vmatmul.mubr.msk.f32.gmra.mrb[20].mxu0 %vm356_vm0, %v10922_v49  ;;  %9182 = vmatprep.mubr.msk.f32.mxu1 %vm356_vm0, %v10925_v50 }
  0x3f   : > { %9632 = vmatprep.mubr.msk.f32.mxu0 %vm356_vm0, %v10928_v51 }
  0x41   : > { %9183 = vmatmul.mubr.msk.f32.gmra.mrb[22].mxu1 %vm356_vm0, %v10939_v52 }
  0x42   : > { %9633 = vmatmul.mubr.msk.f32.gmra.mrb[22].mxu0 %vm356_vm0, %v10942_v53  ;;  %9185 = vmatprep.mubr.msk.f32.mxu1 %vm356_vm0, %v10945_v54 }
  0x43   : > { %9635 = vmatprep.mubr.msk.f32.mxu0 %vm356_vm0, %v10948_v55 }
  0x45   : > { %9186 = vmatmul.mubr.msk.f32.gmra.mrb[24].mxu1 %vm356_vm0, %v10959_v56 }
  0x46   : > { %9636 = vmatmul.mubr.msk.f32.gmra.mrb[24].mxu0 %vm356_vm0, %v10962_v57  ;;  %9188 = vmatprep.mubr.msk.f32.mxu1 %vm356_vm0, %v10965_v58 }
  0x47   : > { %9638 = vmatprep.mubr.msk.f32.mxu0 %vm356_vm0, %v10968_v59  ;;  %v11063_v59 = vld [vmem:[%s10701_s10 + $0x4a] sm:$0xff] }
  0x48   : > { %12808 = vst [vmem:[#allocation11_spill] sm:$0xff] %v11063_v59 }
  0x49   : > { %9189 = vmatmul.mubr.msk.f32.gmra.mrb[26].mxu1 %vm356_vm0, %v10979_v60 }
  0x4a   : > { %9639 = vmatmul.mubr.msk.f32.gmra.mrb[26].mxu0 %vm356_vm0, %v10982_v61  ;;  %9191 = vmatprep.mubr.msk.f32.mxu1 %vm356_vm0, %v10985_v62  ;;  %v11035_v61 = vld [vmem:[%s10701_s10 + $0x32] sm:$0xff] }
  0x4b   : > { %9641 = vmatprep.mubr.msk.f32.mxu0 %vm356_vm0, %v10988_v63  ;;  %v325_v63 = vld [vmem:[%s10706_s13 + $0x18] sm:$0xff]  ;;  %12805 = vst [vmem:[#allocation8_spill] sm:$0xff] %v11035_v61 }
  0x4d   : > { %9192 = vmatmul.mubr.msk.f32.gmra.mrb[28].mxu1 %vm356_vm0, %v10999_v0 }
  0x4e   : > { %9642 = vmatmul.mubr.msk.f32.gmra.mrb[28].mxu0 %vm356_vm0, %v11002_v1  ;;  %9194 = vmatprep.mubr.msk.f32.mxu1 %vm356_vm0, %v11005_v2  ;;  %v11031_v1 = vld [vmem:[%s10701_s10 + $0x22] sm:$0xff] }
  0x4f   : > { %9644 = vmatprep.mubr.msk.f32.mxu0 %vm356_vm0, %v7962_v3  ;;  %v324_v3 = vld [vmem:[%s10706_s13 + $0x8] sm:$0xff]  ;;  %12804 = vst [vmem:[#allocation7_spill] sm:$0xff] %v11031_v1 }
  0x51   : > { %9195 = vmatmul.mubr.msk.f32.gmra.mrb[30].mxu1 %vm356_vm0, %v11016_v4 }
  0x52   : > { %9645 = vmatmul.mubr.msk.f32.gmra.mrb[30].mxu0 %vm356_vm0, %v7963_v6  ;;  %9199 = vmatprep.mubr.msk.f32.mxu1 %vm356_vm0, %v323_v8  ;;  %v11043_v6 = vld [vmem:[%s12679_s3 + $0x8] sm:$0xff]  ;;  %v11048_v8 = vld [vmem:[%s12678_s2 + $0x30] sm:$0xff] }
  0x53   : > { %9649 = vmatprep.mubr.msk.f32.mxu0 %vm356_vm0, %v11021_v12  ;;  %v11060_v12 = vld [vmem:[%s10706_s13 + $0x30] sm:$0xff] }
  0x54   : > { %12807 = vst [vmem:[#allocation10_spill] sm:$0xff] %v11060_v12 }
  0x55   : > { %9200 = vmatmul.mubr.msk.f32.vlgmr.msra.gmra.mrb[0].mxu1 %vm356_vm0, %v324_v3  ;;  %v326_v3 = vld [vmem:[%s10706_s13 + $0x20] sm:$0xff] }
  0x56   : > { %9650 = vmatmul.mubr.msk.f32.vlgmr.msra.gmra.mrb[0].mxu0 %vm356_vm0, %v11031_v1  ;;  %9248 = vmatpush3.msra.mxu1 %v10729_v10  ;;  %v11054_v1 = vld [vmem:[%s10701_s10 + $0x3a] sm:$0xff] }
  0x57   : > { %9698 = vmatpush3.msra.mxu0 %v10734_v11  ;;  %12806 = vst [vmem:[#allocation9_spill] sm:$0xff] %v11054_v1  ;;  %9202 = vmatprep.mubr.msk.f32.mxu1 %vm356_vm0, %v325_v63  ;;  %v11075_v10 = vld [vmem:[%s10706_s13 + $0x38] sm:$0xff]  ;;  %v11081_v63 = vld [vmem:[%s10706_s13 + $0x48] sm:$0xff] }
  0x58   : > { %9652 = vmatprep.mubr.msk.f32.mxu0 %vm356_vm0, %v11035_v61  ;;  %9297 = vmatprep.subr.mxu1 %v11043_v6  ;;  %12809 = vst [vmem:[#allocation12_spill] sm:$0xff] %v11075_v10  ;;  %v11078_v11 = vld [vmem:[%s10701_s10 + $0x52] sm:$0xff]  ;;  %12811 = vst [vmem:[#allocation14_spill] sm:$0xff] %v11081_v63  ;;  %v11084_v61 = vld [vmem:[%s10701_s10 + $0x62] sm:$0xff] }
  0x59   : > { %9747 = vmatprep.subr.mxu0 %v11048_v8  ;;  %9203 = vmatmul.mubr.msk.f32.gmra.mrb[2].mxu1 %vm356_vm0, %v326_v3  ;;  %12810 = vst [vmem:[#allocation13_spill] sm:$0xff] %v11078_v11  ;;  %12812 = vst [vmem:[#allocation15_spill] sm:$0xff] %v11084_v61  ;;  %v11095_v3 = vld [vmem:[%s10706_s13 + $0x50] sm:$0xff] }
  0x5a   : > { %9653 = vmatmul.mubr.msk.f32.gmra.mrb[2].mxu0 %vm356_vm0, %v11054_v1  ;;  %9205 = vmatprep.mubr.msk.f32.mxu1 %vm356_vm0, %v11060_v12  ;;  %12813 = vst [vmem:[#allocation16_spill] sm:$0xff] %v11095_v3  ;;  %v11101_v1 = vld [vmem:[%s10706_s13 + $0x60] sm:$0xff] }
  0x5b   : > { %9655 = vmatprep.mubr.msk.f32.mxu0 %vm356_vm0, %v11063_v59  ;;  %v11098_v59 = vld [vmem:[%s10701_s10 + $0x6a] sm:$0xff]  ;;  %12815 = vst [vmem:[#allocation18_spill] sm:$0xff] %v11101_v1  ;;  %v11104_v12 = vld [vmem:[%s10701_s10 + $0x7a] sm:$0xff] }
  0x5c   : > { %12814 = vst [vmem:[#allocation17_spill] sm:$0xff] %v11098_v59  ;;  %12816 = vst [vmem:[#allocation19_spill] sm:$0xff] %v11104_v12 }
  0x5d   : > { %9206 = vmatmul.mubr.msk.f32.gmra.mrb[4].mxu1 %vm356_vm0, %v11075_v10  ;;  %v11124_v10 = vld [vmem:[%s10701_s10 + $0x92] sm:$0xff] }
  0x5e   : > { %9656 = vmatmul.mubr.msk.f32.gmra.mrb[4].mxu0 %vm356_vm0, %v11078_v11  ;;  %9208 = vmatprep.mubr.msk.f32.mxu1 %vm356_vm0, %v11081_v63  ;;  %v11118_v11 = vld [vmem:[%s10701_s10 + $0x82] sm:$0xff]  ;;  %v11121_v63 = vld [vmem:[%s10706_s13 + $0x78] sm:$0xff]  ;;  %12820 = vst [vmem:[#allocation23_spill] sm:$0xff] %v11124_v10 }
  0x5f   : > { %9658 = vmatprep.mubr.msk.f32.mxu0 %vm356_vm0, %v11084_v61  ;;  %v11115_v61 = vld [vmem:[%s10706_s13 + $0x68] sm:$0xff]  ;;  %12818 = vst [vmem:[#allocation21_spill] sm:$0xff] %v11118_v11  ;;  %12819 = vst [vmem:[#allocation22_spill] sm:$0xff] %v11121_v63 }
  0x60   : > { %12817 = vst [vmem:[#allocation20_spill] sm:$0xff] %v11115_v61 }
  0x61   : > { %9209 = vmatmul.mubr.msk.f32.gmra.mrb[6].mxu1 %vm356_vm0, %v11095_v3  ;;  %v11144_v3 = vld [vmem:[%s10701_s10 + $0xaa] sm:$0xff] }
  0x62   : > { %9659 = vmatmul.mubr.msk.f32.gmra.mrb[6].mxu0 %vm356_vm0, %v11098_v59  ;;  %9211 = vmatprep.mubr.msk.f32.mxu1 %vm356_vm0, %v11101_v1  ;;  %v11138_v59 = vld [vmem:[%s10701_s10 + $0x9a] sm:$0xff]  ;;  %v11141_v1 = vld [vmem:[%s10706_s13 + $0x90] sm:$0xff]  ;;  %12824 = vst [vmem:[#allocation27_spill] sm:$0xff] %v11144_v3 }
  0x63   : > { %9661 = vmatprep.mubr.msk.f32.mxu0 %vm356_vm0, %v11104_v12  ;;  %v11135_v12 = vld [vmem:[%s10706_s13 + $0x80] sm:$0xff]  ;;  %12822 = vst [vmem:[#allocation25_spill] sm:$0xff] %v11138_v59  ;;  %12823 = vst [vmem:[#allocation26_spill] sm:$0xff] %v11141_v1 }
  0x64   : > { %12821 = vst [vmem:[#allocation24_spill] sm:$0xff] %v11135_v12 }
  0x65   : > { %9212 = vmatmul.mubr.msk.f32.gmra.mrb[8].mxu1 %vm356_vm0, %v11115_v61  ;;  %v11164_v61 = vld [vmem:[%s10701_s10 + $0xc2] sm:$0xff] }
  0x66   : > { %9662 = vmatmul.mubr.msk.f32.gmra.mrb[8].mxu0 %vm356_vm0, %v11118_v11  ;;  %9214 = vmatprep.mubr.msk.f32.mxu1 %vm356_vm0, %v11121_v63  ;;  %v11158_v11 = vld [vmem:[%s10701_s10 + $0xb2] sm:$0xff]  ;;  %v11161_v63 = vld [vmem:[%s10706_s13 + $0xa8] sm:$0xff]  ;;  %12828 = vst [vmem:[#allocation31_spill] sm:$0xff] %v11164_v61 }
  0x67   : > { %9664 = vmatprep.mubr.msk.f32.mxu0 %vm356_vm0, %v11124_v10  ;;  %v11155_v10 = vld [vmem:[%s10706_s13 + $0x98] sm:$0xff]  ;;  %12826 = vst [vmem:[#allocation29_spill] sm:$0xff] %v11158_v11  ;;  %12827 = vst [vmem:[#allocation30_spill] sm:$0xff] %v11161_v63 }
  0x68   : > { %12825 = vst [vmem:[#allocation28_spill] sm:$0xff] %v11155_v10 }
  0x69   : > { %9215 = vmatmul.mubr.msk.f32.gmra.mrb[10].mxu1 %vm356_vm0, %v11135_v12  ;;  %v11184_v12 = vld [vmem:[%s10701_s10 + $0xda] sm:$0xff] }
  0x6a   : > { %9665 = vmatmul.mubr.msk.f32.gmra.mrb[10].mxu0 %vm356_vm0, %v11138_v59  ;;  %9217 = vmatprep.mubr.msk.f32.mxu1 %vm356_vm0, %v11141_v1  ;;  %v11178_v59 = vld [vmem:[%s10701_s10 + $0xca] sm:$0xff]  ;;  %v11181_v1 = vld [vmem:[%s10706_s13 + $0xc0] sm:$0xff]  ;;  %12832 = vst [vmem:[#allocation35_spill] sm:$0xff] %v11184_v12 }
  0x6b   : > { %9667 = vmatprep.mubr.msk.f32.mxu0 %vm356_vm0, %v11144_v3  ;;  %v11175_v3 = vld [vmem:[%s10706_s13 + $0xb0] sm:$0xff]  ;;  %12830 = vst [vmem:[#allocation33_spill] sm:$0xff] %v11178_v59  ;;  %12831 = vst [vmem:[#allocation34_spill] sm:$0xff] %v11181_v1 }
  0x6c   : > { %12829 = vst [vmem:[#allocation32_spill] sm:$0xff] %v11175_v3 }
  0x6d   : > { %9218 = vmatmul.mubr.msk.f32.gmra.mrb[12].mxu1 %vm356_vm0, %v11155_v10  ;;  %v11204_v10 = vld [vmem:[%s10701_s10 + $0xf2] sm:$0xff] }
  0x6e   : > { %9668 = vmatmul.mubr.msk.f32.gmra.mrb[12].mxu0 %vm356_vm0, %v11158_v11  ;;  %9220 = vmatprep.mubr.msk.f32.mxu1 %vm356_vm0, %v11161_v63  ;;  %v11198_v11 = vld [vmem:[%s10701_s10 + $0xe2] sm:$0xff]  ;;  %v11201_v63 = vld [vmem:[%s10706_s13 + $0xd8] sm:$0xff]  ;;  %12836 = vst [vmem:[#allocation39_spill] sm:$0xff] %v11204_v10 }
  0x6f   : > { %9670 = vmatprep.mubr.msk.f32.mxu0 %vm356_vm0, %v11164_v61  ;;  %v11195_v61 = vld [vmem:[%s10706_s13 + $0xc8] sm:$0xff]  ;;  %12834 = vst [vmem:[#allocation37_spill] sm:$0xff] %v11198_v11  ;;  %12835 = vst [vmem:[#allocation38_spill] sm:$0xff] %v11201_v63 }
  0x70   : > { %12833 = vst [vmem:[#allocation36_spill] sm:$0xff] %v11195_v61 }
  0x71   : > { %9221 = vmatmul.mubr.msk.f32.gmra.mrb[14].mxu1 %vm356_vm0, %v11175_v3  ;;  %v11224_v3 = vld [vmem:[%s10701_s10 + $0x10a] sm:$0xff] }
  0x72   : > { %9671 = vmatmul.mubr.msk.f32.gmra.mrb[14].mxu0 %vm356_vm0, %v11178_v59  ;;  %9223 = vmatprep.mubr.msk.f32.mxu1 %vm356_vm0, %v11181_v1  ;;  %v11218_v59 = vld [vmem:[%s10701_s10 + $0xfa] sm:$0xff]  ;;  %v11221_v1 = vld [vmem:[%s10706_s13 + $0xf0] sm:$0xff]  ;;  %12840 = vst [vmem:[#allocation43_spill] sm:$0xff] %v11224_v3 }
  0x73   : > { %9673 = vmatprep.mubr.msk.f32.mxu0 %vm356_vm0, %v11184_v12  ;;  %v11215_v12 = vld [vmem:[%s10706_s13 + $0xe0] sm:$0xff]  ;;  %12838 = vst [vmem:[#allocation41_spill] sm:$0xff] %v11218_v59  ;;  %12839 = vst [vmem:[#allocation42_spill] sm:$0xff] %v11221_v1 }
  0x74   : > { %12837 = vst [vmem:[#allocation40_spill] sm:$0xff] %v11215_v12 }
  0x75   : > { %9224 = vmatmul.mubr.msk.f32.gmra.mrb[16].mxu1 %vm356_vm0, %v11195_v61  ;;  %v11244_v61 = vld [vmem:[%s10701_s10 + $0x122] sm:$0xff] }
  0x76   : > { %9674 = vmatmul.mubr.msk.f32.gmra.mrb[16].mxu0 %vm356_vm0, %v11198_v11  ;;  %9226 = vmatprep.mubr.msk.f32.mxu1 %vm356_vm0, %v11201_v63  ;;  %v11238_v11 = vld [vmem:[%s10701_s10 + $0x112] sm:$0xff]  ;;  %v11241_v63 = vld [vmem:[%s10706_s13 + $0x108] sm:$0xff]  ;;  %12844 = vst [vmem:[#allocation47_spill] sm:$0xff] %v11244_v61 }
  0x77   : > { %9676 = vmatprep.mubr.msk.f32.mxu0 %vm356_vm0, %v11204_v10  ;;  %v11235_v10 = vld [vmem:[%s10706_s13 + $0xf8] sm:$0xff]  ;;  %12842 = vst [vmem:[#allocation45_spill] sm:$0xff] %v11238_v11  ;;  %12843 = vst [vmem:[#allocation46_spill] sm:$0xff] %v11241_v63 }
  0x78   : > { %12841 = vst [vmem:[#allocation44_spill] sm:$0xff] %v11235_v10 }
  0x79   : > { %9227 = vmatmul.mubr.msk.f32.gmra.mrb[18].mxu1 %vm356_vm0, %v11215_v12  ;;  %v11264_v12 = vld [vmem:[%s10701_s10 + $0x13a] sm:$0xff] }
  0x7a   : > { %9677 = vmatmul.mubr.msk.f32.gmra.mrb[18].mxu0 %vm356_vm0, %v11218_v59  ;;  %9229 = vmatprep.mubr.msk.f32.mxu1 %vm356_vm0, %v11221_v1  ;;  %v11258_v59 = vld [vmem:[%s10701_s10 + $0x12a] sm:$0xff]  ;;  %v11261_v1 = vld [vmem:[%s10706_s13 + $0x120] sm:$0xff]  ;;  %12848 = vst [vmem:[#allocation51_spill] sm:$0xff] %v11264_v12 }
  0x7b   : > { %9679 = vmatprep.mubr.msk.f32.mxu0 %vm356_vm0, %v11224_v3  ;;  %v11255_v3 = vld [vmem:[%s10706_s13 + $0x110] sm:$0xff]  ;;  %12846 = vst [vmem:[#allocation49_spill] sm:$0xff] %v11258_v59  ;;  %12847 = vst [vmem:[#allocation50_spill] sm:$0xff] %v11261_v1 }
  0x7c   : > { %12845 = vst [vmem:[#allocation48_spill] sm:$0xff] %v11255_v3 }
  0x7d   : > { %9230 = vmatmul.mubr.msk.f32.gmra.mrb[20].mxu1 %vm356_vm0, %v11235_v10  ;;  %v11284_v10 = vld [vmem:[%s10701_s10 + $0x152] sm:$0xff] }
  0x7e   : > { %9680 = vmatmul.mubr.msk.f32.gmra.mrb[20].mxu0 %vm356_vm0, %v11238_v11  ;;  %9232 = vmatprep.mubr.msk.f32.mxu1 %vm356_vm0, %v11241_v63  ;;  %v11278_v11 = vld [vmem:[%s10701_s10 + $0x142] sm:$0xff]  ;;  %v11281_v63 = vld [vmem:[%s10706_s13 + $0x138] sm:$0xff]  ;;  %12852 = vst [vmem:[#allocation55_spill] sm:$0xff] %v11284_v10 }
  0x7f   : > { %9682 = vmatprep.mubr.msk.f32.mxu0 %vm356_vm0, %v11244_v61  ;;  %v11275_v61 = vld [vmem:[%s10706_s13 + $0x128] sm:$0xff]  ;;  %12850 = vst [vmem:[#allocation53_spill] sm:$0xff] %v11278_v11  ;;  %12851 = vst [vmem:[#allocation54_spill] sm:$0xff] %v11281_v63 }
  0x80   : > { %12849 = vst [vmem:[#allocation52_spill] sm:$0xff] %v11275_v61 }
  0x81   : > { %9233 = vmatmul.mubr.msk.f32.gmra.mrb[22].mxu1 %vm356_vm0, %v11255_v3  ;;  %v11304_v3 = vld [vmem:[%s10701_s10 + $0x16a] sm:$0xff] }
  0x82   : > { %9683 = vmatmul.mubr.msk.f32.gmra.mrb[22].mxu0 %vm356_vm0, %v11258_v59  ;;  %9235 = vmatprep.mubr.msk.f32.mxu1 %vm356_vm0, %v11261_v1  ;;  %v11298_v59 = vld [vmem:[%s10701_s10 + $0x15a] sm:$0xff]  ;;  %v11301_v1 = vld [vmem:[%s10706_s13 + $0x150] sm:$0xff]  ;;  %12856 = vst [vmem:[#allocation59_spill] sm:$0xff] %v11304_v3 }
  0x83   : > { %9685 = vmatprep.mubr.msk.f32.mxu0 %vm356_vm0, %v11264_v12  ;;  %v11295_v12 = vld [vmem:[%s10706_s13 + $0x140] sm:$0xff]  ;;  %12854 = vst [vmem:[#allocation57_spill] sm:$0xff] %v11298_v59  ;;  %12855 = vst [vmem:[#allocation58_spill] sm:$0xff] %v11301_v1 }
  0x84   : > { %12853 = vst [vmem:[#allocation56_spill] sm:$0xff] %v11295_v12 }
  0x85   : > { %9236 = vmatmul.mubr.msk.f32.gmra.mrb[24].mxu1 %vm356_vm0, %v11275_v61  ;;  %v8060_v61 = vld [vmem:[%s10701_s10 + $0x182] sm:$0xff] }
  0x86   : > { %9686 = vmatmul.mubr.msk.f32.gmra.mrb[24].mxu0 %vm356_vm0, %v11278_v11  ;;  %9238 = vmatprep.mubr.msk.f32.mxu1 %vm356_vm0, %v11281_v63  ;;  %v11318_v11 = vld [vmem:[%s10701_s10 + $0x172] sm:$0xff]  ;;  %v11321_v63 = vld [vmem:[%s10706_s13 + $0x168] sm:$0xff] }
  0x87   : > { %9688 = vmatprep.mubr.msk.f32.mxu0 %vm356_vm0, %v11284_v10  ;;  %v11315_v10 = vld [vmem:[%s10706_s13 + $0x158] sm:$0xff]  ;;  %12858 = vst [vmem:[#allocation61_spill] sm:$0xff] %v11318_v11  ;;  %12859 = vst [vmem:[#allocation62_spill] sm:$0xff] %v11321_v63 }
  0x88   : > { %12857 = vst [vmem:[#allocation60_spill] sm:$0xff] %v11315_v10 }
  0x89   : > { %9239 = vmatmul.mubr.msk.f32.gmra.mrb[26].mxu1 %vm356_vm0, %v11295_v12  ;;  %v11337_v12 = vld [vmem:[%s10706_s13 + $0x1a] sm:$0xff] }
  0x8a   : > { %9689 = vmatmul.mubr.msk.f32.gmra.mrb[26].mxu0 %vm356_vm0, %v11298_v59  ;;  %9241 = vmatprep.mubr.msk.f32.mxu1 %vm356_vm0, %v11301_v1  ;;  %v8061_v59 = vld [vmem:[%s10701_s10 + $0x18a] sm:$0xff]  ;;  %v1064_v1 = vld [vmem:[%s10701_s10 + $0x1] sm:$0xff]  ;;  %12861 = vst [vmem:[#allocation64_spill] sm:$0xff] %v11337_v12 }
  0x8b   : > { %9691 = vmatprep.mubr.msk.f32.mxu0 %vm356_vm0, %v11304_v3  ;;  %v11332_v3 = vld [vmem:[%s10706_s13 + $0x170] sm:$0xff] }
  0x8c   : > { %12860 = vst [vmem:[#allocation63_spill] sm:$0xff] %v11332_v3 }
  0x8d   : > { %9242 = vmatmul.mubr.msk.f32.gmra.mrb[28].mxu1 %vm356_vm0, %v11315_v10  ;;  %v11351_v10 = vld [vmem:[%s10706_s13 + $0x32] sm:$0xff] }
  0x8e   : > { %9692 = vmatmul.mubr.msk.f32.gmra.mrb[28].mxu0 %vm356_vm0, %v11318_v11  ;;  %9244 = vmatprep.mubr.msk.f32.mxu1 %vm356_vm0, %v11321_v63  ;;  %v11347_v11 = vld [vmem:[%s10706_s13 + $0x22] sm:$0xff]  ;;  %v1066_v63 = vld [vmem:[%s10701_s10 + $0x19] sm:$0xff]  ;;  %12863 = vst [vmem:[#allocation66_spill] sm:$0xff] %v11351_v10 }
  0x8f   : > { %9694 = vmatprep.mubr.msk.f32.mxu0 %vm356_vm0, %v8060_v61  ;;  %v1065_v61 = vld [vmem:[%s10701_s10 + $0x9] sm:$0xff]  ;;  %12862 = vst [vmem:[#allocation65_spill] sm:$0xff] %v11347_v11 }
  0x91   : > { %9245 = vmatmul.mubr.msk.f32.gmra.mrb[30].mxu1 %vm356_vm0, %v11332_v3  ;;  %v11379_v3 = vld [vmem:[%s10706_s13 + $0x4a] sm:$0xff] }
  0x92   : > { %9695 = vmatmul.mubr.msk.f32.gmra.mrb[30].mxu0 %vm356_vm0, %v8061_v59  ;;  %9249 = vmatprep.mubr.msk.f32.mxu1 %vm356_vm0, %v1064_v1  ;;  %v11359_v59 = vld [vmem:[%s12678_s2 + $0x10] sm:$0xff]  ;;  %12866 = vst [vmem:[#allocation69_spill] sm:$0xff] %v11379_v3 }
  0x93   : > { %9699 = vmatprep.mubr.msk.f32.mxu0 %vm356_vm0, %v11337_v12  ;;  %v11364_v1 = vld [vmem:[%s12679_s3 + $0x30] sm:$0xff] }
  0x94   : > { %v11376_v12 = vld [vmem:[%s10701_s10 + $0x31] sm:$0xff] }
  0x95   : > { %9250 = vmatmul.mubr.msk.f32.vlgmr.msra.gmra.mrb[0].mxu1 %vm356_vm0, %v1065_v61  ;;  %v1067_v61 = vld [vmem:[%s10701_s10 + $0x21] sm:$0xff]  ;;  %12865 = vst [vmem:[#allocation68_spill] sm:$0xff] %v11376_v12 }
  0x96   : > { %9700 = vmatmul.mubr.msk.f32.vlgmr.msra.gmra.mrb[0].mxu0 %vm356_vm0, %v11347_v11  ;;  %9298 = vmatpush3.msra.mxu1 %v11043_v6  ;;  %v11370_v11 = vld [vmem:[%s10706_s13 + $0x3a] sm:$0xff] }
  0x97   : > { %9748 = vmatpush3.msra.mxu0 %v11048_v8  ;;  %12864 = vst [vmem:[#allocation67_spill] sm:$0xff] %v11370_v11  ;;  %9252 = vmatprep.mubr.msk.f32.mxu1 %vm356_vm0, %v1066_v63  ;;  %v11391_v6 = vld [vmem:[%s10701_s10 + $0x39] sm:$0xff]  ;;  %v11397_v63 = vld [vmem:[%s10701_s10 + $0x49] sm:$0xff] }
  0x98   : > { %9702 = vmatprep.mubr.msk.f32.mxu0 %vm356_vm0, %v11351_v10  ;;  %9347 = vmatprep.subr.mxu1 %v11359_v59  ;;  %12867 = vst [vmem:[#allocation70_spill] sm:$0xff] %v11391_v6  ;;  %v11394_v8 = vld [vmem:[%s10706_s13 + $0x52] sm:$0xff]  ;;  %12869 = vst [vmem:[#allocation72_spill] sm:$0xff] %v11397_v63  ;;  %v11400_v10 = vld [vmem:[%s10706_s13 + $0x62] sm:$0xff] }
  0x99   : > { %9797 = vmatprep.subr.mxu0 %v11364_v1  ;;  %9253 = vmatmul.mubr.msk.f32.gmra.mrb[2].mxu1 %vm356_vm0, %v1067_v61  ;;  %12868 = vst [vmem:[#allocation71_spill] sm:$0xff] %v11394_v8  ;;  %12870 = vst [vmem:[#allocation73_spill] sm:$0xff] %v11400_v10  ;;  %v11411_v61 = vld [vmem:[%s10701_s10 + $0x51] sm:$0xff] }
  0x9a   : > { %9703 = vmatmul.mubr.msk.f32.gmra.mrb[2].mxu0 %vm356_vm0, %v11370_v11  ;;  %9255 = vmatprep.mubr.msk.f32.mxu1 %vm356_vm0, %v11376_v12  ;;  %12871 = vst [vmem:[#allocation74_spill] sm:$0xff] %v11411_v61  ;;  %v11417_v11 = vld [vmem:[%s10701_s10 + $0x61] sm:$0xff] }
  0x9b   : > { %9705 = vmatprep.mubr.msk.f32.mxu0 %vm356_vm0, %v11379_v3  ;;  %v11414_v3 = vld [vmem:[%s10706_s13 + $0x6a] sm:$0xff]  ;;  %12873 = vst [vmem:[#allocation76_spill] sm:$0xff] %v11417_v11  ;;  %v11420_v12 = vld [vmem:[%s10706_s13 + $0x7a] sm:$0xff] }
  0x9c   : > { %12872 = vst [vmem:[#allocation75_spill] sm:$0xff] %v11414_v3  ;;  %12874 = vst [vmem:[#allocation77_spill] sm:$0xff] %v11420_v12 }
  0x9d   : > { %9256 = vmatmul.mubr.msk.f32.gmra.mrb[4].mxu1 %vm356_vm0, %v11391_v6  ;;  %v11440_v6 = vld [vmem:[%s10706_s13 + $0x92] sm:$0xff] }
  0x9e   : > { %9706 = vmatmul.mubr.msk.f32.gmra.mrb[4].mxu0 %vm356_vm0, %v11394_v8  ;;  %9258 = vmatprep.mubr.msk.f32.mxu1 %vm356_vm0, %v11397_v63  ;;  %v11434_v8 = vld [vmem:[%s10706_s13 + $0x82] sm:$0xff]  ;;  %v11437_v63 = vld [vmem:[%s10701_s10 + $0x79] sm:$0xff]  ;;  %12878 = vst [vmem:[#allocation81_spill] sm:$0xff] %v11440_v6 }
  0x9f   : > { %9708 = vmatprep.mubr.msk.f32.mxu0 %vm356_vm0, %v11400_v10  ;;  %v11431_v10 = vld [vmem:[%s10701_s10 + $0x69] sm:$0xff]  ;;  %12876 = vst [vmem:[#allocation79_spill] sm:$0xff] %v11434_v8  ;;  %12877 = vst [vmem:[#allocation80_spill] sm:$0xff] %v11437_v63 }
  0xa0   : > { %12875 = vst [vmem:[#allocation78_spill] sm:$0xff] %v11431_v10 }
  0xa1   : > { %9259 = vmatmul.mubr.msk.f32.gmra.mrb[6].mxu1 %vm356_vm0, %v11411_v61  ;;  %v11460_v61 = vld [vmem:[%s10706_s13 + $0xaa] sm:$0xff] }
  0xa2   : > { %9709 = vmatmul.mubr.msk.f32.gmra.mrb[6].mxu0 %vm356_vm0, %v11414_v3  ;;  %9261 = vmatprep.mubr.msk.f32.mxu1 %vm356_vm0, %v11417_v11  ;;  %v11454_v3 = vld [vmem:[%s10706_s13 + $0x9a] sm:$0xff]  ;;  %v11457_v11 = vld [vmem:[%s10701_s10 + $0x91] sm:$0xff]  ;;  %12882 = vst [vmem:[#allocation85_spill] sm:$0xff] %v11460_v61 }
  0xa3   : > { %9711 = vmatprep.mubr.msk.f32.mxu0 %vm356_vm0, %v11420_v12  ;;  %v11451_v12 = vld [vmem:[%s10701_s10 + $0x81] sm:$0xff]  ;;  %12880 = vst [vmem:[#allocation83_spill] sm:$0xff] %v11454_v3  ;;  %12881 = vst [vmem:[#allocation84_spill] sm:$0xff] %v11457_v11 }
  0xa4   : > { %12879 = vst [vmem:[#allocation82_spill] sm:$0xff] %v11451_v12 }
  0xa5   : > { %9262 = vmatmul.mubr.msk.f32.gmra.mrb[8].mxu1 %vm356_vm0, %v11431_v10  ;;  %v11480_v10 = vld [vmem:[%s10706_s13 + $0xc2] sm:$0xff] }
  0xa6   : > { %9712 = vmatmul.mubr.msk.f32.gmra.mrb[8].mxu0 %vm356_vm0, %v11434_v8  ;;  %9264 = vmatprep.mubr.msk.f32.mxu1 %vm356_vm0, %v11437_v63  ;;  %v11474_v8 = vld [vmem:[%s10706_s13 + $0xb2] sm:$0xff]  ;;  %v11477_v63 = vld [vmem:[%s10701_s10 + $0xa9] sm:$0xff]  ;;  %12886 = vst [vmem:[#allocation89_spill] sm:$0xff] %v11480_v10 }
  0xa7   : > { %9714 = vmatprep.mubr.msk.f32.mxu0 %vm356_vm0, %v11440_v6  ;;  %v11471_v6 = vld [vmem:[%s10701_s10 + $0x99] sm:$0xff]  ;;  %12884 = vst [vmem:[#allocation87_spill] sm:$0xff] %v11474_v8  ;;  %12885 = vst [vmem:[#allocation88_spill] sm:$0xff] %v11477_v63 }
  0xa8   : > { %12883 = vst [vmem:[#allocation86_spill] sm:$0xff] %v11471_v6 }
  0xa9   : > { %9265 = vmatmul.mubr.msk.f32.gmra.mrb[10].mxu1 %vm356_vm0, %v11451_v12  ;;  %v11500_v12 = vld [vmem:[%s10706_s13 + $0xda] sm:$0xff] }
  0xaa   : > { %9715 = vmatmul.mubr.msk.f32.gmra.mrb[10].mxu0 %vm356_vm0, %v11454_v3  ;;  %9267 = vmatprep.mubr.msk.f32.mxu1 %vm356_vm0, %v11457_v11  ;;  %v11494_v3 = vld [vmem:[%s10706_s13 + $0xca] sm:$0xff]  ;;  %v11497_v11 = vld [vmem:[%s10701_s10 + $0xc1] sm:$0xff]  ;;  %12890 = vst [vmem:[#allocation93_spill] sm:$0xff] %v11500_v12 }
  0xab   : > { %9717 = vmatprep.mubr.msk.f32.mxu0 %vm356_vm0, %v11460_v61  ;;  %v11491_v61 = vld [vmem:[%s10701_s10 + $0xb1] sm:$0xff]  ;;  %12888 = vst [vmem:[#allocation91_spill] sm:$0xff] %v11494_v3  ;;  %12889 = vst [vmem:[#allocation92_spill] sm:$0xff] %v11497_v11 }
  0xac   : > { %12887 = vst [vmem:[#allocation90_spill] sm:$0xff] %v11491_v61 }
  0xad   : > { %9268 = vmatmul.mubr.msk.f32.gmra.mrb[12].mxu1 %vm356_vm0, %v11471_v6  ;;  %v11520_v6 = vld [vmem:[%s10706_s13 + $0xf2] sm:$0xff] }
  0xae   : > { %9718 = vmatmul.mubr.msk.f32.gmra.mrb[12].mxu0 %vm356_vm0, %v11474_v8  ;;  %9270 = vmatprep.mubr.msk.f32.mxu1 %vm356_vm0, %v11477_v63  ;;  %v11514_v8 = vld [vmem:[%s10706_s13 + $0xe2] sm:$0xff]  ;;  %v11517_v63 = vld [vmem:[%s10701_s10 + $0xd9] sm:$0xff]  ;;  %12894 = vst [vmem:[#allocation97_spill] sm:$0xff] %v11520_v6 }
  0xaf   : > { %9720 = vmatprep.mubr.msk.f32.mxu0 %vm356_vm0, %v11480_v10  ;;  %v11511_v10 = vld [vmem:[%s10701_s10 + $0xc9] sm:$0xff]  ;;  %12892 = vst [vmem:[#allocation95_spill] sm:$0xff] %v11514_v8  ;;  %12893 = vst [vmem:[#allocation96_spill] sm:$0xff] %v11517_v63 }
  0xb0   : > { %12891 = vst [vmem:[#allocation94_spill] sm:$0xff] %v11511_v10 }
  0xb1   : > { %9271 = vmatmul.mubr.msk.f32.gmra.mrb[14].mxu1 %vm356_vm0, %v11491_v61  ;;  %v11540_v61 = vld [vmem:[%s10706_s13 + $0x10a] sm:$0xff] }
  0xb2   : > { %9721 = vmatmul.mubr.msk.f32.gmra.mrb[14].mxu0 %vm356_vm0, %v11494_v3  ;;  %9273 = vmatprep.mubr.msk.f32.mxu1 %vm356_vm0, %v11497_v11  ;;  %v11534_v3 = vld [vmem:[%s10706_s13 + $0xfa] sm:$0xff]  ;;  %v11537_v11 = vld [vmem:[%s10701_s10 + $0xf1] sm:$0xff]  ;;  %12898 = vst [vmem:[#allocation101_spill] sm:$0xff] %v11540_v61 }
  0xb3   : > { %9723 = vmatprep.mubr.msk.f32.mxu0 %vm356_vm0, %v11500_v12  ;;  %v11531_v12 = vld [vmem:[%s10701_s10 + $0xe1] sm:$0xff]  ;;  %12896 = vst [vmem:[#allocation99_spill] sm:$0xff] %v11534_v3  ;;  %12897 = vst [vmem:[#allocation100_spill] sm:$0xff] %v11537_v11 }
  0xb4   : > { %12895 = vst [vmem:[#allocation98_spill] sm:$0xff] %v11531_v12 }
  0xb5   : > { %9274 = vmatmul.mubr.msk.f32.gmra.mrb[16].mxu1 %vm356_vm0, %v11511_v10  ;;  %v11560_v10 = vld [vmem:[%s10706_s13 + $0x122] sm:$0xff] }
  0xb6   : > { %9724 = vmatmul.mubr.msk.f32.gmra.mrb[16].mxu0 %vm356_vm0, %v11514_v8  ;;  %9276 = vmatprep.mubr.msk.f32.mxu1 %vm356_vm0, %v11517_v63  ;;  %v11554_v8 = vld [vmem:[%s10706_s13 + $0x112] sm:$0xff]  ;;  %v11557_v63 = vld [vmem:[%s10701_s10 + $0x109] sm:$0xff]  ;;  %12902 = vst [vmem:[#allocation105_spill] sm:$0xff] %v11560_v10 }
  0xb7   : > { %9726 = vmatprep.mubr.msk.f32.mxu0 %vm356_vm0, %v11520_v6  ;;  %v11551_v6 = vld [vmem:[%s10701_s10 + $0xf9] sm:$0xff]  ;;  %12900 = vst [vmem:[#allocation103_spill] sm:$0xff] %v11554_v8  ;;  %12901 = vst [vmem:[#allocation104_spill] sm:$0xff] %v11557_v63 }
  0xb8   : > { %12899 = vst [vmem:[#allocation102_spill] sm:$0xff] %v11551_v6 }
  0xb9   : > { %9277 = vmatmul.mubr.msk.f32.gmra.mrb[18].mxu1 %vm356_vm0, %v11531_v12  ;;  %v11580_v12 = vld [vmem:[%s10706_s13 + $0x13a] sm:$0xff] }
  0xba   : > { %9727 = vmatmul.mubr.msk.f32.gmra.mrb[18].mxu0 %vm356_vm0, %v11534_v3  ;;  %9279 = vmatprep.mubr.msk.f32.mxu1 %vm356_vm0, %v11537_v11  ;;  %v11574_v3 = vld [vmem:[%s10706_s13 + $0x12a] sm:$0xff]  ;;  %v11577_v11 = vld [vmem:[%s10701_s10 + $0x121] sm:$0xff]  ;;  %12906 = vst [vmem:[#allocation109_spill] sm:$0xff] %v11580_v12 }
  0xbb   : > { %9729 = vmatprep.mubr.msk.f32.mxu0 %vm356_vm0, %v11540_v61  ;;  %v11571_v61 = vld [vmem:[%s10701_s10 + $0x111] sm:$0xff]  ;;  %12904 = vst [vmem:[#allocation107_spill] sm:$0xff] %v11574_v3  ;;  %12905 = vst [vmem:[#allocation108_spill] sm:$0xff] %v11577_v11 }
  0xbc   : > { %12903 = vst [vmem:[#allocation106_spill] sm:$0xff] %v11571_v61 }
  0xbd   : > { %9280 = vmatmul.mubr.msk.f32.gmra.mrb[20].mxu1 %vm356_vm0, %v11551_v6  ;;  %v11600_v6 = vld [vmem:[%s10706_s13 + $0x152] sm:$0xff] }
  0xbe   : > { %9730 = vmatmul.mubr.msk.f32.gmra.mrb[20].mxu0 %vm356_vm0, %v11554_v8  ;;  %9282 = vmatprep.mubr.msk.f32.mxu1 %vm356_vm0, %v11557_v63  ;;  %v11594_v8 = vld [vmem:[%s10706_s13 + $0x142] sm:$0xff]  ;;  %v11597_v63 = vld [vmem:[%s10701_s10 + $0x139] sm:$0xff]  ;;  %12910 = vst [vmem:[#allocation113_spill] sm:$0xff] %v11600_v6 }
  0xbf   : > { %9732 = vmatprep.mubr.msk.f32.mxu0 %vm356_vm0, %v11560_v10  ;;  %v11591_v10 = vld [vmem:[%s10701_s10 + $0x129] sm:$0xff]  ;;  %12908 = vst [vmem:[#allocation111_spill] sm:$0xff] %v11594_v8  ;;  %12909 = vst [vmem:[#allocation112_spill] sm:$0xff] %v11597_v63 }
  0xc0   : > { %12907 = vst [vmem:[#allocation110_spill] sm:$0xff] %v11591_v10 }
  0xc1   : > { %9283 = vmatmul.mubr.msk.f32.gmra.mrb[22].mxu1 %vm356_vm0, %v11571_v61  ;;  %v11620_v61 = vld [vmem:[%s10706_s13 + $0x16a] sm:$0xff] }
  0xc2   : > { %9733 = vmatmul.mubr.msk.f32.gmra.mrb[22].mxu0 %vm356_vm0, %v11574_v3  ;;  %9285 = vmatprep.mubr.msk.f32.mxu1 %vm356_vm0, %v11577_v11  ;;  %v11614_v3 = vld [vmem:[%s10706_s13 + $0x15a] sm:$0xff]  ;;  %v11617_v11 = vld [vmem:[%s10701_s10 + $0x151] sm:$0xff]  ;;  %12913 = vst [vmem:[#allocation116_spill] sm:$0xff] %v11620_v61 }
  0xc3   : > { %9735 = vmatprep.mubr.msk.f32.mxu0 %vm356_vm0, %v11580_v12  ;;  %v11611_v12 = vld [vmem:[%s10701_s10 + $0x141] sm:$0xff]  ;;  %12911 = vst [vmem:[#allocation114_spill] sm:$0xff] %v11614_v3  ;;  %12912 = vst [vmem:[#allocation115_spill] sm:$0xff] %v11617_v11 }
  0xc5   : > { %9286 = vmatmul.mubr.msk.f32.gmra.mrb[24].mxu1 %vm356_vm0, %v11591_v10  ;;  %v8092_v10 = vld [vmem:[%s10706_s13 + $0x182] sm:$0xff] }
  0xc6   : > { %9736 = vmatmul.mubr.msk.f32.gmra.mrb[24].mxu0 %vm356_vm0, %v11594_v8  ;;  %9288 = vmatprep.mubr.msk.f32.mxu1 %vm356_vm0, %v11597_v63  ;;  %v11634_v8 = vld [vmem:[%s10706_s13 + $0x172] sm:$0xff]  ;;  %v11637_v63 = vld [vmem:[%s10701_s10 + $0x169] sm:$0xff] }
  0xc7   : > { %9738 = vmatprep.mubr.msk.f32.mxu0 %vm356_vm0, %v11600_v6  ;;  %v11631_v6 = vld [vmem:[%s10701_s10 + $0x159] sm:$0xff]  ;;  %12914 = vst [vmem:[#allocation117_spill] sm:$0xff] %v11634_v8 }
  0xc9   : > { %9289 = vmatmul.mubr.msk.f32.gmra.mrb[26].mxu1 %vm356_vm0, %v11611_v12 }
  0xca   : > { %9739 = vmatmul.mubr.msk.f32.gmra.mrb[26].mxu0 %vm356_vm0, %v11614_v3  ;;  %9291 = vmatprep.mubr.msk.f32.mxu1 %vm356_vm0, %v11617_v11  ;;  %v8093_v3 = vld [vmem:[%s10706_s13 + $0x18a] sm:$0xff]  ;;  %v1096_v11 = vld [vmem:[%s10706_s13 + $0x1] sm:$0xff] }
  0xcb   : > { %9741 = vmatprep.mubr.msk.f32.mxu0 %vm356_vm0, %v11620_v61  ;;  %v11648_v61 = vld [vmem:[%s10701_s10 + $0x171] sm:$0xff] }
  0xcd   : > { %9292 = vmatmul.mubr.msk.f32.gmra.mrb[28].mxu1 %vm356_vm0, %v11631_v6 }
  0xce   : > { %9742 = vmatmul.mubr.msk.f32.gmra.mrb[28].mxu0 %vm356_vm0, %v11634_v8  ;;  %9294 = vmatprep.mubr.msk.f32.mxu1 %vm356_vm0, %v11637_v63  ;;  %v1097_v8 = vld [vmem:[%s10706_s13 + $0x9] sm:$0xff] }
  0xcf   : > { %9744 = vmatprep.mubr.msk.f32.mxu0 %vm356_vm0, %v8092_v10  ;;  %v11665_v10 = vld [vmem:[%s12679_s3 + $0x10] sm:$0xff] }
  0xd1   : > { %9295 = vmatmul.mubr.msk.f32.gmra.mrb[30].mxu1 %vm356_vm0, %v11648_v61 }
  0xd2   : > { %9745 = vmatmul.mubr.msk.f32.gmra.mrb[30].mxu0 %vm356_vm0, %v8093_v3  ;;  %9299 = vmatprep.mubr.msk.f32.mxu1 %vm356_vm0, %v1096_v11  ;;  %v11670_v3 = vld [vmem:[%s12678_s2 + $0x38] sm:$0xff]  ;;  %v12961_v11 = vld [vmem:[#allocation43_spill] sm:$0xff] }
  0xd3   : > { %9749 = vmatprep.mubr.msk.f32.mxu0 %vm356_vm0, %v10744_v14  ;;  %v12916_v14 = vld [vmem:[#allocation3_spill] sm:$0xff] }
  0xd5   : > { %9300 = vmatmul.mubr.msk.f32.vlgmr.msra.gmra.mrb[0].mxu1 %vm356_vm0, %v1097_v8  ;;  %v12964_v8 = vld [vmem:[#allocation56_spill] sm:$0xff] }
  0xd6   : > { %9750 = vmatmul.mubr.msk.f32.vlgmr.msra.gmra.mrb[0].mxu0 %vm356_vm0, %v10759_v16  ;;  %9348 = vmatpush3.msra.mxu1 %v11359_v59  ;;  %v8191_v16 = vld [vmem:[%s10701_s10 + $0x1a0] sm:$0xff] }
  0xd7   : > { %9798 = vmatpush3.msra.mxu0 %v11364_v1  ;;  %9302 = vmatprep.mubr.msk.f32.mxu1 %vm356_vm0, %v10710_v5  ;;  %v11777_v5 = vld [vmem:[%s10701_s10 + $0x180] sm:$0xff]  ;;  %v12963_v1 = vld [vmem:[#allocation45_spill] sm:$0xff] }
  0xd8   : > { %9752 = vmatprep.mubr.msk.f32.mxu0 %vm356_vm0, %v10765_v18  ;;  %9397 = vmatprep.subr.mxu1 %v11665_v10  ;;  %v12918_v18 = vld [vmem:[#allocation5_spill] sm:$0xff]  ;;  %v12962_v59 = vld [vmem:[#allocation54_spill] sm:$0xff] }
  0xd9   : > { %9847 = vmatprep.subr.mxu0 %v11670_v3  ;;  %9303 = vmatmul.mubr.msk.f32.gmra.mrb[2].mxu1 %vm356_vm0, %v10717_v7  ;;  %v12915_v7 = vld [vmem:[#allocation2_spill] sm:$0xff] }
  0xda   : > { %9753 = vmatmul.mubr.msk.f32.gmra.mrb[2].mxu0 %vm356_vm0, %v10779_v20  ;;  %9305 = vmatprep.mubr.msk.f32.mxu1 %vm356_vm0, %v10721_v9  ;;  %v11788_v9 = vld [vmem:[%s10701_s10 + $0x188] sm:$0xff] }
  0xdb   : > { %9755 = vmatprep.mubr.msk.f32.mxu0 %vm356_vm0, %v10785_v22  ;;  %v1839_v20 = vld [vmem:[%s10701_s10 + $0xa] sm:$0xff]  ;;  %v11813_v22 = vld [vmem:[%s12678_s2 + $0x18] sm:$0xff] }
  0xdd   : > { %9306 = vmatmul.mubr.msk.f32.gmra.mrb[4].mxu1 %vm356_vm0, %v10738_v13  ;;  %v8190_v13 = vld [vmem:[%s10701_s10 + $0x198] sm:$0xff] }
  0xde   : > { %9756 = vmatmul.mubr.msk.f32.gmra.mrb[4].mxu0 %vm356_vm0, %v10799_v24  ;;  %9308 = vmatprep.mubr.msk.f32.mxu1 %vm356_vm0, %v10747_v15  ;;  %v12917_v15 = vld [vmem:[#allocation4_spill] sm:$0xff]  ;;  %v12921_v24 = vld [vmem:[#allocation6_spill] sm:$0xff] }
  0xdf   : > { %9758 = vmatprep.mubr.msk.f32.mxu0 %vm356_vm0, %v10805_v26  ;;  %v12923_v26 = vld [vmem:[#allocation7_spill] sm:$0xff] }
  0xe1   : > { %9309 = vmatmul.mubr.msk.f32.gmra.mrb[6].mxu1 %vm356_vm0, %v10762_v17  ;;  %v1838_v17 = vld [vmem:[%s10701_s10 + $0x2] sm:$0xff] }
  0xe2   : > { %9759 = vmatmul.mubr.msk.f32.gmra.mrb[6].mxu0 %vm356_vm0, %v10819_v28  ;;  %9311 = vmatprep.mubr.msk.f32.mxu1 %vm356_vm0, %v10768_v19  ;;  %v12919_v19 = vld [vmem:[#allocation10_spill] sm:$0xff]  ;;  %v12925_v28 = vld [vmem:[#allocation8_spill] sm:$0xff] }
  0xe3   : > { %9761 = vmatprep.mubr.msk.f32.mxu0 %vm356_vm0, %v10825_v30  ;;  %v12927_v30 = vld [vmem:[#allocation9_spill] sm:$0xff] }
  0xe5   : > { %9312 = vmatmul.mubr.msk.f32.gmra.mrb[8].mxu1 %vm356_vm0, %v10782_v21  ;;  %v12920_v21 = vld [vmem:[#allocation12_spill] sm:$0xff] }
  0xe6   : > { %9762 = vmatmul.mubr.msk.f32.gmra.mrb[8].mxu0 %vm356_vm0, %v10839_v32  ;;  %9314 = vmatprep.mubr.msk.f32.mxu1 %vm356_vm0, %v10788_v23  ;;  %v11818_v23 = vld [vmem:[%s12679_s3 + $0x38] sm:$0xff]  ;;  %v12929_v32 = vld [vmem:[#allocation11_spill] sm:$0xff] }
  0xe7   : > { %9764 = vmatprep.mubr.msk.f32.mxu0 %vm356_vm0, %v10845_v34  ;;  %v12931_v34 = vld [vmem:[#allocation13_spill] sm:$0xff] }
  0xe9   : > { %9315 = vmatmul.mubr.msk.f32.gmra.mrb[10].mxu1 %vm356_vm0, %v10802_v25  ;;  %v12922_v25 = vld [vmem:[#allocation14_spill] sm:$0xff] }
  0xea   : > { %9765 = vmatmul.mubr.msk.f32.gmra.mrb[10].mxu0 %vm356_vm0, %v10859_v36  ;;  %9317 = vmatprep.mubr.msk.f32.mxu1 %vm356_vm0, %v10808_v27  ;;  %v12924_v27 = vld [vmem:[#allocation16_spill] sm:$0xff]  ;;  %v12933_v36 = vld [vmem:[#allocation15_spill] sm:$0xff] }
  0xeb   : > { %9767 = vmatprep.mubr.msk.f32.mxu0 %vm356_vm0, %v10865_v38  ;;  %v12935_v38 = vld [vmem:[#allocation17_spill] sm:$0xff] }
  0xed   : > { %9318 = vmatmul.mubr.msk.f32.gmra.mrb[12].mxu1 %vm356_vm0, %v10822_v29  ;;  %v12926_v29 = vld [vmem:[#allocation18_spill] sm:$0xff] }
  0xee   : > { %9768 = vmatmul.mubr.msk.f32.gmra.mrb[12].mxu0 %vm356_vm0, %v10879_v40  ;;  %9320 = vmatprep.mubr.msk.f32.mxu1 %vm356_vm0, %v10828_v31  ;;  %v12928_v31 = vld [vmem:[#allocation20_spill] sm:$0xff]  ;;  %v12937_v40 = vld [vmem:[#allocation19_spill] sm:$0xff] }
  0xef   : > { %9770 = vmatprep.mubr.msk.f32.mxu0 %vm356_vm0, %v10885_v42  ;;  %v12939_v42 = vld [vmem:[#allocation21_spill] sm:$0xff] }
  0xf1   : > { %9321 = vmatmul.mubr.msk.f32.gmra.mrb[14].mxu1 %vm356_vm0, %v10842_v33  ;;  %v12930_v33 = vld [vmem:[#allocation22_spill] sm:$0xff] }
  0xf2   : > { %9771 = vmatmul.mubr.msk.f32.gmra.mrb[14].mxu0 %vm356_vm0, %v10899_v44  ;;  %9323 = vmatprep.mubr.msk.f32.mxu1 %vm356_vm0, %v10848_v35  ;;  %v12932_v35 = vld [vmem:[#allocation24_spill] sm:$0xff]  ;;  %v12941_v44 = vld [vmem:[#allocation23_spill] sm:$0xff] }
  0xf3   : > { %9773 = vmatprep.mubr.msk.f32.mxu0 %vm356_vm0, %v10905_v46  ;;  %v12943_v46 = vld [vmem:[#allocation25_spill] sm:$0xff] }
  0xf5   : > { %9324 = vmatmul.mubr.msk.f32.gmra.mrb[16].mxu1 %vm356_vm0, %v10862_v37  ;;  %v12934_v37 = vld [vmem:[#allocation26_spill] sm:$0xff] }
  0xf6   : > { %9774 = vmatmul.mubr.msk.f32.gmra.mrb[16].mxu0 %vm356_vm0, %v10919_v48  ;;  %9326 = vmatprep.mubr.msk.f32.mxu1 %vm356_vm0, %v10868_v39  ;;  %v12936_v39 = vld [vmem:[#allocation28_spill] sm:$0xff]  ;;  %v12945_v48 = vld [vmem:[#allocation27_spill] sm:$0xff] }
  0xf7   : > { %9776 = vmatprep.mubr.msk.f32.mxu0 %vm356_vm0, %v10925_v50  ;;  %v12947_v50 = vld [vmem:[#allocation29_spill] sm:$0xff] }
  0xf9   : > { %9327 = vmatmul.mubr.msk.f32.gmra.mrb[18].mxu1 %vm356_vm0, %v10882_v41  ;;  %v12938_v41 = vld [vmem:[#allocation30_spill] sm:$0xff] }
  0xfa   : > { %9777 = vmatmul.mubr.msk.f32.gmra.mrb[18].mxu0 %vm356_vm0, %v10939_v52  ;;  %9329 = vmatprep.mubr.msk.f32.mxu1 %vm356_vm0, %v10888_v43  ;;  %v12940_v43 = vld [vmem:[#allocation32_spill] sm:$0xff]  ;;  %v12949_v52 = vld [vmem:[#allocation31_spill] sm:$0xff] }
  0xfb   : > { %9779 = vmatprep.mubr.msk.f32.mxu0 %vm356_vm0, %v10945_v54  ;;  %v12951_v54 = vld [vmem:[#allocation33_spill] sm:$0xff] }
  0xfd   : > { %9330 = vmatmul.mubr.msk.f32.gmra.mrb[20].mxu1 %vm356_vm0, %v10902_v45  ;;  %v12942_v45 = vld [vmem:[#allocation34_spill] sm:$0xff] }
  0xfe   : > { %9780 = vmatmul.mubr.msk.f32.gmra.mrb[20].mxu0 %vm356_vm0, %v10959_v56  ;;  %9332 = vmatprep.mubr.msk.f32.mxu1 %vm356_vm0, %v10908_v47  ;;  %v12944_v47 = vld [vmem:[#allocation36_spill] sm:$0xff]  ;;  %v12953_v56 = vld [vmem:[#allocation35_spill] sm:$0xff] }
  0xff   : > { %9782 = vmatprep.mubr.msk.f32.mxu0 %vm356_vm0, %v10965_v58  ;;  %v12955_v58 = vld [vmem:[#allocation37_spill] sm:$0xff] }
 0x101   : > { %9333 = vmatmul.mubr.msk.f32.gmra.mrb[22].mxu1 %vm356_vm0, %v10922_v49  ;;  %v12946_v49 = vld [vmem:[#allocation38_spill] sm:$0xff] }
 0x102   : > { %9783 = vmatmul.mubr.msk.f32.gmra.mrb[22].mxu0 %vm356_vm0, %v10979_v60  ;;  %9335 = vmatprep.mubr.msk.f32.mxu1 %vm356_vm0, %v10928_v51  ;;  %v12948_v51 = vld [vmem:[#allocation40_spill] sm:$0xff] }
 0x103   : > { %9785 = vmatprep.mubr.msk.f32.mxu0 %vm356_vm0, %v10985_v62  ;;  %v12956_v60 = vld [vmem:[#allocation48_spill] sm:$0xff]  ;;  %v12957_v62 = vld [vmem:[#allocation39_spill] sm:$0xff] }
 0x105   : > { %9336 = vmatmul.mubr.msk.f32.gmra.mrb[24].mxu1 %vm356_vm0, %v10942_v53  ;;  %v12950_v53 = vld [vmem:[#allocation42_spill] sm:$0xff] }
 0x106   : > { %9786 = vmatmul.mubr.msk.f32.gmra.mrb[24].mxu0 %vm356_vm0, %v10999_v0  ;;  %9338 = vmatprep.mubr.msk.f32.mxu1 %vm356_vm0, %v10948_v55  ;;  %v12952_v55 = vld [vmem:[#allocation44_spill] sm:$0xff]  ;;  %v12958_v0 = vld [vmem:[#allocation50_spill] sm:$0xff] }
 0x107   : > { %9788 = vmatprep.mubr.msk.f32.mxu0 %vm356_vm0, %v11005_v2  ;;  %v12959_v2 = vld [vmem:[#allocation41_spill] sm:$0xff] }
 0x109   : > { %9339 = vmatmul.mubr.msk.f32.gmra.mrb[26].mxu1 %vm356_vm0, %v10962_v57  ;;  %v12954_v57 = vld [vmem:[#allocation46_spill] sm:$0xff] }
 0x10a   : > { %9789 = vmatmul.mubr.msk.f32.gmra.mrb[26].mxu0 %vm356_vm0, %v11016_v4  ;;  %9341 = vmatprep.mubr.msk.f32.mxu1 %vm356_vm0, %v12915_v7  ;;  %v12960_v4 = vld [vmem:[#allocation52_spill] sm:$0xff]  ;;  %v12967_v7 = vld [vmem:[#allocation49_spill] sm:$0xff] }
 0x10b   : > { %9791 = vmatprep.mubr.msk.f32.mxu0 %vm356_vm0, %v11777_v5 }
 0x10d   : > { %9342 = vmatmul.mubr.msk.f32.gmra.mrb[28].mxu1 %vm356_vm0, %v12916_v14  ;;  %v12969_v14 = vld [vmem:[#allocation51_spill] sm:$0xff] }
 0x10e   : > { %9792 = vmatmul.mubr.msk.f32.gmra.mrb[28].mxu0 %vm356_vm0, %v11788_v9  ;;  %9344 = vmatprep.mubr.msk.f32.mxu1 %vm356_vm0, %v12917_v15  ;;  %v12970_v15 = vld [vmem:[#allocation62_spill] sm:$0xff] }
 0x10f   : > { %9794 = vmatprep.mubr.msk.f32.mxu0 %vm356_vm0, %v8190_v13  ;;  %v12968_v13 = vld [vmem:[#allocation60_spill] sm:$0xff] }
 0x111   : > { %9345 = vmatmul.mubr.msk.f32.gmra.mrb[30].mxu1 %vm356_vm0, %v12918_v18  ;;  %v12972_v18 = vld [vmem:[#allocation63_spill] sm:$0xff] }
 0x112   : > { %9795 = vmatmul.mubr.msk.f32.gmra.mrb[30].mxu0 %vm356_vm0, %v8191_v16  ;;  %9349 = vmatprep.mubr.msk.f32.mxu1 %vm356_vm0, %v1838_v17  ;;  %v11925_v16 = vld [vmem:[%s10706_s13 + $0x180] sm:$0xff]  ;;  %v12971_v17 = vld [vmem:[#allocation53_spill] sm:$0xff] }
 0x113   : > { %9799 = vmatprep.mubr.msk.f32.mxu0 %vm356_vm0, %v12919_v19  ;;  %v12973_v19 = vld [vmem:[#allocation55_spill] sm:$0xff] }
 0x115   : > { %9350 = vmatmul.mubr.msk.f32.vlgmr.msra.gmra.mrb[0].mxu1 %vm356_vm0, %v1839_v20  ;;  %v11936_v20 = vld [vmem:[%s10706_s13 + $0x188] sm:$0xff] }
 0x116   : > { %9800 = vmatmul.mubr.msk.f32.vlgmr.msra.gmra.mrb[0].mxu0 %vm356_vm0, %v12920_v21  ;;  %9398 = vmatpush3.msra.mxu1 %v11665_v10  ;;  %v12965_v10 = vld [vmem:[#allocation47_spill] sm:$0xff]  ;;  %v8222_v21 = vld [vmem:[%s10706_s13 + $0x198] sm:$0xff] }
 0x117   : > { %9848 = vmatpush3.msra.mxu0 %v11670_v3  ;;  %9352 = vmatprep.mubr.msk.f32.mxu1 %vm356_vm0, %v12921_v24  ;;  %v12966_v3 = vld [vmem:[#allocation58_spill] sm:$0xff]  ;;  %v12974_v24 = vld [vmem:[#allocation57_spill] sm:$0xff] }
 0x118   : > { %9802 = vmatprep.mubr.msk.f32.mxu0 %vm356_vm0, %v12922_v25  ;;  %9447 = vmatprep.subr.mxu1 %v11813_v22  ;;  %v12975_v25 = vld [vmem:[#allocation59_spill] sm:$0xff] }
 0x119   : > { %9897 = vmatprep.subr.mxu0 %v11818_v23  ;;  %9353 = vmatmul.mubr.msk.f32.gmra.mrb[2].mxu1 %vm356_vm0, %v12923_v26  ;;  %v8223_v26 = vld [vmem:[%s10706_s13 + $0x1a0] sm:$0xff] }
 0x11a   : > { %9803 = vmatmul.mubr.msk.f32.gmra.mrb[2].mxu0 %vm356_vm0, %v12924_v27  ;;  %9355 = vmatprep.mubr.msk.f32.mxu1 %vm356_vm0, %v12925_v28  ;;  %v1870_v27 = vld [vmem:[%s10706_s13 + $0x2] sm:$0xff]  ;;  %v12976_v28 = vld [vmem:[#allocation61_spill] sm:$0xff] }
 0x11b   : > { %9805 = vmatprep.mubr.msk.f32.mxu0 %vm356_vm0, %v12926_v29  ;;  %v12977_v29 = vld [vmem:[#allocation68_spill] sm:$0xff] }
 0x11d   : > { %9356 = vmatmul.mubr.msk.f32.gmra.mrb[4].mxu1 %vm356_vm0, %v12927_v30  ;;  %v1871_v30 = vld [vmem:[%s10706_s13 + $0xa] sm:$0xff] }
 0x11e   : > { %9806 = vmatmul.mubr.msk.f32.gmra.mrb[4].mxu0 %vm356_vm0, %v12928_v31  ;;  %9358 = vmatprep.mubr.msk.f32.mxu1 %vm356_vm0, %v12929_v32  ;;  %v12978_v31 = vld [vmem:[#allocation70_spill] sm:$0xff]  ;;  %v11961_v32 = vld [vmem:[%s12679_s3 + $0x18] sm:$0xff] }
 0x11f   : > { %9808 = vmatprep.mubr.msk.f32.mxu0 %vm356_vm0, %v12930_v33  ;;  %v11966_v33 = vld [vmem:[%s12678_s2 + $0x40] sm:$0xff] }
 0x121   : > { %9359 = vmatmul.mubr.msk.f32.gmra.mrb[6].mxu1 %vm356_vm0, %v12931_v34  ;;  %v12979_v34 = vld [vmem:[#allocation64_spill] sm:$0xff] }
 0x122   : > { %9809 = vmatmul.mubr.msk.f32.gmra.mrb[6].mxu0 %vm356_vm0, %v12932_v35  ;;  %9361 = vmatprep.mubr.msk.f32.mxu1 %vm356_vm0, %v12933_v36  ;;  %v12980_v35 = vld [vmem:[#allocation72_spill] sm:$0xff]  ;;  %v12981_v36 = vld [vmem:[#allocation65_spill] sm:$0xff] }
 0x123   : > { %9811 = vmatprep.mubr.msk.f32.mxu0 %vm356_vm0, %v12934_v37  ;;  %v12982_v37 = vld [vmem:[#allocation74_spill] sm:$0xff] }
 0x125   : > { %9362 = vmatmul.mubr.msk.f32.gmra.mrb[8].mxu1 %vm356_vm0, %v12935_v38  ;;  %v12983_v38 = vld [vmem:[#allocation66_spill] sm:$0xff] }
 0x126   : > { %9812 = vmatmul.mubr.msk.f32.gmra.mrb[8].mxu0 %vm356_vm0, %v12936_v39  ;;  %9364 = vmatprep.mubr.msk.f32.mxu1 %vm356_vm0, %v12937_v40  ;;  %v12986_v39 = vld [vmem:[#allocation78_spill] sm:$0xff]  ;;  %v12987_v40 = vld [vmem:[#allocation69_spill] sm:$0xff] }
 0x127   : > { %9814 = vmatprep.mubr.msk.f32.mxu0 %vm356_vm0, %v12938_v41  ;;  %v12988_v41 = vld [vmem:[#allocation80_spill] sm:$0xff] }
 0x129   : > { %9365 = vmatmul.mubr.msk.f32.gmra.mrb[10].mxu1 %vm356_vm0, %v12939_v42  ;;  %v12989_v42 = vld [vmem:[#allocation71_spill] sm:$0xff] }
 0x12a   : > { %9815 = vmatmul.mubr.msk.f32.gmra.mrb[10].mxu0 %vm356_vm0, %v12940_v43  ;;  %9367 = vmatprep.mubr.msk.f32.mxu1 %vm356_vm0, %v12941_v44  ;;  %v12990_v43 = vld [vmem:[#allocation82_spill] sm:$0xff]  ;;  %v12991_v44 = vld [vmem:[#allocation73_spill] sm:$0xff] }
 0x12b   : > { %9817 = vmatprep.mubr.msk.f32.mxu0 %vm356_vm0, %v12942_v45  ;;  %v12992_v45 = vld [vmem:[#allocation84_spill] sm:$0xff] }
 0x12d   : > { %9368 = vmatmul.mubr.msk.f32.gmra.mrb[12].mxu1 %vm356_vm0, %v12943_v46  ;;  %v12993_v46 = vld [vmem:[#allocation75_spill] sm:$0xff] }
 0x12e   : > { %9818 = vmatmul.mubr.msk.f32.gmra.mrb[12].mxu0 %vm356_vm0, %v12944_v47  ;;  %9370 = vmatprep.mubr.msk.f32.mxu1 %vm356_vm0, %v12945_v48  ;;  %v12994_v47 = vld [vmem:[#allocation86_spill] sm:$0xff]  ;;  %v12995_v48 = vld [vmem:[#allocation77_spill] sm:$0xff] }
 0x12f   : > { %9820 = vmatprep.mubr.msk.f32.mxu0 %vm356_vm0, %v12946_v49  ;;  %v12996_v49 = vld [vmem:[#allocation88_spill] sm:$0xff] }
 0x131   : > { %9371 = vmatmul.mubr.msk.f32.gmra.mrb[14].mxu1 %vm356_vm0, %v12947_v50  ;;  %v12997_v50 = vld [vmem:[#allocation79_spill] sm:$0xff] }
 0x132   : > { %9821 = vmatmul.mubr.msk.f32.gmra.mrb[14].mxu0 %vm356_vm0, %v12948_v51  ;;  %9373 = vmatprep.mubr.msk.f32.mxu1 %vm356_vm0, %v12949_v52  ;;  %v12998_v51 = vld [vmem:[#allocation90_spill] sm:$0xff]  ;;  %v12999_v52 = vld [vmem:[#allocation81_spill] sm:$0xff] }
 0x133   : > { %9823 = vmatprep.mubr.msk.f32.mxu0 %vm356_vm0, %v12950_v53  ;;  %v13000_v53 = vld [vmem:[#allocation92_spill] sm:$0xff] }
 0x135   : > { %9374 = vmatmul.mubr.msk.f32.gmra.mrb[16].mxu1 %vm356_vm0, %v12951_v54  ;;  %v13001_v54 = vld [vmem:[#allocation83_spill] sm:$0xff] }
 0x136   : > { %9824 = vmatmul.mubr.msk.f32.gmra.mrb[16].mxu0 %vm356_vm0, %v12952_v55  ;;  %9376 = vmatprep.mubr.msk.f32.mxu1 %vm356_vm0, %v12953_v56  ;;  %v13002_v55 = vld [vmem:[#allocation94_spill] sm:$0xff]  ;;  %v13003_v56 = vld [vmem:[#allocation85_spill] sm:$0xff] }
 0x137   : > { %9826 = vmatprep.mubr.msk.f32.mxu0 %vm356_vm0, %v12954_v57  ;;  %v13004_v57 = vld [vmem:[#allocation96_spill] sm:$0xff] }
 0x139   : > { %9377 = vmatmul.mubr.msk.f32.gmra.mrb[18].mxu1 %vm356_vm0, %v12955_v58  ;;  %v13005_v58 = vld [vmem:[#allocation87_spill] sm:$0xff] }
 0x13a   : > { %9827 = vmatmul.mubr.msk.f32.gmra.mrb[18].mxu0 %vm356_vm0, %v12956_v60  ;;  %9379 = vmatprep.mubr.msk.f32.mxu1 %vm356_vm0, %v12957_v62  ;;  %v13006_v60 = vld [vmem:[#allocation98_spill] sm:$0xff]  ;;  %v13007_v62 = vld [vmem:[#allocation89_spill] sm:$0xff] }
 0x13b   : > { %9829 = vmatprep.mubr.msk.f32.mxu0 %vm356_vm0, %v12958_v0  ;;  %v13008_v0 = vld [vmem:[#allocation100_spill] sm:$0xff] }
 0x13d   : > { %9380 = vmatmul.mubr.msk.f32.gmra.mrb[20].mxu1 %vm356_vm0, %v12959_v2  ;;  %v13009_v2 = vld [vmem:[#allocation91_spill] sm:$0xff] }
 0x13e   : > { %9830 = vmatmul.mubr.msk.f32.gmra.mrb[20].mxu0 %vm356_vm0, %v12960_v4  ;;  %9382 = vmatprep.mubr.msk.f32.mxu1 %vm356_vm0, %v12961_v11  ;;  %v13010_v4 = vld [vmem:[#allocation102_spill] sm:$0xff]  ;;  %v13011_v11 = vld [vmem:[#allocation93_spill] sm:$0xff] }
 0x13f   : > { %9832 = vmatprep.mubr.msk.f32.mxu0 %vm356_vm0, %v12962_v59  ;;  %v13012_v59 = vld [vmem:[#allocation104_spill] sm:$0xff] }
 0x141   : > { %9383 = vmatmul.mubr.msk.f32.gmra.mrb[22].mxu1 %vm356_vm0, %v12963_v1  ;;  %v13013_v1 = vld [vmem:[#allocation95_spill] sm:$0xff] }
 0x142   : > { %9833 = vmatmul.mubr.msk.f32.gmra.mrb[22].mxu0 %vm356_vm0, %v12964_v8  ;;  %9385 = vmatprep.mubr.msk.f32.mxu1 %vm356_vm0, %v12965_v10  ;;  %v13014_v8 = vld [vmem:[#allocation106_spill] sm:$0xff]  ;;  %v13015_v10 = vld [vmem:[#allocation97_spill] sm:$0xff] }
 0x143   : > { %9835 = vmatprep.mubr.msk.f32.mxu0 %vm356_vm0, %v12966_v3  ;;  %v13016_v3 = vld [vmem:[#allocation108_spill] sm:$0xff] }
 0x145   : > { %9386 = vmatmul.mubr.msk.f32.gmra.mrb[24].mxu1 %vm356_vm0, %v12967_v7  ;;  %v13017_v7 = vld [vmem:[#allocation99_spill] sm:$0xff] }
 0x146   : > { %9836 = vmatmul.mubr.msk.f32.gmra.mrb[24].mxu0 %vm356_vm0, %v12968_v13  ;;  %9388 = vmatprep.mubr.msk.f32.mxu1 %vm356_vm0, %v12969_v14  ;;  %v13018_v13 = vld [vmem:[#allocation110_spill] sm:$0xff]  ;;  %v13019_v14 = vld [vmem:[#allocation101_spill] sm:$0xff] }
 0x147   : > { %9838 = vmatprep.mubr.msk.f32.mxu0 %vm356_vm0, %v12970_v15  ;;  %v13020_v15 = vld [vmem:[#allocation112_spill] sm:$0xff] }
 0x149   : > { %9389 = vmatmul.mubr.msk.f32.gmra.mrb[26].mxu1 %vm356_vm0, %v12971_v17  ;;  %v13021_v17 = vld [vmem:[#allocation103_spill] sm:$0xff] }
 0x14a   : > { %9839 = vmatmul.mubr.msk.f32.gmra.mrb[26].mxu0 %vm356_vm0, %v12972_v18  ;;  %9391 = vmatprep.mubr.msk.f32.mxu1 %vm356_vm0, %v12973_v19  ;;  %v13022_v18 = vld [vmem:[#allocation105_spill] sm:$0xff]  ;;  %v13023_v19 = vld [vmem:[#allocation115_spill] sm:$0xff] }
 0x14b   : > { %9841 = vmatprep.mubr.msk.f32.mxu0 %vm356_vm0, %v11925_v16 }
 0x14d   : > { %9392 = vmatmul.mubr.msk.f32.gmra.mrb[28].mxu1 %vm356_vm0, %v12974_v24  ;;  %v13025_v24 = vld [vmem:[#allocation109_spill] sm:$0xff] }
 0x14e   : > { %9842 = vmatmul.mubr.msk.f32.gmra.mrb[28].mxu0 %vm356_vm0, %v11936_v20  ;;  %9394 = vmatprep.mubr.msk.f32.mxu1 %vm356_vm0, %v12975_v25  ;;  %v13026_v25 = vld [vmem:[#allocation111_spill] sm:$0xff] }
 0x14f   : > { %9844 = vmatprep.mubr.msk.f32.mxu0 %vm356_vm0, %v8222_v21  ;;  %v13024_v21 = vld [vmem:[#allocation107_spill] sm:$0xff] }
 0x151   : > { %9395 = vmatmul.mubr.msk.f32.gmra.mrb[30].mxu1 %vm356_vm0, %v12976_v28  ;;  %v8321_v28 = vld [vmem:[%s10701_s10 + $0x1a1] sm:$0xff] }
 0x152   : > { %9845 = vmatmul.mubr.msk.f32.gmra.mrb[30].mxu0 %vm356_vm0, %v8223_v26  ;;  %9399 = vmatprep.mubr.msk.f32.mxu1 %vm356_vm0, %v1870_v27  ;;  %v13027_v26 = vld [vmem:[#allocation113_spill] sm:$0xff]  ;;  %v13028_v27 = vld [vmem:[#allocation114_spill] sm:$0xff] }
 0x153   : > { %9849 = vmatprep.mubr.msk.f32.mxu0 %vm356_vm0, %v12977_v29  ;;  %v7770_v29 = vld [vmem:[%s10701_s10 + $0x18] sm:$0xff] }
 0x155   : > { %9400 = vmatmul.mubr.msk.f32.vlgmr.msra.gmra.mrb[0].mxu1 %vm356_vm0, %v1871_v30  ;;  %v8322_v30 = vld [vmem:[%s10706_s13 + $0x31] sm:$0xff] }
 0x156   : > { %9850 = vmatmul.mubr.msk.f32.vlgmr.msra.gmra.mrb[0].mxu0 %vm356_vm0, %v12978_v31  ;;  %9448 = vmatpush3.msra.mxu1 %v11813_v22  ;;  %v12984_v22 = vld [vmem:[#allocation76_spill] sm:$0xff]  ;;  %v13030_v31 = vld [vmem:[#allocation117_spill] sm:$0xff] }
 0x157   : > { %9898 = vmatpush3.msra.mxu0 %v11818_v23  ;;  %9402 = vmatprep.mubr.msk.f32.mxu1 %vm356_vm0, %v12979_v34  ;;  %v12985_v23 = vld [vmem:[#allocation67_spill] sm:$0xff]  ;;  %v7771_v34 = vld [vmem:[%s10701_s10 + $0x20] sm:$0xff] }
 0x158   : > { %9852 = vmatprep.mubr.msk.f32.mxu0 %vm356_vm0, %v12980_v35  ;;  %9497 = vmatprep.subr.mxu1 %v11961_v32  ;;  %v8323_v35 = vld [vmem:[%s10706_s13 + $0x39] sm:$0xff] }
 0x159   : > { %9947 = vmatprep.subr.mxu0 %v11966_v33  ;;  %9403 = vmatmul.mubr.msk.f32.gmra.mrb[2].mxu1 %vm356_vm0, %v12981_v36  ;;  %v7772_v36 = vld [vmem:[%s10701_s10 + $0x30] sm:$0xff] }
 0x15a   : > { %9853 = vmatmul.mubr.msk.f32.gmra.mrb[2].mxu0 %vm356_vm0, %v12982_v37  ;;  %9405 = vmatprep.mubr.msk.f32.mxu1 %vm356_vm0, %v12983_v38  ;;  %v8324_v37 = vld [vmem:[%s10706_s13 + $0x49] sm:$0xff]  ;;  %v12111_v38 = vld [vmem:[%s12678_s2 + $0x20] sm:$0xff] }
 0x15b   : > { %9855 = vmatprep.mubr.msk.f32.mxu0 %vm356_vm0, %v12984_v22  ;;  %v12116_v22 = vld [vmem:[%s12679_s3 + $0x40] sm:$0xff] }
 0x15d   : > { %9406 = vmatmul.mubr.msk.f32.gmra.mrb[4].mxu1 %vm356_vm0, %v12985_v23  ;;  %v7773_v23 = vld [vmem:[%s10701_s10 + $0x38] sm:$0xff] }
 0x15e   : > { %9856 = vmatmul.mubr.msk.f32.gmra.mrb[4].mxu0 %vm356_vm0, %v12986_v39  ;;  %9408 = vmatprep.mubr.msk.f32.mxu1 %vm356_vm0, %v12987_v40  ;;  %v8325_v39 = vld [vmem:[%s10706_s13 + $0x51] sm:$0xff]  ;;  %v7774_v40 = vld [vmem:[%s10701_s10 + $0x48] sm:$0xff] }
 0x15f   : > { %9858 = vmatprep.mubr.msk.f32.mxu0 %vm356_vm0, %v12988_v41  ;;  %v8326_v41 = vld [vmem:[%s10706_s13 + $0x61] sm:$0xff] }
 0x161   : > { %9409 = vmatmul.mubr.msk.f32.gmra.mrb[6].mxu1 %vm356_vm0, %v12989_v42  ;;  %v7776_v42 = vld [vmem:[%s10701_s10 + $0x60] sm:$0xff] }
 0x162   : > { %9859 = vmatmul.mubr.msk.f32.gmra.mrb[6].mxu0 %vm356_vm0, %v12990_v43  ;;  %9411 = vmatprep.mubr.msk.f32.mxu1 %vm356_vm0, %v12991_v44  ;;  %v8328_v43 = vld [vmem:[%s10706_s13 + $0x79] sm:$0xff]  ;;  %v7777_v44 = vld [vmem:[%s10701_s10 + $0x68] sm:$0xff] }
 0x163   : > { %9861 = vmatprep.mubr.msk.f32.mxu0 %vm356_vm0, %v12992_v45  ;;  %v8329_v45 = vld [vmem:[%s10706_s13 + $0x81] sm:$0xff] }
 0x165   : > { %9412 = vmatmul.mubr.msk.f32.gmra.mrb[8].mxu1 %vm356_vm0, %v12993_v46  ;;  %v7778_v46 = vld [vmem:[%s10701_s10 + $0x78] sm:$0xff] }
 0x166   : > { %9862 = vmatmul.mubr.msk.f32.gmra.mrb[8].mxu0 %vm356_vm0, %v12994_v47  ;;  %9414 = vmatprep.mubr.msk.f32.mxu1 %vm356_vm0, %v12995_v48  ;;  %v8330_v47 = vld [vmem:[%s10706_s13 + $0x91] sm:$0xff]  ;;  %v7779_v48 = vld [vmem:[%s10701_s10 + $0x80] sm:$0xff] }
 0x167   : > { %9864 = vmatprep.mubr.msk.f32.mxu0 %vm356_vm0, %v12996_v49  ;;  %v8331_v49 = vld [vmem:[%s10706_s13 + $0x99] sm:$0xff] }
 0x169   : > { %9415 = vmatmul.mubr.msk.f32.gmra.mrb[10].mxu1 %vm356_vm0, %v12997_v50  ;;  %v7780_v50 = vld [vmem:[%s10701_s10 + $0x90] sm:$0xff] }
 0x16a   : > { %9865 = vmatmul.mubr.msk.f32.gmra.mrb[10].mxu0 %vm356_vm0, %v12998_v51  ;;  %9417 = vmatprep.mubr.msk.f32.mxu1 %vm356_vm0, %v12999_v52  ;;  %v8332_v51 = vld [vmem:[%s10706_s13 + $0xa9] sm:$0xff]  ;;  %v7781_v52 = vld [vmem:[%s10701_s10 + $0x98] sm:$0xff] }
 0x16b   : > { %9867 = vmatprep.mubr.msk.f32.mxu0 %vm356_vm0, %v13000_v53  ;;  %v8333_v53 = vld [vmem:[%s10706_s13 + $0xb1] sm:$0xff] }
 0x16d   : > { %9418 = vmatmul.mubr.msk.f32.gmra.mrb[12].mxu1 %vm356_vm0, %v13001_v54  ;;  %v7782_v54 = vld [vmem:[%s10701_s10 + $0xa8] sm:$0xff] }
 0x16e   : > { %9868 = vmatmul.mubr.msk.f32.gmra.mrb[12].mxu0 %vm356_vm0, %v13002_v55  ;;  %9420 = vmatprep.mubr.msk.f32.mxu1 %vm356_vm0, %v13003_v56  ;;  %v8334_v55 = vld [vmem:[%s10706_s13 + $0xc1] sm:$0xff]  ;;  %v7783_v56 = vld [vmem:[%s10701_s10 + $0xb0] sm:$0xff] }
 0x16f   : > { %9870 = vmatprep.mubr.msk.f32.mxu0 %vm356_vm0, %v13004_v57  ;;  %v8335_v57 = vld [vmem:[%s10706_s13 + $0xc9] sm:$0xff] }
 0x171   : > { %9421 = vmatmul.mubr.msk.f32.gmra.mrb[14].mxu1 %vm356_vm0, %v13005_v58  ;;  %v7784_v58 = vld [vmem:[%s10701_s10 + $0xc0] sm:$0xff] }
 0x172   : > { %9871 = vmatmul.mubr.msk.f32.gmra.mrb[14].mxu0 %vm356_vm0, %v13006_v60  ;;  %9423 = vmatprep.mubr.msk.f32.mxu1 %vm356_vm0, %v13007_v62  ;;  %v8336_v60 = vld [vmem:[%s10706_s13 + $0xd9] sm:$0xff]  ;;  %v7785_v62 = vld [vmem:[%s10701_s10 + $0xc8] sm:$0xff] }
 0x173   : > { %9873 = vmatprep.mubr.msk.f32.mxu0 %vm356_vm0, %v13008_v0  ;;  %v8337_v0 = vld [vmem:[%s10706_s13 + $0xe1] sm:$0xff] }
 0x175   : > { %9424 = vmatmul.mubr.msk.f32.gmra.mrb[16].mxu1 %vm356_vm0, %v13009_v2  ;;  %v7786_v2 = vld [vmem:[%s10701_s10 + $0xd8] sm:$0xff] }
 0x176   : > { %9874 = vmatmul.mubr.msk.f32.gmra.mrb[16].mxu0 %vm356_vm0, %v13010_v4  ;;  %9426 = vmatprep.mubr.msk.f32.mxu1 %vm356_vm0, %v13011_v11  ;;  %v8338_v4 = vld [vmem:[%s10706_s13 + $0xf1] sm:$0xff]  ;;  %v7787_v11 = vld [vmem:[%s10701_s10 + $0xe0] sm:$0xff] }
 0x177   : > { %9876 = vmatprep.mubr.msk.f32.mxu0 %vm356_vm0, %v13012_v59  ;;  %v8339_v59 = vld [vmem:[%s10706_s13 + $0xf9] sm:$0xff] }
 0x179   : > { %9427 = vmatmul.mubr.msk.f32.gmra.mrb[18].mxu1 %vm356_vm0, %v13013_v1  ;;  %v7788_v1 = vld [vmem:[%s10701_s10 + $0xf0] sm:$0xff] }
 0x17a   : > { %9877 = vmatmul.mubr.msk.f32.gmra.mrb[18].mxu0 %vm356_vm0, %v13014_v8  ;;  %9429 = vmatprep.mubr.msk.f32.mxu1 %vm356_vm0, %v13015_v10  ;;  %v8340_v8 = vld [vmem:[%s10706_s13 + $0x109] sm:$0xff]  ;;  %v7789_v10 = vld [vmem:[%s10701_s10 + $0xf8] sm:$0xff] }
 0x17b   : > { %9879 = vmatprep.mubr.msk.f32.mxu0 %vm356_vm0, %v13016_v3  ;;  %v8341_v3 = vld [vmem:[%s10706_s13 + $0x111] sm:$0xff] }
 0x17d   : > { %9430 = vmatmul.mubr.msk.f32.gmra.mrb[20].mxu1 %vm356_vm0, %v13017_v7  ;;  %v7790_v7 = vld [vmem:[%s10701_s10 + $0x108] sm:$0xff] }
 0x17e   : > { %9880 = vmatmul.mubr.msk.f32.gmra.mrb[20].mxu0 %vm356_vm0, %v13018_v13  ;;  %9432 = vmatprep.mubr.msk.f32.mxu1 %vm356_vm0, %v13019_v14  ;;  %v8342_v13 = vld [vmem:[%s10706_s13 + $0x121] sm:$0xff]  ;;  %v7791_v14 = vld [vmem:[%s10701_s10 + $0x110] sm:$0xff] }
 0x17f   : > { %9882 = vmatprep.mubr.msk.f32.mxu0 %vm356_vm0, %v13020_v15  ;;  %v8343_v15 = vld [vmem:[%s10706_s13 + $0x129] sm:$0xff] }
 0x181   : > { %9433 = vmatmul.mubr.msk.f32.gmra.mrb[22].mxu1 %vm356_vm0, %v13021_v17  ;;  %v7792_v17 = vld [vmem:[%s10701_s10 + $0x120] sm:$0xff] }
 0x182   : > { %9883 = vmatmul.mubr.msk.f32.gmra.mrb[22].mxu0 %vm356_vm0, %v11611_v12  ;;  %9435 = vmatprep.mubr.msk.f32.mxu1 %vm356_vm0, %v13022_v18  ;;  %v12073_v12 = vld [vmem:[%s10701_s10 + $0x181] sm:$0xff]  ;;  %v8344_v18 = vld [vmem:[%s10706_s13 + $0x139] sm:$0xff] }
 0x183   : > { %9885 = vmatprep.mubr.msk.f32.mxu0 %vm356_vm0, %v13023_v19  ;;  %v7793_v19 = vld [vmem:[%s10701_s10 + $0x128] sm:$0xff] }
 0x185   : > { %9436 = vmatmul.mubr.msk.f32.gmra.mrb[24].mxu1 %vm356_vm0, %v13024_v21  ;;  %v8345_v21 = vld [vmem:[%s10706_s13 + $0x141] sm:$0xff] }
 0x186   : > { %9886 = vmatmul.mubr.msk.f32.gmra.mrb[24].mxu0 %vm356_vm0, %v11631_v6  ;;  %9438 = vmatprep.mubr.msk.f32.mxu1 %vm356_vm0, %v13025_v24  ;;  %v12084_v6 = vld [vmem:[%s10701_s10 + $0x189] sm:$0xff]  ;;  %v7794_v24 = vld [vmem:[%s10701_s10 + $0x138] sm:$0xff] }
 0x187   : > { %9888 = vmatprep.mubr.msk.f32.mxu0 %vm356_vm0, %v11637_v63  ;;  %v8320_v63 = vld [vmem:[%s10701_s10 + $0x199] sm:$0xff] }
 0x189   : > { %9439 = vmatmul.mubr.msk.f32.gmra.mrb[26].mxu1 %vm356_vm0, %v13026_v25  ;;  %v8346_v25 = vld [vmem:[%s10706_s13 + $0x151] sm:$0xff] }
 0x18a   : > { %9889 = vmatmul.mubr.msk.f32.gmra.mrb[26].mxu0 %vm356_vm0, %v11648_v61  ;;  %9441 = vmatprep.mubr.msk.f32.mxu1 %vm356_vm0, %v13027_v26  ;;  %v13029_v61 = vld [vmem:[#allocation116_spill] sm:$0xff]  ;;  %v7795_v26 = vld [vmem:[%s10701_s10 + $0x140] sm:$0xff] }
 0x18b   : > { %9891 = vmatprep.mubr.msk.f32.mxu0 %vm356_vm0, %v12073_v12 }
 0x18d   : > { %9442 = vmatmul.mubr.msk.f32.gmra.mrb[28].mxu1 %vm356_vm0, %v13028_v27  ;;  %v7796_v27 = vld [vmem:[%s10701_s10 + $0x150] sm:$0xff] }
 0x18e   : > { %9892 = vmatmul.mubr.msk.f32.gmra.mrb[28].mxu0 %vm356_vm0, %v12084_v6  ;;  %9444 = vmatprep.mubr.msk.f32.mxu1 %vm356_vm0, %v13029_v61  ;;  %v8348_v61 = vld [vmem:[%s10706_s13 + $0x169] sm:$0xff] }
 0x18f   : > { %9894 = vmatprep.mubr.msk.f32.mxu0 %vm356_vm0, %v8320_v63  ;;  %v8347_v63 = vld [vmem:[%s10706_s13 + $0x159] sm:$0xff] }
 0x191   : > { %9445 = vmatmul.mubr.msk.f32.gmra.mrb[30].mxu1 %vm356_vm0, %v13030_v31  ;;  %v8350_v31 = vld [vmem:[%s10706_s13 + $0x181] sm:$0xff] }
 0x192   : > { %9895 = vmatmul.mubr.msk.f32.gmra.mrb[30].mxu0 %vm356_vm0, %v8321_v28  ;;  %9449 = vmatprep.mubr.msk.f32.mxu1 %vm356_vm0, %v7770_v29  ;;  %v7797_v28 = vld [vmem:[%s10701_s10 + $0x158] sm:$0xff] }
 0x193   : > { %9899 = vmatprep.mubr.msk.f32.mxu0 %vm356_vm0, %v8322_v30  ;;  %v8349_v29 = vld [vmem:[%s10706_s13 + $0x171] sm:$0xff]  ;;  %v7798_v30 = vld [vmem:[%s10701_s10 + $0x168] sm:$0xff] }
 0x195   : > { %9450 = vmatmul.mubr.msk.f32.vlgmr.msra.gmra.mrb[0].mxu1 %vm356_vm0, %v7771_v34  ;;  %v7799_v34 = vld [vmem:[%s10701_s10 + $0x170] sm:$0xff] }
 0x196   : > { %9900 = vmatmul.mubr.msk.f32.vlgmr.msra.gmra.mrb[0].mxu0 %vm356_vm0, %v8323_v35  ;;  %9498 = vmatpush3.msra.mxu1 %v11961_v32  ;;  %v7775_v32 = vld [vmem:[%s10701_s10 + $0x50] sm:$0xff] }
 0x197   : > { %9948 = vmatpush3.msra.mxu0 %v11966_v33  ;;  %9452 = vmatprep.mubr.msk.f32.mxu1 %vm356_vm0, %v7772_v36  ;;  %v8327_v33 = vld [vmem:[%s10706_s13 + $0x69] sm:$0xff]  ;;  %v8352_v36 = vld [vmem:[%s10706_s13 + $0x199] sm:$0xff] }
 0x198   : > { %9902 = vmatprep.mubr.msk.f32.mxu0 %vm356_vm0, %v8324_v37  ;;  %9547 = vmatprep.subr.mxu1 %v12111_v38  ;;  %v8351_v35 = vld [vmem:[%s10706_s13 + $0x189] sm:$0xff]  ;;  %v8353_v37 = vld [vmem:[%s10706_s13 + $0x1a1] sm:$0xff] }
 0x199   : > { %9997 = vmatprep.subr.mxu0 %v12116_v22  ;;  %9453 = vmatmul.mubr.msk.f32.gmra.mrb[2].mxu1 %vm356_vm0, %v7773_v23  ;;  %v7802_v23 = vld [vmem:[%s10706_s13 + $0x18] sm:$0xff] }
 0x19a   : > { %9903 = vmatmul.mubr.msk.f32.gmra.mrb[2].mxu0 %vm356_vm0, %v8325_v39  ;;  %9455 = vmatprep.mubr.msk.f32.mxu1 %vm356_vm0, %v7774_v40  ;;  %v8420_v39 = vld [vmem:[%s10701_s10 + $0x32] sm:$0xff]  ;;  %v7803_v40 = vld [vmem:[%s10706_s13 + $0x20] sm:$0xff] }
 0x19b   : > { %9905 = vmatprep.mubr.msk.f32.mxu0 %vm356_vm0, %v8326_v41  ;;  %v7804_v41 = vld [vmem:[%s10706_s13 + $0x30] sm:$0xff] }
 0x19d   : > { %9456 = vmatmul.mubr.msk.f32.gmra.mrb[4].mxu1 %vm356_vm0, %v7775_v32  ;;  %v8422_v32 = vld [vmem:[%s10701_s10 + $0x4a] sm:$0xff] }
 0x19e   : > { %9906 = vmatmul.mubr.msk.f32.gmra.mrb[4].mxu0 %vm356_vm0, %v8327_v33  ;;  %9458 = vmatprep.mubr.msk.f32.mxu1 %vm356_vm0, %v7776_v42  ;;  %v8423_v33 = vld [vmem:[%s10701_s10 + $0x52] sm:$0xff]  ;;  %v7806_v42 = vld [vmem:[%s10706_s13 + $0x48] sm:$0xff] }
 0x19f   : > { %9908 = vmatprep.mubr.msk.f32.mxu0 %vm356_vm0, %v8328_v43  ;;  %v8424_v43 = vld [vmem:[%s10701_s10 + $0x62] sm:$0xff] }
 0x1a1   : > { %9459 = vmatmul.mubr.msk.f32.gmra.mrb[6].mxu1 %vm356_vm0, %v7777_v44  ;;  %v7808_v44 = vld [vmem:[%s10706_s13 + $0x60] sm:$0xff] }
 0x1a2   : > { %9909 = vmatmul.mubr.msk.f32.gmra.mrb[6].mxu0 %vm356_vm0, %v8329_v45  ;;  %9461 = vmatprep.mubr.msk.f32.mxu1 %vm356_vm0, %v7778_v46  ;;  %v8426_v45 = vld [vmem:[%s10701_s10 + $0x7a] sm:$0xff]  ;;  %v7809_v46 = vld [vmem:[%s10706_s13 + $0x68] sm:$0xff] }
 0x1a3   : > { %9911 = vmatprep.mubr.msk.f32.mxu0 %vm356_vm0, %v8330_v47  ;;  %v8427_v47 = vld [vmem:[%s10701_s10 + $0x82] sm:$0xff] }
 0x1a5   : > { %9462 = vmatmul.mubr.msk.f32.gmra.mrb[8].mxu1 %vm356_vm0, %v7779_v48  ;;  %v7810_v48 = vld [vmem:[%s10706_s13 + $0x78] sm:$0xff] }
 0x1a6   : > { %9912 = vmatmul.mubr.msk.f32.gmra.mrb[8].mxu0 %vm356_vm0, %v8331_v49  ;;  %9464 = vmatprep.mubr.msk.f32.mxu1 %vm356_vm0, %v7780_v50  ;;  %v8428_v49 = vld [vmem:[%s10701_s10 + $0x92] sm:$0xff]  ;;  %v7811_v50 = vld [vmem:[%s10706_s13 + $0x80] sm:$0xff] }
 0x1a7   : > { %9914 = vmatprep.mubr.msk.f32.mxu0 %vm356_vm0, %v8332_v51  ;;  %v8429_v51 = vld [vmem:[%s10701_s10 + $0x9a] sm:$0xff] }
 0x1a9   : > { %9465 = vmatmul.mubr.msk.f32.gmra.mrb[10].mxu1 %vm356_vm0, %v7781_v52  ;;  %v7812_v52 = vld [vmem:[%s10706_s13 + $0x90] sm:$0xff] }
 0x1aa   : > { %9915 = vmatmul.mubr.msk.f32.gmra.mrb[10].mxu0 %vm356_vm0, %v8333_v53  ;;  %9467 = vmatprep.mubr.msk.f32.mxu1 %vm356_vm0, %v7782_v54  ;;  %v8430_v53 = vld [vmem:[%s10701_s10 + $0xaa] sm:$0xff]  ;;  %v7813_v54 = vld [vmem:[%s10706_s13 + $0x98] sm:$0xff] }
 0x1ab   : > { %9917 = vmatprep.mubr.msk.f32.mxu0 %vm356_vm0, %v8334_v55  ;;  %v8431_v55 = vld [vmem:[%s10701_s10 + $0xb2] sm:$0xff] }
 0x1ad   : > { %9468 = vmatmul.mubr.msk.f32.gmra.mrb[12].mxu1 %vm356_vm0, %v7783_v56  ;;  %v7814_v56 = vld [vmem:[%s10706_s13 + $0xa8] sm:$0xff] }
 0x1ae   : > { %9918 = vmatmul.mubr.msk.f32.gmra.mrb[12].mxu0 %vm356_vm0, %v8335_v57  ;;  %9470 = vmatprep.mubr.msk.f32.mxu1 %vm356_vm0, %v7784_v58  ;;  %v8432_v57 = vld [vmem:[%s10701_s10 + $0xc2] sm:$0xff]  ;;  %v7815_v58 = vld [vmem:[%s10706_s13 + $0xb0] sm:$0xff] }
 0x1af   : > { %9920 = vmatprep.mubr.msk.f32.mxu0 %vm356_vm0, %v8336_v60  ;;  %v8433_v60 = vld [vmem:[%s10701_s10 + $0xca] sm:$0xff] }
 0x1b1   : > { %9471 = vmatmul.mubr.msk.f32.gmra.mrb[14].mxu1 %vm356_vm0, %v7785_v62  ;;  %v7816_v62 = vld [vmem:[%s10706_s13 + $0xc0] sm:$0xff] }
 0x1b2   : > { %9921 = vmatmul.mubr.msk.f32.gmra.mrb[14].mxu0 %vm356_vm0, %v8337_v0  ;;  %9473 = vmatprep.mubr.msk.f32.mxu1 %vm356_vm0, %v7786_v2  ;;  %v8434_v0 = vld [vmem:[%s10701_s10 + $0xda] sm:$0xff]  ;;  %v7817_v2 = vld [vmem:[%s10706_s13 + $0xc8] sm:$0xff] }
 0x1b3   : > { %9923 = vmatprep.mubr.msk.f32.mxu0 %vm356_vm0, %v8338_v4  ;;  %v8435_v4 = vld [vmem:[%s10701_s10 + $0xe2] sm:$0xff] }
 0x1b5   : > { %9474 = vmatmul.mubr.msk.f32.gmra.mrb[16].mxu1 %vm356_vm0, %v7787_v11  ;;  %v7818_v11 = vld [vmem:[%s10706_s13 + $0xd8] sm:$0xff] }
 0x1b6   : > { %9924 = vmatmul.mubr.msk.f32.gmra.mrb[16].mxu0 %vm356_vm0, %v8339_v59  ;;  %9476 = vmatprep.mubr.msk.f32.mxu1 %vm356_vm0, %v7788_v1  ;;  %v8436_v59 = vld [vmem:[%s10701_s10 + $0xf2] sm:$0xff]  ;;  %v7819_v1 = vld [vmem:[%s10706_s13 + $0xe0] sm:$0xff] }
 0x1b7   : > { %9926 = vmatprep.mubr.msk.f32.mxu0 %vm356_vm0, %v8340_v8  ;;  %v8437_v8 = vld [vmem:[%s10701_s10 + $0xfa] sm:$0xff] }
 0x1b9   : > { %9477 = vmatmul.mubr.msk.f32.gmra.mrb[18].mxu1 %vm356_vm0, %v7789_v10  ;;  %v7820_v10 = vld [vmem:[%s10706_s13 + $0xf0] sm:$0xff] }
 0x1ba   : > { %9927 = vmatmul.mubr.msk.f32.gmra.mrb[18].mxu0 %vm356_vm0, %v8341_v3  ;;  %9479 = vmatprep.mubr.msk.f32.mxu1 %vm356_vm0, %v7790_v7  ;;  %v8438_v3 = vld [vmem:[%s10701_s10 + $0x10a] sm:$0xff]  ;;  %v7821_v7 = vld [vmem:[%s10706_s13 + $0xf8] sm:$0xff] }
 0x1bb   : > { %9929 = vmatprep.mubr.msk.f32.mxu0 %vm356_vm0, %v8342_v13  ;;  %v8439_v13 = vld [vmem:[%s10701_s10 + $0x112] sm:$0xff] }
 0x1bd   : > { %9480 = vmatmul.mubr.msk.f32.gmra.mrb[20].mxu1 %vm356_vm0, %v7791_v14  ;;  %v7822_v14 = vld [vmem:[%s10706_s13 + $0x108] sm:$0xff] }
 0x1be   : > { %9930 = vmatmul.mubr.msk.f32.gmra.mrb[20].mxu0 %vm356_vm0, %v8343_v15  ;;  %9482 = vmatprep.mubr.msk.f32.mxu1 %vm356_vm0, %v7792_v17  ;;  %v8440_v15 = vld [vmem:[%s10701_s10 + $0x122] sm:$0xff]  ;;  %v7823_v17 = vld [vmem:[%s10706_s13 + $0x110] sm:$0xff] }
 0x1bf   : > { %9932 = vmatprep.mubr.msk.f32.mxu0 %vm356_vm0, %v8344_v18  ;;  %v8441_v18 = vld [vmem:[%s10701_s10 + $0x12a] sm:$0xff] }
 0x1c1   : > { %9483 = vmatmul.mubr.msk.f32.gmra.mrb[22].mxu1 %vm356_vm0, %v7793_v19  ;;  %v7824_v19 = vld [vmem:[%s10706_s13 + $0x120] sm:$0xff] }
 0x1c2   : > { %9933 = vmatmul.mubr.msk.f32.gmra.mrb[22].mxu0 %vm356_vm0, %v8345_v21  ;;  %9485 = vmatprep.mubr.msk.f32.mxu1 %vm356_vm0, %v7794_v24  ;;  %v8442_v21 = vld [vmem:[%s10701_s10 + $0x13a] sm:$0xff]  ;;  %v7825_v24 = vld [vmem:[%s10706_s13 + $0x128] sm:$0xff] }
 0x1c3   : > { %9935 = vmatprep.mubr.msk.f32.mxu0 %vm356_vm0, %v8346_v25  ;;  %v8443_v25 = vld [vmem:[%s10701_s10 + $0x142] sm:$0xff] }
 0x1c5   : > { %9486 = vmatmul.mubr.msk.f32.gmra.mrb[24].mxu1 %vm356_vm0, %v7795_v26  ;;  %v7826_v26 = vld [vmem:[%s10706_s13 + $0x138] sm:$0xff] }
 0x1c6   : > { %9936 = vmatmul.mubr.msk.f32.gmra.mrb[24].mxu0 %vm356_vm0, %v8347_v63  ;;  %9488 = vmatprep.mubr.msk.f32.mxu1 %vm356_vm0, %v7796_v27  ;;  %v8444_v63 = vld [vmem:[%s10701_s10 + $0x152] sm:$0xff]  ;;  %v7827_v27 = vld [vmem:[%s10706_s13 + $0x140] sm:$0xff] }
 0x1c7   : > { %9938 = vmatprep.mubr.msk.f32.mxu0 %vm356_vm0, %v8348_v61  ;;  %v8445_v61 = vld [vmem:[%s10701_s10 + $0x15a] sm:$0xff] }
 0x1c9   : > { %9489 = vmatmul.mubr.msk.f32.gmra.mrb[26].mxu1 %vm356_vm0, %v7797_v28  ;;  %v7828_v28 = vld [vmem:[%s10706_s13 + $0x150] sm:$0xff] }
 0x1ca   : > { %9939 = vmatmul.mubr.msk.f32.gmra.mrb[26].mxu0 %vm356_vm0, %v8349_v29  ;;  %9491 = vmatprep.mubr.msk.f32.mxu1 %vm356_vm0, %v7798_v30  ;;  %v8446_v29 = vld [vmem:[%s10701_s10 + $0x16a] sm:$0xff]  ;;  %v7829_v30 = vld [vmem:[%s10706_s13 + $0x158] sm:$0xff] }
 0x1cb   : > { %9941 = vmatprep.mubr.msk.f32.mxu0 %vm356_vm0, %v8350_v31  ;;  %v8447_v31 = vld [vmem:[%s10701_s10 + $0x172] sm:$0xff] }
 0x1cd   : > { %9492 = vmatmul.mubr.msk.f32.gmra.mrb[28].mxu1 %vm356_vm0, %v7799_v34  ;;  %v7830_v34 = vld [vmem:[%s10706_s13 + $0x168] sm:$0xff] }
 0x1ce   : > { %9942 = vmatmul.mubr.msk.f32.gmra.mrb[28].mxu0 %vm356_vm0, %v8351_v35  ;;  %9494 = vmatprep.mubr.msk.f32.mxu1 %vm356_vm0, %v11777_v5  ;;  %v8421_v5 = vld [vmem:[%s10701_s10 + $0x3a] sm:$0xff]  ;;  %v8448_v35 = vld [vmem:[%s10701_s10 + $0x182] sm:$0xff] }
 0x1cf   : > { %9944 = vmatprep.mubr.msk.f32.mxu0 %vm356_vm0, %v8352_v36  ;;  %v7831_v36 = vld [vmem:[%s10706_s13 + $0x170] sm:$0xff] }
 0x1d1   : > { %9495 = vmatmul.mubr.msk.f32.gmra.mrb[30].mxu1 %vm356_vm0, %v11788_v9  ;;  %v7805_v9 = vld [vmem:[%s10706_s13 + $0x38] sm:$0xff] }
 0x1d2   : > { %9945 = vmatmul.mubr.msk.f32.gmra.mrb[30].mxu0 %vm356_vm0, %v8353_v37  ;;  %9499 = vmatprep.mubr.msk.f32.mxu1 %vm356_vm0, %v7802_v23  ;;  %v8449_v37 = vld [vmem:[%s10701_s10 + $0x18a] sm:$0xff]  ;;  %v8450_v23 = vld [vmem:[%s10701_s10 + $0x19a] sm:$0xff] }
 0x1d3   : > { %9949 = vmatprep.mubr.msk.f32.mxu0 %vm356_vm0, %v8420_v39  ;;  %v8451_v39 = vld [vmem:[%s10701_s10 + $0x1a2] sm:$0xff] }
 0x1d5   : > { %9500 = vmatmul.mubr.msk.f32.vlgmr.msra.gmra.mrb[0].mxu1 %vm356_vm0, %v7803_v40  ;;  %v7900_v40 = vld [vmem:[%s10701_s10 + $0x19] sm:$0xff] }
 0x1d6   : > { %9950 = vmatmul.mubr.msk.f32.vlgmr.msra.gmra.mrb[0].mxu0 %vm356_vm0, %v8421_v5  ;;  %9548 = vmatpush3.msra.mxu1 %v12111_v38  ;;  %v7807_v38 = vld [vmem:[%s10706_s13 + $0x50] sm:$0xff] }
 0x1d7   : > { %9998 = vmatpush3.msra.mxu0 %v12116_v22  ;;  %9502 = vmatprep.mubr.msk.f32.mxu1 %vm356_vm0, %v7804_v41  ;;  %v8425_v22 = vld [vmem:[%s10701_s10 + $0x6a] sm:$0xff]  ;;  %v8452_v5 = vld [vmem:[%s10706_s13 + $0x32] sm:$0xff]  ;;  %v7901_v41 = vld [vmem:[%s10701_s10 + $0x21] sm:$0xff] }
 0x1d8   : > { %9952 = vmatprep.mubr.msk.f32.mxu0 %vm356_vm0, %v8422_v32  ;;  %v7902_v32 = vld [vmem:[%s10701_s10 + $0x31] sm:$0xff] }
 0x1d9   : > { %9503 = vmatmul.mubr.msk.f32.gmra.mrb[2].mxu1 %vm356_vm0, %v7805_v9  ;;  %v8454_v9 = vld [vmem:[%s10706_s13 + $0x4a] sm:$0xff] }
 0x1da   : > { %9953 = vmatmul.mubr.msk.f32.gmra.mrb[2].mxu0 %vm356_vm0, %v8423_v33  ;;  %9505 = vmatprep.mubr.msk.f32.mxu1 %vm356_vm0, %v7806_v42  ;;  %v8455_v33 = vld [vmem:[%s10706_s13 + $0x52] sm:$0xff]  ;;  %v7904_v42 = vld [vmem:[%s10701_s10 + $0x49] sm:$0xff] }
 0x1db   : > { %9955 = vmatprep.mubr.msk.f32.mxu0 %vm356_vm0, %v8424_v43  ;;  %v8456_v43 = vld [vmem:[%s10706_s13 + $0x62] sm:$0xff] }
 0x1dd   : > { %9506 = vmatmul.mubr.msk.f32.gmra.mrb[4].mxu1 %vm356_vm0, %v7807_v38  ;;  %v7905_v38 = vld [vmem:[%s10701_s10 + $0x51] sm:$0xff] }
 0x1de   : > { %9956 = vmatmul.mubr.msk.f32.gmra.mrb[4].mxu0 %vm356_vm0, %v8425_v22  ;;  %9508 = vmatprep.mubr.msk.f32.mxu1 %vm356_vm0, %v7808_v44  ;;  %v8457_v22 = vld [vmem:[%s10706_s13 + $0x6a] sm:$0xff]  ;;  %v7906_v44 = vld [vmem:[%s10701_s10 + $0x61] sm:$0xff] }
 0x1df   : > { %9958 = vmatprep.mubr.msk.f32.mxu0 %vm356_vm0, %v8426_v45  ;;  %v8458_v45 = vld [vmem:[%s10706_s13 + $0x7a] sm:$0xff] }
 0x1e1   : > { %9509 = vmatmul.mubr.msk.f32.gmra.mrb[6].mxu1 %vm356_vm0, %v7809_v46  ;;  %v7907_v46 = vld [vmem:[%s10701_s10 + $0x69] sm:$0xff] }
 0x1e2   : > { %9959 = vmatmul.mubr.msk.f32.gmra.mrb[6].mxu0 %vm356_vm0, %v8427_v47  ;;  %9511 = vmatprep.mubr.msk.f32.mxu1 %vm356_vm0, %v7810_v48  ;;  %v8459_v47 = vld [vmem:[%s10706_s13 + $0x82] sm:$0xff]  ;;  %v7908_v48 = vld [vmem:[%s10701_s10 + $0x79] sm:$0xff] }
 0x1e3   : > { %9961 = vmatprep.mubr.msk.f32.mxu0 %vm356_vm0, %v8428_v49  ;;  %v8460_v49 = vld [vmem:[%s10706_s13 + $0x92] sm:$0xff] }
 0x1e5   : > { %9512 = vmatmul.mubr.msk.f32.gmra.mrb[8].mxu1 %vm356_vm0, %v7811_v50  ;;  %v7909_v50 = vld [vmem:[%s10701_s10 + $0x81] sm:$0xff] }
 0x1e6   : > { %9962 = vmatmul.mubr.msk.f32.gmra.mrb[8].mxu0 %vm356_vm0, %v8429_v51  ;;  %9514 = vmatprep.mubr.msk.f32.mxu1 %vm356_vm0, %v7812_v52  ;;  %v8461_v51 = vld [vmem:[%s10706_s13 + $0x9a] sm:$0xff]  ;;  %v7910_v52 = vld [vmem:[%s10701_s10 + $0x91] sm:$0xff] }
 0x1e7   : > { %9964 = vmatprep.mubr.msk.f32.mxu0 %vm356_vm0, %v8430_v53  ;;  %v8462_v53 = vld [vmem:[%s10706_s13 + $0xaa] sm:$0xff] }
 0x1e9   : > { %9515 = vmatmul.mubr.msk.f32.gmra.mrb[10].mxu1 %vm356_vm0, %v7813_v54  ;;  %v7911_v54 = vld [vmem:[%s10701_s10 + $0x99] sm:$0xff] }
 0x1ea   : > { %9965 = vmatmul.mubr.msk.f32.gmra.mrb[10].mxu0 %vm356_vm0, %v8431_v55  ;;  %9517 = vmatprep.mubr.msk.f32.mxu1 %vm356_vm0, %v7814_v56  ;;  %v8463_v55 = vld [vmem:[%s10706_s13 + $0xb2] sm:$0xff]  ;;  %v7912_v56 = vld [vmem:[%s10701_s10 + $0xa9] sm:$0xff] }
 0x1eb   : > { %9967 = vmatprep.mubr.msk.f32.mxu0 %vm356_vm0, %v8432_v57  ;;  %v8464_v57 = vld [vmem:[%s10706_s13 + $0xc2] sm:$0xff] }
 0x1ed   : > { %9518 = vmatmul.mubr.msk.f32.gmra.mrb[12].mxu1 %vm356_vm0, %v7815_v58  ;;  %v7913_v58 = vld [vmem:[%s10701_s10 + $0xb1] sm:$0xff] }
 0x1ee   : > { %9968 = vmatmul.mubr.msk.f32.gmra.mrb[12].mxu0 %vm356_vm0, %v8433_v60  ;;  %9520 = vmatprep.mubr.msk.f32.mxu1 %vm356_vm0, %v7816_v62  ;;  %v8465_v60 = vld [vmem:[%s10706_s13 + $0xca] sm:$0xff]  ;;  %v7914_v62 = vld [vmem:[%s10701_s10 + $0xc1] sm:$0xff] }
 0x1ef   : > { %9970 = vmatprep.mubr.msk.f32.mxu0 %vm356_vm0, %v8434_v0  ;;  %v8466_v0 = vld [vmem:[%s10706_s13 + $0xda] sm:$0xff] }
 0x1f1   : > { %9521 = vmatmul.mubr.msk.f32.gmra.mrb[14].mxu1 %vm356_vm0, %v7817_v2  ;;  %v7915_v2 = vld [vmem:[%s10701_s10 + $0xc9] sm:$0xff] }
 0x1f2   : > { %9971 = vmatmul.mubr.msk.f32.gmra.mrb[14].mxu0 %vm356_vm0, %v8435_v4  ;;  %9523 = vmatprep.mubr.msk.f32.mxu1 %vm356_vm0, %v7818_v11  ;;  %v8467_v4 = vld [vmem:[%s10706_s13 + $0xe2] sm:$0xff]  ;;  %v7916_v11 = vld [vmem:[%s10701_s10 + $0xd9] sm:$0xff] }
 0x1f3   : > { %9973 = vmatprep.mubr.msk.f32.mxu0 %vm356_vm0, %v8436_v59  ;;  %v8468_v59 = vld [vmem:[%s10706_s13 + $0xf2] sm:$0xff] }
 0x1f5   : > { %9524 = vmatmul.mubr.msk.f32.gmra.mrb[16].mxu1 %vm356_vm0, %v7819_v1  ;;  %v7917_v1 = vld [vmem:[%s10701_s10 + $0xe1] sm:$0xff] }
 0x1f6   : > { %9974 = vmatmul.mubr.msk.f32.gmra.mrb[16].mxu0 %vm356_vm0, %v8437_v8  ;;  %9526 = vmatprep.mubr.msk.f32.mxu1 %vm356_vm0, %v7820_v10  ;;  %v8469_v8 = vld [vmem:[%s10706_s13 + $0xfa] sm:$0xff]  ;;  %v7918_v10 = vld [vmem:[%s10701_s10 + $0xf1] sm:$0xff] }
 0x1f7   : > { %9976 = vmatprep.mubr.msk.f32.mxu0 %vm356_vm0, %v8438_v3  ;;  %v8470_v3 = vld [vmem:[%s10706_s13 + $0x10a] sm:$0xff] }
 0x1f9   : > { %9527 = vmatmul.mubr.msk.f32.gmra.mrb[18].mxu1 %vm356_vm0, %v7821_v7  ;;  %v7919_v7 = vld [vmem:[%s10701_s10 + $0xf9] sm:$0xff] }
 0x1fa   : > { %9977 = vmatmul.mubr.msk.f32.gmra.mrb[18].mxu0 %vm356_vm0, %v8439_v13  ;;  %9529 = vmatprep.mubr.msk.f32.mxu1 %vm356_vm0, %v7822_v14  ;;  %v8471_v13 = vld [vmem:[%s10706_s13 + $0x112] sm:$0xff]  ;;  %v7920_v14 = vld [vmem:[%s10701_s10 + $0x109] sm:$0xff] }
 0x1fb   : > { %9979 = vmatprep.mubr.msk.f32.mxu0 %vm356_vm0, %v8440_v15  ;;  %v8472_v15 = vld [vmem:[%s10706_s13 + $0x122] sm:$0xff] }
 0x1fd   : > { %9530 = vmatmul.mubr.msk.f32.gmra.mrb[20].mxu1 %vm356_vm0, %v7823_v17  ;;  %v7921_v17 = vld [vmem:[%s10701_s10 + $0x111] sm:$0xff] }
 0x1fe   : > { %9980 = vmatmul.mubr.msk.f32.gmra.mrb[20].mxu0 %vm356_vm0, %v8441_v18  ;;  %9532 = vmatprep.mubr.msk.f32.mxu1 %vm356_vm0, %v7824_v19  ;;  %v8473_v18 = vld [vmem:[%s10706_s13 + $0x12a] sm:$0xff]  ;;  %v7922_v19 = vld [vmem:[%s10701_s10 + $0x121] sm:$0xff] }
 0x1ff   : > { %9982 = vmatprep.mubr.msk.f32.mxu0 %vm356_vm0, %v8442_v21  ;;  %v8474_v21 = vld [vmem:[%s10706_s13 + $0x13a] sm:$0xff] }
 0x201   : > { %9533 = vmatmul.mubr.msk.f32.gmra.mrb[22].mxu1 %vm356_vm0, %v7825_v24  ;;  %v7923_v24 = vld [vmem:[%s10701_s10 + $0x129] sm:$0xff] }
 0x202   : > { %9983 = vmatmul.mubr.msk.f32.gmra.mrb[22].mxu0 %vm356_vm0, %v8443_v25  ;;  %9535 = vmatprep.mubr.msk.f32.mxu1 %vm356_vm0, %v7826_v26  ;;  %v8475_v25 = vld [vmem:[%s10706_s13 + $0x142] sm:$0xff]  ;;  %v7924_v26 = vld [vmem:[%s10701_s10 + $0x139] sm:$0xff] }
 0x203   : > { %9985 = vmatprep.mubr.msk.f32.mxu0 %vm356_vm0, %v8444_v63  ;;  %v8476_v63 = vld [vmem:[%s10706_s13 + $0x152] sm:$0xff] }
 0x205   : > { %9536 = vmatmul.mubr.msk.f32.gmra.mrb[24].mxu1 %vm356_vm0, %v7827_v27  ;;  %v7925_v27 = vld [vmem:[%s10701_s10 + $0x141] sm:$0xff] }
 0x206   : > { %9986 = vmatmul.mubr.msk.f32.gmra.mrb[24].mxu0 %vm356_vm0, %v8445_v61  ;;  %9538 = vmatprep.mubr.msk.f32.mxu1 %vm356_vm0, %v7828_v28  ;;  %v8477_v61 = vld [vmem:[%s10706_s13 + $0x15a] sm:$0xff]  ;;  %v7926_v28 = vld [vmem:[%s10701_s10 + $0x151] sm:$0xff] }
 0x207   : > { %9988 = vmatprep.mubr.msk.f32.mxu0 %vm356_vm0, %v8446_v29  ;;  %v8478_v29 = vld [vmem:[%s10706_s13 + $0x16a] sm:$0xff] }
 0x209   : > { %9539 = vmatmul.mubr.msk.f32.gmra.mrb[26].mxu1 %vm356_vm0, %v7829_v30  ;;  %v7927_v30 = vld [vmem:[%s10701_s10 + $0x159] sm:$0xff] }
 0x20a   : > { %9989 = vmatmul.mubr.msk.f32.gmra.mrb[26].mxu0 %vm356_vm0, %v8447_v31  ;;  %9541 = vmatprep.mubr.msk.f32.mxu1 %vm356_vm0, %v7830_v34  ;;  %v8479_v31 = vld [vmem:[%s10706_s13 + $0x172] sm:$0xff]  ;;  %v7928_v34 = vld [vmem:[%s10701_s10 + $0x169] sm:$0xff] }
 0x20b   : > { %9991 = vmatprep.mubr.msk.f32.mxu0 %vm356_vm0, %v8448_v35  ;;  %v8480_v35 = vld [vmem:[%s10706_s13 + $0x182] sm:$0xff] }
 0x20d   : > { %9542 = vmatmul.mubr.msk.f32.gmra.mrb[28].mxu1 %vm356_vm0, %v7831_v36  ;;  %v7929_v36 = vld [vmem:[%s10701_s10 + $0x171] sm:$0xff] }
 0x20e   : > { %9992 = vmatmul.mubr.msk.f32.gmra.mrb[28].mxu0 %vm356_vm0, %v8449_v37  ;;  %9544 = vmatprep.mubr.msk.f32.mxu1 %vm356_vm0, %v11925_v16  ;;  %v8453_v16 = vld [vmem:[%s10706_s13 + $0x3a] sm:$0xff]  ;;  %v8481_v37 = vld [vmem:[%s10706_s13 + $0x18a] sm:$0xff] }
 0x20f   : > { %9994 = vmatprep.mubr.msk.f32.mxu0 %vm356_vm0, %v8450_v23  ;;  %v8482_v23 = vld [vmem:[%s10706_s13 + $0x19a] sm:$0xff] }
 0x211   : > { %9545 = vmatmul.mubr.msk.f32.gmra.mrb[30].mxu1 %vm356_vm0, %v11936_v20  ;;  %v7903_v20 = vld [vmem:[%s10701_s10 + $0x39] sm:$0xff]  ;;  %s8552_s10 = sshll.u32 %s13032_s22, 8 }
 0x212   : > { %9995 = vmatmul.mubr.msk.f32.gmra.mrb[30].mxu0 %vm356_vm0, %v8451_v39  ;;  %9549 = vmatprep.mubr.msk.f32.mxu1 %vm356_vm0, %v7900_v40  ;;  %v8483_v39 = vld [vmem:[%s10706_s13 + $0x1a2] sm:$0xff]  ;;  %v12501_v40 = vld [vmem:[%s12680_s4] ss:$0 sm:$0xff]  ;;  %s12508_s13 = scalar_lea.vmem %s12681_s5, %s8552_s10 }
 0x213   : > { %9999 = vmatprep.mubr.msk.f32.mxu0 %vm356_vm0, %v8452_v5 }
 0x215   : > { %9550 = vmatmul.mubr.msk.f32.vlgmr.msra.gmra.mrb[0].mxu1 %vm356_vm0, %v7901_v41 }
 0x216   : > { %10000 = vmatmul.mubr.msk.f32.vlgmr.msra.gmra.mrb[0].mxu0 %vm356_vm0, %v8453_v16  ;;  %9552 = vmatprep.mubr.msk.f32.mxu1 %vm356_vm0, %v7902_v32 }
 0x217   : > { %10002 = vmatprep.mubr.msk.f32.mxu0 %vm356_vm0, %v8454_v9 }
 0x219   : > { %9553 = vmatmul.mubr.msk.f32.gmra.mrb[2].mxu1 %vm356_vm0, %v7903_v20 }
 0x21a   : > { %10003 = vmatmul.mubr.msk.f32.gmra.mrb[2].mxu0 %vm356_vm0, %v8455_v33  ;;  %9555 = vmatprep.mubr.msk.f32.mxu1 %vm356_vm0, %v7904_v42 }
 0x21b   : > { %10005 = vmatprep.mubr.msk.f32.mxu0 %vm356_vm0, %v8456_v43 }
 0x21d   : > { %9556 = vmatmul.mubr.msk.f32.gmra.mrb[4].mxu1 %vm356_vm0, %v7905_v38 }
 0x21e   : > { %10006 = vmatmul.mubr.msk.f32.gmra.mrb[4].mxu0 %vm356_vm0, %v8457_v22  ;;  %9558 = vmatprep.mubr.msk.f32.mxu1 %vm356_vm0, %v7906_v44 }
 0x21f   : > { %10008 = vmatprep.mubr.msk.f32.mxu0 %vm356_vm0, %v8458_v45 }
 0x221   : > { %9559 = vmatmul.mubr.msk.f32.gmra.mrb[6].mxu1 %vm356_vm0, %v7907_v46 }
 0x222   : > { %10009 = vmatmul.mubr.msk.f32.gmra.mrb[6].mxu0 %vm356_vm0, %v8459_v47  ;;  %9561 = vmatprep.mubr.msk.f32.mxu1 %vm356_vm0, %v7908_v48 }
 0x223   : > { %10011 = vmatprep.mubr.msk.f32.mxu0 %vm356_vm0, %v8460_v49 }
 0x225   : > { %9562 = vmatmul.mubr.msk.f32.gmra.mrb[8].mxu1 %vm356_vm0, %v7909_v50 }
 0x226   : > { %10012 = vmatmul.mubr.msk.f32.gmra.mrb[8].mxu0 %vm356_vm0, %v8461_v51  ;;  %9564 = vmatprep.mubr.msk.f32.mxu1 %vm356_vm0, %v7910_v52 }
 0x227   : > { %10014 = vmatprep.mubr.msk.f32.mxu0 %vm356_vm0, %v8462_v53 }
 0x229   : > { %9565 = vmatmul.mubr.msk.f32.gmra.mrb[10].mxu1 %vm356_vm0, %v7911_v54 }
 0x22a   : > { %10015 = vmatmul.mubr.msk.f32.gmra.mrb[10].mxu0 %vm356_vm0, %v8463_v55  ;;  %9567 = vmatprep.mubr.msk.f32.mxu1 %vm356_vm0, %v7912_v56 }
 0x22b   : > { %10017 = vmatprep.mubr.msk.f32.mxu0 %vm356_vm0, %v8464_v57 }
 0x22d   : > { %9568 = vmatmul.mubr.msk.f32.gmra.mrb[12].mxu1 %vm356_vm0, %v7913_v58 }
 0x22e   : > { %10018 = vmatmul.mubr.msk.f32.gmra.mrb[12].mxu0 %vm356_vm0, %v8465_v60  ;;  %9570 = vmatprep.mubr.msk.f32.mxu1 %vm356_vm0, %v7914_v62 }
 0x22f   : > { %10020 = vmatprep.mubr.msk.f32.mxu0 %vm356_vm0, %v8466_v0 }
 0x231   : > { %9571 = vmatmul.mubr.msk.f32.gmra.mrb[14].mxu1 %vm356_vm0, %v7915_v2 }
 0x232   : > { %10021 = vmatmul.mubr.msk.f32.gmra.mrb[14].mxu0 %vm356_vm0, %v8467_v4  ;;  %9573 = vmatprep.mubr.msk.f32.mxu1 %vm356_vm0, %v7916_v11 }
 0x233   : > { %10023 = vmatprep.mubr.msk.f32.mxu0 %vm356_vm0, %v8468_v59 }
 0x235   : > { %9574 = vmatmul.mubr.msk.f32.gmra.mrb[16].mxu1 %vm356_vm0, %v7917_v1 }
 0x236   : > { %10024 = vmatmul.mubr.msk.f32.gmra.mrb[16].mxu0 %vm356_vm0, %v8469_v8  ;;  %9576 = vmatprep.mubr.msk.f32.mxu1 %vm356_vm0, %v7918_v10 }
 0x237   : > { %10026 = vmatprep.mubr.msk.f32.mxu0 %vm356_vm0, %v8470_v3 }
 0x239   : > { %9577 = vmatmul.mubr.msk.f32.gmra.mrb[18].mxu1 %vm356_vm0, %v7919_v7 }
 0x23a   : > { %10027 = vmatmul.mubr.msk.f32.gmra.mrb[18].mxu0 %vm356_vm0, %v8471_v13  ;;  %9579 = vmatprep.mubr.msk.f32.mxu1 %vm356_vm0, %v7920_v14 }
 0x23b   : > { %10029 = vmatprep.mubr.msk.f32.mxu0 %vm356_vm0, %v8472_v15 }
 0x23d   : > { %9580 = vmatmul.mubr.msk.f32.gmra.mrb[20].mxu1 %vm356_vm0, %v7921_v17 }
 0x23e   : > { %10030 = vmatmul.mubr.msk.f32.gmra.mrb[20].mxu0 %vm356_vm0, %v8473_v18  ;;  %9582 = vmatprep.mubr.msk.f32.mxu1 %vm356_vm0, %v7922_v19 }
 0x23f   : > { %10032 = vmatprep.mubr.msk.f32.mxu0 %vm356_vm0, %v8474_v21 }
 0x241   : > { %9583 = vmatmul.mubr.msk.f32.gmra.mrb[22].mxu1 %vm356_vm0, %v7923_v24 }
 0x242   : > { %10033 = vmatmul.mubr.msk.f32.gmra.mrb[22].mxu0 %vm356_vm0, %v8475_v25  ;;  %9585 = vmatprep.mubr.msk.f32.mxu1 %vm356_vm0, %v7924_v26 }
 0x243   : > { %10035 = vmatprep.mubr.msk.f32.mxu0 %vm356_vm0, %v8476_v63 }
 0x245   : > { %9586 = vmatmul.mubr.msk.f32.gmra.mrb[24].mxu1 %vm356_vm0, %v7925_v27 }
 0x246   : > { %10036 = vmatmul.mubr.msk.f32.gmra.mrb[24].mxu0 %vm356_vm0, %v8477_v61  ;;  %9588 = vmatprep.mubr.msk.f32.mxu1 %vm356_vm0, %v7926_v28 }
 0x247   : > { %10038 = vmatprep.mubr.msk.f32.mxu0 %vm356_vm0, %v8478_v29 }
 0x249   : > { %9589 = vmatmul.mubr.msk.f32.gmra.mrb[26].mxu1 %vm356_vm0, %v7927_v30 }
 0x24a   : > { %10039 = vmatmul.mubr.msk.f32.gmra.mrb[26].mxu0 %vm356_vm0, %v8479_v31  ;;  %9591 = vmatprep.mubr.msk.f32.mxu1 %vm356_vm0, %v7928_v34 }
 0x24b   : > { %10041 = vmatprep.mubr.msk.f32.mxu0 %vm356_vm0, %v8480_v35 }
 0x24d   : > { %9592 = vmatmul.mubr.msk.f32.gmra.mrb[28].mxu1 %vm356_vm0, %v7929_v36 }
 0x24e   : > { %10042 = vmatmul.mubr.msk.f32.gmra.mrb[28].mxu0 %vm356_vm0, %v8481_v37  ;;  %9594 = vmatprep.mubr.msk.f32.mxu1 %vm356_vm0, %v12073_v12 }
 0x24f   : > { %10044 = vmatprep.mubr.msk.f32.mxu0 %vm356_vm0, %v8482_v23 }
 0x251   : > { %9595 = vmatmul.mubr.msk.f32.gmra.mrb[30].mxu1 %vm356_vm0, %v12084_v6 }
 0x252   : > { %10045 = vmatmul.mubr.msk.f32.gmra.mrb[30].mxu0 %vm356_vm0, %v8483_v39 }
 0x2e8   : > { %v9551_v5 = vpop.f32.mrb[0].mxu1 }
 0x2e9   : > { %v10001_v41 = vpop.f32.mrb[0].mxu0  ;;  %v10047_v16 = vadd.f32 %v9551_v5, %v12501_v40  ;;  %v3616_v32 = vpop.f32.mrb[1].mxu1 }
 0x2ea   : > { %v7069_v12 = vpop.f32.mrb[1].mxu0  ;;  %v10049_v6 = vadd.f32 %v12501_v40, %v3616_v32 }
 0x2eb   : > { %v10048_v9 = vadd.f32 %v10047_v16, %v10001_v41 }
 0x2ec   : > { %v10050_v20 = vadd.f32 %v10049_v6, %v7069_v12  ;;  %v9554_v33 = vpop.f32.mrb[2].mxu1 }
 0x2ed   : > { %v10004_v42 = vpop.f32.mrb[2].mxu0  ;;  %7261 = vst.msk [vmem:[%s12508_s13 + $0x8] sm:$0xff] %vm356_vm0, %v10048_v9  ;;  %v7293_v43 = vsel %vm356_vm0, %v10048_v9, 0.0  ;;  %v7364_v38 = vmul.f32 %v10048_v9, %v10048_v9  ;;  %v10051_v22 = vadd.f32 %v9554_v33, %v12501_v40  ;;  %v3626_v44 = vpop.f32.mrb[3].mxu1 }
 0x2ee   : > { %v7079_v45 = vpop.f32.mrb[3].mxu0  ;;  %7260 = vst.msk [vmem:[%s12508_s13] sm:$0xff] %vm356_vm0, %v10050_v20  ;;  %v7292_v46 = vsel %vm356_vm0, %v10050_v20, 0.0  ;;  %v7363_v47 = vmul.f32 %v10050_v20, %v10050_v20  ;;  %v10053_v48 = vadd.f32 %v12501_v40, %v3626_v44 }
 0x2ef   : > { %v7396_v49 = vsel %vm356_vm0, %v7364_v38, 0.0  ;;  %v7294_v50 = vadd.f32 %v7293_v43, %v7292_v46  ;;  %v10052_v51 = vadd.f32 %v10051_v22, %v10004_v42 }
 0x2f0   : > { %v7395_v52 = vsel %vm356_vm0, %v7363_v47, 0.0  ;;  %v10054_v53 = vadd.f32 %v10053_v48, %v7079_v45  ;;  %v9557_v54 = vpop.f32.mrb[4].mxu1 }
 0x2f1   : > { %v10007_v55 = vpop.f32.mrb[4].mxu0  ;;  %v7397_v56 = vadd.f32 %v7396_v49, %v7395_v52  ;;  %7263 = vst.msk [vmem:[%s12508_s13 + $0x18] sm:$0xff] %vm356_vm0, %v10052_v51  ;;  %v7366_v57 = vmul.f32 %v10052_v51, %v10052_v51  ;;  %v10055_v58 = vadd.f32 %v9557_v54, %v12501_v40  ;;  %v3636_v60 = vpop.f32.mrb[5].mxu1  ;;  %v7297_v1 = vsel %vm356_vm0, %v10052_v51, 0.0 }
 0x2f2   : > { %v7089_v62 = vpop.f32.mrb[5].mxu0  ;;  %7262 = vst.msk [vmem:[%s12508_s13 + $0x10] sm:$0xff] %vm356_vm0, %v10054_v53  ;;  %v7295_v0 = vsel %vm356_vm0, %v10054_v53, 0.0  ;;  %v7365_v2 = vmul.f32 %v10054_v53, %v10054_v53  ;;  %v10057_v4 = vadd.f32 %v12501_v40, %v3636_v60 }
 0x2f3   : > { %v7296_v11 = vadd.f32 %v7295_v0, %v7294_v50  ;;  %v10056_v59 = vadd.f32 %v10055_v58, %v10007_v55  ;;  %v7400_v13 = vsel %vm356_vm0, %v7366_v57, 0.0 }
 0x2f4   : > { %v7398_v8 = vsel %vm356_vm0, %v7365_v2, 0.0  ;;  %v10058_v10 = vadd.f32 %v10057_v4, %v7089_v62  ;;  %v9560_v3 = vpop.f32.mrb[6].mxu1 }
 0x2f5   : > { %v10010_v7 = vpop.f32.mrb[6].mxu0  ;;  %v7399_v14 = vadd.f32 %v7398_v8, %v7397_v56  ;;  %7265 = vst.msk [vmem:[%s12508_s13 + $0x28] sm:$0xff] %vm356_vm0, %v10056_v59  ;;  %v7368_v15 = vmul.f32 %v10056_v59, %v10056_v59  ;;  %v7298_v17 = vadd.f32 %v7297_v1, %v7296_v11  ;;  %v3646_v18 = vpop.f32.mrb[7].mxu1  ;;  %v10059_v25 = vadd.f32 %v9560_v3, %v12501_v40 }
 0x2f6   : > { %v7099_v19 = vpop.f32.mrb[7].mxu0  ;;  %7264 = vst.msk [vmem:[%s12508_s13 + $0x20] sm:$0xff] %vm356_vm0, %v10058_v10  ;;  %v7299_v21 = vsel %vm356_vm0, %v10058_v10, 0.0  ;;  %v7367_v24 = vmul.f32 %v10058_v10, %v10058_v10  ;;  %v10061_v26 = vadd.f32 %v12501_v40, %v3646_v18  ;;  %v7301_v61 = vsel %vm356_vm0, %v10056_v59, 0.0 }
 0x2f7   : > { %v7300_v63 = vadd.f32 %v7299_v21, %v7298_v17  ;;  %v7401_v27 = vadd.f32 %v7400_v13, %v7399_v14  ;;  %v10060_v29 = vadd.f32 %v10059_v25, %v10010_v7  ;;  %v7404_v5 = vsel %vm356_vm0, %v7368_v15, 0.0 }
 0x2f8   : > { %v7402_v28 = vsel %vm356_vm0, %v7367_v24, 0.0  ;;  %v10062_v30 = vadd.f32 %v10061_v26, %v7099_v19  ;;  %v9563_v31 = vpop.f32.mrb[8].mxu1 }
 0x2f9   : > { %v10013_v34 = vpop.f32.mrb[8].mxu0  ;;  %v7403_v35 = vadd.f32 %v7402_v28, %v7401_v27  ;;  %v7302_v36 = vadd.f32 %v7301_v61, %v7300_v63  ;;  %v10063_v37 = vadd.f32 %v9563_v31, %v12501_v40  ;;  %v3656_v23 = vpop.f32.mrb[9].mxu1  ;;  %7267 = vst.msk [vmem:[%s12508_s13 + $0x38] sm:$0xff] %vm356_vm0, %v10060_v29  ;;  %v7370_v41 = vmul.f32 %v10060_v29, %v10060_v29 }
 0x2fa   : > { %v7109_v39 = vpop.f32.mrb[9].mxu0  ;;  %7266 = vst.msk [vmem:[%s12508_s13 + $0x30] sm:$0xff] %vm356_vm0, %v10062_v30  ;;  %v7303_v16 = vsel %vm356_vm0, %v10062_v30, 0.0  ;;  %v7369_v32 = vmul.f32 %v10062_v30, %v10062_v30  ;;  %v10065_v20 = vadd.f32 %v12501_v40, %v3656_v23  ;;  %v7305_v38 = vsel %vm356_vm0, %v10060_v29, 0.0 }
 0x2fb   : > { %v7304_v12 = vadd.f32 %v7303_v16, %v7302_v36  ;;  %v7405_v6 = vadd.f32 %v7404_v5, %v7403_v35  ;;  %v10064_v9 = vadd.f32 %v10063_v37, %v10013_v34  ;;  %v7408_v22 = vsel %vm356_vm0, %v7370_v41, 0.0 }
 0x2fc   : > { %v7406_v33 = vsel %vm356_vm0, %v7369_v32, 0.0  ;;  %v9566_v42 = vpop.f32.mrb[10].mxu1  ;;  %v10066_v45 = vadd.f32 %v10065_v20, %v7109_v39 }
 0x2fd   : > { %v10016_v43 = vpop.f32.mrb[10].mxu0  ;;  %v7407_v44 = vadd.f32 %v7406_v33, %v7405_v6  ;;  %7269 = vst.msk [vmem:[%s12508_s13 + $0x48] sm:$0xff] %vm356_vm0, %v10064_v9  ;;  %v3666_v46 = vpop.f32.mrb[11].mxu1  ;;  %v7372_v48 = vmul.f32 %v10064_v9, %v10064_v9  ;;  %v7306_v49 = vadd.f32 %v7305_v38, %v7304_v12  ;;  %v10067_v50 = vadd.f32 %v9566_v42, %v12501_v40 }
 0x2fe   : > { %v7119_v47 = vpop.f32.mrb[11].mxu0  ;;  %v10069_v51 = vadd.f32 %v12501_v40, %v3666_v46  ;;  %7268 = vst.msk [vmem:[%s12508_s13 + $0x40] sm:$0xff] %vm356_vm0, %v10066_v45  ;;  %v7307_v52 = vsel %vm356_vm0, %v10066_v45, 0.0  ;;  %v7371_v53 = vmul.f32 %v10066_v45, %v10066_v45  ;;  %v7309_v62 = vsel %vm356_vm0, %v10064_v9, 0.0 }
 0x2ff   : > { %v7409_v54 = vadd.f32 %v7408_v22, %v7407_v44  ;;  %v7308_v55 = vadd.f32 %v7307_v52, %v7306_v49  ;;  %v10068_v56 = vadd.f32 %v10067_v50, %v10016_v43  ;;  %v7412_v59 = vsel %vm356_vm0, %v7372_v48, 0.0 }
 0x300   : > { %v10070_v57 = vadd.f32 %v10069_v51, %v7119_v47  ;;  %v9569_v58 = vpop.f32.mrb[12].mxu1  ;;  %v7410_v0 = vsel %vm356_vm0, %v7371_v53, 0.0 }
 0x301   : > { %v10019_v60 = vpop.f32.mrb[12].mxu0  ;;  %v10071_v2 = vadd.f32 %v9569_v58, %v12501_v40  ;;  %v3676_v4 = vpop.f32.mrb[13].mxu1  ;;  %v7411_v1 = vadd.f32 %v7410_v0, %v7409_v54  ;;  %7271 = vst.msk [vmem:[%s12508_s13 + $0x58] sm:$0xff] %vm356_vm0, %v10068_v56  ;;  %v7374_v8 = vmul.f32 %v10068_v56, %v10068_v56  ;;  %v7310_v10 = vadd.f32 %v7309_v62, %v7308_v55 }
 0x302   : > { %v7129_v11 = vpop.f32.mrb[13].mxu0  ;;  %7270 = vst.msk [vmem:[%s12508_s13 + $0x50] sm:$0xff] %vm356_vm0, %v10070_v57  ;;  %v7311_v3 = vsel %vm356_vm0, %v10070_v57, 0.0  ;;  %v7373_v7 = vmul.f32 %v10070_v57, %v10070_v57  ;;  %v10073_v14 = vadd.f32 %v12501_v40, %v3676_v4  ;;  %v7313_v21 = vsel %vm356_vm0, %v10068_v56, 0.0 }
 0x303   : > { %v10072_v13 = vadd.f32 %v10071_v2, %v10019_v60  ;;  %v7312_v15 = vadd.f32 %v7311_v3, %v7310_v10  ;;  %v7413_v17 = vadd.f32 %v7412_v59, %v7411_v1  ;;  %v7416_v31 = vsel %vm356_vm0, %v7374_v8, 0.0 }
 0x304   : > { %v9572_v18 = vpop.f32.mrb[14].mxu1  ;;  %v7414_v24 = vsel %vm356_vm0, %v7373_v7, 0.0  ;;  %v10074_v26 = vadd.f32 %v10073_v14, %v7129_v11 }
 0x305   : > { %v10022_v19 = vpop.f32.mrb[14].mxu0  ;;  %7273 = vst.msk [vmem:[%s12508_s13 + $0x68] sm:$0xff] %vm356_vm0, %v10072_v13  ;;  %v7376_v25 = vmul.f32 %v10072_v13, %v10072_v13  ;;  %v3686_v63 = vpop.f32.mrb[15].mxu1  ;;  %v7415_v61 = vadd.f32 %v7414_v24, %v7413_v17  ;;  %v7314_v28 = vadd.f32 %v7313_v21, %v7312_v15  ;;  %v10075_v29 = vadd.f32 %v9572_v18, %v12501_v40 }
 0x306   : > { %v7139_v27 = vpop.f32.mrb[15].mxu0  ;;  %v10077_v30 = vadd.f32 %v12501_v40, %v3686_v63  ;;  %7272 = vst.msk [vmem:[%s12508_s13 + $0x60] sm:$0xff] %vm356_vm0, %v10074_v26  ;;  %v7315_v34 = vsel %vm356_vm0, %v10074_v26, 0.0  ;;  %v7375_v35 = vmul.f32 %v10074_v26, %v10074_v26  ;;  %v7317_v16 = vsel %vm356_vm0, %v10072_v13, 0.0 }
 0x307   : > { %v7316_v36 = vadd.f32 %v7315_v34, %v7314_v28  ;;  %v7417_v37 = vadd.f32 %v7416_v31, %v7415_v61  ;;  %v10076_v23 = vadd.f32 %v10075_v29, %v10022_v19  ;;  %v7420_v20 = vsel %vm356_vm0, %v7376_v25, 0.0 }
 0x308   : > { %v10078_v39 = vadd.f32 %v10077_v30, %v7139_v27  ;;  %v9575_v5 = vpop.f32.mrb[16].mxu1  ;;  %v7418_v32 = vsel %vm356_vm0, %v7375_v35, 0.0 }
 0x309   : > { %v10025_v41 = vpop.f32.mrb[16].mxu0  ;;  %v10079_v12 = vadd.f32 %v9575_v5, %v12501_v40  ;;  %v3696_v6 = vpop.f32.mrb[17].mxu1  ;;  %v7419_v33 = vadd.f32 %v7418_v32, %v7417_v37  ;;  %7275 = vst.msk [vmem:[%s12508_s13 + $0x78] sm:$0xff] %vm356_vm0, %v10076_v23  ;;  %v7378_v42 = vmul.f32 %v10076_v23, %v10076_v23  ;;  %v7318_v43 = vadd.f32 %v7317_v16, %v7316_v36 }
 0x30a   : > { %v7149_v9 = vpop.f32.mrb[17].mxu0  ;;  %7274 = vst.msk [vmem:[%s12508_s13 + $0x70] sm:$0xff] %vm356_vm0, %v10078_v39  ;;  %v7319_v38 = vsel %vm356_vm0, %v10078_v39, 0.0  ;;  %v7377_v22 = vmul.f32 %v10078_v39, %v10078_v39  ;;  %v10081_v45 = vadd.f32 %v12501_v40, %v3696_v6  ;;  %v7321_v50 = vsel %vm356_vm0, %v10076_v23, 0.0 }
 0x30b   : > { %v10080_v44 = vadd.f32 %v10079_v12, %v10025_v41  ;;  %v7320_v46 = vadd.f32 %v7319_v38, %v7318_v43  ;;  %v7421_v47 = vadd.f32 %v7420_v20, %v7419_v33  ;;  %v7424_v62 = vsel %vm356_vm0, %v7378_v42, 0.0 }
 0x30c   : > { %v9578_v48 = vpop.f32.mrb[18].mxu1  ;;  %v7422_v51 = vsel %vm356_vm0, %v7377_v22, 0.0  ;;  %v10082_v53 = vadd.f32 %v10081_v45, %v7149_v9 }
 0x30d   : > { %v10028_v49 = vpop.f32.mrb[18].mxu0  ;;  %7277 = vst.msk [vmem:[%s12508_s13 + $0x88] sm:$0xff] %vm356_vm0, %v10080_v44  ;;  %v7380_v52 = vmul.f32 %v10080_v44, %v10080_v44  ;;  %v3706_v54 = vpop.f32.mrb[19].mxu1  ;;  %v7423_v56 = vadd.f32 %v7422_v51, %v7421_v47  ;;  %v7322_v57 = vadd.f32 %v7321_v50, %v7320_v46  ;;  %v10083_v58 = vadd.f32 %v9578_v48, %v12501_v40 }
 0x30e   : > { %v7159_v55 = vpop.f32.mrb[19].mxu0  ;;  %v10085_v60 = vadd.f32 %v12501_v40, %v3706_v54  ;;  %7276 = vst.msk [vmem:[%s12508_s13 + $0x80] sm:$0xff] %vm356_vm0, %v10082_v53  ;;  %v7323_v0 = vsel %vm356_vm0, %v10082_v53, 0.0  ;;  %v7379_v2 = vmul.f32 %v10082_v53, %v10082_v53  ;;  %v7325_v3 = vsel %vm356_vm0, %v10080_v44, 0.0 }
 0x30f   : > { %v7324_v4 = vadd.f32 %v7323_v0, %v7322_v57  ;;  %v7425_v11 = vadd.f32 %v7424_v62, %v7423_v56  ;;  %v10084_v59 = vadd.f32 %v10083_v58, %v10028_v49  ;;  %v7428_v17 = vsel %vm356_vm0, %v7380_v52, 0.0 }
 0x310   : > { %v10086_v1 = vadd.f32 %v10085_v60, %v7159_v55  ;;  %v9581_v8 = vpop.f32.mrb[20].mxu1  ;;  %v7426_v7 = vsel %vm356_vm0, %v7379_v2, 0.0 }
 0x311   : > { %v10031_v10 = vpop.f32.mrb[20].mxu0  ;;  %v10087_v13 = vadd.f32 %v9581_v8, %v12501_v40  ;;  %v3716_v14 = vpop.f32.mrb[21].mxu1  ;;  %v7427_v18 = vadd.f32 %v7426_v7, %v7425_v11  ;;  %7279 = vst.msk [vmem:[%s12508_s13 + $0x98] sm:$0xff] %vm356_vm0, %v10084_v59  ;;  %v7382_v19 = vmul.f32 %v10084_v59, %v10084_v59  ;;  %v7326_v21 = vadd.f32 %v7325_v3, %v7324_v4 }
 0x312   : > { %v7169_v15 = vpop.f32.mrb[21].mxu0  ;;  %7278 = vst.msk [vmem:[%s12508_s13 + $0x90] sm:$0xff] %vm356_vm0, %v10086_v1  ;;  %v7327_v24 = vsel %vm356_vm0, %v10086_v1, 0.0  ;;  %v7381_v25 = vmul.f32 %v10086_v1, %v10086_v1  ;;  %v10089_v63 = vadd.f32 %v12501_v40, %v3716_v14  ;;  %v7329_v30 = vsel %vm356_vm0, %v10084_v59, 0.0 }
 0x313   : > { %v10088_v26 = vadd.f32 %v10087_v13, %v10031_v10  ;;  %v7328_v27 = vadd.f32 %v7327_v24, %v7326_v21  ;;  %v7429_v61 = vadd.f32 %v7428_v17, %v7427_v18  ;;  %v7432_v16 = vsel %vm356_vm0, %v7382_v19, 0.0 }
 0x314   : > { %v9584_v28 = vpop.f32.mrb[22].mxu1  ;;  %v7430_v31 = vsel %vm356_vm0, %v7381_v25, 0.0  ;;  %v10090_v35 = vadd.f32 %v10089_v63, %v7169_v15 }
 0x315   : > { %v10034_v29 = vpop.f32.mrb[22].mxu0  ;;  %7281 = vst.msk [vmem:[%s12508_s13 + $0xa8] sm:$0xff] %vm356_vm0, %v10088_v26  ;;  %v7384_v34 = vmul.f32 %v10088_v26, %v10088_v26  ;;  %v3726_v36 = vpop.f32.mrb[23].mxu1  ;;  %v7431_v23 = vadd.f32 %v7430_v31, %v7429_v61  ;;  %v7330_v39 = vadd.f32 %v7329_v30, %v7328_v27  ;;  %v10091_v5 = vadd.f32 %v9584_v28, %v12501_v40 }
 0x316   : > { %v7179_v37 = vpop.f32.mrb[23].mxu0  ;;  %v10093_v41 = vadd.f32 %v12501_v40, %v3726_v36  ;;  %7280 = vst.msk [vmem:[%s12508_s13 + $0xa0] sm:$0xff] %vm356_vm0, %v10090_v35  ;;  %v7331_v32 = vsel %vm356_vm0, %v10090_v35, 0.0  ;;  %v7383_v12 = vmul.f32 %v10090_v35, %v10090_v35  ;;  %v7333_v38 = vsel %vm356_vm0, %v10088_v26, 0.0 }
 0x317   : > { %v7332_v6 = vadd.f32 %v7331_v32, %v7330_v39  ;;  %v7433_v9 = vadd.f32 %v7432_v16, %v7431_v23  ;;  %v10092_v20 = vadd.f32 %v10091_v5, %v10034_v29  ;;  %v7436_v47 = vsel %vm356_vm0, %v7384_v34, 0.0 }
 0x318   : > { %v10094_v33 = vadd.f32 %v10093_v41, %v7179_v37  ;;  %v9587_v42 = vpop.f32.mrb[24].mxu1  ;;  %v7434_v22 = vsel %vm356_vm0, %v7383_v12, 0.0 }
 0x319   : > { %v10037_v43 = vpop.f32.mrb[24].mxu0  ;;  %v10095_v44 = vadd.f32 %v9587_v42, %v12501_v40  ;;  %v3736_v45 = vpop.f32.mrb[25].mxu1  ;;  %v7435_v48 = vadd.f32 %v7434_v22, %v7433_v9  ;;  %7283 = vst.msk [vmem:[%s12508_s13 + $0xb8] sm:$0xff] %vm356_vm0, %v10092_v20  ;;  %v7386_v49 = vmul.f32 %v10092_v20, %v10092_v20  ;;  %v7334_v50 = vadd.f32 %v7333_v38, %v7332_v6 }
 0x31a   : > { %v7189_v46 = vpop.f32.mrb[25].mxu0  ;;  %7282 = vst.msk [vmem:[%s12508_s13 + $0xb0] sm:$0xff] %vm356_vm0, %v10094_v33  ;;  %v7335_v51 = vsel %vm356_vm0, %v10094_v33, 0.0  ;;  %v7385_v52 = vmul.f32 %v10094_v33, %v10094_v33  ;;  %v10097_v54 = vadd.f32 %v12501_v40, %v3736_v45  ;;  %v7337_v60 = vsel %vm356_vm0, %v10092_v20, 0.0 }
 0x31b   : > { %v10096_v53 = vadd.f32 %v10095_v44, %v10037_v43  ;;  %v7336_v55 = vadd.f32 %v7335_v51, %v7334_v50  ;;  %v7437_v56 = vadd.f32 %v7436_v47, %v7435_v48  ;;  %v7440_v3 = vsel %vm356_vm0, %v7386_v49, 0.0 }
 0x31c   : > { %v9590_v57 = vpop.f32.mrb[26].mxu1  ;;  %v7438_v62 = vsel %vm356_vm0, %v7385_v52, 0.0  ;;  %v10098_v2 = vadd.f32 %v10097_v54, %v7189_v46 }
 0x31d   : > { %v10040_v58 = vpop.f32.mrb[26].mxu0  ;;  %7285 = vst.msk [vmem:[%s12508_s13 + $0xc8] sm:$0xff] %vm356_vm0, %v10096_v53  ;;  %v7388_v0 = vmul.f32 %v10096_v53, %v10096_v53  ;;  %v3746_v4 = vpop.f32.mrb[27].mxu1  ;;  %v7439_v59 = vadd.f32 %v7438_v62, %v7437_v56  ;;  %v7338_v1 = vadd.f32 %v7337_v60, %v7336_v55  ;;  %v10099_v8 = vadd.f32 %v9590_v57, %v12501_v40 }
 0x31e   : > { %v7199_v11 = vpop.f32.mrb[27].mxu0  ;;  %v10101_v10 = vadd.f32 %v12501_v40, %v3746_v4  ;;  %7284 = vst.msk [vmem:[%s12508_s13 + $0xc0] sm:$0xff] %vm356_vm0, %v10098_v2  ;;  %v7339_v7 = vsel %vm356_vm0, %v10098_v2, 0.0  ;;  %v7387_v13 = vmul.f32 %v10098_v2, %v10098_v2  ;;  %v7341_v24 = vsel %vm356_vm0, %v10096_v53, 0.0 }
 0x31f   : > { %v7340_v14 = vadd.f32 %v7339_v7, %v7338_v1  ;;  %v7441_v15 = vadd.f32 %v7440_v3, %v7439_v59  ;;  %v10100_v17 = vadd.f32 %v10099_v8, %v10040_v58  ;;  %v7444_v61 = vsel %vm356_vm0, %v7388_v0, 0.0 }
 0x320   : > { %v10102_v18 = vadd.f32 %v10101_v10, %v7199_v11  ;;  %v9593_v19 = vpop.f32.mrb[28].mxu1  ;;  %v7442_v25 = vsel %vm356_vm0, %v7387_v13, 0.0 }
 0x321   : > { %v10043_v21 = vpop.f32.mrb[28].mxu0  ;;  %v10103_v26 = vadd.f32 %v9593_v19, %v12501_v40  ;;  %v3756_v63 = vpop.f32.mrb[29].mxu1  ;;  %v7443_v28 = vadd.f32 %v7442_v25, %v7441_v15  ;;  %7287 = vst.msk [vmem:[%s12508_s13 + $0xd8] sm:$0xff] %vm356_vm0, %v10100_v17  ;;  %v7390_v29 = vmul.f32 %v10100_v17, %v10100_v17  ;;  %v7342_v30 = vadd.f32 %v7341_v24, %v7340_v14 }
 0x322   : > { %v7209_v27 = vpop.f32.mrb[29].mxu0  ;;  %7286 = vst.msk [vmem:[%s12508_s13 + $0xd0] sm:$0xff] %vm356_vm0, %v10102_v18  ;;  %v7343_v31 = vsel %vm356_vm0, %v10102_v18, 0.0  ;;  %v7389_v34 = vmul.f32 %v10102_v18, %v10102_v18  ;;  %v10105_v36 = vadd.f32 %v12501_v40, %v3756_v63  ;;  %v7345_v41 = vsel %vm356_vm0, %v10100_v17, 0.0 }
 0x323   : > { %v10104_v35 = vadd.f32 %v10103_v26, %v10043_v21  ;;  %v7344_v37 = vadd.f32 %v7343_v31, %v7342_v30  ;;  %v7445_v23 = vadd.f32 %v7444_v61, %v7443_v28  ;;  %v7448_v43 = vsel %vm356_vm0, %v7390_v29, 0.0 }
 0x324   : > { %v9596_v39 = vpop.f32.mrb[30].mxu1  ;;  %v7446_v16 = vsel %vm356_vm0, %v7389_v34, 0.0  ;;  %v10106_v32 = vadd.f32 %v10105_v36, %v7209_v27 }
 0x325   : > { %v10046_v5 = vpop.f32.mrb[30].mxu0  ;;  %7289 = vst.msk [vmem:[%s12508_s13 + $0xe8] sm:$0xff] %vm356_vm0, %v10104_v35  ;;  %v3766_v12 = vpop.f32.mrb[31].mxu1  ;;  %v7447_v9 = vadd.f32 %v7446_v16, %v7445_v23  ;;  %v7346_v20 = vadd.f32 %v7345_v41, %v7344_v37  ;;  %v10107_v33 = vadd.f32 %v9596_v39, %v12501_v40  ;;  %v7392_v38 = vmul.f32 %v10104_v35, %v10104_v35 }
 0x326   : > { %v7219_v6 = vpop.f32.mrb[31].mxu0  ;;  %v10109_v42 = vadd.f32 %v12501_v40, %v3766_v12  ;;  %7288 = vst.msk [vmem:[%s12508_s13 + $0xe0] sm:$0xff] %vm356_vm0, %v10106_v32  ;;  %v7347_v22 = vsel %vm356_vm0, %v10106_v32, 0.0  ;;  %v7391_v44 = vmul.f32 %v10106_v32, %v10106_v32  ;;  %v7349_v49 = vsel %vm356_vm0, %v10104_v35, 0.0 }
 0x327   : > { %v7348_v45 = vadd.f32 %v7347_v22, %v7346_v20  ;;  %v7449_v46 = vadd.f32 %v7448_v43, %v7447_v9  ;;  %v10108_v47 = vadd.f32 %v10107_v33, %v10046_v5  ;;  %v7452_v52 = vsel %vm356_vm0, %v7392_v38, 0.0 }
 0x328   : > { %v10110_v48 = vadd.f32 %v10109_v42, %v7219_v6  ;;  %v7450_v50 = vsel %vm356_vm0, %v7391_v44, 0.0 }
 0x329   : > { %v7451_v51 = vadd.f32 %v7450_v50, %v7449_v46  ;;  %7291 = vst.msk [vmem:[%s12508_s13 + $0xf8] sm:$0xff] %vm356_vm0, %v10108_v47  ;;  %v7350_v40 = vadd.f32 %v7349_v49, %v7348_v45  ;;  %v7394_v53 = vmul.f32 %v10108_v47, %v10108_v47  ;;  %v7353_v58 = vsel %vm356_vm0, %v10108_v47, 0.0 }
 0x32a   : > { %7290 = vst.msk [vmem:[%s12508_s13 + $0xf0] sm:$0xff] %vm356_vm0, %v10110_v48  ;;  %v7351_v54 = vsel %vm356_vm0, %v10110_v48, 0.0  ;;  %v7393_v55 = vmul.f32 %v10110_v48, %v10110_v48 }
 0x32b   : > { %v7352_v56 = vadd.f32 %v7351_v54, %v7350_v40  ;;  %v7453_v57 = vadd.f32 %v7452_v52, %v7451_v51  ;;  %v7456_v2 = vsel %vm356_vm0, %v7394_v53, 0.0 }
 0x32c   : > { %v7454_v60 = vsel %vm356_vm0, %v7393_v55, 0.0 }
 0x32d   : > { %v7354_v62 = vadd.f32 %v7353_v58, %v7352_v56  ;;  %v7455_v0 = vadd.f32 %v7454_v60, %v7453_v57 }
 0x32f   : > { %v7355_v4 = vrot.slane %v7354_v62, 4  ;;  %v7457_v11 = vadd.f32 %v7456_v2, %v7455_v0 }
 0x331   : > { %v7356_v59 = vadd.f32 %v7355_v4, %v7354_v62  ;;  %v7458_v1 = vrot.slane %v7457_v11, 4 }
 0x333   : > { %v7357_v8 = vrot.slane %v7356_v59, 2  ;;  %v7459_v10 = vadd.f32 %v7458_v1, %v7457_v11 }
 0x335   : > { %v7358_v3 = vadd.f32 %v7357_v8, %v7356_v59  ;;  %v7460_v7 = vrot.slane %v7459_v10, 2 }
 0x337   : > { %v7359_v13 = vrot.slane %v7358_v3, 1  ;;  %v7461_v14 = vadd.f32 %v7460_v7, %v7459_v10 }
 0x339   : > { %v7360_v15 = vadd.f32 %v7359_v13, %v7358_v3  ;;  %v7462_v17 = vrot.slane %v7461_v14, 1 }
 0x33b   : > { %7362 = vst.msk [vmem:[%s282_s7] sm:$0x1] %vm7361_vm1, %v7360_v15  ;;  %v7463_v18 = vadd.f32 %v7462_v17, %v7461_v14 }
 0x33d   : > { %7464 = vst.msk [vmem:[%s282_s7 + $0x1] sm:$0x1] %vm7361_vm1, %v7463_v18 }
 0x33e PF: > { %s17_s21 = sadd.s32 1, %s10638_s21  }
 0x33f   : > { %p14_p4 = scmp.ge.s32.totalorder %s17_s21, 4  }
 0x341   :  { %16 = sbr.rel (!%p14_p4) target bundleno = 1 (0x1), region = 105 }

</bundles_post_ra>
